<compile_context>
chip_gen: v5e
topology: v5e:2x2
jax: 0.10.0
libtpu: 0.0.40
codegen_flags: <defaults>
</compile_context>

<pallas_src>
import jax
import jax.numpy as jnp
from jax import lax
from jax.experimental import pallas as pl
from jax.experimental.pallas import tpu as pltpu

NUM_FTRS = 1536        # EfficientNet-b3 _fc.in_features
REDUCE_CH = 512
NUM_CLASSES = 49
OUT_PAD = 128          # lane-dense padded logit width (sliced to 49 outside)
SPATIAL_CHUNK = 8      # spatial rows of the feature tile read per pooling step


def _head_kernel(feat_ref, w1a_ref, w1m_ref, w2_ref, b2_ref, out_ref):
    """One batch sample per grid step.

    feat_ref: (1, HW, C)  f32   — channels on the lane axis
    w1a_ref : (C, 512)    bf16  — avg-branch reduce weight, 1/HW folded in
    w1m_ref : (C, 512)    bf16  — max-branch reduce weight
    w2_ref  : (512, 128)  f32   — fc weight, columns >= 49 are zero
    b2_ref  : (1, 128)    f32   — fc bias with conv bias folded through fc
    out_ref : (1, 1, 128) f32   — lane-dense padded logits
    """
    hw = feat_ref.shape[1]
    c = feat_ref.shape[2]

    # ---- fused avg+max pooling: single chunked pass over the spatial axis ----
    def body(k, carry):
        s_acc, m_acc = carry
        start = pl.multiple_of(k * SPATIAL_CHUNK, SPATIAL_CHUNK)
        blk = feat_ref[0, pl.ds(start, SPATIAL_CHUNK), :]            # (CHUNK, C)
        s_acc = s_acc + jnp.sum(blk, axis=0, keepdims=True)          # (1, C)
        m_acc = jnp.maximum(m_acc, jnp.max(blk, axis=0, keepdims=True))
        return s_acc, m_acc

    s0 = jnp.zeros((1, c), jnp.float32)
    m0 = jnp.full((1, c), -jnp.inf, jnp.float32)
    n_full = hw // SPATIAL_CHUNK
    s_sum, m_max = lax.fori_loop(0, n_full, body, (s0, m0), unroll=True)

    rem = hw - n_full * SPATIAL_CHUNK          # static tail (HW is static)
    if rem:
        tail = feat_ref[0, pl.ds(n_full * SPATIAL_CHUNK, rem), :]
        s_sum = s_sum + jnp.sum(tail, axis=0, keepdims=True)
        m_max = jnp.maximum(m_max, jnp.max(tail, axis=0, keepdims=True))

    # ---- reduce_layer: 1x1 conv on a 1x1 map == dense.  Concat eliminated by
    # splitting the weight; two MXU dots accumulate into one f32 result.  The
    # average's 1/HW is pre-folded into w1a, so the raw spatial sum is used. ----
    h = (jnp.dot(s_sum.astype(jnp.bfloat16), w1a_ref[...],
                 preferred_element_type=jnp.float32)
         + jnp.dot(m_max.astype(jnp.bfloat16), w1m_ref[...],
                   preferred_element_type=jnp.float32))               # (1, 512)

    # Dropout(0.3): identity at inference.  Conv bias b1 is folded into b2_eff.
    out_ref[0] = (jnp.dot(h, w2_ref[...], preferred_element_type=jnp.float32)
                  + b2_ref[...])                                      # (1, 128)


def net_head(feat_nhwc, conv_w, conv_b, fc_w, fc_b):
    """Head forward pass.

    feat_nhwc: (N, H*W, C) f32 channels-last backbone feature map.
    conv_w: (512, 2C, 1, 1) torch Conv2d weight;  conv_b: (512,)
    fc_w:   (49, 512) torch Linear weight;        fc_b:   (49,)
    Returns logits (N, 49) f32.
    """
    n, hw, c = feat_nhwc.shape

    # One-time weight plumbing (plain JAX, outside the hot path).
    w1 = conv_w.reshape(REDUCE_CH, 2 * c)
    w1_avg = (w1[:, :c].T / float(hw)).astype(jnp.bfloat16)      # (C, 512)
    w1_max = w1[:, c:].T.astype(jnp.bfloat16)                    # (C, 512)
    w2 = jnp.zeros((REDUCE_CH, OUT_PAD), jnp.float32).at[:, :NUM_CLASSES].set(fc_w.T)
    b2_eff = conv_b @ fc_w.T + fc_b                              # fold b1 through fc
    b2 = jnp.zeros((1, OUT_PAD), jnp.float32).at[0, :NUM_CLASSES].set(b2_eff)

    out = pl.pallas_call(
        _head_kernel,
        out_shape=jax.ShapeDtypeStruct((n, 1, OUT_PAD), jnp.float32),
        grid_spec=pltpu.PrefetchScalarGridSpec(
            num_scalar_prefetch=0,
            grid=(n,),
            in_specs=[
                pl.BlockSpec((1, hw, c), lambda i: (i, 0, 0)),         # streamed
                pl.BlockSpec((c, REDUCE_CH), lambda i: (0, 0)),        # resident
                pl.BlockSpec((c, REDUCE_CH), lambda i: (0, 0)),        # resident
                pl.BlockSpec((REDUCE_CH, OUT_PAD), lambda i: (0, 0)),  # resident
                pl.BlockSpec((1, OUT_PAD), lambda i: (0, 0)),          # resident
            ],
            out_specs=pl.BlockSpec((1, 1, OUT_PAD), lambda i: (i, 0, 0)),
        ),
        compiler_params=pltpu.CompilerParams(
            dimension_semantics=("parallel",),
            vmem_limit_bytes=32 * 1024 * 1024,
        ),
    )(feat_nhwc, w1_avg, w1_max, w2, b2)
    return out[:, 0, :NUM_CLASSES]


def net_head_from_nchw(features_nchw, conv_w, conv_b, fc_w, fc_b):
    """Convenience wrapper for torch-layout (NCHW) features.

    In production the backbone should emit channels-last features directly so
    this transpose (an extra HBM pass over the feature map) disappears.
    """
    n, c, h, w = features_nchw.shape
    feat = jnp.transpose(features_nchw, (0, 2, 3, 1)).reshape(n, h * w, c)
    return net_head(feat, conv_w, conv_b, fc_w, fc_b)


# ------------------------------- references ---------------------------------
def _reference_f32(features_nchw, conv_w, conv_b, fc_w, fc_b):
    # Pure-f32 mirror of the PyTorch forward (eval mode).
    c = features_nchw.shape[1]
    x1 = jnp.mean(features_nchw, axis=(2, 3))
    x2 = jnp.max(features_nchw, axis=(2, 3))
    x = jnp.concatenate([x1, x2], axis=1)
    x = x @ conv_w.reshape(REDUCE_CH, 2 * c).T + conv_b
    x = x @ fc_w.T + fc_b
    return x


def _reference_bf16(features_nchw, conv_w, conv_b, fc_w, fc_b):
    # Mirrors the kernel's quantization exactly: split bf16 reduce weights,
    # bf16 pooled activations, f32 accumulation, conv bias folded through fc.
    n, c, h, w = features_nchw.shape
    hw = h * w
    s = jnp.sum(features_nchw, axis=(2, 3))
    m = jnp.max(features_nchw, axis=(2, 3))
    w1 = conv_w.reshape(REDUCE_CH, 2 * c)
    w1a = (w1[:, :c].T / float(hw)).astype(jnp.bfloat16)
    w1m = w1[:, c:].T.astype(jnp.bfloat16)
    hdd = (jnp.dot(s.astype(jnp.bfloat16), w1a, preferred_element_type=jnp.float32)
           + jnp.dot(m.astype(jnp.bfloat16), w1m, preferred_element_type=jnp.float32))
    return hdd @ fc_w.T + (conv_b @ fc_w.T + fc_b)


if __name__ == "__main__":
    key = jax.random.PRNGKey(0)
    k_feat, k_w1, k_b1, k_w2, k_b2 = jax.random.split(key, 5)

    # Small, module-consistent shapes: batch=2, backbone feature map 1536 x 8 x 8.
    N, C, H, W = 2, NUM_FTRS, 8, 8
    features = jax.random.normal(k_feat, (N, C, H, W), dtype=jnp.float32)

    # Deterministic synthetic parameters (no checkpoint).
    conv_w = jax.random.normal(k_w1, (REDUCE_CH, 2 * C, 1, 1), jnp.float32) * 0.02
    conv_b = jax.random.normal(k_b1, (REDUCE_CH,), jnp.float32) * 0.02
    fc_w = jax.random.normal(k_w2, (NUM_CLASSES, REDUCE_CH), jnp.float32) * 0.05
    fc_b = jax.random.normal(k_b2, (NUM_CLASSES,), jnp.float32) * 0.05

    out = net_head_from_nchw(features, conv_w, conv_b, fc_w, fc_b)
    out = jax.block_until_ready(out)
    assert out.shape == (N, NUM_CLASSES), out.shape

    # Tight check vs. a reference that applies the same bf16 weight/activation
    # quantization as the kernel.
    ref_q = _reference_bf16(features, conv_w, conv_b, fc_w, fc_b)
    assert jnp.allclose(out, ref_q, atol=2e-3, rtol=2e-3), \
        float(jnp.abs(out - ref_q).max())

    # Loose check vs. the exact f32 module semantics (slack covers the
    # documented bf16 weight cast).
    ref = _reference_f32(features, conv_w, conv_b, fc_w, fc_b)
    assert jnp.allclose(out, ref, atol=2e-1, rtol=5e-2), \
        float(jnp.abs(out - ref).max())

    print("KERNEL_OK")
</pallas_src>

<mosaic_0001>
module attributes {stable_mosaic.version = 11 : i64} {
  func.func @_head_kernel(%arg0: i32, %arg1: memref<1x64x1536xf32, #tpu.memory_space<vmem>>, %arg2: memref<1536x512xbf16, #tpu.memory_space<vmem>>, %arg3: memref<1536x512xbf16, #tpu.memory_space<vmem>>, %arg4: memref<512x128xf32, #tpu.memory_space<vmem>>, %arg5: memref<1x128xf32, #tpu.memory_space<vmem>>, %arg6: memref<1x1x128xf32, #tpu.memory_space<vmem>>) attributes {dimension_semantics = [#tpu.dimension_semantics<parallel>], iteration_bounds = array<i64: 2>, scalar_prefetch = 0 : i64, scratch_operands = 0 : i64, tpu.core_type = #tpu.core_type<tc>, window_params = [{transform_indices = @transform_0, window_bounds = array<i64: 1, 64, 1536>}, {pipeline_mode = #tpu.pipeline_mode<synchronous>, transform_indices = @transform_1, window_bounds = array<i64: 1536, 512>}, {pipeline_mode = #tpu.pipeline_mode<synchronous>, transform_indices = @transform_2, window_bounds = array<i64: 1536, 512>}, {pipeline_mode = #tpu.pipeline_mode<synchronous>, transform_indices = @transform_3, window_bounds = array<i64: 512, 128>}, {pipeline_mode = #tpu.pipeline_mode<synchronous>, transform_indices = @transform_4, window_bounds = array<i64: 1, 128>}, {transform_indices = @transform_5, window_bounds = array<i64: 1, 1, 128>}]} {
    %cst = arith.constant 0.000000e+00 : f32
    %0 = vector.broadcast %cst : f32 to vector<1x1536xf32>
    %cst_0 = arith.constant 0xFF800000 : f32
    %1 = vector.broadcast %cst_0 : f32 to vector<1x1536xf32>
    %c0_i32 = arith.constant 0 : i32
    %c8_i32 = arith.constant 8 : i32
    %2 = arith.muli %c0_i32, %c8_i32 : i32
    %3 = tpu.assume_multiple %2, 8 : i32
    %c0 = arith.constant 0 : index
    %4 = arith.index_cast %3 : i32 to index
    %c0_1 = arith.constant 0 : index
    %5 = vector.load %arg1[%c0, %4, %c0_1] : memref<1x64x1536xf32, #tpu.memory_space<vmem>>, vector<1x8x1536xf32>
    %6 = vector.shape_cast %5 : vector<1x8x1536xf32> to vector<8x1536xf32>
    %cst_2 = arith.constant dense<0.000000e+00> : vector<1536xf32>
    %7 = vector.multi_reduction <add>, %6, %cst_2 [0] : vector<8x1536xf32> to vector<1536xf32>
    %8 = vector.shape_cast %7 : vector<1536xf32> to vector<1x1536xf32>
    %9 = arith.addf %0, %8 : vector<1x1536xf32>
    %cst_3 = arith.constant dense<0xFF800000> : vector<1536xf32>
    %10 = vector.multi_reduction <maximumf>, %6, %cst_3 [0] : vector<8x1536xf32> to vector<1536xf32>
    %11 = vector.shape_cast %10 : vector<1536xf32> to vector<1x1536xf32>
    %12 = arith.maximumf %1, %11 : vector<1x1536xf32>
    %c1_i32 = arith.constant 1 : i32
    %c8_i32_4 = arith.constant 8 : i32
    %13 = arith.muli %c1_i32, %c8_i32_4 : i32
    %14 = tpu.assume_multiple %13, 8 : i32
    %c0_5 = arith.constant 0 : index
    %15 = arith.index_cast %14 : i32 to index
    %c0_6 = arith.constant 0 : index
    %16 = vector.load %arg1[%c0_5, %15, %c0_6] : memref<1x64x1536xf32, #tpu.memory_space<vmem>>, vector<1x8x1536xf32>
    %17 = vector.shape_cast %16 : vector<1x8x1536xf32> to vector<8x1536xf32>
    %cst_7 = arith.constant dense<0.000000e+00> : vector<1536xf32>
    %18 = vector.multi_reduction <add>, %17, %cst_7 [0] : vector<8x1536xf32> to vector<1536xf32>
    %19 = vector.shape_cast %18 : vector<1536xf32> to vector<1x1536xf32>
    %20 = arith.addf %9, %19 : vector<1x1536xf32>
    %cst_8 = arith.constant dense<0xFF800000> : vector<1536xf32>
    %21 = vector.multi_reduction <maximumf>, %17, %cst_8 [0] : vector<8x1536xf32> to vector<1536xf32>
    %22 = vector.shape_cast %21 : vector<1536xf32> to vector<1x1536xf32>
    %23 = arith.maximumf %12, %22 : vector<1x1536xf32>
    %c2_i32 = arith.constant 2 : i32
    %c8_i32_9 = arith.constant 8 : i32
    %24 = arith.muli %c2_i32, %c8_i32_9 : i32
    %25 = tpu.assume_multiple %24, 8 : i32
    %c0_10 = arith.constant 0 : index
    %26 = arith.index_cast %25 : i32 to index
    %c0_11 = arith.constant 0 : index
    %27 = vector.load %arg1[%c0_10, %26, %c0_11] : memref<1x64x1536xf32, #tpu.memory_space<vmem>>, vector<1x8x1536xf32>
    %28 = vector.shape_cast %27 : vector<1x8x1536xf32> to vector<8x1536xf32>
    %cst_12 = arith.constant dense<0.000000e+00> : vector<1536xf32>
    %29 = vector.multi_reduction <add>, %28, %cst_12 [0] : vector<8x1536xf32> to vector<1536xf32>
    %30 = vector.shape_cast %29 : vector<1536xf32> to vector<1x1536xf32>
    %31 = arith.addf %20, %30 : vector<1x1536xf32>
    %cst_13 = arith.constant dense<0xFF800000> : vector<1536xf32>
    %32 = vector.multi_reduction <maximumf>, %28, %cst_13 [0] : vector<8x1536xf32> to vector<1536xf32>
    %33 = vector.shape_cast %32 : vector<1536xf32> to vector<1x1536xf32>
    %34 = arith.maximumf %23, %33 : vector<1x1536xf32>
    %c3_i32 = arith.constant 3 : i32
    %c8_i32_14 = arith.constant 8 : i32
    %35 = arith.muli %c3_i32, %c8_i32_14 : i32
    %36 = tpu.assume_multiple %35, 8 : i32
    %c0_15 = arith.constant 0 : index
    %37 = arith.index_cast %36 : i32 to index
    %c0_16 = arith.constant 0 : index
    %38 = vector.load %arg1[%c0_15, %37, %c0_16] : memref<1x64x1536xf32, #tpu.memory_space<vmem>>, vector<1x8x1536xf32>
    %39 = vector.shape_cast %38 : vector<1x8x1536xf32> to vector<8x1536xf32>
    %cst_17 = arith.constant dense<0.000000e+00> : vector<1536xf32>
    %40 = vector.multi_reduction <add>, %39, %cst_17 [0] : vector<8x1536xf32> to vector<1536xf32>
    %41 = vector.shape_cast %40 : vector<1536xf32> to vector<1x1536xf32>
    %42 = arith.addf %31, %41 : vector<1x1536xf32>
    %cst_18 = arith.constant dense<0xFF800000> : vector<1536xf32>
    %43 = vector.multi_reduction <maximumf>, %39, %cst_18 [0] : vector<8x1536xf32> to vector<1536xf32>
    %44 = vector.shape_cast %43 : vector<1536xf32> to vector<1x1536xf32>
    %45 = arith.maximumf %34, %44 : vector<1x1536xf32>
    %c4_i32 = arith.constant 4 : i32
    %c8_i32_19 = arith.constant 8 : i32
    %46 = arith.muli %c4_i32, %c8_i32_19 : i32
    %47 = tpu.assume_multiple %46, 8 : i32
    %c0_20 = arith.constant 0 : index
    %48 = arith.index_cast %47 : i32 to index
    %c0_21 = arith.constant 0 : index
    %49 = vector.load %arg1[%c0_20, %48, %c0_21] : memref<1x64x1536xf32, #tpu.memory_space<vmem>>, vector<1x8x1536xf32>
    %50 = vector.shape_cast %49 : vector<1x8x1536xf32> to vector<8x1536xf32>
    %cst_22 = arith.constant dense<0.000000e+00> : vector<1536xf32>
    %51 = vector.multi_reduction <add>, %50, %cst_22 [0] : vector<8x1536xf32> to vector<1536xf32>
    %52 = vector.shape_cast %51 : vector<1536xf32> to vector<1x1536xf32>
    %53 = arith.addf %42, %52 : vector<1x1536xf32>
    %cst_23 = arith.constant dense<0xFF800000> : vector<1536xf32>
    %54 = vector.multi_reduction <maximumf>, %50, %cst_23 [0] : vector<8x1536xf32> to vector<1536xf32>
    %55 = vector.shape_cast %54 : vector<1536xf32> to vector<1x1536xf32>
    %56 = arith.maximumf %45, %55 : vector<1x1536xf32>
    %c5_i32 = arith.constant 5 : i32
    %c8_i32_24 = arith.constant 8 : i32
    %57 = arith.muli %c5_i32, %c8_i32_24 : i32
    %58 = tpu.assume_multiple %57, 8 : i32
    %c0_25 = arith.constant 0 : index
    %59 = arith.index_cast %58 : i32 to index
    %c0_26 = arith.constant 0 : index
    %60 = vector.load %arg1[%c0_25, %59, %c0_26] : memref<1x64x1536xf32, #tpu.memory_space<vmem>>, vector<1x8x1536xf32>
    %61 = vector.shape_cast %60 : vector<1x8x1536xf32> to vector<8x1536xf32>
    %cst_27 = arith.constant dense<0.000000e+00> : vector<1536xf32>
    %62 = vector.multi_reduction <add>, %61, %cst_27 [0] : vector<8x1536xf32> to vector<1536xf32>
    %63 = vector.shape_cast %62 : vector<1536xf32> to vector<1x1536xf32>
    %64 = arith.addf %53, %63 : vector<1x1536xf32>
    %cst_28 = arith.constant dense<0xFF800000> : vector<1536xf32>
    %65 = vector.multi_reduction <maximumf>, %61, %cst_28 [0] : vector<8x1536xf32> to vector<1536xf32>
    %66 = vector.shape_cast %65 : vector<1536xf32> to vector<1x1536xf32>
    %67 = arith.maximumf %56, %66 : vector<1x1536xf32>
    %c6_i32 = arith.constant 6 : i32
    %c8_i32_29 = arith.constant 8 : i32
    %68 = arith.muli %c6_i32, %c8_i32_29 : i32
    %69 = tpu.assume_multiple %68, 8 : i32
    %c0_30 = arith.constant 0 : index
    %70 = arith.index_cast %69 : i32 to index
    %c0_31 = arith.constant 0 : index
    %71 = vector.load %arg1[%c0_30, %70, %c0_31] : memref<1x64x1536xf32, #tpu.memory_space<vmem>>, vector<1x8x1536xf32>
    %72 = vector.shape_cast %71 : vector<1x8x1536xf32> to vector<8x1536xf32>
    %cst_32 = arith.constant dense<0.000000e+00> : vector<1536xf32>
    %73 = vector.multi_reduction <add>, %72, %cst_32 [0] : vector<8x1536xf32> to vector<1536xf32>
    %74 = vector.shape_cast %73 : vector<1536xf32> to vector<1x1536xf32>
    %75 = arith.addf %64, %74 : vector<1x1536xf32>
    %cst_33 = arith.constant dense<0xFF800000> : vector<1536xf32>
    %76 = vector.multi_reduction <maximumf>, %72, %cst_33 [0] : vector<8x1536xf32> to vector<1536xf32>
    %77 = vector.shape_cast %76 : vector<1536xf32> to vector<1x1536xf32>
    %78 = arith.maximumf %67, %77 : vector<1x1536xf32>
    %c7_i32 = arith.constant 7 : i32
    %c8_i32_34 = arith.constant 8 : i32
    %79 = arith.muli %c7_i32, %c8_i32_34 : i32
    %80 = tpu.assume_multiple %79, 8 : i32
    %c0_35 = arith.constant 0 : index
    %81 = arith.index_cast %80 : i32 to index
    %c0_36 = arith.constant 0 : index
    %82 = vector.load %arg1[%c0_35, %81, %c0_36] : memref<1x64x1536xf32, #tpu.memory_space<vmem>>, vector<1x8x1536xf32>
    %83 = vector.shape_cast %82 : vector<1x8x1536xf32> to vector<8x1536xf32>
    %cst_37 = arith.constant dense<0.000000e+00> : vector<1536xf32>
    %84 = vector.multi_reduction <add>, %83, %cst_37 [0] : vector<8x1536xf32> to vector<1536xf32>
    %85 = vector.shape_cast %84 : vector<1536xf32> to vector<1x1536xf32>
    %86 = arith.addf %75, %85 : vector<1x1536xf32>
    %cst_38 = arith.constant dense<0xFF800000> : vector<1536xf32>
    %87 = vector.multi_reduction <maximumf>, %83, %cst_38 [0] : vector<8x1536xf32> to vector<1536xf32>
    %88 = vector.shape_cast %87 : vector<1536xf32> to vector<1x1536xf32>
    %89 = arith.maximumf %78, %88 : vector<1x1536xf32>
    %c8_i32_39 = arith.constant 8 : i32
    %90 = arith.truncf %86 : vector<1x1536xf32> to vector<1x1536xbf16>
    %c0_40 = arith.constant 0 : index
    %c0_41 = arith.constant 0 : index
    %91 = vector.load %arg2[%c0_40, %c0_41] : memref<1536x512xbf16, #tpu.memory_space<vmem>>, vector<1536x512xbf16>
    %cst_42 = arith.constant dense<0.000000e+00> : vector<1x512xf32>
    %92 = tpu.matmul %90, %91, %cst_42 {dimension_numbers = #tpu.dot_dimension_numbers<[1], [0], [0], [1], [0, 0, 1, 1], [], []>} : vector<1x1536xbf16>, vector<1536x512xbf16>, vector<1x512xf32> -> vector<1x512xf32>
    %93 = arith.truncf %89 : vector<1x1536xf32> to vector<1x1536xbf16>
    %c0_43 = arith.constant 0 : index
    %c0_44 = arith.constant 0 : index
    %94 = vector.load %arg3[%c0_43, %c0_44] : memref<1536x512xbf16, #tpu.memory_space<vmem>>, vector<1536x512xbf16>
    %cst_45 = arith.constant dense<0.000000e+00> : vector<1x512xf32>
    %95 = tpu.matmul %93, %94, %cst_45 {dimension_numbers = #tpu.dot_dimension_numbers<[1], [0], [0], [1], [0, 0, 1, 1], [], []>} : vector<1x1536xbf16>, vector<1536x512xbf16>, vector<1x512xf32> -> vector<1x512xf32>
    %96 = arith.addf %92, %95 : vector<1x512xf32>
    %c0_46 = arith.constant 0 : index
    %c0_47 = arith.constant 0 : index
    %97 = vector.load %arg4[%c0_46, %c0_47] : memref<512x128xf32, #tpu.memory_space<vmem>>, vector<512x128xf32>
    %cst_48 = arith.constant dense<0.000000e+00> : vector<1x128xf32>
    %98 = tpu.matmul %96, %97, %cst_48 {dimension_numbers = #tpu.dot_dimension_numbers<[1], [0], [0], [1], [0, 0, 1, 1], [], []>} : vector<1x512xf32>, vector<512x128xf32>, vector<1x128xf32> -> vector<1x128xf32>
    %c0_49 = arith.constant 0 : index
    %c0_50 = arith.constant 0 : index
    %99 = vector.load %arg5[%c0_49, %c0_50] : memref<1x128xf32, #tpu.memory_space<vmem>>, vector<1x128xf32>
    %100 = arith.addf %98, %99 : vector<1x128xf32>
    %c0_51 = arith.constant 0 : index
    %c0_52 = arith.constant 0 : index
    %c0_53 = arith.constant 0 : index
    %101 = vector.load %arg6[%c0_51, %c0_52, %c0_53] : memref<1x1x128xf32, #tpu.memory_space<vmem>>, vector<1x1x128xf32>
    %102 = vector.shape_cast %101 : vector<1x1x128xf32> to vector<1x128xf32>
    %103 = vector.shape_cast %100 : vector<1x128xf32> to vector<1x1x128xf32>
    tpu.vector_store %arg6[%c0_51, %c0_52, %c0_53], %103 {strides = array<i32>} : memref<1x1x128xf32, #tpu.memory_space<vmem>>, vector<1x1x128xf32>,
    return
  }
  func.func @transform_0(%arg0: i32) -> (i32, i32, i32) {
    %c0_i32 = arith.constant 0 : i32
    %c0_i32_0 = arith.constant 0 : i32
    %c0_i32_1 = arith.constant 0 : i32
    return %arg0, %c0_i32, %c0_i32_0 : i32, i32, i32
  }
  func.func @transform_1(%arg0: i32) -> (i32, i32) {
    %c0_i32 = arith.constant 0 : i32
    %c0_i32_0 = arith.constant 0 : i32
    %c0_i32_1 = arith.constant 0 : i32
    return %c0_i32, %c0_i32_0 : i32, i32
  }
  func.func @transform_2(%arg0: i32) -> (i32, i32) {
    %c0_i32 = arith.constant 0 : i32
    %c0_i32_0 = arith.constant 0 : i32
    %c0_i32_1 = arith.constant 0 : i32
    return %c0_i32, %c0_i32_0 : i32, i32
  }
  func.func @transform_3(%arg0: i32) -> (i32, i32) {
    %c0_i32 = arith.constant 0 : i32
    %c0_i32_0 = arith.constant 0 : i32
    %c0_i32_1 = arith.constant 0 : i32
    return %c0_i32, %c0_i32_0 : i32, i32
  }
  func.func @transform_4(%arg0: i32) -> (i32, i32) {
    %c0_i32 = arith.constant 0 : i32
    %c0_i32_0 = arith.constant 0 : i32
    %c0_i32_1 = arith.constant 0 : i32
    return %c0_i32, %c0_i32_0 : i32, i32
  }
  func.func @transform_5(%arg0: i32) -> (i32, i32, i32) {
    %c0_i32 = arith.constant 0 : i32
    %c0_i32_0 = arith.constant 0 : i32
    %c0_i32_1 = arith.constant 0 : i32
    return %arg0, %c0_i32, %c0_i32_0 : i32, i32, i32
  }
}

</mosaic_0001>

<bundles_post_ra>
// kernel: tpu_custom_call.1
= control target key start
LH: loop header
LB: loop body
LE: loop exit
PB: predicated region body
PF: predicated region fallthrough
CT: control target
= control target key end

     0   :  { %s14353_s0 = inlined_call_operand.hbm [shape: f32[2,64,1536], index: 0, kind: input, shape index: {}]   ;;  %s14354_s1 = inlined_call_operand.hbm [shape: bf16[1536,512], index: 1, kind: input, shape index: {}]   ;;  %s14355_s2 = inlined_call_operand.hbm [shape: bf16[1536,512], index: 2, kind: input, shape index: {}]   ;;  %s14356_s3 = inlined_call_operand.hbm [shape: f32[512,128], index: 3, kind: input, shape index: {}]   ;;  %s14357_s4 = inlined_call_operand.hbm [shape: f32[1,128], index: 4, kind: input, shape index: {}]   ;;  %s14358_s5 = inlined_call_operand.hbm [shape: f32[2,1,128], index: 5, kind: output, shape index: {}]  }
   0x1   :  { %14502 = sst [smem:[#allocation145_spill]] %s14354_s1 }
   0x2   :  { %10 = vsyncpa [#allocation3], 0 }
   0x3   :  { %12 = vsyncpa [#allocation3 + $0x1], 0 }
   0x4   :  { %13 = vsyncpa [#allocation6], 0 }
   0x5   :  { %14 = vsyncpa [#allocation9], 0 }
   0x6   :  { %15 = vsyncpa [#allocation4], 0 }
   0x7   :  { %17 = vsyncpa [#allocation4 + $0x1], 0  ;;  %s12211_s18 = smov 0   ;;  %s12213_s19 = smov 0  }
   0x8   :  { %s12215_s20 = smov 0   ;;  %s12217_s21 = smov 0  }
   0x9 LB: > { %s12232_s22 = sadd.s32 4294967295, %s12169_s21   ;;  %s7910_s23 = sadd.s32 4294967294, %s12169_s21   ;;  %s12169_s21 = sphi %s12217_s21, %s14879_s21   ;;  %s12165_s20 = sphi %s12215_s20, %s14878_s20   ;;  %s12161_s19 = sphi %s12213_s19, %s14877_s19   ;;  %s12157_s18 = sphi %s12211_s18, %s14876_s18  }
   0xa   : > { %p43_p0 = scmp.ne.s32.totalorder %s12161_s19, %s12157_s18  ;;  %p44_p1 = scmp.eq.s32.totalorder %s12232_s22, 0 }
   0xb   : > { %p151_p2 = scmp.eq.s32.totalorder %s12232_s22, 1  ;;  %p157_p3 = scmp.eq.s32.totalorder %s7910_s23, 1 }
   0xc   : > { %p12241_p4 = por %p44_p1, %p43_p0  ;;  %p7911_p5 = scmp.ge.s32.totalorder %s12169_s21, 1 }
   0xd   : > { %p12246_p6 = por %p157_p3, %p43_p0  ;;  %p164_p7 = scmp.lt.s32.totalorder %s12169_s21, 3 }
   0xe   : > { %s14505_s1 = sld [smem:[#allocation145_spill]]  ;;  %s12171_s30 = smov [#allocation5]  }
   0xf   : > { %p12254_p8 = pnand %p7911_p5, %p164_p7  ;;  %s177_s6 = sshll.u32 %s12171_s30, 4  ;;  %s178_s6 = int_to_ptr.vmem [resolvable:$true] %s177_s6 }
  0x10   : > { %s203_s10 = sshll.u32 %s14356_s3, 4  ;;  %s12172_s11 = smov 256   ;;  %s204_s10 = int_to_ptr.hbm [resolvable:$true] %s203_s10 }
  0x11   : > { %p11872_p9 = pneg %p12254_p8  ;;  %s12173_s12 = smov 16  }
  0x12   : > { %s12174_s13 = smov [#allocation8]   ;;  %s12175_s15 = smov 128  }
  0x13   : > { %p12262_p10 = pnand %p11872_p9, %p44_p1  ;;  %s205_s14 = sshll.u32 %s12174_s13, 4  ;;  %s206_s14 = int_to_ptr.vmem [resolvable:$true] %s205_s14 }
  0x14   : > { %s175_s28 = sshll.u32 %s14505_s1, 4  ;;  %s12176_s16 = smov 8   ;;  %s176_s28 = int_to_ptr.hbm [resolvable:$true] %s175_s28 }
  0x15   : > { %11875 = dma.hbm_to_vmem [thread:$0]  (!%p12262_p10), %s176_s28, 49152, %s178_s6, [#allocation6], %s12172_s11, %s12172_s11, %s12173_s12  }
  0x16   : > { %11881 = dma.hbm_to_vmem [thread:$0]  (!%p12262_p10), %s204_s10, 8192, %s206_s14, [#allocation9], %s12175_s15, %s12175_s15, %s12176_s16  }
  0x17   : > { %s189_s26 = sshll.u32 %s14355_s2, 4  ;;  %s12177_s27 = smov [#allocation7]   ;;  %s190_s26 = int_to_ptr.hbm [resolvable:$true] %s189_s26 }
  0x18   : > { %s191_s28 = sshll.u32 %s12177_s27, 4  ;;  %s218_s8 = sshll.u32 %s14357_s4, 4  ;;  %s192_s28 = int_to_ptr.vmem [resolvable:$true] %s191_s28  ;;  %s219_s8 = int_to_ptr.hbm [resolvable:$true] %s218_s8 }
  0x19   : > { %11878 = dma.hbm_to_vmem [thread:$0]  (!%p12262_p10), %s190_s26, 49152, %s192_s28, [#allocation6], %s12172_s11, %s12172_s11, %s12173_s12  }
  0x1a   : > { %s12178_s9 = smov [#allocation10]   ;;  %s12285_s13 = sadd.s32 1, %s12169_s21  }
  0x1b   : > { %s220_s10 = sshll.u32 %s12178_s9, 4  ;;  %s30_s14 = sadd.s32 1, %s12165_s20  ;;  %s221_s10 = int_to_ptr.vmem [resolvable:$true] %s220_s10 }
  0x1c   : > { %11884 = dma.hbm_to_vmem [thread:$0]  (!%p12262_p10), %s219_s8, 16, %s221_s10, [#allocation9]  }
  0x1d   : > { %s27_s15 = ssub.s32 %s12169_s21, %s12285_s13  ;;  %p37_p12 = scmp.ne.s32.totalorder %s12165_s20, %s12161_s19 }
  0x1e   : > { %p28_p13 = scmp.eq.s32.totalorder %s27_s15, 0  ;;  %p38_p0 = scmp.eq.s32.totalorder %s12169_s21, 0 }
  0x1f   : > { %p12295_p3 = por %p151_p2, %p37_p12  ;;  %p11897_p5 = scmp.lt.s32.totalorder %s12169_s21, 2 }
  0x20   : > { %s12301_s11 = scalar_select %p28_p13, %s12165_s20, %s30_s14  }
  0x21   : > { %p39_p7 = por %p38_p0, %p37_p12  ;;  %s231_s12 = sand.u32 1, %s12165_s20  }
  0x22   : > { %s11849_s7 = smul.u32 768, %s231_s12  ;;  %s232_s9 = scalar_lea.sflag [#allocation3], %s231_s12 }
  0x23   : > { %s11850_s17 = smul.u32 768, %s12169_s21  ;;  %p12305_p9 = pnand %p11897_p5, %p39_p7 }
  0x24   : > { %s235_s30 = scalar_lea.vmem [#allocation2], %s11849_s7  ;;  %s12072_s26 = scalar_lea.hbm %s14353_s0, 1536 }
  0x25   : > { %s240_s28 = scalar_lea.hbm %s14353_s0, %s11850_s17  ;;  %s243_s6 = sshll.u32 %s235_s30, 4  ;;  %s244_s6 = int_to_ptr.vmem [resolvable:$true] %s243_s6 }
  0x26   : > { %s241_s8 = sshll.u32 %s240_s28, 4  ;;  %p12069_p10 = pneg %p12305_p9  ;;  %s242_s8 = int_to_ptr.hbm [resolvable:$true] %s241_s8 }
  0x27   : > { %s12065_s10 = sshra.s32 %s242_s8, 4  ;;  %s12066_s10 = int_to_ptr.hbm [resolvable:$true] %s12065_s10 }
  0x28   : > { %s12067_s14 = scalar_lea.hbm %s12066_s10, 768  ;;  %p12073_p0 = scmp.lt.s32.totalorder %s12066_s10, %s14353_s0 }
  0x29   : > { %p12068_p2 = scmp.ne.s32.totalorder %s12066_s10, %s12067_s14  ;;  %p12074_p5 = scmp.lt.s32.totalorder %s12072_s26, %s12067_s14 }
  0x2b   : > { %p12070_p12 = pnand %p12069_p10, %p12068_p2  ;;  %p12075_p7 = por %p12074_p5, %p12073_p0 }
  0x2d   : > { %p12071_p13 = pneg %p12070_p12 }
  0x2f   : > { %p12076_p11 = pnand %p12075_p7, %p12071_p13 }
  0x31   : > { %12079 = shalt.err (!%p12076_p11)
}
  0x32   : > { %s12179_s12 = smov 1536   ;;  %s12180_s7 = smov 96  }
  0x33   : > { %11888 = dma.hbm_to_vmem [thread:$0]  (!%p12305_p9), %s242_s8, 12288, %s244_s6, %s232_s9, %s12179_s12, %s12179_s12, %s12180_s7  }
  0x34   : > { %255 = sbr.rel (%p12254_p8) target bundleno = 1332 (0x534), region = 40 }
  0x39   : > { %s12325_s1 = sand.u32 1, %s12161_s19  }
  0x3a   : > { %s11851_s28 = smul.u32 768, %s12325_s1  ;;  %s258_s30 = scalar_lea.sflag [#allocation3], %s12325_s1 }
  0x3c   : > { %s12329_s10 = scalar_lea.vmem [#allocation2], %s11851_s28 }
  0x3d   : > { %12140 = dma.done.wait (%p12241_p4), %s258_s30, 12288  }
  0x3e   : > { %12142 = vsyncadd (%p12241_p4), %s258_s30, 4294955008 }
  0x3f   : > { %12144 = dma.done.wait (%p44_p1), [#allocation6], 98304  }
  0x40   : > { %12146 = vsyncadd (%p44_p1), [#allocation6], 4294868992 }
  0x41   : > { %12148 = dma.done.wait (%p44_p1), [#allocation9], 8208  }
  0x42   : > { %12150 = vsyncadd (%p44_p1), [#allocation9], 4294959088  ;;  %v8121_v0 = vld [vmem:[#allocation7 + $0xe0] sm:$0xf]  ;;  %v11495_v1 = vld [vmem:[#allocation7 + $0xec] sm:$0xf0]  ;;  %s7795_s23 = scalar_lea.hbm %s14358_s5, %s12232_s22 }
  0x43   : > { %v8249_v2 = vld [vmem:[#allocation7 + $0x1e0] sm:$0xf]  ;;  %v8122_v3 = vor.u32 %v11495_v1, %v8121_v0  ;;  %v11527_v4 = vld [vmem:[#allocation7 + $0x1ec] sm:$0xf0]  ;;  %s307_s6 = scalar_lea.vmem [#allocation11], %s12325_s1  ;;  %s7799_s9 = sshll.u32 %s7795_s23, 4  ;;  %s7800_s9 = int_to_ptr.hbm [resolvable:$true] %s7799_s9 }
  0x44   : > { %v8377_v5 = vld [vmem:[#allocation7 + $0x2e0] sm:$0xf]  ;;  %v11559_v6 = vld [vmem:[#allocation7 + $0x2ec] sm:$0xf0]  ;;  %v8250_v7 = vor.u32 %v11527_v4, %v8249_v2  ;;  %s7797_s8 = sshll.u32 %s307_s6, 4  ;;  %s7787_s14 = scalar_lea.sflag [#allocation4], %s12325_s1  ;;  %s7798_s8 = int_to_ptr.vmem [resolvable:$true] %s7797_s8 }
  0x45   : > { %v8378_v8 = vor.u32 %v11559_v6, %v8377_v5  ;;  %v8505_v9 = vld [vmem:[#allocation7 + $0x3e0] sm:$0xf]  ;;  %v11591_v10 = vld [vmem:[#allocation7 + $0x3ec] sm:$0xf0]  ;;  %4472 = vmatpush.bf16.msra.mxu0 %v8122_v3  ;;  %s12109_s15 = sshra.s32 %s7800_s9, 4  ;;  %s12115_s17 = scalar_lea.hbm %s14358_s5, 2  ;;  %s12110_s15 = int_to_ptr.hbm [resolvable:$true] %s12109_s15 }
  0x46   : > { %v8105_v11 = vld [vmem:[#allocation7 + $0xc0] sm:$0xf]  ;;  %v8506_v12 = vor.u32 %v11591_v10, %v8505_v9  ;;  %v11491_v13 = vld [vmem:[#allocation7 + $0xcc] sm:$0xf0]  ;;  %4485 = vmatpush.bf16.msra.mxu1 %v8250_v7  ;;  %s12111_s26 = scalar_lea.hbm %s12110_s15, 1  ;;  %p12116_p11 = scmp.lt.s32.totalorder %s12110_s15, %s14358_s5 }
  0x47   : > { %v8233_v14 = vld [vmem:[#allocation7 + $0x1c0] sm:$0xf]  ;;  %v11523_v15 = vld [vmem:[#allocation7 + $0x1cc] sm:$0xf0]  ;;  %4498 = vmatpush.bf16.msra.mxu2 %v8378_v8  ;;  %v8106_v16 = vor.u32 %v11491_v13, %v8105_v11  ;;  %p12112_p1 = scmp.ne.s32.totalorder %s12110_s15, %s12111_s26  ;;  %p12117_p9 = scmp.lt.s32.totalorder %s12115_s17, %s12111_s26 }
  0x48   : > { %v8234_v17 = vor.u32 %v11523_v15, %v8233_v14  ;;  %v8361_v18 = vld [vmem:[#allocation7 + $0x2c0] sm:$0xf]  ;;  %v11555_v19 = vld [vmem:[#allocation7 + $0x2cc] sm:$0xf0]  ;;  %4511 = vmatpush.bf16.msra.mxu3 %v8506_v12 }
  0x49   : > { %v8489_v20 = vld [vmem:[#allocation7 + $0x3c0] sm:$0xf]  ;;  %v8362_v21 = vor.u32 %v11555_v19, %v8361_v18  ;;  %v11587_v22 = vld [vmem:[#allocation7 + $0x3cc] sm:$0xf0]  ;;  %4473 = vmatpush.bf16.msra.mxu0 %v8106_v16  ;;  %p12113_p4 = pnand %p12112_p1, %p12295_p3  ;;  %p12118_p2 = por %p12117_p9, %p12116_p11 }
  0x4a   : > { %v8089_v23 = vld [vmem:[#allocation7 + $0xa0] sm:$0xf]  ;;  %v11487_v24 = vld [vmem:[#allocation7 + $0xac] sm:$0xf0]  ;;  %v8490_v25 = vor.u32 %v11587_v22, %v8489_v20  ;;  %4486 = vmatpush.bf16.msra.mxu1 %v8234_v17 }
  0x4b   : > { %v8217_v26 = vld [vmem:[#allocation7 + $0x1a0] sm:$0xf]  ;;  %v11519_v27 = vld [vmem:[#allocation7 + $0x1ac] sm:$0xf0]  ;;  %v8090_v29 = vor.u32 %v11487_v24, %v8089_v23  ;;  %4499 = vmatpush.bf16.msra.mxu2 %v8362_v21  ;;  %p12114_p8 = pneg %p12113_p4 }
  0x4c   : > { %v8345_v28 = vld [vmem:[#allocation7 + $0x2a0] sm:$0xf]  ;;  %v11551_v30 = vld [vmem:[#allocation7 + $0x2ac] sm:$0xf0]  ;;  %v8218_v33 = vor.u32 %v11519_v27, %v8217_v26  ;;  %4512 = vmatpush.bf16.msra.mxu3 %v8490_v25 }
  0x4d   : > { %v8473_v31 = vld [vmem:[#allocation7 + $0x3a0] sm:$0xf]  ;;  %v11583_v32 = vld [vmem:[#allocation7 + $0x3ac] sm:$0xf0]  ;;  %v8346_v34 = vor.u32 %v11551_v30, %v8345_v28  ;;  %4474 = vmatpush.bf16.msra.mxu0 %v8090_v29  ;;  %p12119_p10 = pnand %p12118_p2, %p12114_p8 }
  0x4e   : > { %v8073_v35 = vld [vmem:[#allocation7 + $0x80] sm:$0xf]  ;;  %v11483_v36 = vld [vmem:[#allocation7 + $0x8c] sm:$0xf0]  ;;  %v8474_v38 = vor.u32 %v11583_v32, %v8473_v31  ;;  %4487 = vmatpush.bf16.msra.mxu1 %v8218_v33 }
  0x4f   : > { %v8201_v37 = vld [vmem:[#allocation7 + $0x180] sm:$0xf]  ;;  %v11515_v39 = vld [vmem:[#allocation7 + $0x18c] sm:$0xf0]  ;;  %v8074_v44 = vor.u32 %v11483_v36, %v8073_v35  ;;  %4500 = vmatpush.bf16.msra.mxu2 %v8346_v34 }
  0x50   : > { %v8329_v40 = vld [vmem:[#allocation7 + $0x280] sm:$0xf]  ;;  %v11547_v41 = vld [vmem:[#allocation7 + $0x28c] sm:$0xf0]  ;;  %v8202_v45 = vor.u32 %v11515_v39, %v8201_v37  ;;  %4513 = vmatpush.bf16.msra.mxu3 %v8474_v38 }
  0x51   : > { %v8457_v42 = vld [vmem:[#allocation7 + $0x380] sm:$0xf]  ;;  %v11579_v43 = vld [vmem:[#allocation7 + $0x38c] sm:$0xf0]  ;;  %v8330_v46 = vor.u32 %v11547_v41, %v8329_v40  ;;  %4475 = vmatpush.bf16.msra.mxu0 %v8074_v44 }
  0x52   : > { %v8057_v47 = vld [vmem:[#allocation7 + $0x60] sm:$0xf]  ;;  %v11479_v48 = vld [vmem:[#allocation7 + $0x6c] sm:$0xf0]  ;;  %v8458_v50 = vor.u32 %v11579_v43, %v8457_v42  ;;  %4488 = vmatpush.bf16.msra.mxu1 %v8202_v45 }
  0x53   : > { %v8185_v49 = vld [vmem:[#allocation7 + $0x160] sm:$0xf]  ;;  %v11511_v51 = vld [vmem:[#allocation7 + $0x16c] sm:$0xf0]  ;;  %v8058_v56 = vor.u32 %v11479_v48, %v8057_v47  ;;  %4501 = vmatpush.bf16.msra.mxu2 %v8330_v46 }
  0x54   : > { %v8313_v52 = vld [vmem:[#allocation7 + $0x260] sm:$0xf]  ;;  %v11543_v53 = vld [vmem:[#allocation7 + $0x26c] sm:$0xf0]  ;;  %v8186_v57 = vor.u32 %v11511_v51, %v8185_v49  ;;  %4514 = vmatpush.bf16.msra.mxu3 %v8458_v50 }
  0x55   : > { %v8441_v54 = vld [vmem:[#allocation7 + $0x360] sm:$0xf]  ;;  %v11575_v55 = vld [vmem:[#allocation7 + $0x36c] sm:$0xf0]  ;;  %v8314_v58 = vor.u32 %v11543_v53, %v8313_v52  ;;  %4476 = vmatpush.bf16.msra.mxu0 %v8058_v56 }
  0x56   : > { %v8041_v59 = vld [vmem:[#allocation7 + $0x40] sm:$0xf]  ;;  %v11475_v60 = vld [vmem:[#allocation7 + $0x4c] sm:$0xf0]  ;;  %v8442_v62 = vor.u32 %v11575_v55, %v8441_v54  ;;  %4489 = vmatpush.bf16.msra.mxu1 %v8186_v57 }
  0x57   : > { %v8169_v61 = vld [vmem:[#allocation7 + $0x140] sm:$0xf]  ;;  %v11507_v63 = vld [vmem:[#allocation7 + $0x14c] sm:$0xf0]  ;;  %v8042_v4 = vor.u32 %v11475_v60, %v8041_v59  ;;  %4502 = vmatpush.bf16.msra.mxu2 %v8314_v58 }
  0x58   : > { %v8297_v0 = vld [vmem:[#allocation7 + $0x240] sm:$0xf]  ;;  %v11539_v1 = vld [vmem:[#allocation7 + $0x24c] sm:$0xf0]  ;;  %v8170_v6 = vor.u32 %v11507_v63, %v8169_v61  ;;  %4515 = vmatpush.bf16.msra.mxu3 %v8442_v62 }
  0x59   : > { %v8425_v2 = vld [vmem:[#allocation7 + $0x340] sm:$0xf]  ;;  %v11571_v3 = vld [vmem:[#allocation7 + $0x34c] sm:$0xf0]  ;;  %v8298_v7 = vor.u32 %v11539_v1, %v8297_v0  ;;  %4477 = vmatpush.bf16.msra.mxu0 %v8042_v4 }
  0x5a   : > { %v8025_v5 = vld [vmem:[#allocation7 + $0x20] sm:$0xf]  ;;  %v11471_v8 = vld [vmem:[#allocation7 + $0x2c] sm:$0xf0]  ;;  %v8426_v11 = vor.u32 %v11571_v3, %v8425_v2  ;;  %4490 = vmatpush.bf16.msra.mxu1 %v8170_v6 }
  0x5b   : > { %v8153_v9 = vld [vmem:[#allocation7 + $0x120] sm:$0xf]  ;;  %v11503_v10 = vld [vmem:[#allocation7 + $0x12c] sm:$0xf0]  ;;  %v8026_v18 = vor.u32 %v11471_v8, %v8025_v5  ;;  %4503 = vmatpush.bf16.msra.mxu2 %v8298_v7 }
  0x5c   : > { %v8281_v12 = vld [vmem:[#allocation7 + $0x220] sm:$0xf]  ;;  %v11535_v13 = vld [vmem:[#allocation7 + $0x22c] sm:$0xf0]  ;;  %v8154_v23 = vor.u32 %v11503_v10, %v8153_v9  ;;  %4516 = vmatpush.bf16.msra.mxu3 %v8426_v11 }
  0x5d   : > { %v8409_v14 = vld [vmem:[#allocation7 + $0x320] sm:$0xf]  ;;  %v11567_v15 = vld [vmem:[#allocation7 + $0x32c] sm:$0xf0]  ;;  %v8282_v24 = vor.u32 %v11535_v13, %v8281_v12  ;;  %4478 = vmatpush.bf16.msra.mxu0 %v8026_v18 }
  0x5e   : > { %v8009_v16 = vld [vmem:[#allocation7] sm:$0xf]  ;;  %v11467_v17 = vld [vmem:[#allocation7 + $0xc] sm:$0xf0]  ;;  %v8410_v29 = vor.u32 %v11567_v15, %v8409_v14  ;;  %4491 = vmatpush.bf16.msra.mxu1 %v8154_v23 }
  0x5f   : > { %v8137_v19 = vld [vmem:[#allocation7 + $0x100] sm:$0xf]  ;;  %v11499_v20 = vld [vmem:[#allocation7 + $0x10c] sm:$0xf0]  ;;  %v8010_v42 = vor.u32 %v11467_v17, %v8009_v16  ;;  %4504 = vmatpush.bf16.msra.mxu2 %v8282_v24 }
  0x60   : > { %v8265_v21 = vld [vmem:[#allocation7 + $0x200] sm:$0xf]  ;;  %v11531_v22 = vld [vmem:[#allocation7 + $0x20c] sm:$0xf0]  ;;  %v8138_v49 = vor.u32 %v11499_v20, %v8137_v19  ;;  %4517 = vmatpush.bf16.msra.mxu3 %v8410_v29 }
  0x61   : > { %v8393_v25 = vld [vmem:[#allocation7 + $0x300] sm:$0xf]  ;;  %v11563_v26 = vld [vmem:[#allocation7 + $0x30c] sm:$0xf0]  ;;  %v8266_v50 = vor.u32 %v11531_v22, %v8265_v21  ;;  %4479 = vmatpush.bf16.msra.mxu0 %v8010_v42 }
  0x62   : > { %v8633_v27 = vld [vmem:[#allocation7 + $0x4e0] sm:$0xf]  ;;  %v11623_v28 = vld [vmem:[#allocation7 + $0x4ec] sm:$0xf0]  ;;  %v8394_v54 = vor.u32 %v11563_v26, %v8393_v25  ;;  %4492 = vmatpush.bf16.msra.mxu1 %v8138_v49 }
  0x63   : > { %v8761_v30 = vld [vmem:[#allocation7 + $0x5e0] sm:$0xf]  ;;  %v11655_v31 = vld [vmem:[#allocation7 + $0x5ec] sm:$0xf0]  ;;  %v8634_v55 = vor.u32 %v11623_v28, %v8633_v27  ;;  %4505 = vmatpush.bf16.msra.mxu2 %v8266_v50 }
  0x64   : > { %v8889_v32 = vld [vmem:[#allocation7 + $0x6e0] sm:$0xf]  ;;  %v11687_v33 = vld [vmem:[#allocation7 + $0x6ec] sm:$0xf0]  ;;  %v8762_v59 = vor.u32 %v11655_v31, %v8761_v30  ;;  %4518 = vmatpush.bf16.msra.mxu3 %v8394_v54 }
  0x65   : > { %v12343_v34 = vld [vmem:[#allocation7 + $0x7e0] sm:$0xf]  ;;  %v12345_v35 = vld [vmem:[#allocation7 + $0x7ec] sm:$0xf0]  ;;  %v8890_v60 = vor.u32 %v11687_v33, %v8889_v32  ;;  %4524 = vmatpush.bf16.msrb.mxu0 %v8634_v55 }
  0x66   : > { %v12347_v36 = vld [vmem:[#allocation7 + $0x4c0] sm:$0xf]  ;;  %v12349_v37 = vld [vmem:[#allocation7 + $0x4cc] sm:$0xf0]  ;;  %v9018_v0 = vor.u32 %v12345_v35, %v12343_v34  ;;  %4537 = vmatpush.bf16.msrb.mxu1 %v8762_v59 }
  0x67   : > { %v12351_v38 = vld [vmem:[#allocation7 + $0x5c0] sm:$0xf]  ;;  %v12353_v39 = vld [vmem:[#allocation7 + $0x5cc] sm:$0xf0]  ;;  %v8618_v1 = vor.u32 %v12349_v37, %v12347_v36  ;;  %4550 = vmatpush.bf16.msrb.mxu2 %v8890_v60 }
  0x68   : > { %v12355_v40 = vld [vmem:[#allocation7 + $0x6c0] sm:$0xf]  ;;  %v12357_v41 = vld [vmem:[#allocation7 + $0x6cc] sm:$0xf0]  ;;  %v8746_v2 = vor.u32 %v12353_v39, %v12351_v38  ;;  %4563 = vmatpush.bf16.msrb.mxu3 %v9018_v0 }
  0x69   : > { %v12359_v43 = vld [vmem:[#allocation7 + $0x7c0] sm:$0xf]  ;;  %v12361_v44 = vld [vmem:[#allocation7 + $0x7cc] sm:$0xf0]  ;;  %v8874_v3 = vor.u32 %v12357_v41, %v12355_v40  ;;  %4525 = vmatpush.bf16.msrb.mxu0 %v8618_v1 }
  0x6a   : > { %v12363_v45 = vld [vmem:[#allocation7 + $0x4a0] sm:$0xf]  ;;  %v12365_v46 = vld [vmem:[#allocation7 + $0x4ac] sm:$0xf0]  ;;  %v9002_v7 = vor.u32 %v12361_v44, %v12359_v43  ;;  %4538 = vmatpush.bf16.msrb.mxu1 %v8746_v2 }
  0x6b   : > { %v12367_v47 = vld [vmem:[#allocation7 + $0x5a0] sm:$0xf]  ;;  %v12369_v48 = vld [vmem:[#allocation7 + $0x5ac] sm:$0xf0]  ;;  %v8602_v8 = vor.u32 %v12365_v46, %v12363_v45  ;;  %4551 = vmatpush.bf16.msrb.mxu2 %v8874_v3 }
  0x6c   : > { %v12371_v51 = vld [vmem:[#allocation7 + $0x6a0] sm:$0xf]  ;;  %v12373_v52 = vld [vmem:[#allocation7 + $0x6ac] sm:$0xf0]  ;;  %v8730_v9 = vor.u32 %v12369_v48, %v12367_v47  ;;  %4564 = vmatpush.bf16.msrb.mxu3 %v9002_v7 }
  0x6d   : > { %v12375_v53 = vld [vmem:[#allocation7 + $0x7a0] sm:$0xf]  ;;  %v12377_v56 = vld [vmem:[#allocation7 + $0x7ac] sm:$0xf0]  ;;  %v8858_v13 = vor.u32 %v12373_v52, %v12371_v51  ;;  %4526 = vmatpush.bf16.msrb.mxu0 %v8602_v8 }
  0x6e   : > { %v12379_v57 = vld [vmem:[#allocation7 + $0x480] sm:$0xf]  ;;  %v12381_v58 = vld [vmem:[#allocation7 + $0x48c] sm:$0xf0]  ;;  %v8986_v14 = vor.u32 %v12377_v56, %v12375_v53  ;;  %4539 = vmatpush.bf16.msrb.mxu1 %v8730_v9 }
  0x6f   : > { %v12383_v61 = vld [vmem:[#allocation7 + $0x580] sm:$0xf]  ;;  %v12385_v62 = vld [vmem:[#allocation7 + $0x58c] sm:$0xf0]  ;;  %v8586_v15 = vor.u32 %v12381_v58, %v12379_v57  ;;  %4552 = vmatpush.bf16.msrb.mxu2 %v8858_v13 }
  0x70   : > { %v12387_v63 = vld [vmem:[#allocation7 + $0x680] sm:$0xf]  ;;  %v12397_v4 = vld [vmem:[#allocation7 + $0x68c] sm:$0xf0]  ;;  %v8714_v19 = vor.u32 %v12385_v62, %v12383_v61  ;;  %4565 = vmatpush.bf16.msrb.mxu3 %v8986_v14 }
  0x71   : > { %v12399_v5 = vld [vmem:[#allocation7 + $0x780] sm:$0xf]  ;;  %v12401_v6 = vld [vmem:[#allocation7 + $0x78c] sm:$0xf0]  ;;  %v8842_v20 = vor.u32 %v12397_v4, %v12387_v63  ;;  %4527 = vmatpush.bf16.msrb.mxu0 %v8586_v15 }
  0x72   : > { %v12409_v10 = vld [vmem:[#allocation7 + $0x460] sm:$0xf]  ;;  %v12411_v11 = vld [vmem:[#allocation7 + $0x46c] sm:$0xf0]  ;;  %v8970_v21 = vor.u32 %v12401_v6, %v12399_v5  ;;  %4540 = vmatpush.bf16.msrb.mxu1 %v8714_v19 }
  0x73   : > { %v12413_v12 = vld [vmem:[#allocation7 + $0x560] sm:$0xf]  ;;  %v12421_v16 = vld [vmem:[#allocation7 + $0x56c] sm:$0xf0]  ;;  %v8570_v25 = vor.u32 %v12411_v11, %v12409_v10  ;;  %4553 = vmatpush.bf16.msrb.mxu2 %v8842_v20 }
  0x74   : > { %v12423_v17 = vld [vmem:[#allocation7 + $0x660] sm:$0xf]  ;;  %v12425_v18 = vld [vmem:[#allocation7 + $0x66c] sm:$0xf0]  ;;  %v8698_v26 = vor.u32 %v12421_v16, %v12413_v12  ;;  %4566 = vmatpush.bf16.msrb.mxu3 %v8970_v21 }
  0x75   : > { %v12433_v22 = vld [vmem:[#allocation7 + $0x760] sm:$0xf]  ;;  %v12435_v23 = vld [vmem:[#allocation7 + $0x76c] sm:$0xf0]  ;;  %v8826_v27 = vor.u32 %v12425_v18, %v12423_v17  ;;  %4528 = vmatpush.bf16.msrb.mxu0 %v8570_v25 }
  0x76   : > { %v313_v24 = vld [vmem:[%s12329_s10 + $0x10] sm:$0xff]  ;;  %v8954_v32 = vor.u32 %v12435_v23, %v12433_v22  ;;  %v8809_v58 = vld [vmem:[#allocation7 + $0x640] sm:$0xf]  ;;  %4541 = vmatpush.bf16.msrb.mxu1 %v8698_v26 }
  0x77   : > { %v335_v28 = vrot.slane %v313_v24, 4  ;;  %v7925_v29 = vld [vmem:[%s12329_s10 + $0x70] sm:$0xff]  ;;  %v8937_v63 = vld [vmem:[#allocation7 + $0x740] sm:$0xf]  ;;  %4554 = vmatpush.bf16.msrb.mxu2 %v8826_v27 }
  0x78   : > { %v7937_v30 = vld [vmem:[%s12329_s10 + $0xd0] sm:$0xff]  ;;  %v506_v33 = vrot.slane %v7925_v29, 4  ;;  %v311_v20 = vld [vmem:[%s12329_s10] sm:$0xff]  ;;  %4567 = vmatpush.bf16.msrb.mxu3 %v8954_v32 }
  0x79   : > { %v7949_v31 = vld [vmem:[%s12329_s10 + $0x130] sm:$0xff]  ;;  %v689_v34 = vrot.slane %v7937_v30, 4  ;;  %v12452_v39 = vadd.f32 %v335_v28, %v313_v24  ;;  %v420_v40 = vmax.f32 %v313_v24, %v335_v28 }
  0x7a   : > { %v872_v35 = vrot.slane %v7949_v31, 4  ;;  %v7961_v36 = vld [vmem:[%s12329_s10 + $0x190] sm:$0xff]  ;;  %v12454_v43 = vadd.f32 %v7925_v29, %v506_v33  ;;  %v591_v44 = vmax.f32 %v7925_v29, %v506_v33 }
  0x7b   : > { %v7973_v37 = vld [vmem:[%s12329_s10 + $0x1f0] sm:$0xff]  ;;  %14510 = vst [vmem:[#allocation16_spill] sm:$0xff] %v12452_v39  ;;  %v1055_v41 = vrot.slane %v7961_v36, 4  ;;  %v12456_v45 = vadd.f32 %v7937_v30, %v689_v34  ;;  %v421_v47 = vrot.slane %v420_v40, 2  ;;  %v774_v48 = vmax.f32 %v7937_v30, %v689_v34  ;;  %v13129_v39 = vld [vmem:[#allocation5 + $0x3c0] sm:$0xf] }
  0x7c   : > { %v7985_v38 = vld [vmem:[%s12329_s10 + $0x250] sm:$0xff]  ;;  %v1238_v42 = vrot.slane %v7973_v37, 4  ;;  %14511 = vst [vmem:[#allocation17_spill] sm:$0xff] %v12454_v43  ;;  %v12458_v49 = vadd.f32 %v7949_v31, %v872_v35  ;;  %v957_v50 = vmax.f32 %v7949_v31, %v872_v35  ;;  %v592_v51 = vrot.slane %v591_v44, 2  ;;  %v8553_v31 = vld [vmem:[#allocation7 + $0x440] sm:$0xf] }
  0x7d   : > { %14512 = vst [vmem:[#allocation18_spill] sm:$0xff] %v12456_v45  ;;  %v1421_v46 = vrot.slane %v7985_v38, 4  ;;  %v12460_v52 = vadd.f32 %v7961_v36, %v1055_v41  ;;  %v1140_v53 = vmax.f32 %v7961_v36, %v1055_v41  ;;  %v422_v55 = vmax.f32 %v420_v40, %v421_v47  ;;  %v7997_v0 = vld [vmem:[%s12329_s10 + $0x2b0] sm:$0xff]  ;;  %v13121_v43 = vld [vmem:[#allocation5 + $0x2c0] sm:$0xf] }
  0x7e   : > { %14513 = vst [vmem:[#allocation19_spill] sm:$0xff] %v12458_v49  ;;  %v12462_v54 = vadd.f32 %v7973_v37, %v1238_v42  ;;  %v775_v56 = vrot.slane %v774_v48, 2  ;;  %v958_v59 = vrot.slane %v957_v50, 2  ;;  %v1323_v60 = vmax.f32 %v7973_v37, %v1238_v42  ;;  %v11603_v36 = vld [vmem:[#allocation7 + $0x44c] sm:$0xf0] }
  0x7f   : > { %14514 = vst [vmem:[#allocation20_spill] sm:$0xff] %v12460_v52  ;;  %v593_v1 = vmax.f32 %v591_v44, %v592_v51  ;;  %v1141_v2 = vrot.slane %v1140_v53, 2  ;;  %v12465_v3 = vadd.f32 %v7985_v38, %v1421_v46  ;;  %v1506_v7 = vmax.f32 %v7985_v38, %v1421_v46  ;;  %v8681_v38 = vld [vmem:[#allocation7 + $0x540] sm:$0xf]  ;;  %v11635_v14 = vld [vmem:[#allocation7 + $0x54c] sm:$0xf0] }
  0x80   : > { %14515 = vst [vmem:[#allocation21_spill] sm:$0xff] %v12462_v54  ;;  %v423_v24 = vrot.slane %v422_v55, 1  ;;  %v776_v28 = vmax.f32 %v774_v48, %v775_v56  ;;  %v959_v29 = vmax.f32 %v957_v50, %v958_v59  ;;  %v1324_v30 = vrot.slane %v1323_v60, 2  ;;  %v11667_v15 = vld [vmem:[#allocation7 + $0x64c] sm:$0xf0]  ;;  %v7947_v56 = vld [vmem:[%s12329_s10 + $0x120] sm:$0xff] }
  0x81   : > { %14516 = vst [vmem:[#allocation22_spill] sm:$0xff] %v12465_v3  ;;  %v594_v33 = vrot.slane %v593_v1, 1  ;;  %v1142_v8 = vmax.f32 %v1140_v53, %v1141_v2  ;;  %v1507_v34 = vrot.slane %v1506_v7, 2  ;;  %v1604_v35 = vrot.slane %v7997_v0, 4  ;;  %v11699_v4 = vld [vmem:[#allocation7 + $0x74c] sm:$0xf0] }
  0x82   : > { %v424_v9 = vmax.f32 %v422_v55, %v423_v24  ;;  %v777_v13 = vrot.slane %v776_v28, 1  ;;  %v960_v37 = vrot.slane %v959_v29, 1  ;;  %v1325_v40 = vmax.f32 %v1323_v60, %v1324_v30  ;;  %v7923_v53 = vld [vmem:[%s12329_s10 + $0x60] sm:$0xff]  ;;  %v12785_v54 = vld [vmem:[#allocation7 + $0x1f0] sm:$0xf0] }
  0x83   : > { %v595_v41 = vmax.f32 %v593_v1, %v594_v33  ;;  %v1143_v42 = vrot.slane %v1142_v8, 1  ;;  %v1508_v44 = vmax.f32 %v1506_v7, %v1507_v34  ;;  %v12476_v57 = vadd.f32 %v7997_v0, %v1604_v35  ;;  %v7935_v55 = vld [vmem:[%s12329_s10 + $0xc0] sm:$0xff]  ;;  %v13107_v49 = vld [vmem:[#allocation5 + $0xcc] sm:$0xf0] }
  0x84   : > { %v778_v61 = vmax.f32 %v776_v28, %v777_v13  ;;  %v961_v62 = vmax.f32 %v959_v29, %v960_v37  ;;  %v1326_v19 = vrot.slane %v1325_v40, 1  ;;  %v1689_v46 = vmax.f32 %v7997_v0, %v1604_v35  ;;  %v7959_v60 = vld [vmem:[%s12329_s10 + $0x180] sm:$0xff]  ;;  %14620 = vst [vmem:[#allocation126_spill] sm:$0xff] %v13107_v49  ;;  %v13119_v45 = vld [vmem:[#allocation5 + $0x1cc] sm:$0xf0] }
  0x85   : > { %14517 = vst [vmem:[#allocation23_spill] sm:$0xff] %v12476_v57  ;;  %v652_v47 = vmax.f32 %v424_v9, %v595_v41  ;;  %v1144_v48 = vmax.f32 %v1142_v8, %v1143_v42  ;;  %v1509_v50 = vrot.slane %v1508_v44, 1  ;;  %v8554_v51 = vor.u32 %v11603_v36, %v8553_v31  ;;  %v7971_v31 = vld [vmem:[%s12329_s10 + $0x1e0] sm:$0xff]  ;;  %v12738_v57 = vld [vmem:[#allocation7 + $0x82c] sm:$0xf0] }
  0x86   : > { %v1327_v5 = vmax.f32 %v1325_v40, %v1326_v19  ;;  %v1690_v6 = vrot.slane %v1689_v46, 2  ;;  %v8682_v21 = vor.u32 %v11635_v14, %v8681_v38  ;;  %v8810_v59 = vor.u32 %v11667_v15, %v8809_v58  ;;  %v7983_v33 = vld [vmem:[%s12329_s10 + $0x240] sm:$0xff] }
  0x87   : > { %v835_v0 = vmax.f32 %v652_v47, %v778_v61  ;;  %v1510_v1 = vmax.f32 %v1508_v44, %v1509_v50  ;;  %v8938_v2 = vor.u32 %v11699_v4, %v8937_v63  ;;  %v323_v7 = vrot.slane %v311_v20, 4  ;;  %4529 = vmatpush.bf16.msrb.mxu0 %v8554_v51  ;;  %v7995_v50 = vld [vmem:[%s12329_s10 + $0x2a0] sm:$0xff] }
  0x88   : > { %v1691_v10 = vmax.f32 %v1689_v46, %v1690_v6  ;;  %v494_v11 = vrot.slane %v7923_v53, 4  ;;  %v677_v25 = vrot.slane %v7935_v55, 4  ;;  %v860_v24 = vrot.slane %v7947_v56, 4  ;;  %4542 = vmatpush.bf16.msrb.mxu1 %v8682_v21  ;;  %4555 = vmatpush.bf16.msrb.mxu2 %v8810_v59  ;;  %v7926_v6 = vld [vmem:[%s12329_s10 + $0x78] sm:$0xff]  ;;  %v319_v3 = vld [vmem:[%s12329_s10 + $0x40] sm:$0xff] }
  0x89   : > { %v1018_v28 = vmax.f32 %v835_v0, %v961_v62  ;;  %v12498_v12 = vadd.f32 %v323_v7, %v311_v20  ;;  %v408_v16 = vmax.f32 %v311_v20, %v323_v7  ;;  %v1043_v17 = vrot.slane %v7959_v60, 4  ;;  %4568 = vmatpush.bf16.msrb.mxu3 %v8938_v2 }
  0x8a   : > { %v1692_v18 = vrot.slane %v1691_v10, 1  ;;  %v12500_v26 = vadd.f32 %v7923_v53, %v494_v11  ;;  %v579_v27 = vmax.f32 %v7923_v53, %v494_v11  ;;  %v12502_v29 = vadd.f32 %v7935_v55, %v677_v25 }
  0x8b   : > { %v1201_v22 = vmax.f32 %v1018_v28, %v1144_v48  ;;  %v409_v23 = vrot.slane %v408_v16, 2  ;;  %v762_v32 = vmax.f32 %v7935_v55, %v677_v25  ;;  %v12504_v30 = vadd.f32 %v7947_v56, %v860_v24 }
  0x8c   : > { %v1693_v8 = vmax.f32 %v1691_v10, %v1692_v18  ;;  %v580_v34 = vrot.slane %v579_v27, 2  ;;  %v945_v35 = vmax.f32 %v7947_v56, %v860_v24  ;;  %v12508_v36 = vadd.f32 %v7959_v60, %v1043_v17 }
  0x8d   : > { %v1384_v9 = vmax.f32 %v1201_v22, %v1327_v5  ;;  %v410_v13 = vmax.f32 %v408_v16, %v409_v23  ;;  %v763_v37 = vrot.slane %v762_v32, 2  ;;  %v1128_v40 = vmax.f32 %v7959_v60, %v1043_v17  ;;  %v314_v5 = vld [vmem:[%s12329_s10 + $0x18] sm:$0xff] }
  0x8e   : > { %v581_v38 = vmax.f32 %v579_v27, %v580_v34  ;;  %v946_v14 = vrot.slane %v945_v35, 2  ;;  %v1226_v41 = vrot.slane %v7971_v31, 4  ;;  %v1409_v42 = vrot.slane %v7983_v33, 4  ;;  %v7938_v22 = vld [vmem:[%s12329_s10 + $0xd8] sm:$0xff] }
  0x8f   : > { %v1567_v44 = vmax.f32 %v1384_v9, %v1510_v1  ;;  %v411_v58 = vrot.slane %v410_v13, 1  ;;  %v764_v15 = vmax.f32 %v762_v32, %v763_v37  ;;  %v1129_v61 = vrot.slane %v1128_v40, 2  ;;  %v7950_v23 = vld [vmem:[%s12329_s10 + $0x138] sm:$0xff] }
  0x90   : > { %v582_v62 = vrot.slane %v581_v38, 1  ;;  %v947_v19 = vmax.f32 %v945_v35, %v946_v14  ;;  %v12510_v46 = vadd.f32 %v7971_v31, %v1226_v41  ;;  %v1311_v63 = vmax.f32 %v7971_v31, %v1226_v41  ;;  %v7962_v34 = vld [vmem:[%s12329_s10 + $0x198] sm:$0xff] }
  0x91   : > { %v1750_v4 = vmax.f32 %v1567_v44, %v1693_v8  ;;  %v412_v20 = vmax.f32 %v410_v13, %v411_v58  ;;  %v765_v47 = vrot.slane %v764_v15, 1  ;;  %v1130_v48 = vmax.f32 %v1128_v40, %v1129_v61 }
  0x92   : > { %v583_v51 = vmax.f32 %v581_v38, %v582_v62  ;;  %v948_v53 = vrot.slane %v947_v19, 1  ;;  %v1312_v55 = vrot.slane %v1311_v63, 2  ;;  %v12513_v56 = vadd.f32 %v7983_v33, %v1409_v42 }
  0x93   : > { %v12517_v21 = vpack.c.bf16 %v1750_v4, %v1750_v4  ;;  %v766_v59 = vmax.f32 %v764_v15, %v765_v47  ;;  %v1131_v60 = vrot.slane %v1130_v48, 1  ;;  %v1494_v0 = vmax.f32 %v7983_v33, %v1409_v42 }
  0x94   : > { %14518 = vst [vmem:[#allocation24_spill] sm:$0xff] %v12513_v56  ;;  %v650_v1 = vmax.f32 %v412_v20, %v583_v51  ;;  %v949_v2 = vmax.f32 %v947_v19, %v948_v53  ;;  %v1313_v7 = vmax.f32 %v1311_v63, %v1312_v55  ;;  %v1592_v10 = vrot.slane %v7995_v50, 4  ;;  %v13143_v56 = vld [vmem:[#allocation5 + $0x1ac] sm:$0xf0] }
  0x95   : > { %4506 = vmatmul.bf16.vlgmr.msra.gmra.mxu2 %v12517_v21  ;;  %v1132_v11 = vmax.f32 %v1130_v48, %v1131_v60  ;;  %v1495_v25 = vrot.slane %v1494_v0, 2  ;;  %v341_v24 = vrot.slane %v314_v5, 4  ;;  %v512_v28 = vrot.slane %v7926_v6, 4 }
  0x96   : > { %v833_v16 = vmax.f32 %v650_v1, %v766_v59  ;;  %v1314_v17 = vrot.slane %v1313_v7, 1  ;;  %v12520_v18 = vadd.f32 %v7995_v50, %v1592_v10  ;;  %v1677_v27 = vmax.f32 %v7995_v50, %v1592_v10  ;;  %v7974_v50 = vld [vmem:[%s12329_s10 + $0x1f8] sm:$0xff] }
  0x97   : > { %v1496_v32 = vmax.f32 %v1494_v0, %v1495_v25  ;;  %v12524_v31 = vadd.f32 %v341_v24, %v314_v5  ;;  %v426_v33 = vmax.f32 %v314_v5, %v341_v24  ;;  %v12526_v8 = vadd.f32 %v7926_v6, %v512_v28 }
  0x98   : > { %14519 = vst [vmem:[#allocation25_spill] sm:$0xff] %v12520_v18  ;;  %v1016_v35 = vmax.f32 %v833_v16, %v949_v2  ;;  %v1315_v9 = vmax.f32 %v1313_v7, %v1314_v17  ;;  %v1678_v13 = vrot.slane %v1677_v27, 2  ;;  %v597_v37 = vmax.f32 %v7926_v6, %v512_v28  ;;  %v7986_v6 = vld [vmem:[%s12329_s10 + $0x258] sm:$0xff]  ;;  %v13133_v18 = vld [vmem:[#allocation5 + $0xa0] sm:$0xf] }
  0x99   : > { %14520 = vst [vmem:[#allocation26_spill] sm:$0xff] %v12524_v31  ;;  %v1497_v40 = vrot.slane %v1496_v32, 1  ;;  %v427_v38 = vrot.slane %v426_v33, 2  ;;  %v695_v14 = vrot.slane %v7938_v22, 4  ;;  %v878_v41 = vrot.slane %v7950_v23, 4 }
  0x9a   : > { %14521 = vst [vmem:[#allocation27_spill] sm:$0xff] %v12526_v8  ;;  %v1199_v42 = vmax.f32 %v1016_v35, %v1132_v11  ;;  %v1679_v44 = vmax.f32 %v1677_v27, %v1678_v13  ;;  %v598_v58 = vrot.slane %v597_v37, 2  ;;  %v1061_v15 = vrot.slane %v7962_v34, 4  ;;  %v7924_v35 = vld [vmem:[%s12329_s10 + $0x68] sm:$0xff] }
  0x9b   : > { %v1498_v61 = vmax.f32 %v1496_v32, %v1497_v40  ;;  %v428_v62 = vmax.f32 %v426_v33, %v427_v38  ;;  %v12529_v19 = vadd.f32 %v7938_v22, %v695_v14  ;;  %v780_v63 = vmax.f32 %v7938_v22, %v695_v14  ;;  %v7998_v32 = vld [vmem:[%s12329_s10 + $0x2b8] sm:$0xff]  ;;  %v312_v33 = vld [vmem:[%s12329_s10 + $0x8] sm:$0xff] }
  0x9c   : > { %v1382_v4 = vmax.f32 %v1199_v42, %v1315_v9  ;;  %v1680_v20 = vrot.slane %v1679_v44, 1  ;;  %v599_v47 = vmax.f32 %v597_v37, %v598_v58  ;;  %v12531_v48 = vadd.f32 %v7950_v23, %v878_v41 }
  0x9d   : > { %14522 = vst [vmem:[#allocation28_spill] sm:$0xff] %v12529_v19  ;;  %v429_v51 = vrot.slane %v428_v62, 1  ;;  %v781_v53 = vrot.slane %v780_v63, 2  ;;  %v963_v55 = vmax.f32 %v7950_v23, %v878_v41  ;;  %v12534_v5 = vadd.f32 %v7962_v34, %v1061_v15  ;;  %v11751_v19 = vld [vmem:[#allocation7 + $0x8ec] sm:$0xf0] }
  0x9e   : > { %14523 = vst [vmem:[#allocation29_spill] sm:$0xff] %v12531_v48  ;;  %v1565_v59 = vmax.f32 %v1382_v4, %v1498_v61  ;;  %v1681_v60 = vmax.f32 %v1679_v44, %v1680_v20  ;;  %v600_v0 = vrot.slane %v599_v47, 1  ;;  %v1146_v1 = vmax.f32 %v7962_v34, %v1061_v15  ;;  %v7936_v20 = vld [vmem:[%s12329_s10 + $0xc8] sm:$0xff] }
  0x9f   : > { %14524 = vst [vmem:[#allocation30_spill] sm:$0xff] %v12534_v5  ;;  %v430_v2 = vmax.f32 %v428_v62, %v429_v51  ;;  %v782_v7 = vmax.f32 %v780_v63, %v781_v53  ;;  %v964_v10 = vrot.slane %v963_v55, 2  ;;  %v1244_v11 = vrot.slane %v7974_v50, 4 }
  0xa0   : > { %v1748_v25 = vmax.f32 %v1565_v59, %v1681_v60  ;;  %v601_v24 = vmax.f32 %v599_v47, %v600_v0  ;;  %v1147_v28 = vrot.slane %v1146_v1, 2  ;;  %v1427_v16 = vrot.slane %v7986_v6, 4 }
  0xa1   : > { %v783_v17 = vrot.slane %v782_v7, 1  ;;  %v965_v27 = vmax.f32 %v963_v55, %v964_v10  ;;  %v12537_v22 = vadd.f32 %v7974_v50, %v1244_v11  ;;  %v1329_v23 = vmax.f32 %v7974_v50, %v1244_v11  ;;  %v7948_v10 = vld [vmem:[%s12329_s10 + $0x128] sm:$0xff] }
  0xa2   : > { %v12542_v9 = vpack.c.bf16 %v1748_v25, %v1748_v25  ;;  %v653_v13 = vmax.f32 %v430_v2, %v601_v24  ;;  %v1148_v34 = vmax.f32 %v1146_v1, %v1147_v28  ;;  %v12544_v37 = vadd.f32 %v7986_v6, %v1427_v16 }
  0xa3   : > { %14525 = vst [vmem:[#allocation31_spill] sm:$0xff] %v12537_v22  ;;  %v784_v40 = vmax.f32 %v782_v7, %v783_v17  ;;  %v966_v38 = vrot.slane %v965_v27, 1  ;;  %v1330_v14 = vrot.slane %v1329_v23, 2  ;;  %v1512_v41 = vmax.f32 %v7986_v6, %v1427_v16  ;;  %v7960_v16 = vld [vmem:[%s12329_s10 + $0x188] sm:$0xff] }
  0xa4   : > { %14526 = vst [vmem:[#allocation32_spill] sm:$0xff] %v12544_v37  ;;  %4480 = vmatmul.bf16.vlgmr.msra.gmra.mxu0 %v12542_v9  ;;  %v1149_v42 = vrot.slane %v1148_v34, 1  ;;  %v1610_v44 = vrot.slane %v7998_v32, 4  ;;  %v329_v58 = vrot.slane %v312_v33, 4  ;;  %v500_v15 = vrot.slane %v7924_v35, 4 }
  0xa5   : > { %v836_v61 = vmax.f32 %v653_v13, %v784_v40  ;;  %v967_v62 = vmax.f32 %v965_v27, %v966_v38  ;;  %v1331_v63 = vmax.f32 %v1329_v23, %v1330_v14  ;;  %v1513_v4 = vrot.slane %v1512_v41, 2  ;;  %v11659_v37 = vld [vmem:[#allocation7 + $0x60c] sm:$0xf0] }
  0xa6   : > { %v1150_v47 = vmax.f32 %v1148_v34, %v1149_v42  ;;  %v12548_v50 = vadd.f32 %v7998_v32, %v1610_v44  ;;  %v1695_v51 = vmax.f32 %v7998_v32, %v1610_v44  ;;  %v12550_v53 = vadd.f32 %v329_v58, %v312_v33  ;;  %v7972_v42 = vld [vmem:[%s12329_s10 + $0x1e8] sm:$0xff] }
  0xa7   : > { %v1019_v55 = vmax.f32 %v836_v61, %v967_v62  ;;  %v1332_v6 = vrot.slane %v1331_v63, 1  ;;  %v1514_v59 = vmax.f32 %v1512_v41, %v1513_v4  ;;  %v414_v60 = vmax.f32 %v312_v33, %v329_v58  ;;  %v7984_v62 = vld [vmem:[%s12329_s10 + $0x248] sm:$0xff] }
  0xa8   : > { %14527 = vst [vmem:[#allocation33_spill] sm:$0xff] %v12548_v50  ;;  %v1696_v0 = vrot.slane %v1695_v51, 2  ;;  %v12552_v1 = vadd.f32 %v7924_v35, %v500_v15  ;;  %v585_v2 = vmax.f32 %v7924_v35, %v500_v15  ;;  %v683_v7 = vrot.slane %v7936_v20, 4  ;;  %v11627_v50 = vld [vmem:[#allocation7 + $0x50c] sm:$0xf0] }
  0xa9   : > { %14528 = vst [vmem:[#allocation34_spill] sm:$0xff] %v12550_v53  ;;  %v1202_v11 = vmax.f32 %v1019_v55, %v1150_v47  ;;  %v1333_v25 = vmax.f32 %v1331_v63, %v1332_v6  ;;  %v1515_v24 = vrot.slane %v1514_v59, 1  ;;  %v415_v28 = vrot.slane %v414_v60, 2  ;;  %v12736_v53 = vld [vmem:[#allocation7 + $0x820] sm:$0xf] }
  0xaa   : > { %14529 = vst [vmem:[#allocation35_spill] sm:$0xff] %v12552_v1  ;;  %v1697_v17 = vmax.f32 %v1695_v51, %v1696_v0  ;;  %v586_v27 = vrot.slane %v585_v2, 2  ;;  %v12556_v23 = vadd.f32 %v7936_v20, %v683_v7  ;;  %v768_v32 = vmax.f32 %v7936_v20, %v683_v7 }
  0xab   : > { %v1385_v13 = vmax.f32 %v1202_v11, %v1333_v25  ;;  %v1516_v33 = vmax.f32 %v1514_v59, %v1515_v24  ;;  %v416_v34 = vmax.f32 %v414_v60, %v415_v28  ;;  %v866_v40 = vrot.slane %v7948_v10, 4  ;;  %v8537_v11 = vld [vmem:[#allocation7 + $0x420] sm:$0xf]  ;;  %v11599_v25 = vld [vmem:[#allocation7 + $0x42c] sm:$0xf0] }
  0xac   : > { %14530 = vst [vmem:[#allocation36_spill] sm:$0xff] %v12556_v23  ;;  %v1698_v38 = vrot.slane %v1697_v17, 1  ;;  %v587_v35 = vmax.f32 %v585_v2, %v586_v27  ;;  %v769_v14 = vrot.slane %v768_v32, 2  ;;  %v1049_v41 = vrot.slane %v7960_v16, 4  ;;  %v7996_v27 = vld [vmem:[%s12329_s10 + $0x2a8] sm:$0xff] }
  0xad   : > { %v1568_v44 = vmax.f32 %v1385_v13, %v1516_v33  ;;  %v417_v58 = vrot.slane %v416_v34, 1  ;;  %v12559_v15 = vadd.f32 %v7948_v10, %v866_v40  ;;  %v951_v61 = vmax.f32 %v7948_v10, %v866_v40  ;;  %v11631_v13 = vld [vmem:[#allocation7 + $0x52c] sm:$0xf0] }
  0xae   : > { %v1699_v63 = vmax.f32 %v1697_v17, %v1698_v38  ;;  %v588_v4 = vrot.slane %v587_v35, 1  ;;  %v770_v47 = vmax.f32 %v768_v32, %v769_v14  ;;  %v12562_v20 = vadd.f32 %v7960_v16, %v1049_v41  ;;  %v8665_v32 = vld [vmem:[#allocation7 + $0x520] sm:$0xf]  ;;  %v12572_v14 = vld [vmem:[%s12329_s10 + $0x30] sm:$0xff] }
  0xaf   : > { %14531 = vst [vmem:[#allocation37_spill] sm:$0xff] %v12559_v15  ;;  %v418_v51 = vmax.f32 %v416_v34, %v417_v58  ;;  %v952_v55 = vrot.slane %v951_v61, 2  ;;  %v1134_v6 = vmax.f32 %v7960_v16, %v1049_v41  ;;  %v1232_v59 = vrot.slane %v7972_v42, 4  ;;  %v8793_v38 = vld [vmem:[#allocation7 + $0x620] sm:$0xf] }
  0xb0   : > { %14532 = vst [vmem:[#allocation38_spill] sm:$0xff] %v12562_v20  ;;  %v1751_v60 = vmax.f32 %v1568_v44, %v1699_v63  ;;  %v589_v0 = vmax.f32 %v587_v35, %v588_v4  ;;  %v771_v2 = vrot.slane %v770_v47, 1  ;;  %v1415_v7 = vrot.slane %v7984_v62, 4  ;;  %v11663_v35 = vld [vmem:[#allocation7 + $0x62c] sm:$0xf0] }
  0xb1   : > { %v953_v24 = vmax.f32 %v951_v61, %v952_v55  ;;  %v1135_v10 = vrot.slane %v1134_v6, 2  ;;  %v12564_v28 = vadd.f32 %v7972_v42, %v1232_v59  ;;  %v1317_v17 = vmax.f32 %v7972_v42, %v1232_v59  ;;  %v8921_v63 = vld [vmem:[#allocation7 + $0x720] sm:$0xf]  ;;  %v11695_v4 = vld [vmem:[#allocation7 + $0x72c] sm:$0xf0] }
  0xb2   : > { %v12567_v33 = vpack.c.bf16 %v1751_v60, %v1751_v60  ;;  %v651_v34 = vmax.f32 %v418_v51, %v589_v0  ;;  %v772_v16 = vmax.f32 %v770_v47, %v771_v2  ;;  %v12569_v40 = vadd.f32 %v7984_v62, %v1415_v7  ;;  %v8521_v42 = vld [vmem:[#allocation7 + $0x400] sm:$0xf]  ;;  %v11595_v55 = vld [vmem:[#allocation7 + $0x40c] sm:$0xf0] }
  0xb3   : > { %14533 = vst [vmem:[#allocation39_spill] sm:$0xff] %v12564_v28  ;;  %v954_v41 = vrot.slane %v953_v24, 1  ;;  %v1136_v44 = vmax.f32 %v1134_v6, %v1135_v10  ;;  %v1318_v58 = vrot.slane %v1317_v17, 2  ;;  %v1500_v61 = vmax.f32 %v7984_v62, %v1415_v7  ;;  %v8649_v59 = vld [vmem:[#allocation7 + $0x500] sm:$0xf] }
  0xb4   : > { %14534 = vst [vmem:[#allocation40_spill] sm:$0xff] %v12569_v40  ;;  %4519 = vmatmul.bf16.vlgmr.msra.gmra.mxu3 %v12567_v33  ;;  %v834_v51 = vmax.f32 %v651_v34, %v772_v16  ;;  %v1598_v47 = vrot.slane %v7996_v27, 4  ;;  %v8538_v60 = vor.u32 %v11599_v25, %v8537_v11  ;;  %v8666_v0 = vor.u32 %v11631_v13, %v8665_v32  ;;  %v8777_v2 = vld [vmem:[#allocation7 + $0x600] sm:$0xf]  ;;  %v12577_v62 = vld [vmem:[#allocation7 + $0x70c] sm:$0xf0] }
  0xb5   : > { %v955_v22 = vmax.f32 %v953_v24, %v954_v41  ;;  %v1137_v5 = vrot.slane %v1136_v44, 1  ;;  %v1319_v48 = vmax.f32 %v1317_v17, %v1318_v58  ;;  %v1501_v6 = vrot.slane %v1500_v61, 2  ;;  %v12575_v10 = vld [vmem:[#allocation7 + $0x700] sm:$0xf]  ;;  %v12583_v32 = vld [vmem:[#allocation7 + $0x9ec] sm:$0xf0] }
  0xb6   : > { %v9145_v7 = vld [vmem:[#allocation7 + $0x8e0] sm:$0xf]  ;;  %v12579_v8 = vadd.f32 %v7996_v27, %v1598_v47  ;;  %v1683_v31 = vmax.f32 %v7996_v27, %v1598_v47  ;;  %4530 = vmatpush.bf16.msrb.mxu0 %v8538_v60  ;;  %4543 = vmatpush.bf16.msrb.mxu1 %v8666_v0  ;;  %v8794_v11 = vor.u32 %v11663_v35, %v8793_v38  ;;  %v11815_v17 = vld [vmem:[#allocation7 + $0xaec] sm:$0xf0]  ;;  %v359_v13 = vrot.slane %v12572_v14, 4 }
  0xb7   : > { %v12581_v25 = vld [vmem:[#allocation7 + $0x9e0] sm:$0xf]  ;;  %v1017_v34 = vmax.f32 %v834_v51, %v955_v22  ;;  %v1138_v16 = vmax.f32 %v1136_v44, %v1137_v5  ;;  %v1320_v41 = vrot.slane %v1319_v48, 1  ;;  %v1502_v58 = vmax.f32 %v1500_v61, %v1501_v6  ;;  %v11847_v28 = vld [vmem:[#allocation7 + $0xbec] sm:$0xf0] }
  0xb8   : > { %14535 = vst [vmem:[#allocation41_spill] sm:$0xff] %v12579_v8  ;;  %v9401_v24 = vld [vmem:[#allocation7 + $0xae0] sm:$0xf]  ;;  %v11747_v27 = vld [vmem:[#allocation7 + $0x8cc] sm:$0xf0]  ;;  %v1684_v60 = vrot.slane %v1683_v31, 2  ;;  %4556 = vmatpush.bf16.msrb.mxu2 %v8794_v11  ;;  %v8922_v38 = vor.u32 %v11695_v4, %v8921_v63  ;;  %v8522_v35 = vor.u32 %v11595_v55, %v8521_v42  ;;  %v8650_v0 = vor.u32 %v11627_v50, %v8649_v59 }
  0xb9   : > { %v9529_v40 = vld [vmem:[#allocation7 + $0xbe0] sm:$0xf]  ;;  %v7929_v47 = vld [vmem:[%s12329_s10 + $0x90] sm:$0xff]  ;;  %v1200_v23 = vmax.f32 %v1017_v34, %v1138_v16  ;;  %v1321_v1 = vmax.f32 %v1319_v48, %v1320_v41  ;;  %v1503_v22 = vrot.slane %v1502_v58, 1  ;;  %v8778_v5 = vor.u32 %v11659_v37, %v8777_v2 }
  0xba   : > { %v9129_v8 = vld [vmem:[#allocation7 + $0x8c0] sm:$0xf]  ;;  %v12589_v15 = vld [vmem:[#allocation7 + $0x9cc] sm:$0xf0]  ;;  %v1685_v51 = vmax.f32 %v1683_v31, %v1684_v60  ;;  %4569 = vmatpush.bf16.msrb.mxu3 %v8922_v38  ;;  %4531 = vmatpush.bf16.msrb.mxu0 %v8522_v35  ;;  %v8906_v6 = vor.u32 %v12577_v62, %v12575_v10  ;;  %v9146_v63 = vor.u32 %v11751_v19, %v9145_v7  ;;  %v530_v42 = vrot.slane %v7929_v47, 4 }
  0xbb   : > { %v12587_v20 = vld [vmem:[#allocation7 + $0x9c0] sm:$0xf]  ;;  %v11811_v61 = vld [vmem:[#allocation7 + $0xacc] sm:$0xf0]  ;;  %v1383_v55 = vmax.f32 %v1200_v23, %v1321_v1  ;;  %v1504_v48 = vmax.f32 %v1502_v58, %v1503_v22  ;;  %4544 = vmatpush.bf16.msrb.mxu1 %v8650_v0  ;;  %v9274_v37 = vor.u32 %v12583_v32, %v12581_v25  ;;  %v9402_v59 = vor.u32 %v11815_v17, %v9401_v24 }
  0xbc   : > { %v9385_v44 = vld [vmem:[#allocation7 + $0xac0] sm:$0xf]  ;;  %v11843_v4 = vld [vmem:[#allocation7 + $0xbcc] sm:$0xf0]  ;;  %v1686_v2 = vrot.slane %v1685_v51, 1  ;;  %4557 = vmatpush.bf16.msrb.mxu2 %v8778_v5  ;;  %v9530_v10 = vor.u32 %v11847_v28, %v9529_v40  ;;  %v9130_v19 = vor.u32 %v11747_v27, %v9129_v8  ;;  %v9258_v62 = vor.u32 %v12589_v15, %v12587_v20 }
  0xbd   : > { %v9513_v50 = vld [vmem:[#allocation7 + $0xbc0] sm:$0xf]  ;;  %v7941_v31 = vld [vmem:[%s12329_s10 + $0xf0] sm:$0xff]  ;;  %v1566_v1 = vmax.f32 %v1383_v55, %v1504_v48  ;;  %v9386_v23 = vor.u32 %v11811_v61, %v9385_v44  ;;  %v12602_v25 = vadd.f32 %v359_v13, %v12572_v14  ;;  %v444_v17 = vmax.f32 %v12572_v14, %v359_v13 }
  0xbe   : > { %4576 = vmatpush.bf16.msra.mxu0 %v9146_v63  ;;  %v7953_v7 = vld [vmem:[%s12329_s10 + $0x150] sm:$0xff]  ;;  %v9514_v16 = vor.u32 %v11843_v4, %v9513_v50  ;;  %v1687_v24 = vmax.f32 %v1685_v51, %v1686_v2  ;;  %4570 = vmatpush.bf16.msrb.mxu3 %v8906_v6  ;;  %v12606_v28 = vadd.f32 %v7929_v47, %v530_v42  ;;  %v713_v40 = vrot.slane %v7941_v31, 4  ;;  %v7951_v20 = vld [vmem:[%s12329_s10 + $0x140] sm:$0xff] }
  0xbf   : > { %v7965_v11 = vld [vmem:[%s12329_s10 + $0x1b0] sm:$0xff]  ;;  %14536 = vst [vmem:[#allocation42_spill] sm:$0xff] %v12602_v25  ;;  %v615_v8 = vmax.f32 %v7929_v47, %v530_v42  ;;  %v896_v41 = vrot.slane %v7953_v7, 4  ;;  %v445_v38 = vrot.slane %v444_v17, 2 }
  0xc0   : > { %v7977_v34 = vld [vmem:[%s12329_s10 + $0x210] sm:$0xff]  ;;  %4602 = vmatpush.bf16.msra.mxu2 %v9402_v59  ;;  %14537 = vst [vmem:[#allocation43_spill] sm:$0xff] %v12606_v28  ;;  %v1079_v58 = vrot.slane %v7965_v11, 4  ;;  %v1749_v60 = vmax.f32 %v1566_v1, %v1687_v24  ;;  %v12608_v22 = vadd.f32 %v7941_v31, %v713_v40  ;;  %v798_v5 = vmax.f32 %v7941_v31, %v713_v40 }
  0xc1   : > { %v7989_v32 = vld [vmem:[%s12329_s10 + $0x270] sm:$0xff]  ;;  %v1262_v27 = vrot.slane %v7977_v34, 4  ;;  %v616_v35 = vrot.slane %v615_v8, 2  ;;  %v12610_v44 = vadd.f32 %v7953_v7, %v896_v41  ;;  %v981_v14 = vmax.f32 %v7953_v7, %v896_v41  ;;  %v315_v41 = vld [vmem:[%s12329_s10 + $0x20] sm:$0xff] }
  0xc2   : > { %4615 = vmatpush.bf16.msra.mxu3 %v9530_v10  ;;  %4577 = vmatpush.bf16.msra.mxu0 %v9130_v19  ;;  %v1445_v0 = vrot.slane %v7989_v32, 4  ;;  %14538 = vst [vmem:[#allocation44_spill] sm:$0xff] %v12608_v22  ;;  %v12612_v13 = vpack.c.bf16 %v1749_v60, %v1749_v60  ;;  %v446_v47 = vmax.f32 %v444_v17, %v445_v38  ;;  %v799_v6 = vrot.slane %v798_v5, 2  ;;  %v8001_v42 = vld [vmem:[%s12329_s10 + $0x2d0] sm:$0xff]  ;;  %v7939_v38 = vld [vmem:[%s12329_s10 + $0xe0] sm:$0xff] }
  0xc3   : > { %14539 = vst [vmem:[#allocation45_spill] sm:$0xff] %v12610_v44  ;;  %v617_v61 = vmax.f32 %v615_v8, %v616_v35  ;;  %v12614_v51 = vadd.f32 %v7965_v11, %v1079_v58  ;;  %v982_v63 = vrot.slane %v981_v14, 2  ;;  %v1164_v50 = vmax.f32 %v7965_v11, %v1079_v58  ;;  %v7927_v58 = vld [vmem:[%s12329_s10 + $0x80] sm:$0xff] }
  0xc4   : > { %4603 = vmatpush.bf16.msra.mxu2 %v9386_v23  ;;  %v12616_v4 = vadd.f32 %v7977_v34, %v1262_v27  ;;  %4493 = vmatmul.bf16.vlgmr.msra.gmra.mxu1 %v12612_v13  ;;  %v447_v55 = vrot.slane %v446_v47, 1  ;;  %v1347_v59 = vmax.f32 %v7977_v34, %v1262_v27  ;;  %v12620_v31 = vadd.f32 %v7989_v32, %v1445_v0 }
  0xc5   : > { %14540 = vst [vmem:[#allocation46_spill] sm:$0xff] %v12614_v51  ;;  %v618_v48 = vrot.slane %v617_v61, 1  ;;  %4589 = vmatpush.bf16.msra.mxu1 %v9274_v37  ;;  %v800_v2 = vmax.f32 %v798_v5, %v799_v6  ;;  %v983_v10 = vmax.f32 %v981_v14, %v982_v63  ;;  %v1165_v19 = vrot.slane %v1164_v50, 2 }
  0xc6   : > { %4616 = vmatpush.bf16.msra.mxu3 %v9514_v16  ;;  %14541 = vst [vmem:[#allocation47_spill] sm:$0xff] %v12616_v4  ;;  %v1530_v7 = vmax.f32 %v7989_v32, %v1445_v0  ;;  %v448_v1 = vmax.f32 %v446_v47, %v447_v55  ;;  %v1348_v23 = vrot.slane %v1347_v59, 2  ;;  %v1628_v16 = vrot.slane %v8001_v42, 4 }
  0xc7   : > { %14542 = vst [vmem:[#allocation48_spill] sm:$0xff] %v12620_v31  ;;  %v619_v11 = vmax.f32 %v617_v61, %v618_v48  ;;  %v801_v24 = vrot.slane %v800_v2, 1  ;;  %v984_v17 = vrot.slane %v983_v10, 1  ;;  %v1166_v8 = vmax.f32 %v1164_v50, %v1165_v19 }
  0xc8   : > { %v1531_v40 = vrot.slane %v1530_v7, 2  ;;  %v1349_v27 = vmax.f32 %v1347_v59, %v1348_v23  ;;  %v12624_v60 = vadd.f32 %v8001_v42, %v1628_v16  ;;  %v1713_v37 = vmax.f32 %v8001_v42, %v1628_v16 }
  0xc9   : > { %v656_v34 = vmax.f32 %v448_v1, %v619_v11  ;;  %4590 = vmatpush.bf16.msra.mxu1 %v9258_v62  ;;  %v802_v32 = vmax.f32 %v800_v2, %v801_v24  ;;  %v985_v35 = vmax.f32 %v983_v10, %v984_v17  ;;  %v1167_v0 = vrot.slane %v1166_v8, 1  ;;  %v7963_v62 = vld [vmem:[%s12329_s10 + $0x1a0] sm:$0xff] }
  0xca   : > { %14543 = vst [vmem:[#allocation49_spill] sm:$0xff] %v12624_v60  ;;  %v1532_v5 = vmax.f32 %v1530_v7, %v1531_v40  ;;  %v1350_v14 = vrot.slane %v1349_v27, 1  ;;  %v1714_v47 = vrot.slane %v1713_v37, 2  ;;  %v347_v61 = vrot.slane %v315_v41, 4  ;;  %v7975_v11 = vld [vmem:[%s12329_s10 + $0x200] sm:$0xff] }
  0xcb   : > { %v518_v6 = vrot.slane %v7927_v58, 4  ;;  %v839_v63 = vmax.f32 %v656_v34, %v802_v32  ;;  %v1168_v50 = vmax.f32 %v1166_v8, %v1167_v0  ;;  %v701_v42 = vrot.slane %v7939_v38, 4 }
  0xcc   : > { %v1533_v55 = vrot.slane %v1532_v5, 1  ;;  %v1351_v48 = vmax.f32 %v1349_v27, %v1350_v14  ;;  %v1715_v59 = vmax.f32 %v1713_v37, %v1714_v47  ;;  %v12630_v19 = vadd.f32 %v347_v61, %v315_v41 }
  0xcd   : > { %v432_v15 = vmax.f32 %v315_v41, %v347_v61  ;;  %v1022_v2 = vmax.f32 %v839_v63, %v985_v35  ;;  %v12634_v1 = vadd.f32 %v7927_v58, %v518_v6  ;;  %v603_v7 = vmax.f32 %v7927_v58, %v518_v6  ;;  %v7987_v63 = vld [vmem:[%s12329_s10 + $0x260] sm:$0xff] }
  0xce   : > { %14544 = vst [vmem:[#allocation50_spill] sm:$0xff] %v12630_v19  ;;  %v1534_v10 = vmax.f32 %v1532_v5, %v1533_v55  ;;  %v1716_v23 = vrot.slane %v1715_v59, 1  ;;  %v12637_v24 = vadd.f32 %v7939_v38, %v701_v42  ;;  %v786_v17 = vmax.f32 %v7939_v38, %v701_v42 }
  0xcf   : > { %14545 = vst [vmem:[#allocation51_spill] sm:$0xff] %v12634_v1  ;;  %v433_v16 = vrot.slane %v432_v15, 2  ;;  %v1205_v8 = vmax.f32 %v1022_v2, %v1168_v50  ;;  %v604_v40 = vrot.slane %v603_v7, 2  ;;  %v884_v34 = vrot.slane %v7951_v20, 4 }
  0xd0   : > { %14546 = vst [vmem:[#allocation52_spill] sm:$0xff] %v12637_v24  ;;  %v1067_v27 = vrot.slane %v7963_v62, 4  ;;  %v1717_v37 = vmax.f32 %v1715_v59, %v1716_v23  ;;  %v787_v32 = vrot.slane %v786_v17, 2  ;;  %v1250_v35 = vrot.slane %v7975_v11, 4 }
  0xd1   : > { %v434_v41 = vmax.f32 %v432_v15, %v433_v16  ;;  %v1388_v0 = vmax.f32 %v1205_v8, %v1351_v48  ;;  %v605_v5 = vmax.f32 %v603_v7, %v604_v40  ;;  %v12639_v14 = vadd.f32 %v7951_v20, %v884_v34  ;;  %v7999_v15 = vld [vmem:[%s12329_s10 + $0x2c0] sm:$0xff] }
  0xd2   : > { %v969_v58 = vmax.f32 %v7951_v20, %v884_v34  ;;  %v788_v61 = vmax.f32 %v786_v17, %v787_v32  ;;  %v12641_v6 = vadd.f32 %v7963_v62, %v1067_v27  ;;  %v1152_v38 = vmax.f32 %v7963_v62, %v1067_v27 }
  0xd3   : > { %14547 = vst [vmem:[#allocation53_spill] sm:$0xff] %v12639_v14  ;;  %v435_v47 = vrot.slane %v434_v41, 1  ;;  %v1571_v50 = vmax.f32 %v1388_v0, %v1534_v10  ;;  %v606_v55 = vrot.slane %v605_v5, 1  ;;  %v12644_v59 = vadd.f32 %v7975_v11, %v1250_v35  ;;  %v318_v10 = vld [vmem:[%s12329_s10 + $0x38] sm:$0xff]  ;;  %v12722_v14 = vld [vmem:[#allocation7 + $0x84c] sm:$0xf0] }
  0xd4   : > { %14548 = vst [vmem:[#allocation54_spill] sm:$0xff] %v12641_v6  ;;  %v970_v42 = vrot.slane %v969_v58, 2  ;;  %v789_v23 = vrot.slane %v788_v61, 1  ;;  %v1153_v48 = vrot.slane %v1152_v38, 2  ;;  %v1335_v7 = vmax.f32 %v7975_v11, %v1250_v35  ;;  %v12720_v6 = vld [vmem:[#allocation7 + $0x840] sm:$0xf] }
  0xd5   : > { %14549 = vst [vmem:[#allocation55_spill] sm:$0xff] %v12644_v59  ;;  %v436_v2 = vmax.f32 %v434_v41, %v435_v47  ;;  %v1754_v16 = vmax.f32 %v1571_v50, %v1717_v37  ;;  %v607_v20 = vmax.f32 %v605_v5, %v606_v55  ;;  %v1433_v17 = vrot.slane %v7987_v63, 4  ;;  %v7930_v41 = vld [vmem:[%s12329_s10 + $0x98] sm:$0xff] }
  0xd6   : > { %v971_v8 = vmax.f32 %v969_v58, %v970_v42  ;;  %v790_v40 = vmax.f32 %v788_v61, %v789_v23  ;;  %v1154_v34 = vmax.f32 %v1152_v38, %v1153_v48  ;;  %v1336_v62 = vrot.slane %v1335_v7, 2 }
  0xd7   : > { %v1616_v27 = vrot.slane %v7999_v15, 4  ;;  %v12648_v32 = vpack.c.bf16 %v1754_v16, %v1754_v16  ;;  %v654_v0 = vmax.f32 %v436_v2, %v607_v20  ;;  %v12650_v31 = vadd.f32 %v7987_v63, %v1433_v17  ;;  %v7942_v2 = vld [vmem:[%s12329_s10 + $0xf8] sm:$0xff] }
  0xd8   : > { %v972_v60 = vrot.slane %v971_v8, 1  ;;  %v1155_v47 = vrot.slane %v1154_v34, 1  ;;  %v1337_v4 = vmax.f32 %v1335_v7, %v1336_v62  ;;  %v1518_v11 = vmax.f32 %v7987_v63, %v1433_v17  ;;  %v7954_v7 = vld [vmem:[%s12329_s10 + $0x158] sm:$0xff] }
  0xd9   : > { %14550 = vst [vmem:[#allocation56_spill] sm:$0xff] %v12650_v31  ;;  %v12653_v37 = vadd.f32 %v7999_v15, %v1616_v27  ;;  %4558 = vmatmul.bf16.vlgmr.msrb.gmra.mxu2 %v12648_v32  ;;  %v837_v35 = vmax.f32 %v654_v0, %v790_v40  ;;  %v1701_v58 = vmax.f32 %v7999_v15, %v1616_v27  ;;  %v365_v61 = vrot.slane %v318_v10, 4  ;;  %v7966_v20 = vld [vmem:[%s12329_s10 + $0x1b8] sm:$0xff] }
  0xda   : > { %v973_v5 = vmax.f32 %v971_v8, %v972_v60  ;;  %v1156_v38 = vmax.f32 %v1154_v34, %v1155_v47  ;;  %v1338_v50 = vrot.slane %v1337_v4, 1  ;;  %v1519_v55 = vrot.slane %v1518_v11, 2 }
  0xdb   : > { %14551 = vst [vmem:[#allocation57_spill] sm:$0xff] %v12653_v37  ;;  %v536_v42 = vrot.slane %v7930_v41, 4  ;;  %v1702_v48 = vrot.slane %v1701_v58, 2  ;;  %v12657_v16 = vadd.f32 %v365_v61, %v318_v10  ;;  %v450_v63 = vmax.f32 %v318_v10, %v365_v61 }
  0xdc   : > { %v1020_v23 = vmax.f32 %v837_v35, %v973_v5  ;;  %v1339_v17 = vmax.f32 %v1337_v4, %v1338_v50  ;;  %v1520_v62 = vmax.f32 %v1518_v11, %v1519_v55  ;;  %v719_v34 = vrot.slane %v7942_v2, 4 }
  0xdd   : > { %14552 = vst [vmem:[#allocation58_spill] sm:$0xff] %v12657_v16  ;;  %v12661_v51 = vadd.f32 %v7930_v41, %v536_v42  ;;  %v621_v40 = vmax.f32 %v7930_v41, %v536_v42  ;;  %v1703_v15 = vmax.f32 %v1701_v58, %v1702_v48  ;;  %v451_v8 = vrot.slane %v450_v63, 2  ;;  %v7978_v41 = vld [vmem:[%s12329_s10 + $0x218] sm:$0xff] }
  0xde   : > { %v1203_v60 = vmax.f32 %v1020_v23, %v1156_v38  ;;  %v1521_v27 = vrot.slane %v1520_v62, 1  ;;  %v902_v47 = vrot.slane %v7954_v7, 4  ;;  %v1085_v35 = vrot.slane %v7966_v20, 4  ;;  %v7990_v38 = vld [vmem:[%s12329_s10 + $0x278] sm:$0xff] }
  0xdf   : > { %14553 = vst [vmem:[#allocation59_spill] sm:$0xff] %v12661_v51  ;;  %v622_v0 = vrot.slane %v621_v40, 2  ;;  %v1704_v16 = vrot.slane %v1703_v15, 1  ;;  %v452_v10 = vmax.f32 %v450_v63, %v451_v8  ;;  %v12663_v61 = vadd.f32 %v7942_v2, %v719_v34 }
  0xe0   : > { %v1386_v5 = vmax.f32 %v1203_v60, %v1339_v17  ;;  %v1522_v4 = vmax.f32 %v1520_v62, %v1521_v27  ;;  %v804_v50 = vmax.f32 %v7942_v2, %v719_v34  ;;  %v12665_v55 = vadd.f32 %v7954_v7, %v902_v47 }
  0xe1   : > { %14554 = vst [vmem:[#allocation60_spill] sm:$0xff] %v12663_v61  ;;  %v623_v11 = vmax.f32 %v621_v40, %v622_v0  ;;  %v1705_v58 = vmax.f32 %v1703_v15, %v1704_v16  ;;  %v453_v42 = vrot.slane %v452_v10, 1  ;;  %v987_v23 = vmax.f32 %v7954_v7, %v902_v47  ;;  %v8002_v0 = vld [vmem:[%s12329_s10 + $0x2d8] sm:$0xff] }
  0xe2   : > { %14555 = vst [vmem:[#allocation61_spill] sm:$0xff] %v12665_v55  ;;  %v12669_v48 = vadd.f32 %v7966_v20, %v1085_v35  ;;  %v1569_v51 = vmax.f32 %v1386_v5, %v1522_v4  ;;  %v805_v17 = vrot.slane %v804_v50, 2  ;;  %v1170_v60 = vmax.f32 %v7966_v20, %v1085_v35  ;;  %v9113_v55 = vld [vmem:[#allocation7 + $0x8a0] sm:$0xf]  ;;  %v11743_v5 = vld [vmem:[#allocation7 + $0x8ac] sm:$0xf0] }
  0xe3   : > { %v624_v44 = vrot.slane %v623_v11, 1  ;;  %v454_v63 = vmax.f32 %v452_v10, %v453_v42  ;;  %v988_v8 = vrot.slane %v987_v23, 2  ;;  %v1268_v61 = vrot.slane %v7978_v41, 4  ;;  %v9241_v4 = vld [vmem:[#allocation7 + $0x9a0] sm:$0xf] }
  0xe4   : > { %14556 = vst [vmem:[#allocation62_spill] sm:$0xff] %v12669_v48  ;;  %v1451_v62 = vrot.slane %v7990_v38, 4  ;;  %v1752_v40 = vmax.f32 %v1569_v51, %v1705_v58  ;;  %v806_v34 = vmax.f32 %v804_v50, %v805_v17  ;;  %v1171_v27 = vrot.slane %v1170_v60, 2  ;;  %v11775_v20 = vld [vmem:[#allocation7 + $0x9ac] sm:$0xf0] }
  0xe5   : > { %v625_v2 = vmax.f32 %v623_v11, %v624_v44  ;;  %v989_v16 = vmax.f32 %v987_v23, %v988_v8  ;;  %v12672_v15 = vadd.f32 %v7978_v41, %v1268_v61  ;;  %v1353_v7 = vmax.f32 %v7978_v41, %v1268_v61  ;;  %v9369_v44 = vld [vmem:[#allocation7 + $0xaa0] sm:$0xf]  ;;  %v11807_v23 = vld [vmem:[#allocation7 + $0xaac] sm:$0xf0]  ;;  %v316_v8 = vld [vmem:[%s12329_s10 + $0x28] sm:$0xff] }
  0xe6   : > { %v12674_v47 = vadd.f32 %v7990_v38, %v1451_v62  ;;  %v12676_v35 = vpack.c.bf16 %v1752_v40, %v1752_v40  ;;  %v807_v42 = vrot.slane %v806_v34, 1  ;;  %v1172_v51 = vmax.f32 %v1170_v60, %v1171_v27  ;;  %v9497_v40 = vld [vmem:[#allocation7 + $0xba0] sm:$0xf]  ;;  %v11839_v48 = vld [vmem:[#allocation7 + $0xbac] sm:$0xf0] }
  0xe7   : > { %14557 = vst [vmem:[#allocation63_spill] sm:$0xff] %v12672_v15  ;;  %v657_v10 = vmax.f32 %v454_v63, %v625_v2  ;;  %v990_v11 = vrot.slane %v989_v16, 1  ;;  %v1354_v50 = vrot.slane %v1353_v7, 2  ;;  %v1536_v58 = vmax.f32 %v7990_v38, %v1451_v62 }
  0xe8   : > { %14558 = vst [vmem:[#allocation64_spill] sm:$0xff] %v12674_v47  ;;  %v1634_v17 = vrot.slane %v8002_v0, 4  ;;  %4532 = vmatmul.bf16.vlgmr.msrb.gmra.mxu0 %v12676_v35  ;;  %v808_v61 = vmax.f32 %v806_v34, %v807_v42  ;;  %v1173_v41 = vrot.slane %v1172_v51, 1  ;;  %v9114_v47 = vor.u32 %v11743_v5, %v9113_v55  ;;  %v7928_v34 = vld [vmem:[%s12329_s10 + $0x88] sm:$0xff] }
  0xe9   : > { %v9242_v15 = vor.u32 %v11775_v20, %v9241_v4  ;;  %v991_v63 = vmax.f32 %v989_v16, %v990_v11  ;;  %v1355_v60 = vmax.f32 %v1353_v7, %v1354_v50  ;;  %v1537_v2 = vrot.slane %v1536_v58, 2  ;;  %v7940_v42 = vld [vmem:[%s12329_s10 + $0xe8] sm:$0xff] }
  0xea   : > { %v12680_v27 = vadd.f32 %v8002_v0, %v1634_v17  ;;  %v840_v38 = vmax.f32 %v657_v10, %v808_v61  ;;  %v1174_v62 = vmax.f32 %v1172_v51, %v1173_v41  ;;  %v1719_v22 = vmax.f32 %v8002_v0, %v1634_v17  ;;  %4578 = vmatpush.bf16.msra.mxu0 %v9114_v47  ;;  %v7952_v4 = vld [vmem:[%s12329_s10 + $0x148] sm:$0xff] }
  0xeb   : > { %4591 = vmatpush.bf16.msra.mxu1 %v9242_v15  ;;  %v353_v28 = vrot.slane %v316_v8, 4  ;;  %v1356_v25 = vrot.slane %v1355_v60, 1  ;;  %v1538_v37 = vmax.f32 %v1536_v58, %v1537_v2  ;;  %v9370_v55 = vor.u32 %v11807_v23, %v9369_v44  ;;  %v7964_v44 = vld [vmem:[%s12329_s10 + $0x1a8] sm:$0xff] }
  0xec   : > { %14559 = vst [vmem:[#allocation65_spill] sm:$0xff] %v12680_v27  ;;  %v9498_v5 = vor.u32 %v11839_v48, %v9497_v40  ;;  %v1023_v16 = vmax.f32 %v840_v38, %v991_v63  ;;  %v1720_v20 = vrot.slane %v1719_v22, 2  ;;  %v524_v0 = vrot.slane %v7928_v34, 4  ;;  %v7976_v38 = vld [vmem:[%s12329_s10 + $0x208] sm:$0xff] }
  0xed   : > { %v12685_v7 = vadd.f32 %v353_v28, %v316_v8  ;;  %v438_v11 = vmax.f32 %v316_v8, %v353_v28  ;;  %v1357_v50 = vmax.f32 %v1355_v60, %v1356_v25  ;;  %v1539_v10 = vrot.slane %v1538_v37, 1  ;;  %4604 = vmatpush.bf16.msra.mxu2 %v9370_v55 }
  0xee   : > { %4617 = vmatpush.bf16.msra.mxu3 %v9498_v5  ;;  %v707_v15 = vrot.slane %v7940_v42, 4  ;;  %v1206_v47 = vmax.f32 %v1023_v16, %v1174_v62  ;;  %v1721_v51 = vmax.f32 %v1719_v22, %v1720_v20  ;;  %v890_v58 = vrot.slane %v7952_v4, 4  ;;  %v7988_v16 = vld [vmem:[%s12329_s10 + $0x268] sm:$0xff] }
  0xef   : > { %14560 = vst [vmem:[#allocation66_spill] sm:$0xff] %v12685_v7  ;;  %v439_v17 = vrot.slane %v438_v11, 2  ;;  %v1540_v48 = vmax.f32 %v1538_v37, %v1539_v10  ;;  %v12688_v23 = vadd.f32 %v7928_v34, %v524_v0  ;;  %v609_v61 = vmax.f32 %v7928_v34, %v524_v0 }
  0xf0   : > { %v12690_v41 = vadd.f32 %v7940_v42, %v707_v15  ;;  %v1389_v28 = vmax.f32 %v1206_v47, %v1357_v50  ;;  %v1722_v25 = vrot.slane %v1721_v51, 1  ;;  %v792_v40 = vmax.f32 %v7940_v42, %v707_v15  ;;  %v9097_v47 = vld [vmem:[#allocation7 + $0x880] sm:$0xf] }
  0xf1   : > { %14561 = vst [vmem:[#allocation67_spill] sm:$0xff] %v12688_v23  ;;  %v440_v8 = vmax.f32 %v438_v11, %v439_v17  ;;  %v610_v63 = vrot.slane %v609_v61, 2  ;;  %v12692_v60 = vadd.f32 %v7952_v4, %v890_v58  ;;  %v975_v2 = vmax.f32 %v7952_v4, %v890_v58  ;;  %v9081_v23 = vld [vmem:[#allocation7 + $0x860] sm:$0xf] }
  0xf2   : > { %14562 = vst [vmem:[#allocation68_spill] sm:$0xff] %v12690_v41  ;;  %v1073_v22 = vrot.slane %v7964_v44, 4  ;;  %v1572_v62 = vmax.f32 %v1389_v28, %v1540_v48  ;;  %v1723_v55 = vmax.f32 %v1721_v51, %v1722_v25  ;;  %v793_v37 = vrot.slane %v792_v40, 2  ;;  %v8000_v48 = vld [vmem:[%s12329_s10 + $0x2c8] sm:$0xff]  ;;  %v11739_v51 = vld [vmem:[#allocation7 + $0x88c] sm:$0xf0] }
  0xf3   : > { %14563 = vst [vmem:[#allocation69_spill] sm:$0xff] %v12692_v60  ;;  %v441_v5 = vrot.slane %v440_v8, 1  ;;  %v611_v20 = vmax.f32 %v609_v61, %v610_v63  ;;  %v976_v34 = vrot.slane %v975_v2, 2  ;;  %v1256_v15 = vrot.slane %v7976_v38, 4  ;;  %v9225_v63 = vld [vmem:[#allocation7 + $0x980] sm:$0xf] }
  0xf4   : > { %v12696_v10 = vadd.f32 %v7964_v44, %v1073_v22  ;;  %v1158_v50 = vmax.f32 %v7964_v44, %v1073_v22  ;;  %v1755_v0 = vmax.f32 %v1572_v62, %v1723_v55  ;;  %v794_v42 = vmax.f32 %v792_v40, %v793_v37  ;;  %v9353_v44 = vld [vmem:[#allocation7 + $0xa80] sm:$0xf]  ;;  %v11803_v22 = vld [vmem:[#allocation7 + $0xa8c] sm:$0xf0] }
  0xf5   : > { %v442_v11 = vmax.f32 %v440_v8, %v441_v5  ;;  %v612_v17 = vrot.slane %v611_v20, 1  ;;  %v977_v4 = vmax.f32 %v975_v2, %v976_v34  ;;  %v1439_v27 = vrot.slane %v7988_v16, 4  ;;  %v9481_v2 = vld [vmem:[#allocation7 + $0xb80] sm:$0xf]  ;;  %v11835_v5 = vld [vmem:[#allocation7 + $0xb8c] sm:$0xf0] }
  0xf6   : > { %14564 = vst [vmem:[#allocation70_spill] sm:$0xff] %v12696_v10  ;;  %v1159_v58 = vrot.slane %v1158_v50, 2  ;;  %v12699_v28 = vpack.c.bf16 %v1755_v0, %v1755_v0  ;;  %v795_v25 = vrot.slane %v794_v42, 1  ;;  %v12701_v60 = vadd.f32 %v7976_v38, %v1256_v15  ;;  %v11771_v10 = vld [vmem:[#allocation7 + $0x98c] sm:$0xf0] }
  0xf7   : > { %v1341_v61 = vmax.f32 %v7976_v38, %v1256_v15  ;;  %v613_v8 = vmax.f32 %v611_v20, %v612_v17  ;;  %v978_v40 = vrot.slane %v977_v4, 1  ;;  %v12703_v55 = vadd.f32 %v7988_v16, %v1439_v27  ;;  %v12706_v38 = vld [vmem:[#allocation7 + $0x960] sm:$0xf]  ;;  %v12708_v15 = vld [vmem:[#allocation7 + $0x96c] sm:$0xf0] }
  0xf8   : > { %14565 = vst [vmem:[#allocation71_spill] sm:$0xff] %v12701_v60  ;;  %v1160_v62 = vmax.f32 %v1158_v50, %v1159_v58  ;;  %4571 = vmatmul.bf16.vlgmr.msrb.gmra.mxu3 %v12699_v28  ;;  %v796_v37 = vmax.f32 %v794_v42, %v795_v25  ;;  %v1524_v0 = vmax.f32 %v7988_v16, %v1439_v27  ;;  %v1622_v41 = vrot.slane %v8000_v48, 4  ;;  %v11735_v60 = vld [vmem:[#allocation7 + $0x86c] sm:$0xf0]  ;;  %v12710_v58 = vld [vmem:[#allocation7 + $0xa60] sm:$0xf] }
  0xf9   : > { %14566 = vst [vmem:[#allocation72_spill] sm:$0xff] %v12703_v55  ;;  %v1342_v34 = vrot.slane %v1341_v61, 2  ;;  %v655_v7 = vmax.f32 %v442_v11, %v613_v8  ;;  %v979_v20 = vmax.f32 %v977_v4, %v978_v40  ;;  %v9098_v50 = vor.u32 %v11739_v51, %v9097_v47  ;;  %v12712_v55 = vld [vmem:[#allocation7 + $0xa6c] sm:$0xf0]  ;;  %v12716_v16 = vld [vmem:[#allocation7 + $0xb60] sm:$0xf] }
  0xfa   : > { %v1161_v17 = vrot.slane %v1160_v62, 1  ;;  %v1525_v59 = vrot.slane %v1524_v0, 2  ;;  %v12714_v42 = vadd.f32 %v8000_v48, %v1622_v41  ;;  %v1707_v27 = vmax.f32 %v8000_v48, %v1622_v41  ;;  %v12718_v25 = vld [vmem:[#allocation7 + $0xb6c] sm:$0xf0]  ;;  %v12724_v11 = vld [vmem:[#allocation7 + $0x940] sm:$0xf] }
  0xfb   : > { %v1343_v31 = vmax.f32 %v1341_v61, %v1342_v34  ;;  %v12726_v47 = vld [vmem:[#allocation7 + $0x94c] sm:$0xf0]  ;;  %v838_v4 = vmax.f32 %v655_v7, %v796_v37  ;;  %4579 = vmatpush.bf16.msra.mxu0 %v9098_v50  ;;  %v9226_v61 = vor.u32 %v11771_v10, %v9225_v63  ;;  %v9354_v8 = vor.u32 %v11803_v22, %v9353_v44  ;;  %v12728_v40 = vld [vmem:[#allocation7 + $0xa40] sm:$0xf] }
  0xfc   : > { %14567 = vst [vmem:[#allocation73_spill] sm:$0xff] %v12714_v42  ;;  %v1162_v51 = vmax.f32 %v1160_v62, %v1161_v17  ;;  %v12730_v41 = vld [vmem:[#allocation7 + $0xa4c] sm:$0xf0]  ;;  %v12732_v48 = vld [vmem:[#allocation7 + $0xb40] sm:$0xf]  ;;  %v1526_v24 = vmax.f32 %v1524_v0, %v1525_v59  ;;  %v1708_v1 = vrot.slane %v1707_v27, 2  ;;  %v9482_v19 = vor.u32 %v11835_v5, %v9481_v2 }
  0xfd   : > { %v12734_v34 = vld [vmem:[#allocation7 + $0xb4c] sm:$0xf0]  ;;  %v1344_v42 = vrot.slane %v1343_v31, 1  ;;  %v12740_v7 = vld [vmem:[#allocation7 + $0x920] sm:$0xf]  ;;  %v1021_v63 = vmax.f32 %v838_v4, %v979_v20  ;;  %4592 = vmatpush.bf16.msra.mxu1 %v9226_v61  ;;  %4605 = vmatpush.bf16.msra.mxu2 %v9354_v8  ;;  %v9082_v44 = vor.u32 %v11735_v60, %v9081_v23  ;;  %v9210_v22 = vor.u32 %v12708_v15, %v12706_v38 }
  0xfe   : > { %v12742_v10 = vld [vmem:[#allocation7 + $0x92c] sm:$0xf0]  ;;  %v12746_v62 = vld [vmem:[#allocation7 + $0xa20] sm:$0xf]  ;;  %v1527_v17 = vrot.slane %v1526_v24, 1  ;;  %v1709_v50 = vmax.f32 %v1707_v27, %v1708_v1  ;;  %4618 = vmatpush.bf16.msra.mxu3 %v9482_v19  ;;  %v9338_v23 = vor.u32 %v12712_v55, %v12710_v58  ;;  %v9466_v19 = vor.u32 %v12718_v25, %v12716_v16 }
  0xff   : > { %v12748_v59 = vld [vmem:[#allocation7 + $0xa2c] sm:$0xf0]  ;;  %v12750_v2 = vld [vmem:[#allocation7 + $0xb20] sm:$0xf]  ;;  %v1345_v20 = vmax.f32 %v1343_v31, %v1344_v42  ;;  %v1204_v31 = vmax.f32 %v1021_v63, %v1162_v51  ;;  %4580 = vmatpush.bf16.msra.mxu0 %v9082_v44  ;;  %v9066_v1 = vor.u32 %v12722_v14, %v12720_v6  ;;  %v9194_v55 = vor.u32 %v12726_v47, %v12724_v11  ;;  %v12779_v58 = vld [vmem:[#allocation7 + $0xe4] sm:$0xf] }
 0x100   : > { %v12752_v5 = vld [vmem:[#allocation7 + $0xb2c] sm:$0xf0]  ;;  %v12754_v37 = vld [vmem:[#allocation7 + $0x800] sm:$0xf]  ;;  %v12781_v42 = vld [vmem:[#allocation7 + $0xf0] sm:$0xf0]  ;;  %v1528_v52 = vmax.f32 %v1526_v24, %v1527_v17  ;;  %v9322_v63 = vor.u32 %v12730_v41, %v12728_v40  ;;  %v9450_v16 = vor.u32 %v12734_v34, %v12732_v48  ;;  %v9050_v11 = vor.u32 %v12738_v57, %v12736_v53 }
 0x101   : > { %v12756_v0 = vld [vmem:[#allocation7 + $0x80c] sm:$0xf0]  ;;  %v12760_v60 = vld [vmem:[#allocation7 + $0x900] sm:$0xf]  ;;  %v12783_v27 = vld [vmem:[#allocation7 + $0x1e4] sm:$0xf]  ;;  %v1387_v25 = vmax.f32 %v1204_v31, %v1345_v20  ;;  %4593 = vmatpush.bf16.msra.mxu1 %v9210_v22  ;;  %4606 = vmatpush.bf16.msra.mxu2 %v9338_v23  ;;  %v9178_v24 = vor.u32 %v12742_v10, %v12740_v7  ;;  %v9306_v34 = vor.u32 %v12748_v59, %v12746_v62 }
 0x102   : > { %v12762_v38 = vld [vmem:[#allocation7 + $0x90c] sm:$0xf0]  ;;  %v12764_v15 = vld [vmem:[#allocation7 + $0xa00] sm:$0xf]  ;;  %v1710_v51 = vrot.slane %v1709_v50, 1  ;;  %v371_v41 = vrot.slane %v319_v3, 4  ;;  %4619 = vmatpush.bf16.msra.mxu3 %v9466_v19  ;;  %v9434_v44 = vor.u32 %v12752_v5, %v12750_v2  ;;  %v9034_v57 = vor.u32 %v12756_v0, %v12754_v37 }
 0x103   : > { %v12766_v4 = vld [vmem:[#allocation7 + $0xa0c] sm:$0xf0]  ;;  %v12768_v61 = vld [vmem:[#allocation7 + $0xb00] sm:$0xf]  ;;  %v12791_v14 = vld [vmem:[#allocation7 + $0x2e4] sm:$0xf]  ;;  %v1570_v10 = vmax.f32 %v1387_v25, %v1528_v52  ;;  %4581 = vmatpush.bf16.msra.mxu0 %v9066_v1  ;;  %v9162_v22 = vor.u32 %v12762_v38, %v12760_v60  ;;  %v8126_v2 = vor.u32 %v12779_v58, %v12781_v42  ;;  %v8254_v5 = vor.u32 %v12783_v27, %v12785_v54 }
 0x104   : > { %v12770_v8 = vld [vmem:[#allocation7 + $0xb0c] sm:$0xf0]  ;;  %v12793_v6 = vld [vmem:[#allocation7 + $0x2f0] sm:$0xf0]  ;;  %v12799_v47 = vld [vmem:[#allocation7 + $0x3e4] sm:$0xf]  ;;  %v1711_v48 = vmax.f32 %v1709_v50, %v1710_v51  ;;  %v9290_v20 = vor.u32 %v12766_v4, %v12764_v15  ;;  %v12828_v23 = vadd.f32 %v371_v41, %v319_v3  ;;  %v456_v60 = vmax.f32 %v319_v3, %v371_v41 }
 0x105   : > { %v12801_v40 = vld [vmem:[#allocation7 + $0x3f0] sm:$0xf0]  ;;  %v7931_v53 = vld [vmem:[%s12329_s10 + $0xa0] sm:$0xff]  ;;  %v9418_v17 = vor.u32 %v12770_v8, %v12768_v61  ;;  %v8382_v52 = vor.u32 %v12791_v14, %v12793_v6  ;;  %4594 = vmatpush.bf16.msra.mxu1 %v9194_v55  ;;  %4607 = vmatpush.bf16.msra.mxu2 %v9322_v63 }
 0x106   : > { %v7943_v7 = vld [vmem:[%s12329_s10 + $0x100] sm:$0xff]  ;;  %v8510_v37 = vor.u32 %v12799_v47, %v12801_v40  ;;  %v1753_v0 = vmax.f32 %v1570_v10, %v1711_v48  ;;  %14568 = vst [vmem:[#allocation74_spill] sm:$0xff] %v12828_v23  ;;  %v542_v38 = vrot.slane %v7931_v53, 4  ;;  %4620 = vmatpush.bf16.msra.mxu3 %v9450_v16  ;;  %v457_v31 = vrot.slane %v456_v60, 2  ;;  %v7957_v40 = vld [vmem:[%s12329_s10 + $0x170] sm:$0xff] }
 0x107   : > { %v7955_v62 = vld [vmem:[%s12329_s10 + $0x160] sm:$0xff]  ;;  %v725_v15 = vrot.slane %v7943_v7, 4  ;;  %4582 = vmatpush.bf16.msra.mxu0 %v9050_v11  ;;  %v13103_v23 = vld [vmem:[#allocation5 + $0x3ec] sm:$0xf0] }
 0x108   : > { %v7967_v59 = vld [vmem:[%s12329_s10 + $0x1c0] sm:$0xff]  ;;  %v908_v4 = vrot.slane %v7955_v62, 4  ;;  %v12830_v54 = vpack.c.bf16 %v1753_v0, %v1753_v0  ;;  %v12832_v19 = vadd.f32 %v7931_v53, %v542_v38  ;;  %v627_v1 = vmax.f32 %v7931_v53, %v542_v38  ;;  %14618 = vst [vmem:[#allocation124_spill] sm:$0xff] %v13103_v23 }
 0x109   : > { %v7979_v50 = vld [vmem:[%s12329_s10 + $0x220] sm:$0xff]  ;;  %v1091_v61 = vrot.slane %v7967_v59, 4  ;;  %v12834_v55 = vadd.f32 %v7943_v7, %v725_v15  ;;  %v810_v58 = vmax.f32 %v7943_v7, %v725_v15  ;;  %4608 = vmatpush.bf16.msra.mxu2 %v9306_v34  ;;  %v458_v51 = vmax.f32 %v456_v60, %v457_v31  ;;  %4595 = vmatpush.bf16.msra.mxu1 %v9178_v24 }
 0x10a   : > { %v1274_v8 = vrot.slane %v7979_v50, 4  ;;  %14569 = vst [vmem:[#allocation75_spill] sm:$0xff] %v12832_v19  ;;  %v12836_v42 = vadd.f32 %v7955_v62, %v908_v4  ;;  %v993_v3 = vmax.f32 %v7955_v62, %v908_v4  ;;  %v7991_v27 = vld [vmem:[%s12329_s10 + $0x280] sm:$0xff]  ;;  %4545 = vmatmul.bf16.vlgmr.msrb.gmra.mxu1 %v12830_v54  ;;  %v628_v63 = vrot.slane %v627_v1, 2  ;;  %4621 = vmatpush.bf16.msra.mxu3 %v9434_v44 }
 0x10b   : > { %14570 = vst [vmem:[#allocation76_spill] sm:$0xff] %v12834_v55  ;;  %v12840_v16 = vadd.f32 %v7967_v59, %v1091_v61  ;;  %v1176_v14 = vmax.f32 %v7967_v59, %v1091_v61  ;;  %v8003_v6 = vld [vmem:[%s12329_s10 + $0x2e0] sm:$0xff]  ;;  %v811_v25 = vrot.slane %v810_v58, 2  ;;  %4583 = vmatpush.bf16.msra.mxu0 %v9034_v57  ;;  %v459_v53 = vrot.slane %v458_v51, 1  ;;  %v13131_v55 = vld [vmem:[#allocation5 + $0x3cc] sm:$0xf0] }
 0x10c   : > { %14571 = vst [vmem:[#allocation77_spill] sm:$0xff] %v12836_v42  ;;  %v994_v11 = vrot.slane %v993_v3, 2  ;;  %v12843_v41 = vadd.f32 %v7979_v50, %v1274_v8  ;;  %v1359_v48 = vmax.f32 %v7979_v50, %v1274_v8  ;;  %v629_v7 = vmax.f32 %v627_v1, %v628_v63  ;;  %v13101_v19 = vld [vmem:[#allocation5 + $0x3e0] sm:$0xf] }
 0x10d   : > { %14572 = vst [vmem:[#allocation78_spill] sm:$0xff] %v12840_v16  ;;  %v1177_v10 = vrot.slane %v1176_v14, 2  ;;  %v1457_v62 = vrot.slane %v7991_v27, 4  ;;  %v812_v34 = vmax.f32 %v810_v58, %v811_v25  ;;  %v1640_v38 = vrot.slane %v8003_v6, 4  ;;  %4609 = vmatpush.bf16.msra.mxu2 %v9290_v20  ;;  %4596 = vmatpush.bf16.msra.mxu1 %v9162_v22  ;;  %v7933_v58 = vld [vmem:[%s12329_s10 + $0xb0] sm:$0xff] }
 0x10e   : > { %14573 = vst [vmem:[#allocation79_spill] sm:$0xff] %v12843_v41  ;;  %v995_v0 = vmax.f32 %v993_v3, %v994_v11  ;;  %v1360_v60 = vrot.slane %v1359_v48, 2  ;;  %v460_v59 = vmax.f32 %v458_v51, %v459_v53  ;;  %v630_v24 = vrot.slane %v629_v7, 1  ;;  %4622 = vmatpush.bf16.msra.mxu3 %v9418_v17  ;;  %v7945_v3 = vld [vmem:[%s12329_s10 + $0x110] sm:$0xff] }
 0x10f   : > { %4628 = vmatpush.bf16.msrb.mxu0 %v8126_v2  ;;  %v1178_v44 = vmax.f32 %v1176_v14, %v1177_v10  ;;  %v12845_v15 = vadd.f32 %v7991_v27, %v1457_v62  ;;  %v813_v57 = vrot.slane %v812_v34, 1  ;;  %v1542_v61 = vmax.f32 %v7991_v27, %v1457_v62  ;;  %v321_v2 = vld [vmem:[%s12329_s10 + $0x50] sm:$0xff]  ;;  %14617 = vst [vmem:[#allocation123_spill] sm:$0xff] %v13101_v19 }
 0x110   : > { %v996_v50 = vrot.slane %v995_v0, 1  ;;  %v1361_v4 = vmax.f32 %v1359_v48, %v1360_v60  ;;  %v631_v8 = vmax.f32 %v629_v7, %v630_v24  ;;  %v12848_v1 = vadd.f32 %v8003_v6, %v1640_v38 }
 0x111   : > { %14574 = vst [vmem:[#allocation80_spill] sm:$0xff] %v12845_v15  ;;  %4641 = vmatpush.bf16.msrb.mxu1 %v8254_v5  ;;  %4654 = vmatpush.bf16.msrb.mxu2 %v8382_v52  ;;  %v1179_v31 = vrot.slane %v1178_v44, 1  ;;  %v1725_v20 = vmax.f32 %v8003_v6, %v1640_v38  ;;  %v814_v22 = vmax.f32 %v812_v34, %v813_v57  ;;  %v1543_v27 = vrot.slane %v1542_v61, 2 }
 0x112   : > { %14575 = vst [vmem:[#allocation81_spill] sm:$0xff] %v12848_v1  ;;  %4667 = vmatpush.bf16.msrb.mxu3 %v8510_v37  ;;  %v997_v17 = vmax.f32 %v995_v0, %v996_v50  ;;  %v1362_v51 = vrot.slane %v1361_v4, 1  ;;  %v658_v63 = vmax.f32 %v460_v59, %v631_v8  ;;  %v383_v14 = vrot.slane %v321_v2, 4  ;;  %v7969_v37 = vld [vmem:[%s12329_s10 + $0x1d0] sm:$0xff] }
 0x113   : > { %v1180_v5 = vmax.f32 %v1178_v44, %v1179_v31  ;;  %v1726_v52 = vrot.slane %v1725_v20, 2  ;;  %v1544_v11 = vmax.f32 %v1542_v61, %v1543_v27  ;;  %v554_v48 = vrot.slane %v7933_v58, 4  ;;  %v8219_v1 = vld [vmem:[#allocation7 + $0x1b0] sm:$0xf0] }
 0x114   : > { %v1363_v25 = vmax.f32 %v1361_v4, %v1362_v51  ;;  %v737_v6 = vrot.slane %v7945_v3, 4  ;;  %v841_v53 = vmax.f32 %v658_v63, %v814_v22  ;;  %v12855_v10 = vadd.f32 %v383_v14, %v321_v2  ;;  %v7981_v22 = vld [vmem:[%s12329_s10 + $0x230] sm:$0xff] }
 0x115   : > { %v1727_v7 = vmax.f32 %v1725_v20, %v1726_v52  ;;  %v468_v47 = vmax.f32 %v321_v2, %v383_v14  ;;  %v1545_v62 = vrot.slane %v1544_v11, 1  ;;  %v12859_v34 = vadd.f32 %v7933_v58, %v554_v48  ;;  %v7993_v51 = vld [vmem:[%s12329_s10 + $0x290] sm:$0xff] }
 0x116   : > { %14576 = vst [vmem:[#allocation82_spill] sm:$0xff] %v12855_v10  ;;  %v639_v0 = vmax.f32 %v7933_v58, %v554_v48  ;;  %v12861_v60 = vadd.f32 %v7945_v3, %v737_v6  ;;  %v1024_v38 = vmax.f32 %v841_v53, %v997_v17  ;;  %v822_v44 = vmax.f32 %v7945_v3, %v737_v6  ;;  %v8091_v10 = vld [vmem:[#allocation7 + $0xb0] sm:$0xf0] }
 0x117   : > { %14577 = vst [vmem:[#allocation83_spill] sm:$0xff] %v12859_v34  ;;  %v1728_v59 = vrot.slane %v1727_v7, 1  ;;  %v469_v24 = vrot.slane %v468_v47, 2  ;;  %v1546_v57 = vmax.f32 %v1544_v11, %v1545_v62  ;;  %v920_v4 = vrot.slane %v7957_v40, 4 }
 0x118   : > { %14578 = vst [vmem:[#allocation84_spill] sm:$0xff] %v12861_v60  ;;  %v640_v50 = vrot.slane %v639_v0, 2  ;;  %v1103_v61 = vrot.slane %v7969_v37, 4  ;;  %v1207_v8 = vmax.f32 %v1024_v38, %v1180_v5  ;;  %v823_v20 = vrot.slane %v822_v44, 2 }
 0x119   : > { %v1729_v2 = vmax.f32 %v1727_v7, %v1728_v59  ;;  %v470_v31 = vmax.f32 %v468_v47, %v469_v24  ;;  %v12865_v63 = vadd.f32 %v7957_v40, %v920_v4  ;;  %v1005_v58 = vmax.f32 %v7957_v40, %v920_v4 }
 0x11a   : > { %v641_v27 = vmax.f32 %v639_v0, %v640_v50  ;;  %v12867_v52 = vadd.f32 %v7969_v37, %v1103_v61  ;;  %v1390_v17 = vmax.f32 %v1207_v8, %v1363_v25  ;;  %v824_v3 = vmax.f32 %v822_v44, %v823_v20  ;;  %v8005_v50 = vld [vmem:[%s12329_s10 + $0x2f0] sm:$0xff]  ;;  %v320_v25 = vld [vmem:[%s12329_s10 + $0x48] sm:$0xff] }
 0x11b   : > { %14579 = vst [vmem:[#allocation85_spill] sm:$0xff] %v12865_v63  ;;  %v471_v14 = vrot.slane %v470_v31, 1  ;;  %v1188_v11 = vmax.f32 %v7969_v37, %v1103_v61  ;;  %v1006_v6 = vrot.slane %v1005_v58, 2  ;;  %v1286_v5 = vrot.slane %v7981_v22, 4 }
 0x11c   : > { %14580 = vst [vmem:[#allocation86_spill] sm:$0xff] %v12867_v52  ;;  %v642_v48 = vrot.slane %v641_v27, 1  ;;  %v1469_v53 = vrot.slane %v7993_v51, 4  ;;  %v1573_v7 = vmax.f32 %v1390_v17, %v1546_v57  ;;  %v825_v62 = vrot.slane %v824_v3, 1 }
 0x11d   : > { %v472_v47 = vmax.f32 %v470_v31, %v471_v14  ;;  %v1189_v38 = vrot.slane %v1188_v11, 2  ;;  %v1007_v59 = vmax.f32 %v1005_v58, %v1006_v6  ;;  %v12869_v24 = vadd.f32 %v7981_v22, %v1286_v5 }
 0x11e   : > { %v643_v0 = vmax.f32 %v641_v27, %v642_v48  ;;  %v1371_v40 = vmax.f32 %v7981_v22, %v1286_v5  ;;  %v1756_v4 = vmax.f32 %v1573_v7, %v1729_v2  ;;  %v826_v8 = vmax.f32 %v824_v3, %v825_v62  ;;  %v7932_v5 = vld [vmem:[%s12329_s10 + $0xa8] sm:$0xff] }
 0x11f   : > { %14581 = vst [vmem:[#allocation87_spill] sm:$0xff] %v12869_v24  ;;  %v1190_v37 = vmax.f32 %v1188_v11, %v1189_v38  ;;  %v12873_v44 = vadd.f32 %v7993_v51, %v1469_v53  ;;  %v1008_v57 = vrot.slane %v1007_v59, 1  ;;  %v1554_v20 = vmax.f32 %v7993_v51, %v1469_v53  ;;  %v7944_v3 = vld [vmem:[%s12329_s10 + $0x108] sm:$0xff] }
 0x120   : > { %v660_v61 = vmax.f32 %v472_v47, %v643_v0  ;;  %v1372_v31 = vrot.slane %v1371_v40, 2  ;;  %v12875_v17 = vpack.c.bf16 %v1756_v4, %v1756_v4  ;;  %v1652_v58 = vrot.slane %v8005_v50, 4  ;;  %v7956_v7 = vld [vmem:[%s12329_s10 + $0x168] sm:$0xff] }
 0x121   : > { %14582 = vst [vmem:[#allocation88_spill] sm:$0xff] %v12873_v44  ;;  %v1191_v27 = vrot.slane %v1190_v37, 1  ;;  %v377_v14 = vrot.slane %v320_v25, 4  ;;  %v1009_v48 = vmax.f32 %v1007_v59, %v1008_v57  ;;  %v1555_v2 = vrot.slane %v1554_v20, 2 }
 0x122   : > { %14583 = vst [vmem:[#allocation89_spill] sm:$0xff] %v12875_v17  ;;  %v843_v22 = vmax.f32 %v660_v61, %v826_v8  ;;  %v1373_v6 = vmax.f32 %v1371_v40, %v1372_v31  ;;  %4584 = vmatmul.bf16.vlgmr.msra.gmra.mxu0 %v12875_v17  ;;  %v12881_v62 = vadd.f32 %v8005_v50, %v1652_v58  ;;  %v548_v59 = vrot.slane %v7932_v5, 4 }
 0x123   : > { %v1192_v11 = vmax.f32 %v1190_v37, %v1191_v27  ;;  %v1737_v47 = vmax.f32 %v8005_v50, %v1652_v58  ;;  %v12883_v38 = vadd.f32 %v377_v14, %v320_v25  ;;  %v1556_v0 = vmax.f32 %v1554_v20, %v1555_v2 }
 0x124   : > { %14584 = vst [vmem:[#allocation90_spill] sm:$0xff] %v12881_v62  ;;  %v1026_v51 = vmax.f32 %v843_v22, %v1009_v48  ;;  %v1374_v53 = vrot.slane %v1373_v6, 1  ;;  %v462_v4 = vmax.f32 %v320_v25, %v377_v14  ;;  %v731_v40 = vrot.slane %v7944_v3, 4  ;;  %v7968_v22 = vld [vmem:[%s12329_s10 + $0x1c8] sm:$0xff] }
 0x125   : > { %14585 = vst [vmem:[#allocation91_spill] sm:$0xff] %v12883_v38  ;;  %v1738_v8 = vrot.slane %v1737_v47, 2  ;;  %v914_v61 = vrot.slane %v7956_v7, 4  ;;  %v1557_v44 = vrot.slane %v1556_v0, 1  ;;  %v12885_v27 = vadd.f32 %v7932_v5, %v548_v59  ;;  %v7980_v14 = vld [vmem:[%s12329_s10 + $0x228] sm:$0xff] }
 0x126   : > { %v1209_v57 = vmax.f32 %v1026_v51, %v1192_v11  ;;  %v1375_v31 = vmax.f32 %v1373_v6, %v1374_v53  ;;  %v463_v24 = vrot.slane %v462_v4, 2  ;;  %v633_v50 = vmax.f32 %v7932_v5, %v548_v59 }
 0x127   : > { %v1739_v37 = vmax.f32 %v1737_v47, %v1738_v8  ;;  %14586 = vst [vmem:[#allocation92_spill] sm:$0xff] %v12885_v27  ;;  %v12887_v58 = vadd.f32 %v7944_v3, %v731_v40  ;;  %v1558_v38 = vmax.f32 %v1556_v0, %v1557_v44  ;;  %v816_v20 = vmax.f32 %v7944_v3, %v731_v40 }
 0x128   : > { %v1392_v48 = vmax.f32 %v1209_v57, %v1375_v31  ;;  %v464_v25 = vmax.f32 %v462_v4, %v463_v24  ;;  %v634_v62 = vrot.slane %v633_v50, 2  ;;  %v12891_v11 = vadd.f32 %v7956_v7, %v914_v61  ;;  %v7992_v57 = vld [vmem:[%s12329_s10 + $0x288] sm:$0xff] }
 0x129   : > { %14587 = vst [vmem:[#allocation93_spill] sm:$0xff] %v12887_v58  ;;  %v1740_v2 = vrot.slane %v1739_v37, 1  ;;  %v999_v6 = vmax.f32 %v7956_v7, %v914_v61  ;;  %v817_v53 = vrot.slane %v816_v20, 2  ;;  %v1097_v8 = vrot.slane %v7968_v22, 4  ;;  %v8004_v4 = vld [vmem:[%s12329_s10 + $0x2e8] sm:$0xff] }
 0x12a   : > { %14588 = vst [vmem:[#allocation94_spill] sm:$0xff] %v12891_v11  ;;  %v1575_v51 = vmax.f32 %v1392_v48, %v1558_v38  ;;  %v465_v47 = vrot.slane %v464_v25, 1  ;;  %v635_v59 = vmax.f32 %v633_v50, %v634_v62  ;;  %v1280_v27 = vrot.slane %v7980_v14, 4 }
 0x12b   : > { %v1741_v5 = vmax.f32 %v1739_v37, %v1740_v2  ;;  %v1000_v58 = vrot.slane %v999_v6, 2  ;;  %v818_v0 = vmax.f32 %v816_v20, %v817_v53  ;;  %v12894_v24 = vadd.f32 %v7968_v22, %v1097_v8 }
 0x12c   : > { %v466_v44 = vmax.f32 %v464_v25, %v465_v47  ;;  %v1182_v3 = vmax.f32 %v7968_v22, %v1097_v8  ;;  %v636_v31 = vrot.slane %v635_v59, 1  ;;  %v12897_v38 = vadd.f32 %v7980_v14, %v1280_v27  ;;  %v322_v47 = vld [vmem:[%s12329_s10 + $0x58] sm:$0xff] }
 0x12d   : > { %14589 = vst [vmem:[#allocation95_spill] sm:$0xff] %v12894_v24  ;;  %v1758_v40 = vmax.f32 %v1575_v51, %v1741_v5  ;;  %v1001_v7 = vmax.f32 %v999_v6, %v1000_v58  ;;  %v819_v61 = vrot.slane %v818_v0, 1  ;;  %v1365_v62 = vmax.f32 %v7980_v14, %v1280_v27  ;;  %v7934_v5 = vld [vmem:[%s12329_s10 + $0xb8] sm:$0xff] }
 0x12e   : > { %14590 = vst [vmem:[#allocation96_spill] sm:$0xff] %v12897_v38  ;;  %v1183_v37 = vrot.slane %v1182_v3, 2  ;;  %v1463_v50 = vrot.slane %v7992_v57, 4  ;;  %v637_v25 = vmax.f32 %v635_v59, %v636_v31  ;;  %v1646_v2 = vrot.slane %v8004_v4, 4  ;;  %v7946_v58 = vld [vmem:[%s12329_s10 + $0x118] sm:$0xff] }
 0x12f   : > { %v12899_v48 = vpack.c.bf16 %v1758_v40, %v1758_v40  ;;  %v1002_v20 = vrot.slane %v1001_v7, 1  ;;  %v820_v53 = vmax.f32 %v818_v0, %v819_v61  ;;  %v1366_v8 = vrot.slane %v1365_v62, 2 }
 0x130   : > { %v1184_v22 = vmax.f32 %v1182_v3, %v1183_v37  ;;  %v12902_v51 = vadd.f32 %v7992_v57, %v1463_v50  ;;  %v659_v6 = vmax.f32 %v466_v44, %v637_v25  ;;  %v1548_v24 = vmax.f32 %v7992_v57, %v1463_v50  ;;  %v7958_v25 = vld [vmem:[%s12329_s10 + $0x178] sm:$0xff] }
 0x131   : > { %14591 = vst [vmem:[#allocation97_spill] sm:$0xff] %v12899_v48  ;;  %4610 = vmatmul.bf16.vlgmr.msra.gmra.mxu2 %v12899_v48  ;;  %v1003_v38 = vmax.f32 %v1001_v7, %v1002_v20  ;;  %v12907_v27 = vadd.f32 %v8004_v4, %v1646_v2  ;;  %v1367_v59 = vmax.f32 %v1365_v62, %v1366_v8  ;;  %v389_v31 = vrot.slane %v322_v47, 4  ;;  %v7970_v20 = vld [vmem:[%s12329_s10 + $0x1d8] sm:$0xff] }
 0x132   : > { %14592 = vst [vmem:[#allocation98_spill] sm:$0xff] %v12902_v51  ;;  %v1185_v14 = vrot.slane %v1184_v22, 1  ;;  %v1731_v40 = vmax.f32 %v8004_v4, %v1646_v2  ;;  %v842_v0 = vmax.f32 %v659_v6, %v820_v53  ;;  %v1549_v3 = vrot.slane %v1548_v24, 2 }
 0x133   : > { %14593 = vst [vmem:[#allocation99_spill] sm:$0xff] %v12907_v27  ;;  %v560_v61 = vrot.slane %v7934_v5, 4  ;;  %v743_v37 = vrot.slane %v7946_v58, 4  ;;  %v1368_v11 = vrot.slane %v1367_v59, 1  ;;  %v12909_v63 = vadd.f32 %v389_v31, %v322_v47 }
 0x134   : > { %v1186_v51 = vmax.f32 %v1184_v22, %v1185_v14  ;;  %v1732_v52 = vrot.slane %v1731_v40, 2  ;;  %v1025_v44 = vmax.f32 %v842_v0, %v1003_v38  ;;  %v1550_v7 = vmax.f32 %v1548_v24, %v1549_v3 }
 0x135   : > { %14594 = vst [vmem:[#allocation100_spill] sm:$0xff] %v12909_v63  ;;  %v474_v57 = vmax.f32 %v322_v47, %v389_v31  ;;  %v12911_v50 = vadd.f32 %v7934_v5, %v560_v61  ;;  %v1369_v62 = vmax.f32 %v1367_v59, %v1368_v11  ;;  %v645_v2 = vmax.f32 %v7934_v5, %v560_v61 }
 0x136   : > { %v1733_v4 = vmax.f32 %v1731_v40, %v1732_v52  ;;  %v12915_v53 = vadd.f32 %v7946_v58, %v743_v37  ;;  %v1208_v8 = vmax.f32 %v1025_v44, %v1186_v51  ;;  %v1551_v6 = vrot.slane %v1550_v7, 1  ;;  %v7994_v40 = vld [vmem:[%s12329_s10 + $0x298] sm:$0xff] }
 0x137   : > { %14595 = vst [vmem:[#allocation101_spill] sm:$0xff] %v12911_v50  ;;  %v475_v22 = vrot.slane %v474_v57, 2  ;;  %v828_v14 = vmax.f32 %v7946_v58, %v743_v37  ;;  %v646_v63 = vrot.slane %v645_v2, 2  ;;  %v926_v38 = vrot.slane %v7958_v25, 4  ;;  %v7982_v50 = vld [vmem:[%s12329_s10 + $0x238] sm:$0xff] }
 0x138   : > { %14596 = vst [vmem:[#allocation102_spill] sm:$0xff] %v12915_v53  ;;  %v1734_v27 = vrot.slane %v1733_v4, 1  ;;  %v1109_v24 = vrot.slane %v7970_v20, 4  ;;  %v1391_v47 = vmax.f32 %v1208_v8, %v1369_v62  ;;  %v1552_v31 = vmax.f32 %v1550_v7, %v1551_v6 }
 0x139   : > { %v476_v0 = vmax.f32 %v474_v57, %v475_v22  ;;  %v829_v3 = vrot.slane %v828_v14, 2  ;;  %v647_v59 = vmax.f32 %v645_v2, %v646_v63  ;;  %v12918_v52 = vadd.f32 %v7958_v25, %v926_v38  ;;  %v8107_v63 = vld [vmem:[#allocation7 + $0xd0] sm:$0xf0] }
 0x13a   : > { %v1735_v11 = vmax.f32 %v1733_v4, %v1734_v27  ;;  %v1011_v5 = vmax.f32 %v7958_v25, %v926_v38  ;;  %v1574_v51 = vmax.f32 %v1391_v47, %v1552_v31  ;;  %v12921_v58 = vadd.f32 %v7970_v20, %v1109_v24  ;;  %v11489_v27 = vld [vmem:[#allocation7 + $0xc4] sm:$0xf]  ;;  %v8006_v38 = vld [vmem:[%s12329_s10 + $0x2f8] sm:$0xff]  ;;  %v8235_v47 = vld [vmem:[#allocation7 + $0x1d0] sm:$0xf0] }
 0x13b   : > { %14597 = vst [vmem:[#allocation103_spill] sm:$0xff] %v12918_v52  ;;  %v477_v61 = vrot.slane %v476_v0, 1  ;;  %v830_v44 = vmax.f32 %v828_v14, %v829_v3  ;;  %v648_v37 = vrot.slane %v647_v59, 1  ;;  %v1194_v60 = vmax.f32 %v7970_v20, %v1109_v24  ;;  %v11521_v14 = vld [vmem:[#allocation7 + $0x1c4] sm:$0xf] }
 0x13c   : > { %14598 = vst [vmem:[#allocation104_spill] sm:$0xff] %v12921_v58  ;;  %v1012_v53 = vrot.slane %v1011_v5, 2  ;;  %v1292_v62 = vrot.slane %v7982_v50, 4  ;;  %v1757_v7 = vmax.f32 %v1574_v51, %v1735_v11  ;;  %v1475_v6 = vrot.slane %v7994_v40, 4  ;;  %v11553_v24 = vld [vmem:[#allocation7 + $0x2c4] sm:$0xf] }
 0x13d   : > { %v478_v57 = vmax.f32 %v476_v0, %v477_v61  ;;  %v831_v8 = vrot.slane %v830_v44, 1  ;;  %v649_v4 = vmax.f32 %v647_v59, %v648_v37  ;;  %v1195_v25 = vrot.slane %v1194_v60, 2  ;;  %v8363_v0 = vld [vmem:[#allocation7 + $0x2d0] sm:$0xf0]  ;;  %v11585_v59 = vld [vmem:[#allocation7 + $0x3c4] sm:$0xf] }
 0x13e   : > { %v1013_v2 = vmax.f32 %v1011_v5, %v1012_v53  ;;  %v12923_v22 = vadd.f32 %v7982_v50, %v1292_v62  ;;  %v12926_v31 = vpack.c.bf16 %v1757_v7, %v1757_v7  ;;  %v1377_v58 = vmax.f32 %v7982_v50, %v1292_v62  ;;  %v8491_v53 = vld [vmem:[#allocation7 + $0x3d0] sm:$0xf0]  ;;  %v11485_v7 = vld [vmem:[#allocation7 + $0xa4] sm:$0xf] }
 0x13f   : > { %v832_v3 = vmax.f32 %v830_v44, %v831_v8  ;;  %v12928_v20 = vadd.f32 %v7994_v40, %v1475_v6  ;;  %v661_v11 = vmax.f32 %v478_v57, %v649_v4  ;;  %v1196_v61 = vmax.f32 %v1194_v60, %v1195_v25  ;;  %v11581_v25 = vld [vmem:[#allocation7 + $0x3a4] sm:$0xf] }
 0x140   : > { %14599 = vst [vmem:[#allocation105_spill] sm:$0xff] %v12923_v22  ;;  %v1014_v51 = vrot.slane %v1013_v2, 1  ;;  %v1560_v52 = vmax.f32 %v7994_v40, %v1475_v6  ;;  %4597 = vmatmul.bf16.vlgmr.msra.gmra.mxu1 %v12926_v31  ;;  %v1378_v5 = vrot.slane %v1377_v58, 2  ;;  %v1658_v37 = vrot.slane %v8006_v38, 4  ;;  %v11549_v40 = vld [vmem:[#allocation7 + $0x2a4] sm:$0xf] }
 0x141   : > { %14600 = vst [vmem:[#allocation106_spill] sm:$0xff] %v12926_v31  ;;  %v8110_v22 = vor.u32 %v11489_v27, %v8107_v63  ;;  %v8238_v34 = vor.u32 %v11521_v14, %v8235_v47  ;;  %v844_v44 = vmax.f32 %v661_v11, %v832_v3  ;;  %v1197_v62 = vrot.slane %v1196_v61, 1  ;;  %v8347_v6 = vld [vmem:[#allocation7 + $0x2b0] sm:$0xf0]  ;;  %v11481_v3 = vld [vmem:[#allocation7 + $0x84] sm:$0xf] }
 0x142   : > { %14601 = vst [vmem:[#allocation107_spill] sm:$0xff] %v12928_v20  ;;  %v1015_v50 = vmax.f32 %v1013_v2, %v1014_v51  ;;  %v1561_v8 = vrot.slane %v1560_v52, 2  ;;  %v11517_v20 = vld [vmem:[#allocation7 + $0x1a4] sm:$0xf]  ;;  %v1379_v57 = vmax.f32 %v1377_v58, %v1378_v5  ;;  %v12931_v4 = vadd.f32 %v8006_v38, %v1658_v37  ;;  %v8475_v47 = vld [vmem:[#allocation7 + $0x3b0] sm:$0xf0] }
 0x143   : > { %v1743_v60 = vmax.f32 %v8006_v38, %v1658_v37  ;;  %4629 = vmatpush.bf16.msrb.mxu0 %v8110_v22  ;;  %4642 = vmatpush.bf16.msrb.mxu1 %v8238_v34  ;;  %v1198_v27 = vmax.f32 %v1196_v61, %v1197_v62  ;;  %v8366_v14 = vor.u32 %v11553_v24, %v8363_v0  ;;  %v8075_v2 = vld [vmem:[#allocation7 + $0x90] sm:$0xf0]  ;;  %v11513_v58 = vld [vmem:[#allocation7 + $0x184] sm:$0xf] }
 0x144   : > { %14602 = vst [vmem:[#allocation108_spill] sm:$0xff] %v12931_v4  ;;  %v1027_v15 = vmax.f32 %v844_v44, %v1015_v50  ;;  %v1562_v63 = vmax.f32 %v1560_v52, %v1561_v8  ;;  %v1380_v11 = vrot.slane %v1379_v57, 1  ;;  %v8494_v41 = vor.u32 %v11585_v59, %v8491_v53  ;;  %v8203_v5 = vld [vmem:[#allocation7 + $0x190] sm:$0xf0]  ;;  %v11545_v37 = vld [vmem:[#allocation7 + $0x284] sm:$0xf] }
 0x145   : > { %v1744_v51 = vrot.slane %v1743_v60, 2  ;;  %v8094_v16 = vor.u32 %v11485_v7, %v8091_v10  ;;  %4655 = vmatpush.bf16.msrb.mxu2 %v8366_v14  ;;  %v8222_v34 = vor.u32 %v11517_v20, %v8219_v1  ;;  %v8350_v22 = vor.u32 %v11549_v40, %v8347_v6  ;;  %v8331_v24 = vld [vmem:[#allocation7 + $0x290] sm:$0xf0]  ;;  %v11577_v0 = vld [vmem:[#allocation7 + $0x384] sm:$0xf] }
 0x146   : > { %v1210_v4 = vmax.f32 %v1027_v15, %v1198_v27  ;;  %v1563_v38 = vrot.slane %v1562_v63, 1  ;;  %v1381_v42 = vmax.f32 %v1379_v57, %v1380_v11  ;;  %4668 = vmatpush.bf16.msrb.mxu3 %v8494_v41  ;;  %v8478_v52 = vor.u32 %v11581_v25, %v8475_v47  ;;  %v8459_v61 = vld [vmem:[#allocation7 + $0x390] sm:$0xf0]  ;;  %v11477_v53 = vld [vmem:[#allocation7 + $0x64] sm:$0xf] }
 0x147   : > { %v1745_v44 = vmax.f32 %v1743_v60, %v1744_v51  ;;  %4630 = vmatpush.bf16.msrb.mxu0 %v8094_v16  ;;  %4643 = vmatpush.bf16.msrb.mxu1 %v8222_v34  ;;  %v8078_v59 = vor.u32 %v11481_v3, %v8075_v2  ;;  %v8206_v10 = vor.u32 %v11513_v58, %v8203_v5  ;;  %v8059_v7 = vld [vmem:[#allocation7 + $0x70] sm:$0xf0]  ;;  %v11509_v8 = vld [vmem:[#allocation7 + $0x164] sm:$0xf] }
 0x148   : > { %v1564_v50 = vmax.f32 %v1562_v63, %v1563_v38  ;;  %v1393_v15 = vmax.f32 %v1210_v4, %v1381_v42  ;;  %v8187_v1 = vld [vmem:[#allocation7 + $0x170] sm:$0xf0]  ;;  %v8334_v20 = vor.u32 %v11545_v37, %v8331_v24  ;;  %v8462_v57 = vor.u32 %v11577_v0, %v8459_v61  ;;  %v11541_v40 = vld [vmem:[#allocation7 + $0x264] sm:$0xf] }
 0x149   : > { %v1746_v62 = vrot.slane %v1745_v44, 1  ;;  %4656 = vmatpush.bf16.msrb.mxu2 %v8350_v22  ;;  %v8062_v16 = vor.u32 %v11477_v53, %v8059_v7  ;;  %v8315_v6 = vld [vmem:[#allocation7 + $0x270] sm:$0xf0]  ;;  %v11573_v25 = vld [vmem:[#allocation7 + $0x364] sm:$0xf]  ;;  %v8190_v27 = vor.u32 %v11509_v8, %v8187_v1 }
 0x14a   : > { %v1576_v60 = vmax.f32 %v1393_v15, %v1564_v50  ;;  %4669 = vmatpush.bf16.msrb.mxu3 %v8478_v52  ;;  %v8443_v63 = vld [vmem:[#allocation7 + $0x370] sm:$0xf0]  ;;  %v11473_v14 = vld [vmem:[#allocation7 + $0x44] sm:$0xf]  ;;  %v8318_v2 = vor.u32 %v11541_v40, %v8315_v6 }
 0x14b   : > { %v1747_v41 = vmax.f32 %v1745_v44, %v1746_v62  ;;  %4631 = vmatpush.bf16.msrb.mxu0 %v8078_v59  ;;  %4644 = vmatpush.bf16.msrb.mxu1 %v8206_v10  ;;  %v8043_v47 = vld [vmem:[#allocation7 + $0x50] sm:$0xf0]  ;;  %v11505_v4 = vld [vmem:[#allocation7 + $0x144] sm:$0xf]  ;;  %v8446_v51 = vor.u32 %v11573_v25, %v8443_v63 }
 0x14c   : > { %v8171_v3 = vld [vmem:[#allocation7 + $0x150] sm:$0xf0]  ;;  %v8046_v58 = vor.u32 %v11473_v14, %v8043_v47  ;;  %v11537_v5 = vld [vmem:[#allocation7 + $0x244] sm:$0xf] }
 0x14d   : > { %v1759_v42 = vmax.f32 %v1576_v60, %v1747_v41  ;;  %4657 = vmatpush.bf16.msrb.mxu2 %v8334_v20  ;;  %v8299_v38 = vld [vmem:[#allocation7 + $0x250] sm:$0xf0]  ;;  %v11569_v34 = vld [vmem:[#allocation7 + $0x344] sm:$0xf]  ;;  %v8174_v22 = vor.u32 %v11505_v4, %v8171_v3 }
 0x14e   : > { %4670 = vmatpush.bf16.msrb.mxu3 %v8462_v57  ;;  %v8427_v37 = vld [vmem:[#allocation7 + $0x350] sm:$0xf0]  ;;  %v11469_v44 = vld [vmem:[#allocation7 + $0x24] sm:$0xf]  ;;  %v8302_v61 = vor.u32 %v11537_v5, %v8299_v38 }
 0x14f   : > { %v12933_v11 = vpack.c.bf16 %v1759_v42, %v1759_v42  ;;  %4632 = vmatpush.bf16.msrb.mxu0 %v8062_v16  ;;  %4645 = vmatpush.bf16.msrb.mxu1 %v8190_v27  ;;  %v8027_v52 = vld [vmem:[#allocation7 + $0x30] sm:$0xf0]  ;;  %v11501_v24 = vld [vmem:[#allocation7 + $0x124] sm:$0xf]  ;;  %v8430_v59 = vor.u32 %v11569_v34, %v8427_v37 }
 0x150   : > { %v8155_v0 = vld [vmem:[#allocation7 + $0x130] sm:$0xf0]  ;;  %v11533_v50 = vld [vmem:[#allocation7 + $0x224] sm:$0xf]  ;;  %v8030_v10 = vor.u32 %v11469_v44, %v8027_v52 }
 0x151   : > { %14603 = vst [vmem:[#allocation109_spill] sm:$0xff] %v12933_v11  ;;  %4623 = vmatmul.bf16.vlgmr.msra.gmra.mxu3 %v12933_v11  ;;  %4658 = vmatpush.bf16.msrb.mxu2 %v8318_v2  ;;  %v8283_v53 = vld [vmem:[#allocation7 + $0x230] sm:$0xf0]  ;;  %v11565_v7 = vld [vmem:[#allocation7 + $0x324] sm:$0xf]  ;;  %v8158_v62 = vor.u32 %v11501_v24, %v8155_v0 }
 0x152   : > { %4671 = vmatpush.bf16.msrb.mxu3 %v8446_v51  ;;  %v8411_v15 = vld [vmem:[#allocation7 + $0x330] sm:$0xf0]  ;;  %v11465_v8 = vld [vmem:[#allocation7 + $0x4] sm:$0xf]  ;;  %v8286_v16 = vor.u32 %v11533_v50, %v8283_v53 }
 0x153   : > { %4633 = vmatpush.bf16.msrb.mxu0 %v8046_v58  ;;  %4646 = vmatpush.bf16.msrb.mxu1 %v8174_v22  ;;  %v8011_v1 = vld [vmem:[#allocation7 + $0x10] sm:$0xf0]  ;;  %v11497_v20 = vld [vmem:[#allocation7 + $0x104] sm:$0xf]  ;;  %v8414_v27 = vor.u32 %v11565_v7, %v8411_v15 }
 0x154   : > { %v8139_v57 = vld [vmem:[#allocation7 + $0x110] sm:$0xf0]  ;;  %v11621_v60 = vld [vmem:[#allocation7 + $0x4e4] sm:$0xf]  ;;  %v8014_v63 = vor.u32 %v11465_v8, %v8011_v1 }
 0x155   : > { %v8635_v41 = vld [vmem:[#allocation7 + $0x4f0] sm:$0xf0]  ;;  %4659 = vmatpush.bf16.msrb.mxu2 %v8302_v61  ;;  %v11529_v40 = vld [vmem:[#allocation7 + $0x204] sm:$0xf]  ;;  %v8142_v4 = vor.u32 %v11497_v20, %v8139_v57 }
 0x156   : > { %v11653_v6 = vld [vmem:[#allocation7 + $0x5e4] sm:$0xf]  ;;  %v8763_v25 = vld [vmem:[#allocation7 + $0x5f0] sm:$0xf0]  ;;  %4672 = vmatpush.bf16.msrb.mxu3 %v8430_v59  ;;  %v8638_v3 = vor.u32 %v11621_v60, %v8635_v41 }
 0x157   : > { %4634 = vmatpush.bf16.msrb.mxu0 %v8030_v10  ;;  %v8267_v14 = vld [vmem:[#allocation7 + $0x210] sm:$0xf0]  ;;  %v11561_v47 = vld [vmem:[#allocation7 + $0x304] sm:$0xf]  ;;  %4647 = vmatpush.bf16.msrb.mxu1 %v8158_v62  ;;  %v8766_v5 = vor.u32 %v11653_v6, %v8763_v25 }
 0x158   : > { %v8395_v42 = vld [vmem:[#allocation7 + $0x310] sm:$0xf0]  ;;  %v11685_v2 = vld [vmem:[#allocation7 + $0x6e4] sm:$0xf]  ;;  %v8270_v37 = vor.u32 %v11529_v40, %v8267_v14 }
 0x159   : > { %v8891_v51 = vld [vmem:[#allocation7 + $0x6f0] sm:$0xf0]  ;;  %v11717_v58 = vld [vmem:[#allocation7 + $0x7e4] sm:$0xf]  ;;  %4660 = vmatpush.bf16.msrb.mxu2 %v8286_v16  ;;  %v8398_v24 = vor.u32 %v11561_v47, %v8395_v42 }
 0x15a   : > { %v9019_v38 = vld [vmem:[#allocation7 + $0x7f0] sm:$0xf0]  ;;  %v11617_v34 = vld [vmem:[#allocation7 + $0x4c4] sm:$0xf]  ;;  %4673 = vmatpush.bf16.msrb.mxu3 %v8414_v27  ;;  %v8894_v0 = vor.u32 %v11685_v2, %v8891_v51 }
 0x15b   : > { %v8619_v22 = vld [vmem:[#allocation7 + $0x4d0] sm:$0xf0]  ;;  %v11649_v44 = vld [vmem:[#allocation7 + $0x5c4] sm:$0xf]  ;;  %4635 = vmatpush.bf16.msrb.mxu0 %v8014_v63  ;;  %4648 = vmatpush.bf16.msrb.mxu1 %v8142_v4  ;;  %v9022_v61 = vor.u32 %v11717_v58, %v9019_v38 }
 0x15c   : > { %v8747_v52 = vld [vmem:[#allocation7 + $0x5d0] sm:$0xf0]  ;;  %v8622_v50 = vor.u32 %v11617_v34, %v8619_v22  ;;  %v11681_v59 = vld [vmem:[#allocation7 + $0x6c4] sm:$0xf] }
 0x15d   : > { %v8875_v10 = vld [vmem:[#allocation7 + $0x6d0] sm:$0xf0]  ;;  %v11713_v53 = vld [vmem:[#allocation7 + $0x7c4] sm:$0xf]  ;;  %v8750_v7 = vor.u32 %v11649_v44, %v8747_v52  ;;  %4661 = vmatpush.bf16.msrb.mxu2 %v8270_v37 }
 0x15e   : > { %v9003_v15 = vld [vmem:[#allocation7 + $0x7d0] sm:$0xf0]  ;;  %v11613_v62 = vld [vmem:[#allocation7 + $0x4a4] sm:$0xf]  ;;  %4636 = vmatmul.bf16.vlgmr.msrb.gmra.mxu0 %v12542_v9  ;;  %4674 = vmatpush.bf16.msrb.mxu3 %v8398_v24  ;;  %v8878_v57 = vor.u32 %v11681_v59, %v8875_v10 }
 0x15f   : > { %4680 = vmatpush.bf16.msra.mxu0 %v8638_v3  ;;  %4693 = vmatpush.bf16.msra.mxu1 %v8766_v5  ;;  %v8603_v8 = vld [vmem:[#allocation7 + $0x4b0] sm:$0xf0]  ;;  %v11645_v1 = vld [vmem:[#allocation7 + $0x5a4] sm:$0xf]  ;;  %v9006_v60 = vor.u32 %v11713_v53, %v9003_v15 }
 0x160   : > { %v8731_v20 = vld [vmem:[#allocation7 + $0x5b0] sm:$0xf0]  ;;  %v8606_v41 = vor.u32 %v11613_v62, %v8603_v8  ;;  %v11677_v16 = vld [vmem:[#allocation7 + $0x6a4] sm:$0xf]  ;;  %4662 = vmatmul.bf16.vlgmr.msrb.gmra.mxu2 %v12517_v21  ;;  %4649 = vmatmul.bf16.vlgmr.msrb.gmra.mxu1 %v12612_v13 }
 0x161   : > { %4706 = vmatpush.bf16.msra.mxu2 %v8894_v0  ;;  %v8859_v40 = vld [vmem:[#allocation7 + $0x6b0] sm:$0xf0]  ;;  %v11709_v6 = vld [vmem:[#allocation7 + $0x7a4] sm:$0xf]  ;;  %v8734_v25 = vor.u32 %v11645_v1, %v8731_v20  ;;  %4675 = vmatmul.bf16.vlgmr.msrb.gmra.mxu3 %v12567_v33 }
 0x162   : > { %4719 = vmatpush.bf16.msra.mxu3 %v9022_v61  ;;  %v8987_v27 = vld [vmem:[#allocation7 + $0x7b0] sm:$0xf0]  ;;  %v11609_v63 = vld [vmem:[#allocation7 + $0x484] sm:$0xf]  ;;  %v8862_v4 = vor.u32 %v11677_v16, %v8859_v40 }
 0x163   : > { %4681 = vmatpush.bf16.msra.mxu0 %v8622_v50  ;;  %4694 = vmatpush.bf16.msra.mxu1 %v8750_v7  ;;  %v8587_v14 = vld [vmem:[#allocation7 + $0x490] sm:$0xf0]  ;;  %v11641_v47 = vld [vmem:[#allocation7 + $0x584] sm:$0xf]  ;;  %v8990_v3 = vor.u32 %v11709_v6, %v8987_v27 }
 0x164   : > { %v8715_v42 = vld [vmem:[#allocation7 + $0x590] sm:$0xf0]  ;;  %v8590_v2 = vor.u32 %v11609_v63, %v8587_v14  ;;  %v11673_v51 = vld [vmem:[#allocation7 + $0x684] sm:$0xf] }
 0x165   : > { %4707 = vmatpush.bf16.msra.mxu2 %v8878_v57  ;;  %v8843_v58 = vld [vmem:[#allocation7 + $0x690] sm:$0xf0]  ;;  %v11705_v5 = vld [vmem:[#allocation7 + $0x784] sm:$0xf]  ;;  %v8718_v38 = vor.u32 %v11641_v47, %v8715_v42 }
 0x166   : > { %4720 = vmatpush.bf16.msra.mxu3 %v9006_v60  ;;  %v8971_v34 = vld [vmem:[#allocation7 + $0x790] sm:$0xf0]  ;;  %v11605_v22 = vld [vmem:[#allocation7 + $0x464] sm:$0xf]  ;;  %v8846_v24 = vor.u32 %v11673_v51, %v8843_v58 }
 0x167   : > { %4682 = vmatpush.bf16.msra.mxu0 %v8606_v41  ;;  %4695 = vmatpush.bf16.msra.mxu1 %v8734_v25  ;;  %v8571_v37 = vld [vmem:[#allocation7 + $0x470] sm:$0xf0]  ;;  %v11637_v44 = vld [vmem:[#allocation7 + $0x564] sm:$0xf]  ;;  %v8974_v0 = vor.u32 %v11705_v5, %v8971_v34 }
 0x168   : > { %v8699_v52 = vld [vmem:[#allocation7 + $0x570] sm:$0xf0]  ;;  %v8574_v61 = vor.u32 %v11605_v22, %v8571_v37  ;;  %v11669_v50 = vld [vmem:[#allocation7 + $0x664] sm:$0xf] }
 0x169   : > { %4708 = vmatpush.bf16.msra.mxu2 %v8862_v4  ;;  %v8827_v59 = vld [vmem:[#allocation7 + $0x670] sm:$0xf0]  ;;  %v11701_v10 = vld [vmem:[#allocation7 + $0x764] sm:$0xf]  ;;  %v8702_v53 = vor.u32 %v11637_v44, %v8699_v52 }
 0x16a   : > { %4721 = vmatpush.bf16.msra.mxu3 %v8990_v3  ;;  %v8955_v7 = vld [vmem:[#allocation7 + $0x770] sm:$0xf0]  ;;  %v11601_v15 = vld [vmem:[#allocation7 + $0x444] sm:$0xf]  ;;  %v8830_v20 = vor.u32 %v11669_v50, %v8827_v59 }
 0x16b   : > { %4683 = vmatpush.bf16.msra.mxu0 %v8590_v2  ;;  %4696 = vmatpush.bf16.msra.mxu1 %v8718_v38  ;;  %v8555_v62 = vld [vmem:[#allocation7 + $0x450] sm:$0xf0]  ;;  %v11633_v8 = vld [vmem:[#allocation7 + $0x544] sm:$0xf]  ;;  %v8958_v57 = vor.u32 %v11701_v10, %v8955_v7 }
 0x16c   : > { %v8683_v1 = vld [vmem:[#allocation7 + $0x550] sm:$0xf0]  ;;  %v8558_v60 = vor.u32 %v11601_v15, %v8555_v62  ;;  %v11665_v41 = vld [vmem:[#allocation7 + $0x644] sm:$0xf] }
 0x16d   : > { %4709 = vmatpush.bf16.msra.mxu2 %v8846_v24  ;;  %v8811_v16 = vld [vmem:[#allocation7 + $0x650] sm:$0xf0]  ;;  %v11697_v40 = vld [vmem:[#allocation7 + $0x744] sm:$0xf]  ;;  %v8686_v6 = vor.u32 %v11633_v8, %v8683_v1 }
 0x16e   : > { %4722 = vmatpush.bf16.msra.mxu3 %v8974_v0  ;;  %v8939_v25 = vld [vmem:[#allocation7 + $0x750] sm:$0xf0]  ;;  %v11597_v27 = vld [vmem:[#allocation7 + $0x424] sm:$0xf]  ;;  %v8814_v42 = vor.u32 %v11665_v41, %v8811_v16 }
 0x16f   : > { %4684 = vmatpush.bf16.msra.mxu0 %v8574_v61  ;;  %4697 = vmatpush.bf16.msra.mxu1 %v8702_v53  ;;  %v8539_v63 = vld [vmem:[#allocation7 + $0x430] sm:$0xf0]  ;;  %v11629_v14 = vld [vmem:[#allocation7 + $0x524] sm:$0xf]  ;;  %v8942_v3 = vor.u32 %v11697_v40, %v8939_v25 }
 0x170   : > { %v8667_v47 = vld [vmem:[#allocation7 + $0x530] sm:$0xf0]  ;;  %v11661_v4 = vld [vmem:[#allocation7 + $0x624] sm:$0xf]  ;;  %v8542_v2 = vor.u32 %v11597_v27, %v8539_v63 }
 0x171   : > { %4710 = vmatpush.bf16.msra.mxu2 %v8830_v20  ;;  %v8795_v51 = vld [vmem:[#allocation7 + $0x630] sm:$0xf0]  ;;  %v11693_v58 = vld [vmem:[#allocation7 + $0x724] sm:$0xf]  ;;  %v8670_v38 = vor.u32 %v11629_v14, %v8667_v47 }
 0x172   : > { %4723 = vmatpush.bf16.msra.mxu3 %v8958_v57  ;;  %v8923_v5 = vld [vmem:[#allocation7 + $0x730] sm:$0xf0]  ;;  %v11593_v34 = vld [vmem:[#allocation7 + $0x404] sm:$0xf]  ;;  %v8798_v0 = vor.u32 %v11661_v4, %v8795_v51 }
 0x173   : > { %4685 = vmatpush.bf16.msra.mxu0 %v8558_v60  ;;  %4698 = vmatpush.bf16.msra.mxu1 %v8686_v6  ;;  %v8523_v22 = vld [vmem:[#allocation7 + $0x410] sm:$0xf0]  ;;  %v11625_v37 = vld [vmem:[#allocation7 + $0x504] sm:$0xf]  ;;  %v8926_v10 = vor.u32 %v11693_v58, %v8923_v5 }
 0x174   : > { %v8651_v44 = vld [vmem:[#allocation7 + $0x510] sm:$0xf0]  ;;  %v11749_v52 = vld [vmem:[#allocation7 + $0x8e4] sm:$0xf]  ;;  %v8526_v53 = vor.u32 %v11593_v34, %v8523_v22  ;;  %v4481_v22 = vpop.f32.mrf.mxu0 }
 0x175   : > { %v9147_v24 = vld [vmem:[#allocation7 + $0x8f0] sm:$0xf0]  ;;  %4711 = vmatpush.bf16.msra.mxu2 %v8814_v42  ;;  %v11657_v61 = vld [vmem:[#allocation7 + $0x604] sm:$0xf]  ;;  %v8654_v8 = vor.u32 %v11625_v37, %v8651_v44 }
 0x176   : > { %v11781_v50 = vld [vmem:[#allocation7 + $0x9e4] sm:$0xf]  ;;  %v9275_v59 = vld [vmem:[#allocation7 + $0x9f0] sm:$0xf0]  ;;  %4724 = vmatpush.bf16.msra.mxu3 %v8942_v3  ;;  %v9150_v1 = vor.u32 %v11749_v52, %v9147_v24  ;;  %v4494_v52 = vpop.f32.mrf.mxu1 }
 0x177   : > { %4686 = vmatpush.bf16.msra.mxu0 %v8542_v2  ;;  %v8779_v7 = vld [vmem:[#allocation7 + $0x610] sm:$0xf0]  ;;  %v11689_v15 = vld [vmem:[#allocation7 + $0x704] sm:$0xf]  ;;  %4699 = vmatpush.bf16.msra.mxu1 %v8670_v38  ;;  %v9278_v41 = vor.u32 %v11781_v50, %v9275_v59 }
 0x178   : > { %v8907_v62 = vld [vmem:[#allocation7 + $0x710] sm:$0xf0]  ;;  %v11813_v20 = vld [vmem:[#allocation7 + $0xae4] sm:$0xf]  ;;  %v8782_v25 = vor.u32 %v11657_v61, %v8779_v7 }
 0x179   : > { %v9403_v57 = vld [vmem:[#allocation7 + $0xaf0] sm:$0xf0]  ;;  %v11845_v60 = vld [vmem:[#allocation7 + $0xbe4] sm:$0xf]  ;;  %4712 = vmatpush.bf16.msra.mxu2 %v8798_v0  ;;  %v8910_v14 = vor.u32 %v11689_v15, %v8907_v62  ;;  %v4495_v0 = vadd.f32 %v4494_v52, %v4481_v22 }
 0x17a   : > { %v9531_v16 = vld [vmem:[#allocation7 + $0xbf0] sm:$0xf0]  ;;  %v11745_v40 = vld [vmem:[#allocation7 + $0x8c4] sm:$0xf]  ;;  %4725 = vmatpush.bf16.msra.mxu3 %v8926_v10  ;;  %v9406_v47 = vor.u32 %v11813_v20, %v9403_v57  ;;  %v4520_v20 = vpop.f32.mrf.mxu3 }
 0x17b   : > { %v9131_v6 = vld [vmem:[#allocation7 + $0x8d0] sm:$0xf0]  ;;  %v11777_v27 = vld [vmem:[#allocation7 + $0x9c4] sm:$0xf]  ;;  %4687 = vmatpush.bf16.msra.mxu0 %v8526_v53  ;;  %4700 = vmatpush.bf16.msra.mxu1 %v8654_v8  ;;  %v9534_v42 = vor.u32 %v11845_v60, %v9531_v16 }
 0x17c   : > { %v9259_v63 = vld [vmem:[#allocation7 + $0x9d0] sm:$0xf0]  ;;  %v9134_v4 = vor.u32 %v11745_v40, %v9131_v6  ;;  %v11809_v3 = vld [vmem:[#allocation7 + $0xac4] sm:$0xf] }
 0x17d   : > { %v9387_v2 = vld [vmem:[#allocation7 + $0xad0] sm:$0xf0]  ;;  %v11841_v51 = vld [vmem:[#allocation7 + $0xbc4] sm:$0xf]  ;;  %v9262_v58 = vor.u32 %v11777_v27, %v9259_v63  ;;  %4713 = vmatpush.bf16.msra.mxu2 %v8782_v25 }
 0x17e   : > { %v9515_v5 = vld [vmem:[#allocation7 + $0xbd0] sm:$0xf0]  ;;  %v11741_v38 = vld [vmem:[#allocation7 + $0x8a4] sm:$0xf]  ;;  %4688 = vmatmul.bf16.vlgmr.msra.gmra.mxu0 %v12676_v35  ;;  %4726 = vmatpush.bf16.msra.mxu3 %v8910_v14  ;;  %v9390_v24 = vor.u32 %v11809_v3, %v9387_v2  ;;  %v4483_v2 = vpop.f32.mrf.mxu0 }
 0x17f   : > { %4732 = vmatpush.bf16.msrb.mxu0 %v9150_v1  ;;  %4745 = vmatpush.bf16.msrb.mxu1 %v9278_v41  ;;  %v9115_v34 = vld [vmem:[#allocation7 + $0x8b0] sm:$0xf0]  ;;  %v11773_v37 = vld [vmem:[#allocation7 + $0x9a4] sm:$0xf]  ;;  %v9518_v61 = vor.u32 %v11841_v51, %v9515_v5  ;;  %v4507_v1 = vpop.f32.mrf.mxu2  ;;  %v4496_v5 = vpop.f32.mrf.mxu1 }
 0x180   : > { %v9243_v44 = vld [vmem:[#allocation7 + $0x9b0] sm:$0xf0]  ;;  %v9118_v50 = vor.u32 %v11741_v38, %v9115_v34  ;;  %v11805_v59 = vld [vmem:[#allocation7 + $0xaa4] sm:$0xf]  ;;  %4714 = vmatmul.bf16.vlgmr.msra.gmra.mxu2 %v12648_v32  ;;  %4701 = vmatmul.bf16.vlgmr.msra.gmra.mxu1 %v12830_v54  ;;  %v4508_v41 = vadd.f32 %v4507_v1, %v4495_v0 }
 0x181   : > { %4758 = vmatpush.bf16.msrb.mxu2 %v9406_v47  ;;  %v9371_v10 = vld [vmem:[#allocation7 + $0xab0] sm:$0xf0]  ;;  %v11837_v53 = vld [vmem:[#allocation7 + $0xba4] sm:$0xf]  ;;  %v9246_v7 = vor.u32 %v11773_v37, %v9243_v44  ;;  %4727 = vmatmul.bf16.vlgmr.msra.gmra.mxu3 %v12699_v28 }
 0x182   : > { %4771 = vmatpush.bf16.msrb.mxu3 %v9534_v42  ;;  %v9499_v15 = vld [vmem:[#allocation7 + $0xbb0] sm:$0xf0]  ;;  %v11737_v62 = vld [vmem:[#allocation7 + $0x884] sm:$0xf]  ;;  %v9374_v16 = vor.u32 %v11805_v59, %v9371_v10  ;;  %v4521_v14 = vadd.f32 %v4520_v20, %v4508_v41  ;;  %v4522_v10 = vpop.f32.mrf.mxu3 }
 0x183   : > { %4733 = vmatpush.bf16.msrb.mxu0 %v9134_v4  ;;  %4746 = vmatpush.bf16.msrb.mxu1 %v9262_v58  ;;  %v9099_v8 = vld [vmem:[#allocation7 + $0x890] sm:$0xf0]  ;;  %v11769_v57 = vld [vmem:[#allocation7 + $0x984] sm:$0xf]  ;;  %v9502_v40 = vor.u32 %v11837_v53, %v9499_v15  ;;  %v8257_v10 = vld [vmem:[#allocation7 + $0x1e8] sm:$0xf] }
 0x184   : > { %v9227_v60 = vld [vmem:[#allocation7 + $0x990] sm:$0xf0]  ;;  %v9102_v6 = vor.u32 %v11737_v62, %v9099_v8  ;;  %v11801_v25 = vld [vmem:[#allocation7 + $0xa84] sm:$0xf] }
 0x185   : > { %4759 = vmatpush.bf16.msrb.mxu2 %v9390_v24  ;;  %v9355_v27 = vld [vmem:[#allocation7 + $0xa90] sm:$0xf0]  ;;  %v11833_v63 = vld [vmem:[#allocation7 + $0xb84] sm:$0xf]  ;;  %v9230_v47 = vor.u32 %v11769_v57, %v9227_v60 }
 0x186   : > { %4772 = vmatpush.bf16.msrb.mxu3 %v9518_v61  ;;  %v9483_v42 = vld [vmem:[#allocation7 + $0xb90] sm:$0xf0]  ;;  %v11733_v4 = vld [vmem:[#allocation7 + $0x864] sm:$0xf]  ;;  %v9358_v38 = vor.u32 %v11801_v25, %v9355_v27 }
 0x187   : > { %4734 = vmatpush.bf16.msrb.mxu0 %v9118_v50  ;;  %4747 = vmatpush.bf16.msrb.mxu1 %v9246_v7  ;;  %v9083_v3 = vld [vmem:[#allocation7 + $0x870] sm:$0xf0]  ;;  %v11765_v51 = vld [vmem:[#allocation7 + $0x964] sm:$0xf]  ;;  %v9486_v34 = vor.u32 %v11833_v63, %v9483_v42  ;;  %v4509_v59 = vpop.f32.mrf.mxu2 }
 0x188   : > { %v9211_v58 = vld [vmem:[#allocation7 + $0x970] sm:$0xf0]  ;;  %v9086_v22 = vor.u32 %v11733_v4, %v9083_v3  ;;  %v11797_v37 = vld [vmem:[#allocation7 + $0xa64] sm:$0xf] }
 0x189   : > { %4760 = vmatpush.bf16.msrb.mxu2 %v9374_v16  ;;  %v9339_v44 = vld [vmem:[#allocation7 + $0xa70] sm:$0xf0]  ;;  %v11829_v52 = vld [vmem:[#allocation7 + $0xb64] sm:$0xf]  ;;  %v9214_v24 = vor.u32 %v11765_v51, %v9211_v58 }
 0x18a   : > { %4773 = vmatpush.bf16.msrb.mxu3 %v9502_v40  ;;  %v9467_v0 = vld [vmem:[#allocation7 + $0xb70] sm:$0xf0]  ;;  %v11729_v61 = vld [vmem:[#allocation7 + $0x844] sm:$0xf]  ;;  %v9342_v15 = vor.u32 %v11797_v37, %v9339_v44 }
 0x18b   : > { %4735 = vmatpush.bf16.msrb.mxu0 %v9102_v6  ;;  %4748 = vmatpush.bf16.msrb.mxu1 %v9230_v47  ;;  %v9067_v50 = vld [vmem:[#allocation7 + $0x850] sm:$0xf0]  ;;  %v11761_v53 = vld [vmem:[#allocation7 + $0x944] sm:$0xf]  ;;  %v9470_v62 = vor.u32 %v11829_v52, %v9467_v0  ;;  %v4533_v6 = vpop.f32.mrf.mxu0  ;;  %v4546_v47 = vpop.f32.mrf.mxu1  ;;  %v8129_v0 = vld [vmem:[#allocation7 + $0xe8] sm:$0xf] }
 0x18c   : > { %v9195_v7 = vld [vmem:[#allocation7 + $0x950] sm:$0xf0]  ;;  %v9070_v8 = vor.u32 %v11729_v61, %v9067_v50  ;;  %v11793_v1 = vld [vmem:[#allocation7 + $0xa44] sm:$0xf]  ;;  %v4534_v63 = vadd.f32 %v4533_v6, %v4521_v14  ;;  %v11496_v61 = vld [vmem:[#allocation7 + $0xf4] sm:$0xf0] }
 0x18d   : > { %4761 = vmatpush.bf16.msrb.mxu2 %v9358_v38  ;;  %v9323_v20 = vld [vmem:[#allocation7 + $0xa50] sm:$0xf0]  ;;  %v11825_v57 = vld [vmem:[#allocation7 + $0xb44] sm:$0xf]  ;;  %v9198_v60 = vor.u32 %v11761_v53, %v9195_v7  ;;  %v11528_v53 = vld [vmem:[#allocation7 + $0x1f4] sm:$0xf0] }
 0x18e   : > { %4774 = vmatpush.bf16.msrb.mxu3 %v9486_v34  ;;  %v9451_v41 = vld [vmem:[#allocation7 + $0xb50] sm:$0xf0]  ;;  %v11725_v16 = vld [vmem:[#allocation7 + $0x824] sm:$0xf]  ;;  %v9326_v42 = vor.u32 %v11793_v1, %v9323_v20  ;;  %v4547_v38 = vadd.f32 %v4546_v47, %v4534_v63  ;;  %v11592_v63 = vld [vmem:[#allocation7 + $0x3f4] sm:$0xf0] }
 0x18f   : > { %4736 = vmatpush.bf16.msrb.mxu0 %v9086_v22  ;;  %4749 = vmatpush.bf16.msrb.mxu1 %v9214_v24  ;;  %v9051_v40 = vld [vmem:[#allocation7 + $0x830] sm:$0xf0]  ;;  %v11757_v25 = vld [vmem:[#allocation7 + $0x924] sm:$0xf]  ;;  %v9454_v3 = vor.u32 %v11825_v57, %v9451_v41  ;;  %v4559_v52 = vpop.f32.mrf.mxu2  ;;  %v4572_v24 = vpop.f32.mrf.mxu3  ;;  %v8130_v41 = vor.u32 %v11496_v61, %v8129_v0  ;;  %v8097_v61 = vld [vmem:[#allocation7 + $0xa8] sm:$0xf] }
 0x190   : > { %v9179_v27 = vld [vmem:[#allocation7 + $0x930] sm:$0xf0]  ;;  %v11789_v4 = vld [vmem:[#allocation7 + $0xa24] sm:$0xf]  ;;  %v9054_v2 = vor.u32 %v11725_v16, %v9051_v40  ;;  %v4560_v50 = vadd.f32 %v4559_v52, %v4547_v38  ;;  %v8385_v16 = vld [vmem:[#allocation7 + $0x2e8] sm:$0xf] }
 0x191   : > { %4762 = vmatpush.bf16.msrb.mxu2 %v9342_v15  ;;  %v9307_v51 = vld [vmem:[#allocation7 + $0xa30] sm:$0xf0]  ;;  %v11821_v58 = vld [vmem:[#allocation7 + $0xb24] sm:$0xf]  ;;  %v9182_v34 = vor.u32 %v11757_v25, %v9179_v27  ;;  %v11560_v40 = vld [vmem:[#allocation7 + $0x2f4] sm:$0xf0]  ;;  %v8258_v25 = vor.u32 %v11528_v53, %v8257_v10 }
 0x192   : > { %4775 = vmatpush.bf16.msrb.mxu3 %v9470_v62  ;;  %v9435_v5 = vld [vmem:[#allocation7 + $0xb30] sm:$0xf0]  ;;  %v11721_v22 = vld [vmem:[#allocation7 + $0x804] sm:$0xf]  ;;  %v9310_v59 = vor.u32 %v11789_v4, %v9307_v51  ;;  %v12944_v20 = vadd.f32 %v4572_v24, %v4560_v50  ;;  %v8513_v27 = vld [vmem:[#allocation7 + $0x3e8] sm:$0xf]  ;;  %v8386_v51 = vor.u32 %v11560_v40, %v8385_v16 }
 0x193   : > { %4737 = vmatpush.bf16.msrb.mxu0 %v9070_v8  ;;  %4750 = vmatpush.bf16.msrb.mxu1 %v9198_v60  ;;  %v9035_v37 = vld [vmem:[#allocation7 + $0x810] sm:$0xf0]  ;;  %v11753_v44 = vld [vmem:[#allocation7 + $0x904] sm:$0xf]  ;;  %v9438_v7 = vor.u32 %v11821_v58, %v9435_v5  ;;  %v4535_v6 = vpop.f32.mrf.mxu0  ;;  %v4548_v47 = vpop.f32.mrf.mxu1  ;;  %v8113_v4 = vld [vmem:[#allocation7 + $0xc8] sm:$0xf]  ;;  %v8514_v38 = vor.u32 %v11592_v63, %v8513_v27 }
 0x194   : > { %v9163_v14 = vld [vmem:[#allocation7 + $0x910] sm:$0xf0]  ;;  %v9038_v15 = vor.u32 %v11721_v22, %v9035_v37  ;;  %v11785_v62 = vld [vmem:[#allocation7 + $0xa04] sm:$0xf]  ;;  %v8241_v58 = vld [vmem:[#allocation7 + $0x1c8] sm:$0xf] }
 0x195   : > { %4763 = vmatpush.bf16.msrb.mxu2 %v9326_v42  ;;  %v9291_v8 = vld [vmem:[#allocation7 + $0xa10] sm:$0xf0]  ;;  %v11817_v1 = vld [vmem:[#allocation7 + $0xb04] sm:$0xf]  ;;  %v9166_v57 = vor.u32 %v11753_v44, %v9163_v14  ;;  %v11524_v5 = vld [vmem:[#allocation7 + $0x1d4] sm:$0xf0] }
 0x196   : > { %4776 = vmatpush.bf16.msrb.mxu3 %v9454_v3  ;;  %v9419_v60 = vld [vmem:[#allocation7 + $0xb10] sm:$0xf0]  ;;  %v9294_v42 = vor.u32 %v11785_v62, %v9291_v8  ;;  %v11492_v3 = vld [vmem:[#allocation7 + $0xd4] sm:$0xf0]  ;;  %v8497_v24 = vld [vmem:[#allocation7 + $0x3c8] sm:$0xf]  ;;  %v8242_v0 = vor.u32 %v11524_v5, %v8241_v58 }
 0x197   : > { %4738 = vmatpush.bf16.msrb.mxu0 %v9054_v2  ;;  %4751 = vmatpush.bf16.msrb.mxu1 %v9182_v34  ;;  %v9422_v2 = vor.u32 %v11817_v1, %v9419_v60  ;;  %v8369_v34 = vld [vmem:[#allocation7 + $0x2c8] sm:$0xf]  ;;  %v11556_v22 = vld [vmem:[#allocation7 + $0x2d4] sm:$0xf0]  ;;  %v4561_v37 = vpop.f32.mrf.mxu2  ;;  %v4574_v44 = vpop.f32.mrf.mxu3  ;;  %v8114_v52 = vor.u32 %v11492_v3, %v8113_v4 }
 0x198   : > { %v11588_v14 = vld [vmem:[#allocation7 + $0x3d4] sm:$0xf0]  ;;  %v8225_v10 = vld [vmem:[#allocation7 + $0x1a8] sm:$0xf] }
 0x199   : > { %4764 = vmatpush.bf16.msrb.mxu2 %v9310_v59  ;;  %v11488_v50 = vld [vmem:[#allocation7 + $0xb4] sm:$0xf0]  ;;  %v8370_v59 = vor.u32 %v11556_v22, %v8369_v34  ;;  %v8481_v1 = vld [vmem:[#allocation7 + $0x3a8] sm:$0xf] }
 0x19a   : > { %4777 = vmatpush.bf16.msrb.mxu3 %v9438_v7  ;;  %v11520_v53 = vld [vmem:[#allocation7 + $0x1b4] sm:$0xf0]  ;;  %v8498_v7 = vor.u32 %v11588_v14, %v8497_v24  ;;  %v8098_v8 = vor.u32 %v11488_v50, %v8097_v61  ;;  %v8209_v6 = vld [vmem:[#allocation7 + $0x188] sm:$0xf] }
 0x19b   : > { %4739 = vmatpush.bf16.msrb.mxu0 %v9038_v15  ;;  %4752 = vmatpush.bf16.msrb.mxu1 %v9166_v57  ;;  %v8353_v15 = vld [vmem:[#allocation7 + $0x2a8] sm:$0xf]  ;;  %v11552_v62 = vld [vmem:[#allocation7 + $0x2b4] sm:$0xf0]  ;;  %v8226_v60 = vor.u32 %v11520_v53, %v8225_v10 }
 0x19c   : > { %v11584_v57 = vld [vmem:[#allocation7 + $0x3b4] sm:$0xf0]  ;;  %v8354_v40 = vor.u32 %v11552_v62, %v8353_v15  ;;  %v8337_v63 = vld [vmem:[#allocation7 + $0x288] sm:$0xf] }
 0x19d   : > { %4765 = vmatpush.bf16.msrb.mxu2 %v9294_v42  ;;  %v11484_v16 = vld [vmem:[#allocation7 + $0x94] sm:$0xf0]  ;;  %v8482_v27 = vor.u32 %v11584_v57, %v8481_v1  ;;  %v8465_v4 = vld [vmem:[#allocation7 + $0x388] sm:$0xf] }
 0x19e   : > { %4740 = vmatmul.bf16.vlgmr.msrb.gmra.mxu0 %v12875_v17  ;;  %4778 = vmatpush.bf16.msrb.mxu3 %v9422_v2  ;;  %v11548_v47 = vld [vmem:[#allocation7 + $0x294] sm:$0xf0]  ;;  %v8193_v34 = vld [vmem:[#allocation7 + $0x168] sm:$0xf] }
 0x19f   : > { %4784 = vmatpush.bf16.msra.mxu0 %v8130_v41  ;;  %4797 = vmatpush.bf16.msra.mxu1 %v8258_v25  ;;  %v8081_v41 = vld [vmem:[#allocation7 + $0x88] sm:$0xf]  ;;  %v11516_v25 = vld [vmem:[#allocation7 + $0x194] sm:$0xf0]  ;;  %v4585_v5 = vpop.f32.mrf.mxu0 }
 0x1a0   : > { %4753 = vmatmul.bf16.vlgmr.msrb.gmra.mxu1 %v12926_v31  ;;  %4766 = vmatmul.bf16.vlgmr.msrb.gmra.mxu2 %v12899_v48  ;;  %v8082_v42 = vor.u32 %v11484_v16, %v8081_v41  ;;  %v11580_v3 = vld [vmem:[#allocation7 + $0x394] sm:$0xf0]  ;;  %v8210_v2 = vor.u32 %v11516_v25, %v8209_v6  ;;  %v12951_v37 = vadd.f32 %v4585_v5, %v12944_v20  ;;  %v8305_v20 = vld [vmem:[#allocation7 + $0x248] sm:$0xf] }
 0x1a1   : > { %4810 = vmatpush.bf16.msra.mxu2 %v8386_v51  ;;  %4779 = vmatmul.bf16.vlgmr.msrb.gmra.mxu3 %v12933_v11  ;;  %v8065_v51 = vld [vmem:[#allocation7 + $0x68] sm:$0xf]  ;;  %v11480_v58 = vld [vmem:[#allocation7 + $0x74] sm:$0xf0]  ;;  %v8466_v44 = vor.u32 %v11580_v3, %v8465_v4 }
 0x1a2   : > { %4823 = vmatpush.bf16.msra.mxu3 %v8514_v38  ;;  %v8338_v38 = vor.u32 %v11548_v47, %v8337_v63  ;;  %v11512_v22 = vld [vmem:[#allocation7 + $0x174] sm:$0xf0]  ;;  %v8066_v14 = vor.u32 %v11480_v58, %v8065_v51  ;;  %v8433_v57 = vld [vmem:[#allocation7 + $0x348] sm:$0xf] }
 0x1a3   : > { %4785 = vmatpush.bf16.msra.mxu0 %v8114_v52  ;;  %4798 = vmatpush.bf16.msra.mxu1 %v8242_v0  ;;  %v8321_v52 = vld [vmem:[#allocation7 + $0x268] sm:$0xf]  ;;  %v11544_v24 = vld [vmem:[#allocation7 + $0x274] sm:$0xf0]  ;;  %v8194_v50 = vor.u32 %v11512_v22, %v8193_v34 }
 0x1a4   : > { %v8449_v0 = vld [vmem:[#allocation7 + $0x368] sm:$0xf]  ;;  %v11576_v61 = vld [vmem:[#allocation7 + $0x374] sm:$0xf0]  ;;  %v8322_v53 = vor.u32 %v11544_v24, %v8321_v52 }
 0x1a5   : > { %4811 = vmatpush.bf16.msra.mxu2 %v8370_v59  ;;  %v8049_v59 = vld [vmem:[#allocation7 + $0x48] sm:$0xf]  ;;  %v11476_v10 = vld [vmem:[#allocation7 + $0x54] sm:$0xf0]  ;;  %v8450_v62 = vor.u32 %v11576_v61, %v8449_v0 }
 0x1a6   : > { %4824 = vmatpush.bf16.msra.mxu3 %v8498_v7  ;;  %v8177_v7 = vld [vmem:[#allocation7 + $0x148] sm:$0xf]  ;;  %v11508_v15 = vld [vmem:[#allocation7 + $0x154] sm:$0xf0]  ;;  %v8050_v1 = vor.u32 %v11476_v10, %v8049_v59 }
 0x1a7   : > { %4786 = vmatpush.bf16.msra.mxu0 %v8098_v8  ;;  %4799 = vmatpush.bf16.msra.mxu1 %v8226_v60  ;;  %v11540_v8 = vld [vmem:[#allocation7 + $0x254] sm:$0xf0]  ;;  %v8178_v41 = vor.u32 %v11508_v15, %v8177_v7  ;;  %v8033_v16 = vld [vmem:[#allocation7 + $0x28] sm:$0xf]  ;;  %v4587_v6 = vpop.f32.mrf.mxu0 }
 0x1a8   : > { %v11572_v60 = vld [vmem:[#allocation7 + $0x354] sm:$0xf0]  ;;  %v8306_v25 = vor.u32 %v11540_v8, %v8305_v20  ;;  %v8417_v3 = vld [vmem:[#allocation7 + $0x328] sm:$0xf] }
 0x1a9   : > { %4812 = vmatpush.bf16.msra.mxu2 %v8354_v40  ;;  %v11472_v40 = vld [vmem:[#allocation7 + $0x34] sm:$0xf0]  ;;  %v8434_v47 = vor.u32 %v11572_v60, %v8433_v57  ;;  %v8017_v58 = vld [vmem:[#allocation7 + $0x8] sm:$0xf] }
 0x1aa   : > { %4825 = vmatpush.bf16.msra.mxu3 %v8482_v27  ;;  %v8161_v27 = vld [vmem:[#allocation7 + $0x128] sm:$0xf]  ;;  %v11504_v63 = vld [vmem:[#allocation7 + $0x134] sm:$0xf0] }
 0x1ab   : > { %4787 = vmatpush.bf16.msra.mxu0 %v8082_v42  ;;  %4800 = vmatpush.bf16.msra.mxu1 %v8210_v2  ;;  %v8289_v42 = vld [vmem:[#allocation7 + $0x228] sm:$0xf]  ;;  %v11536_v4 = vld [vmem:[#allocation7 + $0x234] sm:$0xf0]  ;;  %v8034_v2 = vor.u32 %v11472_v40, %v8033_v16 }
 0x1ac   : > { %v11568_v51 = vld [vmem:[#allocation7 + $0x334] sm:$0xf0]  ;;  %v8145_v34 = vld [vmem:[#allocation7 + $0x108] sm:$0xf]  ;;  %v8290_v52 = vor.u32 %v11536_v4, %v8289_v42 }
 0x1ad   : > { %4813 = vmatpush.bf16.msra.mxu2 %v8338_v38  ;;  %v11468_v5 = vld [vmem:[#allocation7 + $0x14] sm:$0xf0]  ;;  %v8162_v38 = vor.u32 %v11504_v63, %v8161_v27  ;;  %v8418_v61 = vor.u32 %v11568_v51, %v8417_v3  ;;  %v8769_v59 = vld [vmem:[#allocation7 + $0x5e8] sm:$0xf] }
 0x1ae   : > { %4826 = vmatpush.bf16.msra.mxu3 %v8466_v44  ;;  %v11500_v22 = vld [vmem:[#allocation7 + $0x114] sm:$0xf0]  ;;  %v8273_v44 = vld [vmem:[#allocation7 + $0x208] sm:$0xf] }
 0x1af   : > { %4788 = vmatpush.bf16.msra.mxu0 %v8066_v14  ;;  %4801 = vmatpush.bf16.msra.mxu1 %v8194_v50  ;;  %v11532_v24 = vld [vmem:[#allocation7 + $0x214] sm:$0xf0]  ;;  %v8641_v14 = vld [vmem:[#allocation7 + $0x4e8] sm:$0xf]  ;;  %v8146_v20 = vor.u32 %v11500_v22, %v8145_v34 }
 0x1b0   : > { %v11624_v0 = vld [vmem:[#allocation7 + $0x4f4] sm:$0xf0]  ;;  %v8401_v50 = vld [vmem:[#allocation7 + $0x308] sm:$0xf]  ;;  %v8274_v60 = vor.u32 %v11532_v24, %v8273_v44 }
 0x1b1   : > { %4814 = vmatpush.bf16.msra.mxu2 %v8322_v53  ;;  %v11656_v10 = vld [vmem:[#allocation7 + $0x5f4] sm:$0xf0]  ;;  %v8018_v53 = vor.u32 %v11468_v5, %v8017_v58  ;;  %v8897_v15 = vld [vmem:[#allocation7 + $0x6e8] sm:$0xf]  ;;  %v8642_v8 = vor.u32 %v11624_v0, %v8641_v14 }
 0x1b2   : > { %4827 = vmatpush.bf16.msra.mxu3 %v8450_v62  ;;  %v11564_v7 = vld [vmem:[#allocation7 + $0x314] sm:$0xf0]  ;;  %v8625_v16 = vld [vmem:[#allocation7 + $0x4c8] sm:$0xf] }
 0x1b3   : > { %4789 = vmatpush.bf16.msra.mxu0 %v8050_v1  ;;  %4802 = vmatpush.bf16.msra.mxu1 %v8178_v41  ;;  %v11688_v62 = vld [vmem:[#allocation7 + $0x6f4] sm:$0xf0]  ;;  %v9025_v1 = vld [vmem:[#allocation7 + $0x7e8] sm:$0xf]  ;;  %v8770_v41 = vor.u32 %v11656_v10, %v8769_v59  ;;  %v8402_v6 = vor.u32 %v11564_v7, %v8401_v50 }
 0x1b4   : > { %v11720_v57 = vld [vmem:[#allocation7 + $0x7f4] sm:$0xf0]  ;;  %v8753_v27 = vld [vmem:[#allocation7 + $0x5c8] sm:$0xf]  ;;  %v4611_v58 = vpop.f32.mrf.mxu2 }
 0x1b5   : > { %4815 = vmatpush.bf16.msra.mxu2 %v8306_v25  ;;  %v11620_v40 = vld [vmem:[#allocation7 + $0x4d4] sm:$0xf0]  ;;  %v8898_v25 = vor.u32 %v11688_v62, %v8897_v15  ;;  %v8881_v42 = vld [vmem:[#allocation7 + $0x6c8] sm:$0xf] }
 0x1b6   : > { %4828 = vmatpush.bf16.msra.mxu3 %v8434_v47  ;;  %v11652_v63 = vld [vmem:[#allocation7 + $0x5d4] sm:$0xf0]  ;;  %v9026_v47 = vor.u32 %v11720_v57, %v9025_v1  ;;  %v8626_v3 = vor.u32 %v11620_v40, %v8625_v16  ;;  %v8737_v44 = vld [vmem:[#allocation7 + $0x5a8] sm:$0xf] }
 0x1b7   : > { %4790 = vmatpush.bf16.msra.mxu0 %v8034_v2  ;;  %4803 = vmatpush.bf16.msra.mxu1 %v8162_v38  ;;  %v11684_v4 = vld [vmem:[#allocation7 + $0x6d4] sm:$0xf0]  ;;  %v9009_v2 = vld [vmem:[#allocation7 + $0x7c8] sm:$0xf]  ;;  %v8754_v5 = vor.u32 %v11652_v63, %v8753_v27 }
 0x1b8   : > { %v11716_v51 = vld [vmem:[#allocation7 + $0x7d4] sm:$0xf0]  ;;  %v8609_v38 = vld [vmem:[#allocation7 + $0x4a8] sm:$0xf]  ;;  %v8882_v22 = vor.u32 %v11684_v4, %v8881_v42 }
 0x1b9   : > { %4816 = vmatpush.bf16.msra.mxu2 %v8290_v52  ;;  %v11616_v34 = vld [vmem:[#allocation7 + $0x4b4] sm:$0xf0]  ;;  %v9010_v24 = vor.u32 %v11716_v51, %v9009_v2  ;;  %v8865_v14 = vld [vmem:[#allocation7 + $0x6a8] sm:$0xf] }
 0x1ba   : > { %4829 = vmatpush.bf16.msra.mxu3 %v8418_v61  ;;  %v11648_v52 = vld [vmem:[#allocation7 + $0x5b4] sm:$0xf0]  ;;  %v8610_v61 = vor.u32 %v11616_v34, %v8609_v38  ;;  %v8993_v50 = vld [vmem:[#allocation7 + $0x7a8] sm:$0xf] }
 0x1bb   : > { %4791 = vmatpush.bf16.msra.mxu0 %v8018_v53  ;;  %4804 = vmatpush.bf16.msra.mxu1 %v8146_v20  ;;  %v11680_v0 = vld [vmem:[#allocation7 + $0x6b4] sm:$0xf0]  ;;  %v8738_v10 = vor.u32 %v11648_v52, %v8737_v44  ;;  %v8593_v53 = vld [vmem:[#allocation7 + $0x488] sm:$0xf] }
 0x1bc   : > { %v11712_v59 = vld [vmem:[#allocation7 + $0x7b4] sm:$0xf0]  ;;  %v8866_v15 = vor.u32 %v11680_v0, %v8865_v14  ;;  %v8721_v62 = vld [vmem:[#allocation7 + $0x588] sm:$0xf]  ;;  %v4613_v40 = vpop.f32.mrf.mxu2 }
 0x1bd   : > { %4817 = vmatpush.bf16.msra.mxu2 %v8274_v60  ;;  %v11612_v7 = vld [vmem:[#allocation7 + $0x494] sm:$0xf0]  ;;  %v8849_v1 = vld [vmem:[#allocation7 + $0x688] sm:$0xf] }
 0x1be   : > { %4830 = vmatpush.bf16.msra.mxu3 %v8402_v6  ;;  %4792 = vmatmul.bf16.vlgmr.msra.gmra.mxu0 %v12542_v9  ;;  %v11644_v20 = vld [vmem:[#allocation7 + $0x594] sm:$0xf0]  ;;  %v8594_v60 = vor.u32 %v11612_v7, %v8593_v53  ;;  %v8705_v42 = vld [vmem:[#allocation7 + $0x568] sm:$0xf] }
 0x1bf   : > { %4836 = vmatpush.bf16.msrb.mxu0 %v8642_v8  ;;  %4849 = vmatpush.bf16.msrb.mxu1 %v8770_v41  ;;  %v8994_v8 = vor.u32 %v11712_v59, %v8993_v50  ;;  %v11676_v57 = vld [vmem:[#allocation7 + $0x694] sm:$0xf0]  ;;  %v8977_v41 = vld [vmem:[#allocation7 + $0x788] sm:$0xf]  ;;  %v8722_v6 = vor.u32 %v11644_v20, %v8721_v62 }
 0x1c0   : > { %4818 = vmatmul.bf16.vlgmr.msra.gmra.mxu2 %v12517_v21  ;;  %4805 = vmatmul.bf16.vlgmr.msra.gmra.mxu1 %v12612_v13  ;;  %v11708_v16 = vld [vmem:[#allocation7 + $0x794] sm:$0xf0]  ;;  %v8850_v63 = vor.u32 %v11676_v57, %v8849_v1  ;;  %v8833_v51 = vld [vmem:[#allocation7 + $0x668] sm:$0xf] }
 0x1c1   : > { %4862 = vmatpush.bf16.msrb.mxu2 %v8898_v25  ;;  %4831 = vmatmul.bf16.vlgmr.msra.gmra.mxu3 %v12567_v33  ;;  %v8577_v25 = vld [vmem:[#allocation7 + $0x468] sm:$0xf]  ;;  %v11608_v27 = vld [vmem:[#allocation7 + $0x474] sm:$0xf0] }
 0x1c2   : > { %4875 = vmatpush.bf16.msrb.mxu3 %v9026_v47  ;;  %v4598_v47 = vpop.f32.mrf.mxu1  ;;  %v11640_v4 = vld [vmem:[#allocation7 + $0x574] sm:$0xf0]  ;;  %v8578_v38 = vor.u32 %v11608_v27, %v8577_v25  ;;  %v8961_v34 = vld [vmem:[#allocation7 + $0x768] sm:$0xf] }
 0x1c3   : > { %4837 = vmatpush.bf16.msrb.mxu0 %v8626_v3  ;;  %4850 = vmatpush.bf16.msrb.mxu1 %v8754_v5  ;;  %v8978_v3 = vor.u32 %v11708_v16, %v8977_v41  ;;  %v4599_v2 = vadd.f32 %v4598_v47, %v12951_v37  ;;  %v11672_v5 = vld [vmem:[#allocation7 + $0x674] sm:$0xf0]  ;;  %v8706_v44 = vor.u32 %v11640_v4, %v8705_v42  ;;  %v8945_v7 = vld [vmem:[#allocation7 + $0x748] sm:$0xf] }
 0x1c4   : > { %v11604_v14 = vld [vmem:[#allocation7 + $0x454] sm:$0xf0]  ;;  %v8834_v0 = vor.u32 %v11672_v5, %v8833_v51  ;;  %v8545_v20 = vld [vmem:[#allocation7 + $0x428] sm:$0xf] }
 0x1c5   : > { %4863 = vmatpush.bf16.msrb.mxu2 %v8882_v22  ;;  %v11704_v22 = vld [vmem:[#allocation7 + $0x774] sm:$0xf0]  ;;  %v12958_v52 = vadd.f32 %v4611_v58, %v4599_v2  ;;  %v8673_v1 = vld [vmem:[#allocation7 + $0x528] sm:$0xf] }
 0x1c6   : > { %4876 = vmatpush.bf16.msrb.mxu3 %v9010_v24  ;;  %v8561_v24 = vld [vmem:[#allocation7 + $0x448] sm:$0xf]  ;;  %v11636_v50 = vld [vmem:[#allocation7 + $0x554] sm:$0xf0]  ;;  %v8962_v59 = vor.u32 %v11704_v22, %v8961_v34 }
 0x1c7   : > { %4838 = vmatpush.bf16.msrb.mxu0 %v8610_v61  ;;  %4851 = vmatpush.bf16.msrb.mxu1 %v8738_v10  ;;  %v8689_v61 = vld [vmem:[#allocation7 + $0x548] sm:$0xf]  ;;  %v11668_v37 = vld [vmem:[#allocation7 + $0x654] sm:$0xf0]  ;;  %v8562_v53 = vor.u32 %v11604_v14, %v8561_v24 }
 0x1c8   : > { %v8817_v10 = vld [vmem:[#allocation7 + $0x648] sm:$0xf]  ;;  %v8690_v62 = vor.u32 %v11636_v50, %v8689_v61  ;;  %v11632_v57 = vld [vmem:[#allocation7 + $0x534] sm:$0xf0] }
 0x1c9   : > { %4864 = vmatpush.bf16.msrb.mxu2 %v8866_v15  ;;  %v11700_v15 = vld [vmem:[#allocation7 + $0x754] sm:$0xf0]  ;;  %v8818_v58 = vor.u32 %v11668_v37, %v8817_v10  ;;  %v8801_v16 = vld [vmem:[#allocation7 + $0x628] sm:$0xf]  ;;  %v8674_v42 = vor.u32 %v11632_v57, %v8673_v1 }
 0x1ca   : > { %4877 = vmatpush.bf16.msrb.mxu3 %v8994_v8  ;;  %v11600_v8 = vld [vmem:[#allocation7 + $0x434] sm:$0xf0]  ;;  %v8946_v41 = vor.u32 %v11700_v15, %v8945_v7  ;;  %v8657_v4 = vld [vmem:[#allocation7 + $0x508] sm:$0xf] }
 0x1cb   : > { %4839 = vmatpush.bf16.msrb.mxu0 %v8594_v60  ;;  %4852 = vmatpush.bf16.msrb.mxu1 %v8722_v6  ;;  %v4600_v60 = vpop.f32.mrf.mxu1  ;;  %v11664_v40 = vld [vmem:[#allocation7 + $0x634] sm:$0xf0]  ;;  %v8929_v6 = vld [vmem:[#allocation7 + $0x728] sm:$0xf]  ;;  %v8546_v25 = vor.u32 %v11600_v8, %v8545_v20 }
 0x1cc   : > { %v11696_v27 = vld [vmem:[#allocation7 + $0x734] sm:$0xf0]  ;;  %v8785_v2 = vld [vmem:[#allocation7 + $0x608] sm:$0xf]  ;;  %v8802_v51 = vor.u32 %v11664_v40, %v8801_v16 }
 0x1cd   : > { %4865 = vmatpush.bf16.msrb.mxu2 %v8850_v63  ;;  %v8529_v63 = vld [vmem:[#allocation7 + $0x408] sm:$0xf]  ;;  %v11596_v47 = vld [vmem:[#allocation7 + $0x414] sm:$0xf0]  ;;  %v8930_v22 = vor.u32 %v11696_v27, %v8929_v6 }
 0x1ce   : > { %4878 = vmatpush.bf16.msrb.mxu3 %v8978_v3  ;;  %v11628_v3 = vld [vmem:[#allocation7 + $0x514] sm:$0xf0]  ;;  %v9281_v24 = vld [vmem:[#allocation7 + $0x9e8] sm:$0xf] }
 0x1cf   : > { %4840 = vmatpush.bf16.msrb.mxu0 %v8578_v38  ;;  %4853 = vmatpush.bf16.msrb.mxu1 %v8706_v44  ;;  %v11660_v5 = vld [vmem:[#allocation7 + $0x614] sm:$0xf0]  ;;  %v9153_v38 = vld [vmem:[#allocation7 + $0x8e8] sm:$0xf]  ;;  %v8658_v10 = vor.u32 %v11628_v3, %v8657_v4 }
 0x1d0   : > { %v11752_v34 = vld [vmem:[#allocation7 + $0x8f4] sm:$0xf0]  ;;  %v8913_v44 = vld [vmem:[#allocation7 + $0x708] sm:$0xf]  ;;  %v8786_v15 = vor.u32 %v11660_v5, %v8785_v2 }
 0x1d1   : > { %4866 = vmatpush.bf16.msrb.mxu2 %v8834_v0  ;;  %v11784_v14 = vld [vmem:[#allocation7 + $0x9f4] sm:$0xf0]  ;;  %v8530_v0 = vor.u32 %v11596_v47, %v8529_v63  ;;  %v9409_v50 = vld [vmem:[#allocation7 + $0xae8] sm:$0xf]  ;;  %v9154_v37 = vor.u32 %v11752_v34, %v9153_v38 }
 0x1d2   : > { %4879 = vmatpush.bf16.msrb.mxu3 %v8962_v59  ;;  %v11692_v61 = vld [vmem:[#allocation7 + $0x714] sm:$0xf0]  ;;  %v9137_v20 = vld [vmem:[#allocation7 + $0x8c8] sm:$0xf] }
 0x1d3   : > { %4841 = vmatpush.bf16.msrb.mxu0 %v8562_v53  ;;  %4854 = vmatpush.bf16.msrb.mxu1 %v8690_v62  ;;  %v11816_v59 = vld [vmem:[#allocation7 + $0xaf4] sm:$0xf0]  ;;  %v9537_v53 = vld [vmem:[#allocation7 + $0xbe8] sm:$0xf]  ;;  %v9282_v62 = vor.u32 %v11784_v14, %v9281_v24 }
 0x1d4   : > { %v11848_v7 = vld [vmem:[#allocation7 + $0xbf4] sm:$0xf0]  ;;  %v9410_v1 = vor.u32 %v11816_v59, %v9409_v50  ;;  %v9265_v57 = vld [vmem:[#allocation7 + $0x9c8] sm:$0xf] }
 0x1d5   : > { %4867 = vmatpush.bf16.msrb.mxu2 %v8818_v58  ;;  %v11748_v8 = vld [vmem:[#allocation7 + $0x8d4] sm:$0xf0]  ;;  %v8914_v58 = vor.u32 %v11692_v61, %v8913_v44  ;;  %v9393_v16 = vld [vmem:[#allocation7 + $0xac8] sm:$0xf] }
 0x1d6   : > { %4880 = vmatpush.bf16.msrb.mxu3 %v8946_v41  ;;  %v11780_v60 = vld [vmem:[#allocation7 + $0x9d4] sm:$0xf0]  ;;  %v9538_v41 = vor.u32 %v11848_v7, %v9537_v53  ;;  %v9138_v6 = vor.u32 %v11748_v8, %v9137_v20  ;;  %v9121_v47 = vld [vmem:[#allocation7 + $0x8a8] sm:$0xf] }
 0x1d7   : > { %4842 = vmatpush.bf16.msrb.mxu0 %v8546_v25  ;;  %4855 = vmatpush.bf16.msrb.mxu1 %v8674_v42  ;;  %v11812_v40 = vld [vmem:[#allocation7 + $0xad4] sm:$0xf0]  ;;  %v9521_v25 = vld [vmem:[#allocation7 + $0xbc8] sm:$0xf]  ;;  %v9266_v63 = vor.u32 %v11780_v60, %v9265_v57 }
 0x1d8   : > { %v11844_v27 = vld [vmem:[#allocation7 + $0xbd4] sm:$0xf0]  ;;  %v9394_v4 = vor.u32 %v11812_v40, %v9393_v16  ;;  %v9249_v3 = vld [vmem:[#allocation7 + $0x9a8] sm:$0xf] }
 0x1d9   : > { %4868 = vmatpush.bf16.msrb.mxu2 %v8802_v51  ;;  %v11744_v42 = vld [vmem:[#allocation7 + $0x8b4] sm:$0xf0]  ;;  %v4624_v51 = vpop.f32.mrf.mxu3  ;;  %v9522_v5 = vor.u32 %v11844_v27, %v9521_v25  ;;  %v9377_v38 = vld [vmem:[#allocation7 + $0xaa8] sm:$0xf] }
 0x1da   : > { %4881 = vmatpush.bf16.msrb.mxu3 %v8930_v22  ;;  %v11776_v2 = vld [vmem:[#allocation7 + $0x9b4] sm:$0xf0]  ;;  %v12962_v22 = vadd.f32 %v4624_v51, %v12958_v52  ;;  %v9122_v44 = vor.u32 %v11744_v42, %v9121_v47  ;;  %v9505_v24 = vld [vmem:[#allocation7 + $0xba8] sm:$0xf] }
 0x1db   : > { %4843 = vmatpush.bf16.msrb.mxu0 %v8530_v0  ;;  %4856 = vmatpush.bf16.msrb.mxu1 %v8658_v10  ;;  %v11808_v34 = vld [vmem:[#allocation7 + $0xab4] sm:$0xf0]  ;;  %v9250_v0 = vor.u32 %v11776_v2, %v9249_v3  ;;  %v9105_v61 = vld [vmem:[#allocation7 + $0x888] sm:$0xf]  ;;  %v4637_v16 = vpop.f32.mrf.mxu0 }
 0x1dc   : > { %14604 = vst [vmem:[#allocation110_spill] sm:$0xff] %v12962_v22  ;;  %v11840_v14 = vld [vmem:[#allocation7 + $0xbb4] sm:$0xf0]  ;;  %v9378_v59 = vor.u32 %v11808_v34, %v9377_v38  ;;  %v9233_v10 = vld [vmem:[#allocation7 + $0x988] sm:$0xf] }
 0x1dd   : > { %4869 = vmatpush.bf16.msrb.mxu2 %v8786_v15  ;;  %v11740_v50 = vld [vmem:[#allocation7 + $0x894] sm:$0xf0]  ;;  %v9506_v52 = vor.u32 %v11840_v14, %v9505_v24  ;;  %v9361_v53 = vld [vmem:[#allocation7 + $0xa88] sm:$0xf]  ;;  %v4650_v34 = vpop.f32.mrf.mxu1  ;;  %v13083_v22 = vld [vmem:[#allocation5 + $0xec] sm:$0xf0] }
 0x1de   : > { %4882 = vmatpush.bf16.msrb.mxu3 %v8914_v58  ;;  %4844 = vmatmul.bf16.vlgmr.msrb.gmra.mxu0 %v12676_v35  ;;  %v11804_v7 = vld [vmem:[#allocation7 + $0xa94] sm:$0xf0]  ;;  %v9106_v15 = vor.u32 %v11740_v50, %v9105_v61  ;;  %v9089_v58 = vld [vmem:[#allocation7 + $0x868] sm:$0xf] }
 0x1df   : > { %4888 = vmatpush.bf16.msra.mxu0 %v9154_v37  ;;  %4901 = vmatpush.bf16.msra.mxu1 %v9282_v62  ;;  %v11772_v37 = vld [vmem:[#allocation7 + $0x994] sm:$0xf0]  ;;  %v9489_v62 = vld [vmem:[#allocation7 + $0xb88] sm:$0xf]  ;;  %v9362_v57 = vor.u32 %v11804_v7, %v9361_v53 }
 0x1e0   : > { %4870 = vmatmul.bf16.vlgmr.msrb.gmra.mxu2 %v12648_v32  ;;  %4857 = vmatmul.bf16.vlgmr.msrb.gmra.mxu1 %v12830_v54  ;;  %v11836_v20 = vld [vmem:[#allocation7 + $0xb94] sm:$0xf0]  ;;  %v9234_v8 = vor.u32 %v11772_v37, %v9233_v10  ;;  %v9217_v60 = vld [vmem:[#allocation7 + $0x968] sm:$0xf] }
 0x1e1   : > { %4914 = vmatpush.bf16.msra.mxu2 %v9410_v1  ;;  %4883 = vmatmul.bf16.vlgmr.msrb.gmra.mxu3 %v12699_v28  ;;  %v11736_v1 = vld [vmem:[#allocation7 + $0x874] sm:$0xf0]  ;;  %v9490_v40 = vor.u32 %v11836_v20, %v9489_v62  ;;  %v4626_v27 = vpop.f32.mrf.mxu3  ;;  %v9473_v47 = vld [vmem:[#allocation7 + $0xb68] sm:$0xf] }
 0x1e2   : > { %4927 = vmatpush.bf16.msra.mxu3 %v9538_v41  ;;  %v11768_v41 = vld [vmem:[#allocation7 + $0x974] sm:$0xf0]  ;;  %v9073_v3 = vld [vmem:[#allocation7 + $0x848] sm:$0xf] }
 0x1e3   : > { %4889 = vmatpush.bf16.msra.mxu0 %v9138_v6  ;;  %4902 = vmatpush.bf16.msra.mxu1 %v9266_v63  ;;  %v9345_v6 = vld [vmem:[#allocation7 + $0xa68] sm:$0xf]  ;;  %v11800_v25 = vld [vmem:[#allocation7 + $0xa74] sm:$0xf0]  ;;  %v9090_v63 = vor.u32 %v11736_v1, %v9089_v58  ;;  %v4639_v62 = vpop.f32.mrf.mxu0 }
 0x1e4   : > { %v11832_v42 = vld [vmem:[#allocation7 + $0xb74] sm:$0xf0]  ;;  %v9346_v51 = vor.u32 %v11800_v25, %v9345_v6  ;;  %v9329_v24 = vld [vmem:[#allocation7 + $0xa48] sm:$0xf] }
 0x1e5   : > { %4915 = vmatpush.bf16.msra.mxu2 %v9394_v4  ;;  %v9218_v4 = vor.u32 %v11768_v41, %v9217_v60  ;;  %v11732_v2 = vld [vmem:[#allocation7 + $0x854] sm:$0xf0]  ;;  %v9457_v50 = vld [vmem:[#allocation7 + $0xb48] sm:$0xf] }
 0x1e6   : > { %4928 = vmatpush.bf16.msra.mxu3 %v9522_v5  ;;  %v9201_v5 = vld [vmem:[#allocation7 + $0x948] sm:$0xf]  ;;  %v11764_v38 = vld [vmem:[#allocation7 + $0x954] sm:$0xf0]  ;;  %v9074_v61 = vor.u32 %v11732_v2, %v9073_v3  ;;  %v11494_v2 = vld [vmem:[#allocation7 + $0xec] sm:$0xf] }
 0x1e7   : > { %4890 = vmatpush.bf16.msra.mxu0 %v9122_v44  ;;  %4903 = vmatpush.bf16.msra.mxu1 %v9250_v0  ;;  %v9474_v44 = vor.u32 %v11832_v42, %v9473_v47  ;;  %v11796_v14 = vld [vmem:[#allocation7 + $0xa54] sm:$0xf0]  ;;  %v4651_v0 = vadd.f32 %v4650_v34, %v4637_v16  ;;  %v9202_v10 = vor.u32 %v11764_v38, %v9201_v5  ;;  %v9057_v37 = vld [vmem:[#allocation7 + $0x828] sm:$0xf]  ;;  %v4652_v38 = vpop.f32.mrf.mxu1 }
 0x1e8   : > { %v9330_v53 = vor.u32 %v11796_v14, %v9329_v24  ;;  %v9185_v7 = vld [vmem:[#allocation7 + $0x928] sm:$0xf]  ;;  %v11792_v58 = vld [vmem:[#allocation7 + $0xa34] sm:$0xf0]  ;;  %v11526_v24 = vld [vmem:[#allocation7 + $0x1ec] sm:$0xf] }
 0x1e9   : > { %4916 = vmatpush.bf16.msra.mxu2 %v9378_v59  ;;  %v11828_v59 = vld [vmem:[#allocation7 + $0xb54] sm:$0xf0]  ;;  %v9441_v1 = vld [vmem:[#allocation7 + $0xb28] sm:$0xf]  ;;  %v4676_v25 = vpop.f32.mrf.mxu3  ;;  %v8259_v14 = vld [vmem:[#allocation7 + $0x1f8] sm:$0xf0] }
 0x1ea   : > { %4929 = vmatpush.bf16.msra.mxu3 %v9506_v52  ;;  %v11728_v52 = vld [vmem:[#allocation7 + $0x834] sm:$0xf0]  ;;  %v9458_v20 = vor.u32 %v11828_v59, %v9457_v50  ;;  %v9041_v16 = vld [vmem:[#allocation7 + $0x808] sm:$0xf]  ;;  %v11558_v50 = vld [vmem:[#allocation7 + $0x2ec] sm:$0xf] }
 0x1eb   : > { %4891 = vmatpush.bf16.msra.mxu0 %v9106_v15  ;;  %4904 = vmatpush.bf16.msra.mxu1 %v9234_v8  ;;  %v11760_v15 = vld [vmem:[#allocation7 + $0x934] sm:$0xf0]  ;;  %v9313_v8 = vld [vmem:[#allocation7 + $0xa28] sm:$0xf]  ;;  %v9058_v60 = vor.u32 %v11728_v52, %v9057_v37  ;;  %v8387_v59 = vld [vmem:[#allocation7 + $0x2f8] sm:$0xf0] }
 0x1ec   : > { %v11824_v41 = vld [vmem:[#allocation7 + $0xb34] sm:$0xf0]  ;;  %v9186_v27 = vor.u32 %v11760_v15, %v9185_v7  ;;  %v9297_v42 = vld [vmem:[#allocation7 + $0xa08] sm:$0xf]  ;;  %v11590_v52 = vld [vmem:[#allocation7 + $0x3ec] sm:$0xf]  ;;  %v8262_v15 = vor.u32 %v11526_v24, %v8259_v14 }
 0x1ed   : > { %4917 = vmatpush.bf16.msra.mxu2 %v9362_v57  ;;  %v4663_v57 = vpop.f32.mrf.mxu2  ;;  %v11756_v47 = vld [vmem:[#allocation7 + $0x914] sm:$0xf0]  ;;  %v9442_v34 = vor.u32 %v11824_v41, %v9441_v1  ;;  %v11522_v1 = vld [vmem:[#allocation7 + $0x1cc] sm:$0xf]  ;;  %v8243_v41 = vld [vmem:[#allocation7 + $0x1d8] sm:$0xf0] }
 0x1ee   : > { %4930 = vmatpush.bf16.msra.mxu3 %v9490_v40  ;;  %v11724_v40 = vld [vmem:[#allocation7 + $0x814] sm:$0xf0]  ;;  %v4664_v6 = vadd.f32 %v4663_v57, %v4651_v0  ;;  %v8227_v38 = vld [vmem:[#allocation7 + $0x1b8] sm:$0xf0]  ;;  %v11582_v24 = vld [vmem:[#allocation7 + $0x3ac] sm:$0xf] }
 0x1ef   : > { %4892 = vmatpush.bf16.msra.mxu0 %v9090_v63  ;;  %4905 = vmatpush.bf16.msra.mxu1 %v9218_v4  ;;  %v9169_v63 = vld [vmem:[#allocation7 + $0x908] sm:$0xf]  ;;  %v9314_v4 = vor.u32 %v11792_v58, %v9313_v8  ;;  %v11788_v3 = vld [vmem:[#allocation7 + $0xa14] sm:$0xf0]  ;;  %v9042_v0 = vor.u32 %v11724_v40, %v9041_v16  ;;  %v11490_v8 = vld [vmem:[#allocation7 + $0xcc] sm:$0xf] }
 0x1f0   : > { %v12967_v5 = vadd.f32 %v4676_v25, %v4664_v6  ;;  %v9298_v7 = vor.u32 %v11788_v3, %v9297_v42  ;;  %v8115_v58 = vld [vmem:[#allocation7 + $0xd8] sm:$0xf0]  ;;  %v11554_v16 = vld [vmem:[#allocation7 + $0x2cc] sm:$0xf] }
 0x1f1   : > { %4918 = vmatpush.bf16.msra.mxu2 %v9346_v51  ;;  %v8131_v51 = vld [vmem:[#allocation7 + $0xf8] sm:$0xf0]  ;;  %v4678_v6 = vpop.f32.mrf.mxu3  ;;  %v11586_v25 = vld [vmem:[#allocation7 + $0x3cc] sm:$0xf] }
 0x1f2   : > { %4931 = vmatpush.bf16.msra.mxu3 %v9474_v44  ;;  %v9425_v44 = vld [vmem:[#allocation7 + $0xb08] sm:$0xf]  ;;  %v8134_v37 = vor.u32 %v11494_v2, %v8131_v51  ;;  %v8371_v40 = vld [vmem:[#allocation7 + $0x2d8] sm:$0xf0]  ;;  %v11518_v2 = vld [vmem:[#allocation7 + $0x1ac] sm:$0xf] }
 0x1f3   : > { %4893 = vmatpush.bf16.msra.mxu0 %v9074_v61  ;;  %4906 = vmatpush.bf16.msra.mxu1 %v9202_v10  ;;  %v11820_v61 = vld [vmem:[#allocation7 + $0xb14] sm:$0xf0]  ;;  %v9170_v10 = vor.u32 %v11756_v47, %v9169_v63  ;;  %v8118_v63 = vor.u32 %v11490_v8, %v8115_v58  ;;  %v8246_v47 = vor.u32 %v11522_v1, %v8243_v41  ;;  %v8099_v3 = vld [vmem:[#allocation7 + $0xb8] sm:$0xf0]  ;;  %v11510_v41 = vld [vmem:[#allocation7 + $0x16c] sm:$0xf] }
 0x1f4   : > { %v9426_v62 = vor.u32 %v11820_v61, %v9425_v44  ;;  %v8374_v42 = vor.u32 %v11554_v16, %v8371_v40  ;;  %v8355_v44 = vld [vmem:[#allocation7 + $0x2b8] sm:$0xf0]  ;;  %v8230_v61 = vor.u32 %v11518_v2, %v8227_v38  ;;  %v11474_v38 = vld [vmem:[#allocation7 + $0x4c] sm:$0xf] }
 0x1f5   : > { %4919 = vmatpush.bf16.msra.mxu2 %v9330_v53  ;;  %v8515_v53 = vld [vmem:[#allocation7 + $0x3f8] sm:$0xf0]  ;;  %v4665_v57 = vpop.f32.mrf.mxu2 }
 0x1f6   : > { %4932 = vmatpush.bf16.msra.mxu3 %v9458_v20  ;;  %v8390_v20 = vor.u32 %v11558_v50, %v8387_v59  ;;  %v8483_v14 = vld [vmem:[#allocation7 + $0x3b8] sm:$0xf0]  ;;  %v11482_v59 = vld [vmem:[#allocation7 + $0x8c] sm:$0xf] }
 0x1f7   : > { %4894 = vmatpush.bf16.msra.mxu0 %v9058_v60  ;;  %4907 = vmatpush.bf16.msra.mxu1 %v9186_v27  ;;  %v8518_v60 = vor.u32 %v11590_v52, %v8515_v53  ;;  %v8499_v27 = vld [vmem:[#allocation7 + $0x3d8] sm:$0xf0]  ;;  %v8486_v52 = vor.u32 %v11582_v24, %v8483_v14  ;;  %v11478_v57 = vld [vmem:[#allocation7 + $0x6c] sm:$0xf] }
 0x1f8   : > { %v8502_v51 = vor.u32 %v11586_v25, %v8499_v27  ;;  %v8211_v53 = vld [vmem:[#allocation7 + $0x198] sm:$0xf0]  ;;  %v11542_v25 = vld [vmem:[#allocation7 + $0x26c] sm:$0xf] }
 0x1f9   : > { %4920 = vmatpush.bf16.msra.mxu2 %v9314_v4  ;;  %v11486_v4 = vld [vmem:[#allocation7 + $0xac] sm:$0xf]  ;;  %v8195_v6 = vld [vmem:[#allocation7 + $0x178] sm:$0xf0] }
 0x1fa   : > { %4933 = vmatpush.bf16.msra.mxu3 %v9442_v34  ;;  %v11550_v34 = vld [vmem:[#allocation7 + $0x2ac] sm:$0xf]  ;;  %v8323_v27 = vld [vmem:[#allocation7 + $0x278] sm:$0xf0] }
 0x1fb   : > { %4895 = vmatpush.bf16.msra.mxu0 %v9042_v0  ;;  %4908 = vmatpush.bf16.msra.mxu1 %v9170_v10  ;;  %v8102_v0 = vor.u32 %v11486_v4, %v8099_v3  ;;  %v8358_v50 = vor.u32 %v11550_v34, %v8355_v44  ;;  %v8083_v10 = vld [vmem:[#allocation7 + $0x98] sm:$0xf0]  ;;  %v4689_v16 = vpop.f32.mrf.mxu0  ;;  %v8198_v3 = vor.u32 %v11510_v41, %v8195_v6  ;;  %v11506_v44 = vld [vmem:[#allocation7 + $0x14c] sm:$0xf] }
 0x1fc   : > { %v8086_v8 = vor.u32 %v11482_v59, %v8083_v10  ;;  %v8326_v2 = vor.u32 %v11542_v25, %v8323_v27  ;;  %v8051_v34 = vld [vmem:[#allocation7 + $0x58] sm:$0xf0]  ;;  %v11570_v59 = vld [vmem:[#allocation7 + $0x34c] sm:$0xf] }
 0x1fd   : > { %4921 = vmatpush.bf16.msra.mxu2 %v9298_v7  ;;  %v11546_v7 = vld [vmem:[#allocation7 + $0x28c] sm:$0xf]  ;;  %v8054_v10 = vor.u32 %v11474_v38, %v8051_v34  ;;  %v8019_v27 = vld [vmem:[#allocation7 + $0x18] sm:$0xf0] }
 0x1fe   : > { %4934 = vmatpush.bf16.msra.mxu3 %v9426_v62  ;;  %4896 = vmatmul.bf16.vlgmr.msra.gmra.mxu0 %v12875_v17  ;;  %v11578_v62 = vld [vmem:[#allocation7 + $0x38c] sm:$0xf]  ;;  %v8275_v34 = vld [vmem:[#allocation7 + $0x218] sm:$0xf0]  ;;  %v13135_v17 = vld [vmem:[#allocation5 + $0xac] sm:$0xf0] }
 0x1ff   : > { %4940 = vmatpush.bf16.msrb.mxu0 %v8134_v37  ;;  %4953 = vmatpush.bf16.msrb.mxu1 %v8262_v15  ;;  %v11514_v37 = vld [vmem:[#allocation7 + $0x18c] sm:$0xf]  ;;  %v8339_v15 = vld [vmem:[#allocation7 + $0x298] sm:$0xf0] }
 0x200   : > { %4922 = vmatmul.bf16.vlgmr.msra.gmra.mxu2 %v12899_v48  ;;  %4909 = vmatmul.bf16.vlgmr.msra.gmra.mxu1 %v12926_v31  ;;  %v8214_v58 = vor.u32 %v11514_v37, %v8211_v53  ;;  %v8342_v1 = vor.u32 %v11546_v7, %v8339_v15  ;;  %v11470_v53 = vld [vmem:[#allocation7 + $0x2c] sm:$0xf]  ;;  %v8035_v7 = vld [vmem:[#allocation7 + $0x38] sm:$0xf0]  ;;  %v13117_v48 = vld [vmem:[#allocation5 + $0x1c0] sm:$0xf] }
 0x201   : > { %4966 = vmatpush.bf16.msrb.mxu2 %v8390_v20  ;;  %4935 = vmatmul.bf16.vlgmr.msra.gmra.mxu3 %v12933_v11  ;;  %v8467_v20 = vld [vmem:[#allocation7 + $0x398] sm:$0xf0]  ;;  %v11502_v15 = vld [vmem:[#allocation7 + $0x12c] sm:$0xf]  ;;  %v8038_v6 = vor.u32 %v11470_v53, %v8035_v7  ;;  %v13105_v11 = vld [vmem:[#allocation5 + $0xc0] sm:$0xf] }
 0x202   : > { %4979 = vmatpush.bf16.msrb.mxu3 %v8518_v60  ;;  %v8067_v60 = vld [vmem:[#allocation7 + $0x78] sm:$0xf0]  ;;  %v8470_v40 = vor.u32 %v11578_v62, %v8467_v20  ;;  %v11466_v25 = vld [vmem:[#allocation7 + $0xc] sm:$0xf]  ;;  %14619 = vst [vmem:[#allocation125_spill] sm:$0xff] %v13105_v11 }
 0x203   : > { %4941 = vmatpush.bf16.msrb.mxu0 %v8118_v63  ;;  %4954 = vmatpush.bf16.msrb.mxu1 %v8246_v47  ;;  %v4690_v63 = vadd.f32 %v4689_v16, %v12967_v5  ;;  %v11574_v47 = vld [vmem:[#allocation7 + $0x36c] sm:$0xf]  ;;  %v8070_v4 = vor.u32 %v11478_v57, %v8067_v60  ;;  %v8435_v5 = vld [vmem:[#allocation7 + $0x358] sm:$0xf0]  ;;  %v4691_v62 = vpop.f32.mrf.mxu0  ;;  %v13223_v11 = vld [vmem:[#allocation5 + $0x36c] sm:$0xf0] }
 0x204   : > { %v8438_v20 = vor.u32 %v11570_v59, %v8435_v5  ;;  %v8291_v57 = vld [vmem:[#allocation7 + $0x238] sm:$0xf0]  ;;  %v4728_v41 = vpop.f32.mrf.mxu3  ;;  %v11566_v16 = vld [vmem:[#allocation7 + $0x32c] sm:$0xf] }
 0x205   : > { %4967 = vmatpush.bf16.msrb.mxu2 %v8374_v42  ;;  %v8451_v42 = vld [vmem:[#allocation7 + $0x378] sm:$0xf0]  ;;  %v11686_v5 = vld [vmem:[#allocation7 + $0x6ec] sm:$0xf] }
 0x206   : > { %4980 = vmatpush.bf16.msrb.mxu3 %v8502_v51  ;;  %v4702_v51 = vpop.f32.mrf.mxu1  ;;  %v8454_v24 = vor.u32 %v11574_v47, %v8451_v42  ;;  %v8771_v59 = vld [vmem:[#allocation7 + $0x5f8] sm:$0xf0]  ;;  %v11718_v53 = vld [vmem:[#allocation7 + $0x7ec] sm:$0xf] }
 0x207   : > { %4942 = vmatpush.bf16.msrb.mxu0 %v8102_v0  ;;  %4955 = vmatpush.bf16.msrb.mxu1 %v8230_v61  ;;  %v4703_v14 = vadd.f32 %v4702_v51, %v4690_v63  ;;  %v8179_v0 = vld [vmem:[#allocation7 + $0x158] sm:$0xf0]  ;;  %v11538_v61 = vld [vmem:[#allocation7 + $0x24c] sm:$0xf] }
 0x208   : > { %v8182_v37 = vor.u32 %v11506_v44, %v8179_v0  ;;  %v11562_v44 = vld [vmem:[#allocation7 + $0x30c] sm:$0xf]  ;;  %v8643_v0 = vld [vmem:[#allocation7 + $0x4f8] sm:$0xf0] }
 0x209   : > { %4968 = vmatpush.bf16.msrb.mxu2 %v8358_v50  ;;  %v8307_v50 = vld [vmem:[#allocation7 + $0x258] sm:$0xf0] }
 0x20a   : > { %4981 = vmatpush.bf16.msrb.mxu3 %v8486_v52  ;;  %v8310_v52 = vor.u32 %v11538_v61, %v8307_v50  ;;  %v11654_v61 = vld [vmem:[#allocation7 + $0x5ec] sm:$0xf]  ;;  %v8022_v50 = vor.u32 %v11466_v25, %v8019_v27  ;;  %v9027_v7 = vld [vmem:[#allocation7 + $0x7f8] sm:$0xf0] }
 0x20b   : > { %4943 = vmatpush.bf16.msrb.mxu0 %v8086_v8  ;;  %4956 = vmatpush.bf16.msrb.mxu1 %v8214_v58  ;;  %v4715_v8 = vpop.f32.mrf.mxu2  ;;  %v8163_v58 = vld [vmem:[#allocation7 + $0x138] sm:$0xf0]  ;;  %v11714_v27 = vld [vmem:[#allocation7 + $0x7cc] sm:$0xf] }
 0x20c   : > { %v4716_v60 = vadd.f32 %v4715_v8, %v4703_v14  ;;  %v8166_v47 = vor.u32 %v11502_v15, %v8163_v58  ;;  %v11622_v14 = vld [vmem:[#allocation7 + $0x4ec] sm:$0xf]  ;;  %v8774_v8 = vor.u32 %v11654_v61, %v8771_v59  ;;  %v8883_v25 = vld [vmem:[#allocation7 + $0x6d8] sm:$0xf0] }
 0x20d   : > { %4969 = vmatpush.bf16.msrb.mxu2 %v8342_v1  ;;  %v11534_v1 = vld [vmem:[#allocation7 + $0x22c] sm:$0xf]  ;;  %v8646_v62 = vor.u32 %v11622_v14, %v8643_v0  ;;  %v8867_v14 = vld [vmem:[#allocation7 + $0x6b8] sm:$0xf0] }
 0x20e   : > { %4982 = vmatpush.bf16.msrb.mxu3 %v8470_v40  ;;  %v8419_v40 = vld [vmem:[#allocation7 + $0x338] sm:$0xf0]  ;;  %v12974_v63 = vadd.f32 %v4728_v41, %v4716_v60  ;;  %v8294_v42 = vor.u32 %v11534_v1, %v8291_v57  ;;  %v4704_v51 = vpop.f32.mrf.mxu1  ;;  %v11618_v1 = vld [vmem:[#allocation7 + $0x4cc] sm:$0xf]  ;;  %v4730_v41 = vpop.f32.mrf.mxu3 }
 0x20f   : > { %4944 = vmatpush.bf16.msrb.mxu0 %v8070_v4  ;;  %4957 = vmatpush.bf16.msrb.mxu1 %v8198_v3  ;;  %v11498_v4 = vld [vmem:[#allocation7 + $0x10c] sm:$0xf]  ;;  %v8147_v3 = vld [vmem:[#allocation7 + $0x118] sm:$0xf0]  ;;  %v8422_v38 = vor.u32 %v11566_v16, %v8419_v40  ;;  %v9030_v16 = vor.u32 %v11718_v53, %v9027_v7 }
 0x210   : > { %v8627_v57 = vld [vmem:[#allocation7 + $0x4d8] sm:$0xf0]  ;;  %v11650_v60 = vld [vmem:[#allocation7 + $0x5cc] sm:$0xf] }
 0x211   : > { %4970 = vmatpush.bf16.msrb.mxu2 %v8326_v2  ;;  %v11530_v2 = vld [vmem:[#allocation7 + $0x20c] sm:$0xf]  ;;  %v8755_v40 = vld [vmem:[#allocation7 + $0x5d8] sm:$0xf0] }
 0x212   : > { %4983 = vmatpush.bf16.msrb.mxu3 %v8454_v24  ;;  %v8403_v24 = vld [vmem:[#allocation7 + $0x318] sm:$0xf0]  ;;  %v11710_v0 = vld [vmem:[#allocation7 + $0x7ac] sm:$0xf] }
 0x213   : > { %4945 = vmatpush.bf16.msrb.mxu0 %v8054_v10  ;;  %4958 = vmatpush.bf16.msrb.mxu1 %v8182_v37  ;;  %v8899_v10 = vld [vmem:[#allocation7 + $0x6f8] sm:$0xf0]  ;;  %v8150_v37 = vor.u32 %v11498_v4, %v8147_v3  ;;  %v8406_v15 = vor.u32 %v11562_v44, %v8403_v24  ;;  %v8758_v4 = vor.u32 %v11650_v60, %v8755_v40  ;;  %v11678_v24 = vld [vmem:[#allocation7 + $0x6ac] sm:$0xf] }
 0x214   : > { %v8902_v58 = vor.u32 %v11686_v5, %v8899_v10  ;;  %v8611_v51 = vld [vmem:[#allocation7 + $0x4b8] sm:$0xf0]  ;;  %v8870_v5 = vor.u32 %v11678_v24, %v8867_v14  ;;  %v11610_v10 = vld [vmem:[#allocation7 + $0x48c] sm:$0xf] }
 0x215   : > { %4971 = vmatpush.bf16.msrb.mxu2 %v8310_v52  ;;  %v8278_v52 = vor.u32 %v11530_v2, %v8275_v34  ;;  %v11614_v2 = vld [vmem:[#allocation7 + $0x4ac] sm:$0xf]  ;;  %v8739_v44 = vld [vmem:[#allocation7 + $0x5b8] sm:$0xf0] }
 0x216   : > { %4984 = vmatpush.bf16.msrb.mxu3 %v8438_v20  ;;  %v4717_v20 = vpop.f32.mrf.mxu2  ;;  %v8995_v61 = vld [vmem:[#allocation7 + $0x7b8] sm:$0xf0]  ;;  %v11674_v7 = vld [vmem:[#allocation7 + $0x68c] sm:$0xf] }
 0x217   : > { %4946 = vmatpush.bf16.msrb.mxu0 %v8038_v6  ;;  %4959 = vmatpush.bf16.msrb.mxu1 %v8166_v47  ;;  %v11682_v6 = vld [vmem:[#allocation7 + $0x6cc] sm:$0xf]  ;;  %v9011_v47 = vld [vmem:[#allocation7 + $0x7d8] sm:$0xf0]  ;;  %v8998_v53 = vor.u32 %v11710_v0, %v8995_v61 }
 0x218   : > { %v8886_v3 = vor.u32 %v11682_v6, %v8883_v25  ;;  %v9014_v34 = vor.u32 %v11714_v27, %v9011_v47  ;;  %v11638_v60 = vld [vmem:[#allocation7 + $0x56c] sm:$0xf]  ;;  %v8707_v40 = vld [vmem:[#allocation7 + $0x578] sm:$0xf0] }
 0x219   : > { %4972 = vmatpush.bf16.msrb.mxu2 %v8294_v42  ;;  %v8630_v42 = vor.u32 %v11618_v1, %v8627_v57  ;;  %v11606_v1 = vld [vmem:[#allocation7 + $0x46c] sm:$0xf]  ;;  %v8579_v57 = vld [vmem:[#allocation7 + $0x478] sm:$0xf0] }
 0x21a   : > { %4985 = vmatpush.bf16.msrb.mxu3 %v8422_v38  ;;  %v11646_v38 = vld [vmem:[#allocation7 + $0x5ac] sm:$0xf]  ;;  %v8835_v25 = vld [vmem:[#allocation7 + $0x678] sm:$0xf0] }
 0x21b   : > { %4947 = vmatpush.bf16.msrb.mxu0 %v8022_v50  ;;  %4960 = vmatpush.bf16.msrb.mxu1 %v8150_v37  ;;  %v8614_v50 = vor.u32 %v11614_v2, %v8611_v51  ;;  %v8742_v59 = vor.u32 %v11646_v38, %v8739_v44  ;;  %v8595_v37 = vld [vmem:[#allocation7 + $0x498] sm:$0xf0]  ;;  %v11670_v6 = vld [vmem:[#allocation7 + $0x66c] sm:$0xf] }
 0x21c   : > { %v8598_v20 = vor.u32 %v11610_v10, %v8595_v37  ;;  %v11702_v47 = vld [vmem:[#allocation7 + $0x76c] sm:$0xf]  ;;  %v8563_v51 = vld [vmem:[#allocation7 + $0x458] sm:$0xf0] }
 0x21d   : > { %4973 = vmatpush.bf16.msrb.mxu2 %v8278_v52  ;;  %v11642_v52 = vld [vmem:[#allocation7 + $0x58c] sm:$0xf]  ;;  %v8691_v44 = vld [vmem:[#allocation7 + $0x558] sm:$0xf0] }
 0x21e   : > { %4986 = vmatpush.bf16.msrb.mxu3 %v8406_v15  ;;  %4948 = vmatmul.bf16.vlgmr.msrb.gmra.mxu0 %v12542_v9  ;;  %v8851_v15 = vld [vmem:[#allocation7 + $0x698] sm:$0xf0]  ;;  %v11602_v2 = vld [vmem:[#allocation7 + $0x44c] sm:$0xf] }
 0x21f   : > { %4992 = vmatpush.bf16.msra.mxu0 %v8646_v62  ;;  %5005 = vmatpush.bf16.msra.mxu1 %v8774_v8  ;;  %v11706_v62 = vld [vmem:[#allocation7 + $0x78c] sm:$0xf]  ;;  %v8979_v9 = vld [vmem:[#allocation7 + $0x798] sm:$0xf0] }
 0x220   : > { %4974 = vmatmul.bf16.vlgmr.msrb.gmra.mxu2 %v12517_v21  ;;  %4961 = vmatmul.bf16.vlgmr.msrb.gmra.mxu1 %v12612_v13  ;;  %v8723_v21 = vld [vmem:[#allocation7 + $0x598] sm:$0xf0]  ;;  %v8982_v41 = vor.u32 %v11706_v62, %v8979_v9  ;;  %v11634_v38 = vld [vmem:[#allocation7 + $0x54c] sm:$0xf] }
 0x221   : > { %5018 = vmatpush.bf16.msra.mxu2 %v8902_v58  ;;  %4987 = vmatmul.bf16.vlgmr.msrb.gmra.mxu3 %v12567_v33  ;;  %v4741_v33 = vpop.f32.mrf.mxu0  ;;  %v8726_v8 = vor.u32 %v11642_v52, %v8723_v21  ;;  %v8854_v58 = vor.u32 %v11674_v7, %v8851_v15  ;;  %v11666_v24 = vld [vmem:[#allocation7 + $0x64c] sm:$0xf]  ;;  %v8819_v14 = vld [vmem:[#allocation7 + $0x658] sm:$0xf0]  ;;  %v8694_v10 = vor.u32 %v11634_v38, %v8691_v44 }
 0x222   : > { %5031 = vmatpush.bf16.msra.mxu3 %v9030_v16  ;;  %v4742_v13 = vadd.f32 %v4741_v33, %v12974_v63  ;;  %v4754_v16 = vpop.f32.mrf.mxu1  ;;  %v8838_v63 = vor.u32 %v11670_v6, %v8835_v25  ;;  %v11698_v0 = vld [vmem:[#allocation7 + $0x74c] sm:$0xf]  ;;  %v8947_v61 = vld [vmem:[#allocation7 + $0x758] sm:$0xf0]  ;;  %v8822_v37 = vor.u32 %v11666_v24, %v8819_v14 }
 0x223   : > { %4993 = vmatpush.bf16.msra.mxu0 %v8630_v42  ;;  %5006 = vmatpush.bf16.msra.mxu1 %v8758_v4  ;;  %v8963_v42 = vld [vmem:[#allocation7 + $0x778] sm:$0xf0]  ;;  %v8582_v4 = vor.u32 %v11606_v1, %v8579_v57  ;;  %v11598_v52 = vld [vmem:[#allocation7 + $0x42c] sm:$0xf]  ;;  %v8950_v62 = vor.u32 %v11698_v0, %v8947_v61 }
 0x224   : > { %v4755_v27 = vadd.f32 %v4754_v16, %v4742_v13  ;;  %v11630_v21 = vld [vmem:[#allocation7 + $0x52c] sm:$0xf]  ;;  %v4780_v15 = vpop.f32.mrf.mxu3  ;;  %v8675_v9 = vld [vmem:[#allocation7 + $0x538] sm:$0xf0] }
 0x225   : > { %5019 = vmatpush.bf16.msra.mxu2 %v8886_v3  ;;  %v8710_v3 = vor.u32 %v11638_v60, %v8707_v40  ;;  %v11662_v33 = vld [vmem:[#allocation7 + $0x62c] sm:$0xf]  ;;  %v8678_v16 = vor.u32 %v11630_v21, %v8675_v9  ;;  %v8659_v25 = vld [vmem:[#allocation7 + $0x518] sm:$0xf0] }
 0x226   : > { %5032 = vmatpush.bf16.msra.mxu3 %v9014_v34  ;;  %v8966_v34 = vor.u32 %v11702_v47, %v8963_v42  ;;  %v11594_v60 = vld [vmem:[#allocation7 + $0x40c] sm:$0xf]  ;;  %v8787_v42 = vld [vmem:[#allocation7 + $0x618] sm:$0xf0] }
 0x227   : > { %4994 = vmatpush.bf16.msra.mxu0 %v8614_v50  ;;  %5007 = vmatpush.bf16.msra.mxu1 %v8742_v59  ;;  %v8566_v50 = vor.u32 %v11602_v2, %v8563_v51  ;;  %v11626_v6 = vld [vmem:[#allocation7 + $0x50c] sm:$0xf]  ;;  %v9155_v2 = vld [vmem:[#allocation7 + $0x8f8] sm:$0xf0] }
 0x228   : > { %v11782_v51 = vld [vmem:[#allocation7 + $0x9ec] sm:$0xf]  ;;  %v9411_v24 = vld [vmem:[#allocation7 + $0xaf8] sm:$0xf0]  ;;  %v8662_v14 = vor.u32 %v11626_v6, %v8659_v25 }
 0x229   : > { %5020 = vmatpush.bf16.msra.mxu2 %v8870_v5  ;;  %v4743_v59 = vpop.f32.mrf.mxu0  ;;  %v4767_v5 = vpop.f32.mrf.mxu2  ;;  %v11814_v44 = vld [vmem:[#allocation7 + $0xaec] sm:$0xf]  ;;  %v9267_v9 = vld [vmem:[#allocation7 + $0x9d8] sm:$0xf0] }
 0x22a   : > { %5033 = vmatpush.bf16.msra.mxu3 %v8998_v53  ;;  %v8547_v53 = vld [vmem:[#allocation7 + $0x438] sm:$0xf0]  ;;  %v4768_v7 = vadd.f32 %v4767_v5, %v4755_v27  ;;  %v4756_v13 = vpop.f32.mrf.mxu1  ;;  %v11658_v27 = vld [vmem:[#allocation7 + $0x60c] sm:$0xf] }
 0x22b   : > { %4995 = vmatpush.bf16.msra.mxu0 %v8598_v20  ;;  %5008 = vmatpush.bf16.msra.mxu1 %v8726_v8  ;;  %v8803_v20 = vld [vmem:[#allocation7 + $0x638] sm:$0xf0]  ;;  %v11694_v8 = vld [vmem:[#allocation7 + $0x72c] sm:$0xf]  ;;  %v8550_v57 = vor.u32 %v11598_v52, %v8547_v53  ;;  %v8790_v0 = vor.u32 %v11658_v27, %v8787_v42  ;;  %v9414_v53 = vor.u32 %v11814_v44, %v9411_v24 }
 0x22c   : > { %v12981_v1 = vadd.f32 %v4780_v15, %v4768_v7  ;;  %v8806_v40 = vor.u32 %v11662_v33, %v8803_v20  ;;  %v11846_v61 = vld [vmem:[#allocation7 + $0xbec] sm:$0xf]  ;;  %v9139_v7 = vld [vmem:[#allocation7 + $0x8d8] sm:$0xf0] }
 0x22d   : > { %5021 = vmatpush.bf16.msra.mxu2 %v8854_v58  ;;  %v8931_v58 = vld [vmem:[#allocation7 + $0x738] sm:$0xf0]  ;;  %v11746_v21 = vld [vmem:[#allocation7 + $0x8cc] sm:$0xf] }
 0x22e   : > { %5034 = vmatpush.bf16.msra.mxu3 %v8982_v41  ;;  %14605 = vst [vmem:[#allocation111_spill] sm:$0xff] %v12981_v1  ;;  %v8531_v41 = vld [vmem:[#allocation7 + $0x418] sm:$0xf0]  ;;  %v8934_v47 = vor.u32 %v11694_v8, %v8931_v58  ;;  %v11778_v15 = vld [vmem:[#allocation7 + $0x9cc] sm:$0xf]  ;;  %v9142_v58 = vor.u32 %v11746_v21, %v9139_v7 }
 0x22f   : > { %4996 = vmatpush.bf16.msra.mxu0 %v8582_v4  ;;  %5009 = vmatpush.bf16.msra.mxu1 %v8710_v3  ;;  %v11690_v4 = vld [vmem:[#allocation7 + $0x70c] sm:$0xf]  ;;  %v8915_v3 = vld [vmem:[#allocation7 + $0x718] sm:$0xf0]  ;;  %v8534_v38 = vor.u32 %v11594_v60, %v8531_v41  ;;  %v9270_v60 = vor.u32 %v11778_v15, %v9267_v9  ;;  %v13081_v1 = vld [vmem:[#allocation5 + $0xe0] sm:$0xf] }
 0x230   : > { %v8918_v5 = vor.u32 %v11690_v4, %v8915_v3  ;;  %v11810_v33 = vld [vmem:[#allocation7 + $0xacc] sm:$0xf]  ;;  %v9395_v20 = vld [vmem:[#allocation7 + $0xad8] sm:$0xf0]  ;;  %14612 = vst [vmem:[#allocation118_spill] sm:$0xff] %v13081_v1 }
 0x231   : > { %5022 = vmatpush.bf16.msra.mxu2 %v8838_v63  ;;  %v11750_v63 = vld [vmem:[#allocation7 + $0x8ec] sm:$0xf]  ;;  %v4769_v59 = vpop.f32.mrf.mxu2  ;;  %v9523_v8 = vld [vmem:[#allocation7 + $0xbd8] sm:$0xf0]  ;;  %v9398_v41 = vor.u32 %v11810_v33, %v9395_v20 }
 0x232   : > { %5035 = vmatpush.bf16.msra.mxu3 %v8966_v34  ;;  %v9283_v34 = vld [vmem:[#allocation7 + $0x9f8] sm:$0xf0]  ;;  %v11842_v13 = vld [vmem:[#allocation7 + $0xbcc] sm:$0xf] }
 0x233   : > { %4997 = vmatpush.bf16.msra.mxu0 %v8566_v50  ;;  %5010 = vmatpush.bf16.msra.mxu1 %v8694_v10  ;;  %v9539_v50 = vld [vmem:[#allocation7 + $0xbf8] sm:$0xf0]  ;;  %v9158_v10 = vor.u32 %v11750_v63, %v9155_v2  ;;  %v9286_v52 = vor.u32 %v11782_v51, %v9283_v34  ;;  %v9526_v25 = vor.u32 %v11842_v13, %v9523_v8  ;;  %v11806_v27 = vld [vmem:[#allocation7 + $0xaac] sm:$0xf] }
 0x234   : > { %v9251_v6 = vld [vmem:[#allocation7 + $0x9b8] sm:$0xf0]  ;;  %v11838_v42 = vld [vmem:[#allocation7 + $0xbac] sm:$0xf] }
 0x235   : > { %5023 = vmatpush.bf16.msra.mxu2 %v8822_v37  ;;  %v4782_v37 = vpop.f32.mrf.mxu3  ;;  %v9507_v4 = vld [vmem:[#allocation7 + $0xbb8] sm:$0xf0]  ;;  %v12986_v3 = vld [vmem:[#allocation7 + $0x88c] sm:$0xf] }
 0x236   : > { %5036 = vmatpush.bf16.msra.mxu3 %v8950_v62  ;;  %v9542_v62 = vor.u32 %v11846_v61, %v9539_v50  ;;  %v12988_v63 = vld [vmem:[#allocation7 + $0x898] sm:$0xf0]  ;;  %v12991_v51 = vld [vmem:[#allocation7 + $0x98c] sm:$0xf] }
 0x237   : > { %4998 = vmatpush.bf16.msra.mxu0 %v8550_v57  ;;  %5011 = vmatpush.bf16.msra.mxu1 %v8678_v16  ;;  %v11742_v57 = vld [vmem:[#allocation7 + $0x8ac] sm:$0xf]  ;;  %v9123_v16 = vld [vmem:[#allocation7 + $0x8b8] sm:$0xf0] }
 0x238   : > { %v9126_v2 = vor.u32 %v11742_v57, %v9123_v16  ;;  %v12997_v34 = vld [vmem:[#allocation7 + $0xa98] sm:$0xf0]  ;;  %v12999_v44 = vld [vmem:[#allocation7 + $0xb8c] sm:$0xf] }
 0x239   : > { %5024 = vmatpush.bf16.msra.mxu2 %v8806_v40  ;;  %v11774_v40 = vld [vmem:[#allocation7 + $0x9ac] sm:$0xf]  ;;  %v13001_v24 = vld [vmem:[#allocation7 + $0xb98] sm:$0xf0] }
 0x23a   : > { %5037 = vmatpush.bf16.msra.mxu3 %v8934_v47  ;;  %v9379_v47 = vld [vmem:[#allocation7 + $0xab8] sm:$0xf0]  ;;  %v13011_v50 = vld [vmem:[#allocation7 + $0xa6c] sm:$0xf] }
 0x23b   : > { %4999 = vmatpush.bf16.msra.mxu0 %v8534_v38  ;;  %5012 = vmatpush.bf16.msra.mxu1 %v8662_v14  ;;  %v12993_v38 = vld [vmem:[#allocation7 + $0x998] sm:$0xf0]  ;;  %v13003_v14 = vld [vmem:[#allocation7 + $0x86c] sm:$0xf] }
 0x23c   : > { %v13009_v61 = vld [vmem:[#allocation7 + $0x978] sm:$0xf0]  ;;  %v13023_v21 = vld [vmem:[#allocation7 + $0x94c] sm:$0xf] }
 0x23d   : > { %5025 = vmatpush.bf16.msra.mxu2 %v8790_v0  ;;  %v13005_v0 = vld [vmem:[#allocation7 + $0x878] sm:$0xf0]  ;;  %v13027_v15 = vld [vmem:[#allocation7 + $0xa4c] sm:$0xf]  ;;  %v4806_v31 = vpop.f32.mrf.mxu1 }
 0x23e   : > { %5038 = vmatpush.bf16.msra.mxu3 %v8918_v5  ;;  %5000 = vmatmul.bf16.vlgmr.msra.gmra.mxu0 %v12676_v35  ;;  %v9254_v35 = vor.u32 %v11774_v40, %v9251_v6  ;;  %v13013_v59 = vld [vmem:[#allocation7 + $0xa78] sm:$0xf0]  ;;  %v9510_v5 = vor.u32 %v11838_v42, %v9507_v4  ;;  %v13031_v9 = vld [vmem:[#allocation7 + $0xb4c] sm:$0xf] }
 0x23f   : > { %5044 = vmatpush.bf16.msrb.mxu0 %v9158_v10  ;;  %5057 = vmatpush.bf16.msrb.mxu1 %v9286_v52  ;;  %v13015_v10 = vld [vmem:[#allocation7 + $0xb6c] sm:$0xf]  ;;  %v13017_v37 = vld [vmem:[#allocation7 + $0xb78] sm:$0xf0] }
 0x240   : > { %5026 = vmatmul.bf16.vlgmr.msra.gmra.mxu2 %v12648_v32  ;;  %5013 = vmatmul.bf16.vlgmr.msra.gmra.mxu1 %v12830_v54  ;;  %v12995_v32 = vld [vmem:[#allocation7 + $0xa8c] sm:$0xf]  ;;  %v13025_v7 = vld [vmem:[#allocation7 + $0x958] sm:$0xf0] }
 0x241   : > { %5070 = vmatpush.bf16.msrb.mxu2 %v9414_v53  ;;  %5039 = vmatmul.bf16.vlgmr.msra.gmra.mxu3 %v12699_v28  ;;  %v9382_v28 = vor.u32 %v11806_v27, %v9379_v47  ;;  %v13007_v54 = vld [vmem:[#allocation7 + $0x96c] sm:$0xf]  ;;  %v13021_v53 = vld [vmem:[#allocation7 + $0x858] sm:$0xf0]  ;;  %v9238_v27 = vor.u32 %v12991_v51, %v12993_v38  ;;  %v9366_v47 = vor.u32 %v12995_v32, %v12997_v34  ;;  %v13141_v38 = vld [vmem:[#allocation5 + $0x1a0] sm:$0xf] }
 0x242   : > { %5083 = vmatpush.bf16.msrb.mxu3 %v9542_v62  ;;  %v13019_v52 = vld [vmem:[#allocation7 + $0x84c] sm:$0xf]  ;;  %v13029_v62 = vld [vmem:[#allocation7 + $0xa58] sm:$0xf0]  ;;  %14621 = vst [vmem:[#allocation127_spill] sm:$0xff] %v13141_v38  ;;  %v325_v51 = vrot.slane %v12498_v12, 2 }
 0x243   : > { %5045 = vmatpush.bf16.msrb.mxu0 %v9142_v58  ;;  %5058 = vmatpush.bf16.msrb.mxu1 %v9270_v60  ;;  %v13033_v33 = vld [vmem:[#allocation7 + $0xb58] sm:$0xf0]  ;;  %v13035_v20 = vld [vmem:[#allocation7 + $0x82c] sm:$0xf]  ;;  %v4819_v1 = vpop.f32.mrf.mxu2  ;;  %v13239_v38 = vld [vmem:[#allocation5 + $0x14c] sm:$0xf0] }
 0x244   : > { %v13037_v13 = vld [vmem:[#allocation7 + $0x838] sm:$0xf0]  ;;  %v13039_v8 = vld [vmem:[#allocation7 + $0x92c] sm:$0xf]  ;;  %v4832_v19 = vpop.f32.mrf.mxu3 }
 0x245   : > { %5071 = vmatpush.bf16.msrb.mxu2 %v9398_v41  ;;  %v13041_v58 = vld [vmem:[#allocation7 + $0x938] sm:$0xf0]  ;;  %v13043_v57 = vld [vmem:[#allocation7 + $0xa2c] sm:$0xf]  ;;  %v9110_v41 = vor.u32 %v12986_v3, %v12988_v63 }
 0x246   : > { %5084 = vmatpush.bf16.msrb.mxu3 %v9526_v25  ;;  %v13045_v60 = vld [vmem:[#allocation7 + $0xa38] sm:$0xf0]  ;;  %v13049_v16 = vld [vmem:[#allocation7 + $0xb2c] sm:$0xf] }
 0x247   : > { %5046 = vmatpush.bf16.msrb.mxu0 %v9126_v2  ;;  %v13051_v40 = vld [vmem:[#allocation7 + $0xb38] sm:$0xf0]  ;;  %v13053_v6 = vld [vmem:[#allocation7 + $0x80c] sm:$0xf]  ;;  %5059 = vmatpush.bf16.msrb.mxu1 %v9254_v35  ;;  %v4793_v2 = vpop.f32.mrf.mxu0  ;;  %v9494_v35 = vor.u32 %v12999_v44, %v13001_v24  ;;  %v13087_v44 = vld [vmem:[#allocation5 + $0x1ec] sm:$0xf0] }
 0x248   : > { %14606 = vst [vmem:[#allocation112_spill] sm:$0xff] %v13053_v6  ;;  %v13055_v25 = vld [vmem:[#allocation7 + $0x818] sm:$0xf0]  ;;  %v13061_v42 = vld [vmem:[#allocation7 + $0x90c] sm:$0xf] }
 0x249   : > { %14607 = vst [vmem:[#allocation113_spill] sm:$0xff] %v13055_v25  ;;  %5072 = vmatpush.bf16.msrb.mxu2 %v9382_v28  ;;  %v13063_v4 = vld [vmem:[#allocation7 + $0x918] sm:$0xf0]  ;;  %v13065_v3 = vld [vmem:[#allocation7 + $0xa0c] sm:$0xf]  ;;  %v9094_v28 = vor.u32 %v13003_v14, %v13005_v0  ;;  %v4807_v0 = vadd.f32 %v4806_v31, %v4793_v2  ;;  %v496_v25 = vrot.slane %v12500_v26, 2 }
 0x24a   : > { %14608 = vst [vmem:[#allocation114_spill] sm:$0xff] %v13061_v42  ;;  %v13067_v63 = vld [vmem:[#allocation7 + $0xa18] sm:$0xf0]  ;;  %5085 = vmatpush.bf16.msrb.mxu3 %v9510_v5  ;;  %v13077_v32 = vld [vmem:[#allocation7 + $0xb0c] sm:$0xf] }
 0x24b   : > { %14609 = vst [vmem:[#allocation115_spill] sm:$0xff] %v13063_v4  ;;  %v13079_v34 = vld [vmem:[#allocation7 + $0xb18] sm:$0xf0]  ;;  %v13085_v5 = vld [vmem:[#allocation5 + $0x1e0] sm:$0xf]  ;;  %5047 = vmatpush.bf16.msrb.mxu0 %v9110_v41  ;;  %5060 = vmatpush.bf16.msrb.mxu1 %v9238_v27  ;;  %v14626_v27 = vor.u32 %v13011_v50, %v13013_v59  ;;  %v4820_v49 = vadd.f32 %v4819_v1, %v4807_v0 }
 0x24c   : > { %14610 = vst [vmem:[#allocation116_spill] sm:$0xff] %v13065_v3  ;;  %v13089_v24 = vld [vmem:[#allocation5 + $0x2e0] sm:$0xf]  ;;  %v13091_v14 = vld [vmem:[#allocation5 + $0x2ec] sm:$0xf0] }
 0x24d   : > { %14611 = vst [vmem:[#allocation117_spill] sm:$0xff] %v13067_v63  ;;  %v13123_v41 = vld [vmem:[#allocation5 + $0x2cc] sm:$0xf0]  ;;  %5073 = vmatpush.bf16.msrb.mxu2 %v9366_v47  ;;  %v13145_v31 = vld [vmem:[#allocation5 + $0x2a0] sm:$0xf] }
 0x24e   : > { %14613 = vst [vmem:[#allocation119_spill] sm:$0xff] %v13085_v5  ;;  %5086 = vmatpush.bf16.msrb.mxu3 %v9494_v35  ;;  %v13147_v2 = vld [vmem:[#allocation5 + $0x2ac] sm:$0xf0]  ;;  %v13159_v3 = vld [vmem:[#allocation5 + $0x3a0] sm:$0xf] }
 0x24f   : > { %14614 = vst [vmem:[#allocation120_spill] sm:$0xff] %v13087_v44  ;;  %v13161_v4 = vld [vmem:[#allocation5 + $0x3ac] sm:$0xf0]  ;;  %v13163_v42 = vld [vmem:[#allocation5 + $0x80] sm:$0xf]  ;;  %5048 = vmatpush.bf16.msrb.mxu0 %v9094_v28  ;;  %v497_v44 = vadd.f32 %v496_v25, %v12500_v26  ;;  %v14625_v28 = vor.u32 %v13007_v54, %v13009_v61  ;;  %v4795_v23 = vpop.f32.mrf.mxu0  ;;  %v679_v54 = vrot.slane %v12502_v29, 2  ;;  %v14628_v61 = vor.u32 %v13015_v10, %v13017_v37  ;;  %v4808_v10 = vpop.f32.mrf.mxu1 }
 0x250   : > { %14615 = vst [vmem:[#allocation121_spill] sm:$0xff] %v13089_v24  ;;  %v13165_v6 = vld [vmem:[#allocation5 + $0x8c] sm:$0xf0]  ;;  %v13171_v47 = vld [vmem:[#allocation5 + $0x180] sm:$0xf] }
 0x251   : > { %14616 = vst [vmem:[#allocation122_spill] sm:$0xff] %v13091_v14  ;;  %v13173_v5 = vld [vmem:[#allocation5 + $0x18c] sm:$0xf0]  ;;  %v13175_v63 = vld [vmem:[#allocation5 + $0x280] sm:$0xf]  ;;  %v326_v14 = vadd.f32 %v325_v51, %v12498_v12  ;;  %5061 = vmatpush.bf16.msrb.mxu1 %v14625_v28  ;;  %5074 = vmatpush.bf16.msrb.mxu2 %v14626_v27  ;;  %v498_v27 = vrot.slane %v497_v44, 1  ;;  %v13211_v28 = vadd.f32 %v4832_v19, %v4820_v49 }
 0x252   : > { %14622 = vst [vmem:[#allocation128_spill] sm:$0xff] %v13145_v31  ;;  %v13177_v24 = vld [vmem:[#allocation5 + $0x28c] sm:$0xf0]  ;;  %v13191_v12 = vld [vmem:[#allocation5 + $0x380] sm:$0xf]  ;;  %5087 = vmatpush.bf16.msrb.mxu3 %v14628_v61  ;;  %v680_v35 = vadd.f32 %v679_v54, %v12502_v29  ;;  %v14633_v49 = vor.u32 %v13019_v52, %v13021_v53  ;;  %v14634_v52 = vor.u32 %v13023_v21, %v13025_v7  ;;  %v862_v7 = vrot.slane %v12504_v30, 2 }
 0x253   : > { %14623 = vst [vmem:[#allocation129_spill] sm:$0xff] %v13147_v2  ;;  %v13193_v26 = vld [vmem:[#allocation5 + $0x38c] sm:$0xf0]  ;;  %v13203_v25 = vld [vmem:[#allocation5 + $0x60] sm:$0xf]  ;;  %v327_v0 = vrot.slane %v326_v14, 1  ;;  %v499_v54 = vadd.f32 %v498_v27, %v497_v44  ;;  %v14635_v53 = vor.u32 %v13027_v15, %v13029_v62  ;;  %v14636_v15 = vor.u32 %v13031_v9, %v13033_v33 }
 0x254   : > { %14624 = vst [vmem:[#allocation130_spill] sm:$0xff] %v13175_v63  ;;  %v13205_v1 = vld [vmem:[#allocation5 + $0x6c] sm:$0xf0]  ;;  %v13207_v23 = vld [vmem:[#allocation5 + $0x160] sm:$0xf]  ;;  %5049 = vmatpush.bf16.msrb.mxu0 %v14633_v49  ;;  %v681_v21 = vrot.slane %v680_v35, 1 }
 0x255   : > { %14627 = vst [vmem:[#allocation131_spill] sm:$0xff] %v13191_v12  ;;  %v13209_v51 = vld [vmem:[#allocation5 + $0x16c] sm:$0xf0]  ;;  %v13217_v61 = vld [vmem:[#allocation5 + $0x260] sm:$0xf]  ;;  %v328_v29 = vadd.f32 %v327_v0, %v326_v14  ;;  %5062 = vmatpush.bf16.msrb.mxu1 %v14634_v52  ;;  %5075 = vmatpush.bf16.msrb.mxu2 %v14635_v53  ;;  %v1045_v53 = vrot.slane %v12508_v36, 2  ;;  %v863_v12 = vadd.f32 %v862_v7, %v12504_v30 }
 0x256   : > { %14629 = vst [vmem:[#allocation132_spill] sm:$0xff] %v13203_v25  ;;  %v13219_v59 = vld [vmem:[#allocation5 + $0x26c] sm:$0xf0]  ;;  %v13221_v50 = vld [vmem:[#allocation5 + $0x360] sm:$0xf]  ;;  %5088 = vmatpush.bf16.msrb.mxu3 %v14636_v15  ;;  %v1228_v49 = vrot.slane %v12510_v46, 2  ;;  %v682_v62 = vadd.f32 %v681_v21, %v680_v35  ;;  %v4834_v21 = vpop.f32.mrf.mxu3 }
 0x257   : > { %14630 = vst [vmem:[#allocation133_spill] sm:$0xff] %v13207_v23  ;;  %v13235_v31 = vld [vmem:[#allocation5 + $0x4c] sm:$0xf0]  ;;  %v13237_v2 = vld [vmem:[#allocation5 + $0x140] sm:$0xf]  ;;  %v566_v52 = vadd.f32 %v499_v54, %v328_v29  ;;  %v14638_v29 = vor.u32 %v13035_v20, %v13037_v13  ;;  %v4821_v54 = vpop.f32.mrf.mxu2  ;;  %v1046_v35 = vadd.f32 %v1045_v53, %v12508_v36  ;;  %v14640_v20 = vor.u32 %v13039_v8, %v13041_v58  ;;  %v14648_v58 = vld [vmem:[#allocation112_spill] sm:$0xff] }
 0x258   : > { %14631 = vst [vmem:[#allocation134_spill] sm:$0xff] %v13209_v51  ;;  %v13251_v37 = vld [vmem:[#allocation5 + $0x240] sm:$0xf]  ;;  %v13253_v19 = vld [vmem:[#allocation5 + $0x24c] sm:$0xf0]  ;;  %v1229_v30 = vadd.f32 %v1228_v49, %v12510_v46  ;;  %v14641_v13 = vor.u32 %v13043_v57, %v13045_v60  ;;  %v864_v49 = vrot.slane %v863_v12, 1  ;;  %v14644_v8 = vor.u32 %v13049_v16, %v13051_v40 }
 0x259   : > { %14632 = vst [vmem:[#allocation135_spill] sm:$0xff] %v13211_v28  ;;  %v13233_v28 = vld [vmem:[#allocation5 + $0x40] sm:$0xf]  ;;  %v13257_v44 = vld [vmem:[#allocation5 + $0x34c] sm:$0xf0]  ;;  %5050 = vmatpush.bf16.msrb.mxu0 %v14638_v29  ;;  %5063 = vmatpush.bf16.msrb.mxu1 %v14640_v20  ;;  %v749_v46 = vadd.f32 %v682_v62, %v566_v52  ;;  %v1047_v20 = vrot.slane %v1046_v35, 1 }
 0x25a   : > { %v13255_v14 = vld [vmem:[#allocation5 + $0x340] sm:$0xf]  ;;  %v13267_v27 = vld [vmem:[#allocation5 + $0x2c] sm:$0xf0]  ;;  %5076 = vmatpush.bf16.msrb.mxu2 %v14641_v13  ;;  %5089 = vmatpush.bf16.msrb.mxu3 %v14644_v8  ;;  %v1230_v13 = vrot.slane %v1229_v30, 1  ;;  %v865_v57 = vadd.f32 %v864_v49, %v863_v12  ;;  %v14654_v49 = vld [vmem:[#allocation114_spill] sm:$0xff] }
 0x25b   : > { %v13265_v0 = vld [vmem:[#allocation5 + $0x20] sm:$0xf]  ;;  %v13277_v33 = vld [vmem:[#allocation5 + $0x12c] sm:$0xf0]  ;;  %v1048_v12 = vadd.f32 %v1047_v20, %v1046_v35  ;;  %v14663_v35 = vor.u32 %v13077_v32, %v13079_v34  ;;  %v14669_v32 = vld [vmem:[#allocation120_spill] sm:$0xff] }
 0x25c   : > { %v13275_v9 = vld [vmem:[#allocation5 + $0x120] sm:$0xf]  ;;  %v13289_v23 = vld [vmem:[#allocation5 + $0x22c] sm:$0xf0] }
 0x25d   : > { %v13279_v15 = vld [vmem:[#allocation5 + $0x220] sm:$0xf]  ;;  %14639 = vst [vmem:[#allocation137_spill] sm:$0xff] %v13289_v23  ;;  %v13293_v25 = vld [vmem:[#allocation5 + $0x32c] sm:$0xf0] }
 0x25e   : > { %14637 = vst [vmem:[#allocation136_spill] sm:$0xff] %v13279_v15  ;;  %v13291_v51 = vld [vmem:[#allocation5 + $0x320] sm:$0xf]  ;;  %v13309_v36 = vld [vmem:[#allocation5 + $0xc] sm:$0xf0]  ;;  %5090 = vmatpush.bf16.msrb.mxu3 %v14663_v35 }
 0x25f   : > { %v13307_v54 = vld [vmem:[#allocation5] sm:$0xf]  ;;  %14643 = vst [vmem:[#allocation139_spill] sm:$0xff] %v13309_v36  ;;  %v13320_v53 = vld [vmem:[#allocation5 + $0x10c] sm:$0xf0]  ;;  %v1231_v36 = vadd.f32 %v1230_v13, %v1229_v30 }
 0x260   : > { %14642 = vst [vmem:[#allocation138_spill] sm:$0xff] %v13307_v54  ;;  %v13318_v60 = vld [vmem:[#allocation5 + $0x100] sm:$0xf]  ;;  %v13330_v21 = vld [vmem:[#allocation5 + $0x20c] sm:$0xf0] }
 0x261   : > { %14645 = vst [vmem:[#allocation140_spill] sm:$0xff] %v13318_v60  ;;  %v13328_v40 = vld [vmem:[#allocation5 + $0x200] sm:$0xf]  ;;  %v14649_v29 = vld [vmem:[#allocation113_spill] sm:$0xff] }
 0x262   : > { %14646 = vst [vmem:[#allocation141_spill] sm:$0xff] %v13320_v53  ;;  %v13332_v8 = vld [vmem:[#allocation5 + $0x300] sm:$0xf]  ;;  %v14650_v7 = vor.u32 %v14648_v58, %v14649_v29  ;;  %v13343_v63 = vld [vmem:[#allocation5 + $0x30c] sm:$0xf0]  ;;  %v932_v53 = vadd.f32 %v865_v57, %v749_v46 }
 0x263   : > { %14647 = vst [vmem:[#allocation142_spill] sm:$0xff] %v13332_v8  ;;  %v13345_v10 = vld [vmem:[#allocation5 + $0x4e0] sm:$0xf]  ;;  %v13347_v15 = vld [vmem:[#allocation5 + $0x4ec] sm:$0xf0] }
 0x264   : > { %5051 = vmatpush.bf16.msrb.mxu0 %v14650_v7  ;;  %14651 = vst [vmem:[#allocation112_spill] sm:$0xff] %v13343_v63  ;;  %v14655_v23 = vld [vmem:[#allocation115_spill] sm:$0xff]  ;;  %v14657_v7 = vld [vmem:[#allocation116_spill] sm:$0xff]  ;;  %v14658_v58 = vld [vmem:[#allocation117_spill] sm:$0xff] }
 0x265   : > { %14652 = vst [vmem:[#allocation113_spill] sm:$0xff] %v13345_v10  ;;  %v14656_v29 = vor.u32 %v14654_v49, %v14655_v23  ;;  %v14659_v62 = vor.u32 %v14657_v7, %v14658_v58  ;;  %v13357_v54 = vld [vmem:[#allocation5 + $0x5e0] sm:$0xf]  ;;  %v13359_v16 = vld [vmem:[#allocation5 + $0x5ec] sm:$0xf0]  ;;  %v14664_v23 = vld [vmem:[#allocation118_spill] sm:$0xff] }
 0x266   : > { %14653 = vst [vmem:[#allocation143_spill] sm:$0xff] %v13347_v15  ;;  %v13361_v60 = vld [vmem:[#allocation5 + $0x6e0] sm:$0xf]  ;;  %v14665_v20 = vor.u32 %v13083_v22, %v14664_v23  ;;  %v13375_v7 = vld [vmem:[#allocation5 + $0x6ec] sm:$0xf0]  ;;  %v14672_v22 = vld [vmem:[#allocation122_spill] sm:$0xff] }
 0x267   : > { %5064 = vmatpush.bf16.msrb.mxu1 %v14656_v29  ;;  %5077 = vmatpush.bf16.msrb.mxu2 %v14659_v62  ;;  %14660 = vst [vmem:[#allocation114_spill] sm:$0xff] %v13357_v54  ;;  %v13377_v30 = vld [vmem:[#allocation5 + $0x7e0] sm:$0xf]  ;;  %v13379_v46 = vld [vmem:[#allocation5 + $0x7ec] sm:$0xf0]  ;;  %v14675_v29 = vld [vmem:[#allocation24_spill] sm:$0xff] }
 0x268   : > { %14661 = vst [vmem:[#allocation115_spill] sm:$0xff] %v13359_v16  ;;  %7016 = vmatpush.bf16.msra.mxu0 %v14665_v20  ;;  %v14670_v34 = vld [vmem:[#allocation119_spill] sm:$0xff]  ;;  %v14673_v13 = vld [vmem:[#allocation121_spill] sm:$0xff]  ;;  %v1115_v20 = vadd.f32 %v1048_v12, %v932_v53  ;;  %v1411_v49 = vrot.slane %v14675_v29, 2  ;;  %v14676_v62 = vld [vmem:[#allocation124_spill] sm:$0xff] }
 0x269   : > { %14662 = vst [vmem:[#allocation116_spill] sm:$0xff] %v13361_v60  ;;  %v14671_v57 = vor.u32 %v14669_v32, %v14670_v34  ;;  %v14674_v58 = vor.u32 %v14672_v22, %v14673_v13  ;;  %v14677_v52 = vld [vmem:[#allocation123_spill] sm:$0xff]  ;;  %v14679_v16 = vld [vmem:[#allocation89_spill] sm:$0xff]  ;;  %v14683_v10 = vld [vmem:[#allocation18_spill] sm:$0xff] }
 0x26a   : > { %14666 = vst [vmem:[#allocation117_spill] sm:$0xff] %v13375_v7  ;;  %v14678_v54 = vor.u32 %v14676_v62, %v14677_v52  ;;  %5052 = vmatmul.bf16.vlgmr.msrb.gmra.mxu0 %v14679_v16  ;;  %v14680_v32 = vld [vmem:[#allocation25_spill] sm:$0xff]  ;;  %v691_v35 = vrot.slane %v14683_v10, 2  ;;  %v14685_v23 = vld [vmem:[#allocation106_spill] sm:$0xff]  ;;  %v1298_v53 = vadd.f32 %v1231_v36, %v1115_v20  ;;  %v1412_v12 = vadd.f32 %v1411_v49, %v14675_v29 }
 0x26b   : > { %14667 = vst [vmem:[#allocation118_spill] sm:$0xff] %v13377_v30  ;;  %7029 = vmatpush.bf16.msra.mxu1 %v14671_v57  ;;  %7042 = vmatpush.bf16.msra.mxu2 %v14674_v58  ;;  %v1594_v34 = vrot.slane %v14680_v32, 2  ;;  %v14681_v57 = vld [vmem:[#allocation16_spill] sm:$0xff]  ;;  %v14682_v13 = vld [vmem:[#allocation17_spill] sm:$0xff]  ;;  %v14686_v30 = vld [vmem:[#allocation19_spill] sm:$0xff]  ;;  %v14693_v49 = vor.u32 %v13119_v45, %v13117_v48  ;;  %v14694_v29 = vor.u32 %v13123_v41, %v13121_v43 }
 0x26c   : > { %14668 = vst [vmem:[#allocation144_spill] sm:$0xff] %v13379_v46  ;;  %7055 = vmatpush.bf16.msra.mxu3 %v14678_v54  ;;  %v337_v22 = vrot.slane %v14681_v57, 2  ;;  %v508_v58 = vrot.slane %v14682_v13, 2  ;;  %v14684_v60 = vld [vmem:[#allocation97_spill] sm:$0xff]  ;;  %5065 = vmatmul.bf16.vlgmr.msrb.gmra.mxu1 %v14685_v23  ;;  %v874_v52 = vrot.slane %v14686_v30, 2  ;;  %v14687_v54 = vld [vmem:[#allocation20_spill] sm:$0xff] }
 0x26d   : > { %5078 = vmatmul.bf16.vlgmr.msrb.gmra.mxu2 %v14684_v60  ;;  %v1057_v62 = vrot.slane %v14687_v54, 2  ;;  %v14688_v16 = vld [vmem:[#allocation109_spill] sm:$0xff]  ;;  %v14689_v46 = vld [vmem:[#allocation126_spill] sm:$0xff]  ;;  %v1595_v8 = vadd.f32 %v1594_v34, %v14680_v32  ;;  %v1413_v20 = vrot.slane %v1412_v12, 1  ;;  %v14695_v32 = vor.u32 %v13131_v55, %v13129_v39  ;;  %v14697_v39 = vld [vmem:[#allocation127_spill] sm:$0xff] }
 0x26e   : > { %5091 = vmatmul.bf16.vlgmr.msrb.gmra.mxu3 %v14688_v16  ;;  %v14690_v7 = vld [vmem:[#allocation125_spill] sm:$0xff]  ;;  %v338_v63 = vadd.f32 %v337_v22, %v14681_v57  ;;  %v509_v60 = vadd.f32 %v508_v58, %v14682_v13  ;;  %v14698_v55 = vor.u32 %v13143_v56, %v14697_v39  ;;  %v14700_v16 = vld [vmem:[#allocation128_spill] sm:$0xff]  ;;  %v4858_v56 = vpop.f32.mrf.mxu1  ;;  %v14706_v39 = vld [vmem:[#allocation34_spill] sm:$0xff] }
 0x26f   : > { %v14691_v15 = vor.u32 %v14689_v46, %v14690_v7  ;;  %v14692_v23 = vld [vmem:[#allocation21_spill] sm:$0xff]  ;;  %7030 = vmatpush.bf16.msra.mxu1 %v14693_v49  ;;  %7043 = vmatpush.bf16.msra.mxu2 %v14694_v29  ;;  %v692_v7 = vadd.f32 %v691_v35, %v14683_v10  ;;  %v1058_v46 = vadd.f32 %v1057_v62, %v14687_v54  ;;  %v1596_v34 = vrot.slane %v1595_v8, 1 }
 0x270   : > { %v1240_v36 = vrot.slane %v14692_v23, 2  ;;  %7056 = vmatpush.bf16.msra.mxu3 %v14695_v32  ;;  %v339_v57 = vrot.slane %v338_v63, 1  ;;  %v510_v22 = vrot.slane %v509_v60, 1  ;;  %v1414_v48 = vadd.f32 %v1413_v20, %v1412_v12  ;;  %v14699_v62 = vld [vmem:[#allocation129_spill] sm:$0xff]  ;;  %v14702_v12 = vld [vmem:[#allocation135_spill] sm:$0xff]  ;;  %v14703_v20 = vld [vmem:[#allocation22_spill] sm:$0xff] }
 0x271   : > { %7017 = vmatpush.bf16.msra.mxu0 %v14691_v15  ;;  %v875_v15 = vadd.f32 %v874_v52, %v14686_v30  ;;  %v693_v13 = vrot.slane %v692_v7, 1  ;;  %v1059_v41 = vrot.slane %v1058_v46, 1  ;;  %v14696_v10 = vor.u32 %v13135_v17, %v13133_v18  ;;  %v4845_v30 = vpop.f32.mrf.mxu0 }
 0x272   : > { %v1241_v45 = vadd.f32 %v1240_v36, %v14692_v23  ;;  %v1597_v35 = vadd.f32 %v1596_v34, %v1595_v8  ;;  %v340_v58 = vadd.f32 %v339_v57, %v338_v63  ;;  %v511_v52 = vadd.f32 %v510_v22, %v509_v60  ;;  %v14705_v22 = vld [vmem:[#allocation23_spill] sm:$0xff] }
 0x273   : > { %v876_v43 = vrot.slane %v875_v15, 1  ;;  %7031 = vmatpush.bf16.msra.mxu1 %v14698_v55  ;;  %v14701_v23 = vor.u32 %v14699_v62, %v14700_v16  ;;  %v4846_v36 = vadd.f32 %v4845_v30, %v14702_v12  ;;  %v1481_v49 = vadd.f32 %v1414_v48, %v1298_v53 }
 0x274   : > { %v1242_v54 = vrot.slane %v1241_v45, 1  ;;  %v694_v29 = vadd.f32 %v693_v13, %v692_v7  ;;  %v1423_v18 = vrot.slane %v14703_v20, 2  ;;  %v14704_v17 = vor.u32 %v13161_v4, %v13159_v3  ;;  %v14708_v4 = vld [vmem:[#allocation35_spill] sm:$0xff]  ;;  %v14709_v13 = vld [vmem:[#allocation36_spill] sm:$0xff] }
 0x275   : > { %7018 = vmatpush.bf16.msra.mxu0 %v14696_v10  ;;  %7044 = vmatpush.bf16.msra.mxu2 %v14701_v23  ;;  %v568_v63 = vadd.f32 %v511_v52, %v340_v58  ;;  %v877_v8 = vadd.f32 %v876_v43, %v875_v15  ;;  %v1060_v60 = vadd.f32 %v1059_v41, %v1058_v46  ;;  %v1606_v10 = vrot.slane %v14705_v22, 2  ;;  %v14713_v58 = vld [vmem:[#allocation131_spill] sm:$0xff] }
 0x276   : > { %7057 = vmatpush.bf16.msra.mxu3 %v14704_v17  ;;  %v1243_v32 = vadd.f32 %v1242_v54, %v1241_v45  ;;  %v1664_v34 = vadd.f32 %v1597_v35, %v1481_v49  ;;  %v1424_v57 = vadd.f32 %v1423_v18, %v14703_v20  ;;  %v331_v30 = vrot.slane %v14706_v39, 2  ;;  %v14711_v45 = vld [vmem:[#allocation130_spill] sm:$0xff] }
 0x277   : > { %v14707_v53 = vor.u32 %v13165_v6, %v13163_v42  ;;  %v4859_v7 = vadd.f32 %v4858_v56, %v4846_v36  ;;  %v751_v48 = vadd.f32 %v694_v29, %v568_v63  ;;  %v502_v3 = vrot.slane %v14708_v4, 2  ;;  %v14716_v36 = vld [vmem:[#allocation38_spill] sm:$0xff]  ;;  %v14717_v29 = vld [vmem:[#allocation132_spill] sm:$0xff] }
 0x278   : > { %v685_v15 = vrot.slane %v14709_v13, 2  ;;  %v14710_v46 = vor.u32 %v13173_v5, %v13171_v47  ;;  %v14712_v43 = vor.u32 %v13177_v24, %v14711_v45  ;;  %v13454_v41 = vpack.c.bf16 %v1664_v34, %v1664_v34  ;;  %v14715_v47 = vld [vmem:[#allocation37_spill] sm:$0xff]  ;;  %v4871_v24 = vpop.f32.mrf.mxu2  ;;  %v14719_v34 = vld [vmem:[#allocation134_spill] sm:$0xff] }
 0x279   : > { %7019 = vmatpush.bf16.msra.mxu0 %v14707_v53  ;;  %v1425_v35 = vrot.slane %v1424_v57, 1  ;;  %v1607_v6 = vadd.f32 %v1606_v10, %v14705_v22  ;;  %v332_v42 = vadd.f32 %v331_v30, %v14706_v39  ;;  %v14714_v52 = vor.u32 %v13193_v26, %v14713_v58  ;;  %v4884_v26 = vpop.f32.mrf.mxu3  ;;  %v4847_v63 = vpop.f32.mrf.mxu0  ;;  %v14720_v22 = vld [vmem:[#allocation133_spill] sm:$0xff]  ;;  %v14728_v58 = vld [vmem:[#allocation26_spill] sm:$0xff] }
 0x27a   : > { %7032 = vmatpush.bf16.msra.mxu1 %v14710_v46  ;;  %7045 = vmatpush.bf16.msra.mxu2 %v14712_v43  ;;  %v934_v54 = vadd.f32 %v877_v8, %v751_v48  ;;  %v503_v55 = vadd.f32 %v502_v3, %v14708_v4  ;;  %v686_v5 = vadd.f32 %v685_v15, %v14709_v13  ;;  %v868_v62 = vrot.slane %v14715_v47, 2  ;;  %v4860_v43 = vpop.f32.mrf.mxu1  ;;  %v14736_v63 = vld [vmem:[#allocation136_spill] sm:$0xff] }
 0x27b   : > { %7058 = vmatpush.bf16.msra.mxu3 %v14714_v52  ;;  %v1426_v16 = vadd.f32 %v1425_v35, %v1424_v57  ;;  %v1608_v23 = vrot.slane %v1607_v6, 1  ;;  %v333_v12 = vrot.slane %v332_v42, 1  ;;  %v1051_v49 = vrot.slane %v14716_v36, 2 }
 0x27c   : > { %v14718_v20 = vor.u32 %v13205_v1, %v14717_v29  ;;  %v4872_v18 = vadd.f32 %v4871_v24, %v4859_v7  ;;  %v1117_v17 = vadd.f32 %v1060_v60, %v934_v54  ;;  %v504_v8 = vrot.slane %v503_v55, 1  ;;  %v14723_v1 = vld [vmem:[#allocation39_spill] sm:$0xff] }
 0x27d   : > { %v687_v56 = vrot.slane %v686_v5, 1  ;;  %v14721_v10 = vor.u32 %v14719_v34, %v14720_v22  ;;  %v14722_v57 = vor.u32 %v13219_v59, %v13217_v61  ;;  %v1609_v39 = vadd.f32 %v1608_v23, %v1607_v6  ;;  %v14725_v61 = vld [vmem:[#allocation40_spill] sm:$0xff] }
 0x27e   : > { %7020 = vmatpush.bf16.msra.mxu0 %v14718_v20  ;;  %v334_v30 = vadd.f32 %v333_v12, %v332_v42  ;;  %v869_v53 = vadd.f32 %v868_v62, %v14715_v47  ;;  %v1234_v48 = vrot.slane %v14723_v1, 2  ;;  %v14724_v60 = vor.u32 %v13223_v11, %v13221_v50  ;;  %v14727_v50 = vld [vmem:[#allocation41_spill] sm:$0xff]  ;;  %v14738_v22 = vld [vmem:[#allocation28_spill] sm:$0xff] }
 0x27f   : > { %7033 = vmatpush.bf16.msra.mxu1 %v14721_v10  ;;  %7046 = vmatpush.bf16.msra.mxu2 %v14722_v57  ;;  %v13479_v7 = vadd.f32 %v4884_v26, %v4872_v18  ;;  %v1300_v4 = vadd.f32 %v1243_v32, %v1117_v17  ;;  %v505_v3 = vadd.f32 %v504_v8, %v503_v55  ;;  %v1417_v45 = vrot.slane %v14725_v61, 2  ;;  %v14735_v17 = vld [vmem:[#allocation137_spill] sm:$0xff] }
 0x280   : > { %7059 = vmatpush.bf16.msra.mxu3 %v14724_v60  ;;  %v688_v13 = vadd.f32 %v687_v56, %v686_v5  ;;  %v870_v15 = vrot.slane %v869_v53, 1  ;;  %v1052_v46 = vadd.f32 %v1051_v49, %v14716_v36  ;;  %v1235_v59 = vadd.f32 %v1234_v48, %v14723_v1  ;;  %v4873_v36 = vpop.f32.mrf.mxu2 }
 0x281   : > { %v14726_v35 = vor.u32 %v13235_v31, %v13233_v28  ;;  %v1483_v6 = vadd.f32 %v1426_v16, %v1300_v4  ;;  %v567_v11 = vadd.f32 %v505_v3, %v334_v30  ;;  %v1600_v42 = vrot.slane %v14727_v50, 2  ;;  %v4886_v18 = vpop.f32.mrf.mxu3  ;;  %v14742_v4 = vld [vmem:[#allocation31_spill] sm:$0xff]  ;;  %v13558_v36 = vld [vmem:[#allocation5 + $0x7cc] sm:$0xf0] }
 0x282   : > { %v343_v32 = vrot.slane %v14728_v58, 2  ;;  %v14729_v52 = vor.u32 %v13239_v38, %v13237_v2  ;;  %v14730_v54 = vor.u32 %v13253_v19, %v13251_v37  ;;  %v871_v55 = vadd.f32 %v870_v15, %v869_v53  ;;  %v14732_v37 = vld [vmem:[#allocation27_spill] sm:$0xff]  ;;  %v14744_v15 = vld [vmem:[#allocation138_spill] sm:$0xff] }
 0x283   : > { %7021 = vmatpush.bf16.msra.mxu0 %v14726_v35  ;;  %v1053_v5 = vrot.slane %v1052_v46, 1  ;;  %v1236_v47 = vrot.slane %v1235_v59, 1  ;;  %v1418_v31 = vadd.f32 %v1417_v45, %v14725_v61  ;;  %v14731_v28 = vor.u32 %v13257_v44, %v13255_v14  ;;  %v14747_v45 = vld [vmem:[#allocation33_spill] sm:$0xff]  ;;  %v13529_v35 = vld [vmem:[#allocation5 + $0x4c0] sm:$0xf] }
 0x284   : > { %7034 = vmatpush.bf16.msra.mxu1 %v14729_v52  ;;  %7047 = vmatpush.bf16.msra.mxu2 %v14730_v54  ;;  %v1666_v62 = vadd.f32 %v1609_v39, %v1483_v6  ;;  %v750_v24 = vadd.f32 %v688_v13, %v567_v11  ;;  %v1601_v16 = vadd.f32 %v1600_v42, %v14727_v50  ;;  %v514_v19 = vrot.slane %v14732_v37, 2  ;;  %v14743_v13 = vld [vmem:[#allocation139_spill] sm:$0xff]  ;;  %v13531_v6 = vld [vmem:[#allocation5 + $0x4cc] sm:$0xf0] }
 0x285   : > { %7060 = vmatpush.bf16.msra.mxu3 %v14731_v28  ;;  %v344_v38 = vadd.f32 %v343_v32, %v14728_v58  ;;  %v1054_v2 = vadd.f32 %v1053_v5, %v1052_v46  ;;  %v1237_v23 = vadd.f32 %v1236_v47, %v1235_v59  ;;  %v1419_v12 = vrot.slane %v1418_v31, 1  ;;  %v13533_v11 = vld [vmem:[#allocation5 + $0x5c0] sm:$0xf]  ;;  %v13535_v50 = vld [vmem:[#allocation5 + $0x5cc] sm:$0xf0]  ;;  %v14749_v58 = vld [vmem:[#allocation140_spill] sm:$0xff] }
 0x286   : > { %v14733_v49 = vor.u32 %v13267_v27, %v13265_v0  ;;  %v13505_v29 = vpack.c.bf16 %v1666_v62, %v1666_v62  ;;  %v933_v14 = vadd.f32 %v871_v55, %v750_v24  ;;  %v1602_v44 = vrot.slane %v1601_v16, 1  ;;  %v14739_v27 = vld [vmem:[#allocation29_spill] sm:$0xff]  ;;  %v14752_v62 = vld [vmem:[#allocation112_spill] sm:$0xff]  ;;  %v14753_v24 = vld [vmem:[#allocation142_spill] sm:$0xff] }
 0x287   : > { %v345_v20 = vrot.slane %v344_v38, 1  ;;  %v14734_v26 = vor.u32 %v13277_v33, %v13275_v9  ;;  %v14737_v8 = vor.u32 %v14735_v17, %v14736_v63  ;;  %v1420_v56 = vadd.f32 %v1419_v12, %v1418_v31  ;;  %v14741_v9 = vld [vmem:[#allocation30_spill] sm:$0xff]  ;;  %v14748_v42 = vld [vmem:[#allocation141_spill] sm:$0xff]  ;;  %v13544_v31 = vld [vmem:[#allocation5 + $0x6c0] sm:$0xf] }
 0x288   : > { %7022 = vmatpush.bf16.msra.mxu0 %v14733_v49  ;;  %v515_v34 = vadd.f32 %v514_v19, %v14732_v37  ;;  %v697_v0 = vrot.slane %v14738_v22, 2  ;;  %v880_v10 = vrot.slane %v14739_v27, 2  ;;  %v14740_v57 = vor.u32 %v13293_v25, %v13291_v51  ;;  %v14746_v51 = vld [vmem:[#allocation32_spill] sm:$0xff]  ;;  %v13546_v28 = vld [vmem:[#allocation5 + $0x6cc] sm:$0xf0] }
 0x289   : > { %7035 = vmatpush.bf16.msra.mxu1 %v14734_v26  ;;  %7048 = vmatpush.bf16.msra.mxu2 %v14737_v8  ;;  %v1116_v39 = vadd.f32 %v1054_v2, %v933_v14  ;;  %v1603_v30 = vadd.f32 %v1602_v44, %v1601_v16  ;;  %v346_v53 = vadd.f32 %v345_v20, %v344_v38  ;;  %v1063_v33 = vrot.slane %v14741_v9, 2  ;;  %v14755_v38 = vld [vmem:[#allocation143_spill] sm:$0xff]  ;;  %v14756_v2 = vld [vmem:[#allocation113_spill] sm:$0xff]  ;;  %v14759_v20 = vld [vmem:[#allocation114_spill] sm:$0xff] }
 0x28a   : > { %7061 = vmatpush.bf16.msra.mxu3 %v14740_v57  ;;  %v516_v1 = vrot.slane %v515_v34, 1  ;;  %v698_v48 = vadd.f32 %v697_v0, %v14738_v22  ;;  %v881_v60 = vadd.f32 %v880_v10, %v14739_v27  ;;  %v1246_v3 = vrot.slane %v14742_v4, 2  ;;  %v13556_v19 = vld [vmem:[#allocation5 + $0x7c0] sm:$0xf]  ;;  %v13562_v14 = vld [vmem:[#allocation5 + $0x4ac] sm:$0xf0] }
 0x28b   : > { %v14745_v46 = vor.u32 %v14743_v13, %v14744_v15  ;;  %v1299_v59 = vadd.f32 %v1237_v23, %v1116_v39  ;;  %v1064_v25 = vadd.f32 %v1063_v33, %v14741_v9  ;;  %v1429_v61 = vrot.slane %v14746_v51, 2  ;;  %v13560_v49 = vld [vmem:[#allocation5 + $0x4a0] sm:$0xf]  ;;  %v14761_v26 = vld [vmem:[#allocation117_spill] sm:$0xff]  ;;  %v14762_v17 = vld [vmem:[#allocation116_spill] sm:$0xff] }
 0x28c   : > { %v1612_v43 = vrot.slane %v14747_v45, 2  ;;  %v14750_v32 = vor.u32 %v14748_v42, %v14749_v58  ;;  %v14751_v52 = vor.u32 %v13330_v21, %v13328_v40  ;;  %v517_v54 = vadd.f32 %v516_v1, %v515_v34  ;;  %v14758_v44 = vld [vmem:[#allocation115_spill] sm:$0xff]  ;;  %v13572_v27 = vld [vmem:[#allocation5 + $0x5ac] sm:$0xf0]  ;;  %v14764_v33 = vld [vmem:[#allocation144_spill] sm:$0xff] }
 0x28d   : > { %7023 = vmatpush.bf16.msra.mxu0 %v14745_v46  ;;  %v699_v55 = vrot.slane %v698_v48, 1  ;;  %v882_v5 = vrot.slane %v881_v60, 1  ;;  %v1247_v47 = vadd.f32 %v1246_v3, %v14742_v4  ;;  %v14754_v16 = vor.u32 %v14752_v62, %v14753_v24  ;;  %v13570_v0 = vld [vmem:[#allocation5 + $0x5a0] sm:$0xf]  ;;  %v13576_v57 = vld [vmem:[#allocation5 + $0x6ac] sm:$0xf0] }
 0x28e   : > { %7036 = vmatpush.bf16.msra.mxu1 %v14750_v32  ;;  %7049 = vmatpush.bf16.msra.mxu2 %v14751_v52  ;;  %v14757_v23 = vor.u32 %v14755_v38, %v14756_v2  ;;  %v1482_v12 = vadd.f32 %v1420_v56, %v1299_v59  ;;  %v1065_v40 = vrot.slane %v1064_v25, 1  ;;  %v1430_v21 = vadd.f32 %v1429_v61, %v14746_v51  ;;  %v13574_v10 = vld [vmem:[#allocation5 + $0x6a0] sm:$0xf]  ;;  %v13580_v9 = vld [vmem:[#allocation5 + $0x7ac] sm:$0xf0]  ;;  %v14765_v1 = vld [vmem:[#allocation118_spill] sm:$0xff] }
 0x28f   : > { %7062 = vmatpush.bf16.msra.mxu3 %v14754_v16  ;;  %v1613_v37 = vadd.f32 %v1612_v43, %v14747_v45  ;;  %v14760_v18 = vor.u32 %v14758_v44, %v14759_v20  ;;  %v14763_v63 = vor.u32 %v14761_v26, %v14762_v17  ;;  %v569_v8 = vadd.f32 %v517_v54, %v346_v53  ;;  %v13578_v39 = vld [vmem:[#allocation5 + $0x7a0] sm:$0xf]  ;;  %v13588_v15 = vld [vmem:[#allocation5 + $0x48c] sm:$0xf0] }
 0x290   : > { %v700_v56 = vadd.f32 %v699_v55, %v698_v48  ;;  %v883_v34 = vadd.f32 %v882_v5, %v881_v60  ;;  %v1248_v22 = vrot.slane %v1247_v47, 1  ;;  %v14766_v4 = vor.u32 %v14764_v33, %v14765_v1  ;;  %7024 = vmatmul.bf16.vlgmr.msra.gmra.mxu0 %v13454_v41  ;;  %v13586_v13 = vld [vmem:[#allocation5 + $0x480] sm:$0xf]  ;;  %v13592_v59 = vld [vmem:[#allocation5 + $0x58c] sm:$0xf0] }
 0x291   : > { %7068 = vmatpush.bf16.msrb.mxu0 %v14757_v23  ;;  %v1665_v53 = vadd.f32 %v1603_v30, %v1482_v12  ;;  %v1066_v48 = vadd.f32 %v1065_v40, %v1064_v25  ;;  %v1431_v60 = vrot.slane %v1430_v21, 1  ;;  %v1614_v3 = vrot.slane %v1613_v37, 1  ;;  %v13590_v46 = vld [vmem:[#allocation5 + $0x580] sm:$0xf]  ;;  %v13596_v61 = vld [vmem:[#allocation5 + $0x68c] sm:$0xf0]  ;;  %7050 = vmatmul.bf16.vlgmr.msra.gmra.mxu2 %v13505_v29 }
 0x292   : > { %7081 = vmatpush.bf16.msrb.mxu1 %v14760_v18  ;;  %7094 = vmatpush.bf16.msrb.mxu2 %v14763_v63  ;;  %v13594_v51 = vld [vmem:[#allocation5 + $0x680] sm:$0xf]  ;;  %v752_v45 = vadd.f32 %v700_v56, %v569_v8  ;;  %v1249_v43 = vadd.f32 %v1248_v22, %v1247_v47  ;;  %v10154_v30 = vor.u32 %v13531_v6, %v13529_v35  ;;  %v13605_v58 = vld [vmem:[#allocation5 + $0x78c] sm:$0xf0]  ;;  %v4897_v63 = vpop.f32.mrf.mxu0 }
 0x293   : > { %7107 = vmatpush.bf16.msrb.mxu3 %v14766_v4  ;;  %v10282_v25 = vor.u32 %v13535_v50, %v13533_v11  ;;  %v13603_v42 = vld [vmem:[#allocation5 + $0x780] sm:$0xf]  ;;  %v13609_v52 = vld [vmem:[#allocation5 + $0x46c] sm:$0xf0]  ;;  %v13615_v5 = vpack.c.bf16 %v1665_v53, %v1665_v53  ;;  %v13617_v47 = vadd.f32 %v1431_v60, %v1430_v21  ;;  %v13619_v35 = vadd.f32 %v1614_v3, %v1613_v37  ;;  %v4910_v53 = vpop.f32.mrf.mxu1 }
 0x294   : > { %v13607_v32 = vld [vmem:[#allocation5 + $0x460] sm:$0xf]  ;;  %v13613_v55 = vld [vmem:[#allocation5 + $0x56c] sm:$0xf0]  ;;  %v10410_v6 = vor.u32 %v13546_v28, %v13544_v31  ;;  %v935_v16 = vadd.f32 %v883_v34, %v752_v45  ;;  %v10538_v38 = vor.u32 %v13558_v36, %v13556_v19  ;;  %v10138_v2 = vor.u32 %v13562_v14, %v13560_v49 }
 0x295   : > { %v13611_v54 = vld [vmem:[#allocation5 + $0x560] sm:$0xf]  ;;  %v13625_v50 = vld [vmem:[#allocation5 + $0x66c] sm:$0xf0]  ;;  %7069 = vmatpush.bf16.msrb.mxu0 %v10154_v30  ;;  %7037 = vmatmul.bf16.vlgmr.msra.gmra.mxu1 %v13615_v5  ;;  %v10266_v37 = vor.u32 %v13572_v27, %v13570_v0  ;;  %v10394_v19 = vor.u32 %v13576_v57, %v13574_v10  ;;  %v10522_v36 = vor.u32 %v13580_v9, %v13578_v39 }
 0x296   : > { %v13623_v11 = vld [vmem:[#allocation5 + $0x660] sm:$0xf]  ;;  %v13629_v24 = vld [vmem:[#allocation5 + $0x76c] sm:$0xf0]  ;;  %7082 = vmatpush.bf16.msrb.mxu1 %v10282_v25  ;;  %7095 = vmatpush.bf16.msrb.mxu2 %v10410_v6  ;;  %v1118_v17 = vadd.f32 %v1066_v48, %v935_v16  ;;  %v10122_v8 = vor.u32 %v13588_v15, %v13586_v13  ;;  %v10250_v56 = vor.u32 %v13592_v59, %v13590_v46 }
 0x297   : > { %v13627_v62 = vld [vmem:[#allocation5 + $0x760] sm:$0xf]  ;;  %v13637_v31 = vld [vmem:[#allocation5 + $0x44c] sm:$0xf0]  ;;  %7108 = vmatpush.bf16.msrb.mxu3 %v10538_v38  ;;  %v10378_v34 = vor.u32 %v13596_v61, %v13594_v51  ;;  %v4898_v1 = vadd.f32 %v4897_v63, %v13479_v7  ;;  %v10506_v4 = vor.u32 %v13605_v58, %v13603_v42  ;;  %v10106_v48 = vor.u32 %v13609_v52, %v13607_v32 }
 0x298   : > { %v13635_v23 = vld [vmem:[#allocation5 + $0x440] sm:$0xf]  ;;  %v13641_v12 = vld [vmem:[#allocation5 + $0x54c] sm:$0xf0]  ;;  %v10234_v60 = vor.u32 %v13613_v55, %v13611_v54  ;;  %v1301_v46 = vadd.f32 %v1249_v43, %v1118_v17  ;;  %v10362_v7 = vor.u32 %v13625_v50, %v13623_v11  ;;  %v10490_v59 = vor.u32 %v13629_v24, %v13627_v62  ;;  %v14767_v17 = vld [vmem:[#allocation50_spill] sm:$0xff] }
 0x299   : > { %v13639_v28 = vld [vmem:[#allocation5 + $0x540] sm:$0xf]  ;;  %v13645_v21 = vld [vmem:[#allocation5 + $0x64c] sm:$0xf0]  ;;  %7070 = vmatpush.bf16.msrb.mxu0 %v10138_v2  ;;  %v4911_v30 = vadd.f32 %v4910_v53, %v4898_v1  ;;  %v349_v63 = vrot.slane %v14767_v17, 2  ;;  %v4923_v1 = vpop.f32.mrf.mxu2  ;;  %v14770_v53 = vld [vmem:[#allocation52_spill] sm:$0xff] }
 0x29a   : > { %v13643_v40 = vld [vmem:[#allocation5 + $0x640] sm:$0xf]  ;;  %v13656_v14 = vld [vmem:[#allocation5 + $0x74c] sm:$0xf0]  ;;  %7083 = vmatpush.bf16.msrb.mxu1 %v10266_v37  ;;  %7096 = vmatpush.bf16.msrb.mxu2 %v10394_v19  ;;  %v1484_v54 = vadd.f32 %v13617_v47, %v1301_v46  ;;  %v4899_v38 = vpop.f32.mrf.mxu0  ;;  %v703_v47 = vrot.slane %v14770_v53, 2  ;;  %v14772_v11 = vld [vmem:[#allocation54_spill] sm:$0xff] }
 0x29b   : > { %v13654_v49 = vld [vmem:[#allocation5 + $0x740] sm:$0xf]  ;;  %v13660_v20 = vld [vmem:[#allocation5 + $0x42c] sm:$0xf0]  ;;  %7109 = vmatpush.bf16.msrb.mxu3 %v10522_v36  ;;  %v4936_v36 = vpop.f32.mrf.mxu3  ;;  %v1069_v6 = vrot.slane %v14772_v11, 2  ;;  %v4912_v42 = vpop.f32.mrf.mxu1 }
 0x29c   : > { %v13658_v44 = vld [vmem:[#allocation5 + $0x420] sm:$0xf]  ;;  %v13664_v26 = vld [vmem:[#allocation5 + $0x52c] sm:$0xf0]  ;;  %v1667_v37 = vadd.f32 %v13619_v35, %v1484_v54  ;;  %v4924_v54 = vadd.f32 %v4923_v1, %v4911_v30  ;;  %v704_v38 = vadd.f32 %v703_v47, %v14770_v53  ;;  %v14778_v47 = vld [vmem:[#allocation42_spill] sm:$0xff]  ;;  %v14779_v53 = vor.u32 %v13641_v12, %v13639_v28 }
 0x29d   : > { %v13662_v18 = vld [vmem:[#allocation5 + $0x520] sm:$0xf]  ;;  %v13674_v0 = vld [vmem:[#allocation5 + $0x62c] sm:$0xf0]  ;;  %7071 = vmatpush.bf16.msrb.mxu0 %v10122_v8  ;;  %v1070_v8 = vadd.f32 %v1069_v6, %v14772_v11 }
 0x29e   : > { %v13672_v22 = vld [vmem:[#allocation5 + $0x620] sm:$0xf]  ;;  %v13678_v10 = vld [vmem:[#allocation5 + $0x72c] sm:$0xf0]  ;;  %7084 = vmatpush.bf16.msrb.mxu1 %v10250_v56  ;;  %7097 = vmatpush.bf16.msrb.mxu2 %v10378_v34  ;;  %v13758_v56 = vpack.c.bf16 %v1667_v37, %v1667_v37  ;;  %v350_v34 = vadd.f32 %v349_v63, %v14767_v17  ;;  %v14775_v17 = vld [vmem:[#allocation56_spill] sm:$0xff] }
 0x29f   : > { %v13676_v27 = vld [vmem:[#allocation5 + $0x720] sm:$0xf]  ;;  %v13682_v39 = vld [vmem:[#allocation5 + $0x40c] sm:$0xf0]  ;;  %7110 = vmatpush.bf16.msrb.mxu3 %v10506_v4  ;;  %v13767_v4 = vadd.f32 %v4936_v36, %v4924_v54  ;;  %v1435_v63 = vrot.slane %v14775_v17, 2 }
 0x2a0   : > { %v13680_v57 = vld [vmem:[#allocation5 + $0x400] sm:$0xf]  ;;  %v13686_v33 = vld [vmem:[#allocation5 + $0x50c] sm:$0xf0]  ;;  %14768 = vst [vmem:[#allocation120_spill] sm:$0xff] %v13758_v56  ;;  %7063 = vmatmul.bf16.vlgmr.msra.gmra.mxu3 %v13758_v56  ;;  %v351_v30 = vrot.slane %v350_v34, 1 }
 0x2a1   : > { %v13684_v9 = vld [vmem:[#allocation5 + $0x500] sm:$0xf]  ;;  %v13697_v13 = vld [vmem:[#allocation5 + $0x60c] sm:$0xf0]  ;;  %7072 = vmatpush.bf16.msrb.mxu0 %v10106_v48  ;;  %14774 = vst [vmem:[#allocation119_spill] sm:$0xff] %v13767_v4  ;;  %v1436_v54 = vadd.f32 %v1435_v63, %v14775_v17  ;;  %v1071_v4 = vrot.slane %v1070_v8, 1 }
 0x2a2   : > { %v13695_v3 = vld [vmem:[#allocation5 + $0x600] sm:$0xf]  ;;  %v13705_v51 = vld [vmem:[#allocation5 + $0x70c] sm:$0xf0]  ;;  %7085 = vmatpush.bf16.msrb.mxu1 %v10234_v60  ;;  %7098 = vmatpush.bf16.msrb.mxu2 %v10362_v7  ;;  %v352_v25 = vadd.f32 %v351_v30, %v350_v34  ;;  %v14777_v7 = vor.u32 %v13637_v31, %v13635_v23  ;;  %v4925_v30 = vpop.f32.mrf.mxu2  ;;  %v14781_v23 = vor.u32 %v13656_v14, %v13654_v49  ;;  %v14786_v14 = vld [vmem:[#allocation46_spill] sm:$0xff] }
 0x2a3   : > { %v13699_v15 = vld [vmem:[#allocation5 + $0x700] sm:$0xf]  ;;  %v13709_v45 = vld [vmem:[#allocation5 + $0x8ec] sm:$0xf0]  ;;  %7111 = vmatpush.bf16.msrb.mxu3 %v10490_v59  ;;  %v1437_v11 = vrot.slane %v1436_v54, 1  ;;  %v361_v59 = vrot.slane %v14778_v47, 2  ;;  %v4938_v28 = vpop.f32.mrf.mxu3 }
 0x2a4   : > { %v13707_v61 = vld [vmem:[#allocation5 + $0x8e0] sm:$0xf]  ;;  %v13719_v32 = vld [vmem:[#allocation5 + $0x9ec] sm:$0xf0] }
 0x2a5   : > { %v13717_v58 = vld [vmem:[#allocation5 + $0x9e0] sm:$0xf]  ;;  %v13730_v50 = vld [vmem:[#allocation5 + $0xaec] sm:$0xf0]  ;;  %7073 = vmatpush.bf16.msrb.mxu0 %v14777_v7  ;;  %v1438_v17 = vadd.f32 %v1437_v11, %v1436_v54  ;;  %v362_v63 = vadd.f32 %v361_v59, %v14778_v47 }
 0x2a6   : > { %v13721_v52 = vld [vmem:[#allocation5 + $0xae0] sm:$0xf]  ;;  %v13734_v24 = vld [vmem:[#allocation5 + $0xbec] sm:$0xf0]  ;;  %7086 = vmatpush.bf16.msrb.mxu1 %v14779_v53 }
 0x2a7   : > { %v13732_v62 = vld [vmem:[#allocation5 + $0xbe0] sm:$0xf]  ;;  %v14771_v16 = vld [vmem:[#allocation53_spill] sm:$0xff]  ;;  %7112 = vmatpush.bf16.msrb.mxu3 %v14781_v23  ;;  %v363_v49 = vrot.slane %v362_v63, 1  ;;  %v14795_v23 = vor.u32 %v13697_v13, %v13695_v3  ;;  %v14799_v3 = vor.u32 %v13719_v32, %v13717_v58  ;;  %v14800_v13 = vor.u32 %v13730_v50, %v13721_v52 }
 0x2a8   : > { %v14769_v19 = vld [vmem:[#allocation51_spill] sm:$0xff]  ;;  %v886_v46 = vrot.slane %v14771_v16, 2  ;;  %v14776_v43 = vld [vmem:[#allocation57_spill] sm:$0xff] }
 0x2a9   : > { %v520_v2 = vrot.slane %v14769_v19, 2  ;;  %v14773_v35 = vld [vmem:[#allocation55_spill] sm:$0xff]  ;;  %v1618_v42 = vrot.slane %v14776_v43, 2  ;;  %v364_v47 = vadd.f32 %v363_v49, %v362_v63  ;;  %v14804_v32 = vld [vmem:[#allocation69_spill] sm:$0xff] }
 0x2aa   : > { %v1252_v55 = vrot.slane %v14773_v35, 2  ;;  %v887_v1 = vadd.f32 %v886_v46, %v14771_v16 }
 0x2ab   : > { %v521_v37 = vadd.f32 %v520_v2, %v14769_v19  ;;  %v705_v2 = vrot.slane %v704_v38, 1  ;;  %v1619_v60 = vadd.f32 %v1618_v42, %v14776_v43  ;;  %v1072_v43 = vadd.f32 %v1071_v4, %v1070_v8  ;;  %v14782_v42 = vld [vmem:[#allocation43_spill] sm:$0xff] }
 0x2ac   : > { %v1253_v36 = vadd.f32 %v1252_v55, %v14773_v35  ;;  %v888_v19 = vrot.slane %v887_v1, 1  ;;  %v14780_v55 = vor.u32 %v13645_v21, %v13643_v40  ;;  %v14783_v40 = vld [vmem:[#allocation44_spill] sm:$0xff]  ;;  %v14785_v8 = vor.u32 %v13660_v20, %v13658_v44 }
 0x2ad   : > { %v522_v48 = vrot.slane %v521_v37, 1  ;;  %v706_v46 = vadd.f32 %v705_v2, %v704_v38  ;;  %v1620_v34 = vrot.slane %v1619_v60, 1  ;;  %v715_v21 = vrot.slane %v14783_v40, 2  ;;  %v14784_v38 = vld [vmem:[#allocation45_spill] sm:$0xff]  ;;  %v14790_v20 = vld [vmem:[#allocation48_spill] sm:$0xff] }
 0x2ae   : > { %v1254_v6 = vrot.slane %v1253_v36, 1  ;;  %7099 = vmatpush.bf16.msrb.mxu2 %v14780_v55  ;;  %v889_v35 = vadd.f32 %v888_v19, %v887_v1  ;;  %v898_v1 = vrot.slane %v14784_v38, 2  ;;  %7074 = vmatpush.bf16.msrb.mxu0 %v14785_v8  ;;  %v14788_v2 = vor.u32 %v13664_v26, %v13662_v18  ;;  %v14803_v8 = vld [vmem:[#allocation68_spill] sm:$0xff] }
 0x2af   : > { %v523_v16 = vadd.f32 %v522_v48, %v521_v37  ;;  %v1621_v12 = vadd.f32 %v1620_v34, %v1619_v60  ;;  %v532_v48 = vrot.slane %v14782_v42, 2  ;;  %v14789_v19 = vor.u32 %v13674_v0, %v13672_v22 }
 0x2b0   : > { %v1255_v37 = vadd.f32 %v1254_v6, %v1253_v36  ;;  %v14787_v36 = vld [vmem:[#allocation47_spill] sm:$0xff]  ;;  %7087 = vmatpush.bf16.msrb.mxu1 %v14788_v2  ;;  %v716_v7 = vadd.f32 %v715_v21, %v14783_v40  ;;  %v899_v44 = vadd.f32 %v898_v1, %v14784_v38  ;;  %v14791_v6 = vor.u32 %v13678_v10, %v13676_v27  ;;  %v14793_v27 = vld [vmem:[#allocation49_spill] sm:$0xff] }
 0x2b1   : > { %v570_v31 = vadd.f32 %v523_v16, %v352_v25  ;;  %v1081_v25 = vrot.slane %v14786_v14, 2  ;;  %v1264_v54 = vrot.slane %v14787_v36, 2  ;;  %v533_v60 = vadd.f32 %v532_v48, %v14782_v42  ;;  %v14801_v38 = vld [vmem:[#allocation67_spill] sm:$0xff] }
 0x2b2   : > { %7100 = vmatpush.bf16.msrb.mxu2 %v14789_v19  ;;  %v1447_v16 = vrot.slane %v14790_v20, 2  ;;  %7113 = vmatpush.bf16.msrb.mxu3 %v14791_v6  ;;  %v717_v0 = vrot.slane %v716_v7, 1  ;;  %v900_v59 = vrot.slane %v899_v44, 1  ;;  %v14792_v55 = vor.u32 %v13682_v39, %v13680_v57 }
 0x2b3   : > { %v753_v4 = vadd.f32 %v706_v46, %v570_v31  ;;  %v1082_v18 = vadd.f32 %v1081_v25, %v14786_v14  ;;  %v1265_v26 = vadd.f32 %v1264_v54, %v14787_v36  ;;  %v534_v22 = vrot.slane %v533_v60, 1  ;;  %v14805_v14 = vld [vmem:[#allocation70_spill] sm:$0xff] }
 0x2b4   : > { %v1448_v53 = vadd.f32 %v1447_v16, %v14790_v20  ;;  %7075 = vmatpush.bf16.msrb.mxu0 %v14792_v55  ;;  %v1630_v10 = vrot.slane %v14793_v27, 2  ;;  %v718_v63 = vadd.f32 %v717_v0, %v716_v7  ;;  %v901_v28 = vadd.f32 %v900_v59, %v899_v44  ;;  %v14808_v0 = vld [vmem:[#allocation72_spill] sm:$0xff] }
 0x2b5   : > { %v936_v11 = vadd.f32 %v889_v35, %v753_v4  ;;  %v1083_v34 = vrot.slane %v1082_v18, 1  ;;  %v1266_v30 = vrot.slane %v1265_v26, 1  ;;  %v14794_v35 = vor.u32 %v13686_v33, %v13684_v9  ;;  %v14798_v33 = vld [vmem:[#allocation66_spill] sm:$0xff] }
 0x2b6   : > { %7101 = vmatpush.bf16.msrb.mxu2 %v14795_v23  ;;  %v535_v31 = vadd.f32 %v534_v22, %v533_v60  ;;  %v1449_v42 = vrot.slane %v1448_v53, 1  ;;  %v14796_v57 = vor.u32 %v13705_v51, %v13699_v15  ;;  %v14797_v39 = vor.u32 %v13709_v45, %v13707_v61  ;;  %v14810_v23 = vld [vmem:[#allocation58_spill] sm:$0xff] }
 0x2b7   : > { %v1119_v46 = vadd.f32 %v1072_v43, %v936_v11  ;;  %7088 = vmatpush.bf16.msrb.mxu1 %v14794_v35  ;;  %v1084_v48 = vadd.f32 %v1083_v34, %v1082_v18  ;;  %v1267_v9 = vadd.f32 %v1266_v30, %v1265_v26  ;;  %v355_v40 = vrot.slane %v14798_v33, 2  ;;  %v14807_v18 = vld [vmem:[#allocation71_spill] sm:$0xff] }
 0x2b8   : > { %7114 = vmatpush.bf16.msrb.mxu3 %v14796_v57  ;;  %7120 = vmatpush.bf16.msra.mxu0 %v14797_v39  ;;  %v572_v21 = vadd.f32 %v535_v31, %v364_v47  ;;  %v1450_v15 = vadd.f32 %v1449_v42, %v1448_v53  ;;  %v1631_v51 = vadd.f32 %v1630_v10, %v14793_v27  ;;  %v526_v61 = vrot.slane %v14801_v38, 2  ;;  %v14809_v53 = vld [vmem:[#allocation73_spill] sm:$0xff] }
 0x2b9   : > { %v1302_v43 = vadd.f32 %v1255_v37, %v1119_v46  ;;  %v14802_v45 = vor.u32 %v13734_v24, %v13732_v62  ;;  %v356_v1 = vadd.f32 %v355_v40, %v14798_v33  ;;  %v709_v58 = vrot.slane %v14803_v8, 2 }
 0x2ba   : > { %7146 = vmatpush.bf16.msra.mxu2 %v14800_v13  ;;  %v892_v4 = vrot.slane %v14804_v32, 2  ;;  %v755_v49 = vadd.f32 %v718_v63, %v572_v21  ;;  %v1632_v52 = vrot.slane %v1631_v51, 1  ;;  %v527_v50 = vadd.f32 %v526_v61, %v14801_v38  ;;  %v14811_v63 = vld [vmem:[#allocation59_spill] sm:$0xff] }
 0x2bb   : > { %7133 = vmatpush.bf16.msra.mxu1 %v14799_v3  ;;  %v1485_v37 = vadd.f32 %v1438_v17, %v1302_v43  ;;  %v1075_v25 = vrot.slane %v14805_v14, 2  ;;  %v357_v54 = vrot.slane %v356_v1, 1  ;;  %v710_v2 = vadd.f32 %v709_v58, %v14803_v8  ;;  %v14812_v43 = vld [vmem:[#allocation60_spill] sm:$0xff] }
 0x2bc   : > { %7159 = vmatpush.bf16.msra.mxu3 %v14802_v45  ;;  %v893_v62 = vadd.f32 %v892_v4, %v14804_v32  ;;  %v938_v24 = vadd.f32 %v901_v28, %v755_v49  ;;  %v1633_v17 = vadd.f32 %v1632_v52, %v1631_v51  ;;  %v528_v19 = vrot.slane %v527_v50, 1  ;;  %v14814_v32 = vld [vmem:[#allocation61_spill] sm:$0xff]  ;;  %v10665_v49 = vld [vmem:[#allocation5 + $0x8c0] sm:$0xf] }
 0x2bd   : > { %v1668_v36 = vadd.f32 %v1621_v12, %v1485_v37  ;;  %v1076_v60 = vadd.f32 %v1075_v25, %v14805_v14  ;;  %v358_v44 = vadd.f32 %v357_v54, %v356_v1  ;;  %v711_v20 = vrot.slane %v710_v2, 1  ;;  %v11363_v52 = vld [vmem:[#allocation5 + $0x8cc] sm:$0xf0]  ;;  %v14815_v25 = vld [vmem:[#allocation62_spill] sm:$0xff]  ;;  %v14816_v54 = vld [vmem:[#allocation63_spill] sm:$0xff] }
 0x2be   : > { %v894_v16 = vrot.slane %v893_v62, 1  ;;  %v1121_v6 = vadd.f32 %v1084_v48, %v938_v24  ;;  %v529_v11 = vadd.f32 %v528_v19, %v527_v50  ;;  %v1258_v12 = vrot.slane %v14807_v18, 2  ;;  %v11395_v24 = vld [vmem:[#allocation5 + $0x9cc] sm:$0xf0] }
 0x2bf   : > { %v13852_v7 = vpack.c.bf16 %v1668_v36, %v1668_v36  ;;  %v1077_v47 = vrot.slane %v1076_v60, 1  ;;  %v712_v26 = vadd.f32 %v711_v20, %v710_v2  ;;  %v1441_v59 = vrot.slane %v14808_v0, 2 }
 0x2c0   : > { %v895_v22 = vadd.f32 %v894_v16, %v893_v62  ;;  %v1624_v55 = vrot.slane %v14809_v53, 2  ;;  %v1304_v46 = vadd.f32 %v1267_v9, %v1121_v6  ;;  %v571_v34 = vadd.f32 %v529_v11, %v358_v44  ;;  %v10793_v62 = vld [vmem:[#allocation5 + $0x9c0] sm:$0xf]  ;;  %v14817_v44 = vld [vmem:[#allocation64_spill] sm:$0xff]  ;;  %v13877_v6 = vld [vmem:[#allocation5 + $0xacc] sm:$0xf0] }
 0x2c1   : > { %14806 = vst [vmem:[#allocation122_spill] sm:$0xff] %v13852_v7  ;;  %7076 = vmatmul.bf16.vlgmr.msrb.gmra.mxu0 %v13852_v7  ;;  %v1078_v30 = vadd.f32 %v1077_v47, %v1076_v60  ;;  %v1259_v27 = vadd.f32 %v1258_v12, %v14807_v18  ;;  %v1442_v10 = vadd.f32 %v1441_v59, %v14808_v0  ;;  %v367_v31 = vrot.slane %v14810_v23, 2  ;;  %v13875_v16 = vld [vmem:[#allocation5 + $0xac0] sm:$0xf]  ;;  %v14818_v12 = vld [vmem:[#allocation65_spill] sm:$0xff]  ;;  %v13886_v59 = vpop.f32.mrf.mxu0 }
 0x2c2   : > { %v1625_v35 = vadd.f32 %v1624_v55, %v14809_v53  ;;  %v538_v28 = vrot.slane %v14811_v63, 2  ;;  %v1487_v42 = vadd.f32 %v1450_v15, %v1304_v46  ;;  %v754_v57 = vadd.f32 %v712_v26, %v571_v34  ;;  %v13884_v0 = vld [vmem:[#allocation5 + $0xbcc] sm:$0xf0] }
 0x2c3   : > { %v1260_v39 = vrot.slane %v1259_v27, 1  ;;  %v721_v48 = vrot.slane %v14812_v43, 2  ;;  %v1443_v33 = vrot.slane %v1442_v10, 1  ;;  %v368_v9 = vadd.f32 %v367_v31, %v14810_v23  ;;  %v13897_v23 = vld [vmem:[#allocation5 + $0xaa0] sm:$0xf] }
 0x2c4   : > { %v1626_v40 = vrot.slane %v1625_v35, 1  ;;  %v539_v3 = vadd.f32 %v538_v28, %v14811_v63  ;;  %v1670_v13 = vadd.f32 %v1633_v17, %v1487_v42  ;;  %v937_v21 = vadd.f32 %v895_v22, %v754_v57  ;;  %v13882_v22 = vld [vmem:[#allocation5 + $0xbc0] sm:$0xf]  ;;  %v13899_v31 = vld [vmem:[#allocation5 + $0xaac] sm:$0xf0] }
 0x2c5   : > { %v1261_v51 = vadd.f32 %v1260_v39, %v1259_v27  ;;  %v722_v38 = vadd.f32 %v721_v48, %v14812_v43  ;;  %v1444_v61 = vadd.f32 %v1443_v33, %v1442_v10  ;;  %v369_v37 = vrot.slane %v368_v9, 1  ;;  %v13891_v27 = vld [vmem:[#allocation5 + $0x8ac] sm:$0xf0]  ;;  %v13893_v10 = vld [vmem:[#allocation5 + $0x9a0] sm:$0xf] }
 0x2c6   : > { %v1627_v45 = vadd.f32 %v1626_v40, %v1625_v35  ;;  %v540_v1 = vrot.slane %v539_v3, 1  ;;  %v13867_v15 = vpack.c.bf16 %v1670_v13, %v1670_v13  ;;  %v1120_v8 = vadd.f32 %v1078_v30, %v937_v21  ;;  %v13889_v30 = vld [vmem:[#allocation5 + $0x8a0] sm:$0xf]  ;;  %v13895_v35 = vld [vmem:[#allocation5 + $0x9ac] sm:$0xf0] }
 0x2c7   : > { %v723_v58 = vrot.slane %v722_v38, 1  ;;  %v904_v4 = vrot.slane %v14814_v32, 2  ;;  %v370_v50 = vadd.f32 %v369_v37, %v368_v9  ;;  %v1087_v36 = vrot.slane %v14815_v25, 2  ;;  %v13902_v39 = vld [vmem:[#allocation5 + $0xba0] sm:$0xf] }
 0x2c8   : > { %14813 = vst [vmem:[#allocation121_spill] sm:$0xff] %v13867_v15  ;;  %v541_v14 = vadd.f32 %v540_v1, %v539_v3  ;;  %v1270_v2 = vrot.slane %v14816_v54, 2  ;;  %7102 = vmatmul.bf16.vlgmr.msrb.gmra.mxu2 %v13867_v15  ;;  %v1303_v17 = vadd.f32 %v1261_v51, %v1120_v8  ;;  %v1453_v20 = vrot.slane %v14817_v44, 2  ;;  %v13904_v43 = vld [vmem:[#allocation5 + $0xbac] sm:$0xf0] }
 0x2c9   : > { %v724_v19 = vadd.f32 %v723_v58, %v722_v38  ;;  %v905_v60 = vadd.f32 %v904_v4, %v14814_v32  ;;  %v1088_v47 = vadd.f32 %v1087_v36, %v14815_v25  ;;  %v1636_v26 = vrot.slane %v14818_v12, 2  ;;  %v13906_v48 = vld [vmem:[#allocation5 + $0x880] sm:$0xf]  ;;  %v13908_v33 = vld [vmem:[#allocation5 + $0x88c] sm:$0xf0] }
 0x2ca   : > { %v573_v11 = vadd.f32 %v541_v14, %v370_v50  ;;  %v1271_v18 = vadd.f32 %v1270_v2, %v14816_v54  ;;  %v1486_v53 = vadd.f32 %v1444_v61, %v1303_v17  ;;  %v1454_v46 = vadd.f32 %v1453_v20, %v14817_v44  ;;  %v13910_v21 = vld [vmem:[#allocation5 + $0x980] sm:$0xf]  ;;  %v13912_v51 = vld [vmem:[#allocation5 + $0x98c] sm:$0xf0] }
 0x2cb   : > { %v906_v55 = vrot.slane %v905_v60, 1  ;;  %v10666_v34 = vor.u32 %v11363_v52, %v10665_v49  ;;  %v1089_v28 = vrot.slane %v1088_v47, 1  ;;  %v1637_v57 = vadd.f32 %v1636_v26, %v14818_v12  ;;  %v13914_v38 = vld [vmem:[#allocation5 + $0xa80] sm:$0xf]  ;;  %v13916_v61 = vld [vmem:[#allocation5 + $0xa8c] sm:$0xf0] }
 0x2cc   : > { %v756_v63 = vadd.f32 %v724_v19, %v573_v11  ;;  %v1272_v42 = vrot.slane %v1271_v18, 1  ;;  %v1669_v40 = vadd.f32 %v1627_v45, %v1486_v53  ;;  %v1455_v3 = vrot.slane %v1454_v46, 1  ;;  %v13918_v37 = vld [vmem:[#allocation5 + $0xb80] sm:$0xf]  ;;  %v13920_v1 = vld [vmem:[#allocation5 + $0xb8c] sm:$0xf0] }
 0x2cd   : > { %v907_v9 = vadd.f32 %v906_v55, %v905_v60  ;;  %7121 = vmatpush.bf16.msra.mxu0 %v10666_v34  ;;  %v10794_v13 = vor.u32 %v11395_v24, %v10793_v62  ;;  %v13922_v8 = vld [vmem:[#allocation5 + $0x860] sm:$0xf]  ;;  %v13924_v58 = vld [vmem:[#allocation5 + $0x86c] sm:$0xf0]  ;;  %v1090_v45 = vadd.f32 %v1089_v28, %v1088_v47  ;;  %v1638_v4 = vrot.slane %v1637_v57, 1 }
 0x2ce   : > { %v1273_v32 = vadd.f32 %v1272_v42, %v1271_v18  ;;  %v10922_v49 = vor.u32 %v13877_v6, %v13875_v16  ;;  %v13928_v52 = vld [vmem:[#allocation5 + $0x960] sm:$0xf]  ;;  %v13930_v50 = vld [vmem:[#allocation5 + $0x96c] sm:$0xf0]  ;;  %v13940_v2 = vpack.c.bf16 %v1669_v40, %v1669_v40  ;;  %v1456_v24 = vadd.f32 %v1455_v3, %v1454_v46 }
 0x2cf   : > { %v13932_v14 = vld [vmem:[#allocation5 + $0xa60] sm:$0xf]  ;;  %v13934_v25 = vld [vmem:[#allocation5 + $0xa6c] sm:$0xf0]  ;;  %v939_v62 = vadd.f32 %v907_v9, %v756_v63  ;;  %7134 = vmatpush.bf16.msra.mxu1 %v10794_v13  ;;  %v11050_v17 = vor.u32 %v13884_v0, %v13882_v22  ;;  %v1639_v18 = vadd.f32 %v1638_v4, %v1637_v57  ;;  %v10650_v12 = vor.u32 %v13891_v27, %v13889_v30  ;;  %v4951_v13 = vpop.f32.mrf.mxu0 }
 0x2d0   : > { %v13936_v36 = vld [vmem:[#allocation5 + $0xb60] sm:$0xf]  ;;  %v13938_v54 = vld [vmem:[#allocation5 + $0xb6c] sm:$0xf0]  ;;  %14819 = vst [vmem:[#allocation24_spill] sm:$0xff] %v13940_v2  ;;  %7147 = vmatpush.bf16.msra.mxu2 %v10922_v49  ;;  %v10778_v26 = vor.u32 %v13895_v35, %v13893_v10  ;;  %v10906_v22 = vor.u32 %v13899_v31, %v13897_v23  ;;  %7089 = vmatmul.bf16.vlgmr.msrb.gmra.mxu1 %v13940_v2  ;;  %v14820_v13 = vld [vmem:[#allocation74_spill] sm:$0xff] }
 0x2d1   : > { %v13944_v19 = vld [vmem:[#allocation5 + $0x840] sm:$0xf]  ;;  %v13946_v60 = vld [vmem:[#allocation5 + $0x84c] sm:$0xf0]  ;;  %v1122_v30 = vadd.f32 %v1090_v45, %v939_v62  ;;  %7160 = vmatpush.bf16.msra.mxu3 %v11050_v17  ;;  %v11034_v27 = vor.u32 %v13904_v43, %v13902_v39  ;;  %v10634_v10 = vor.u32 %v13908_v33, %v13906_v48  ;;  %7122 = vmatpush.bf16.msra.mxu0 %v10650_v12  ;;  %v14029_v49 = vld [vmem:[#allocation5 + $0x1e4] sm:$0xf] }
 0x2d2   : > { %v13948_v44 = vld [vmem:[#allocation5 + $0x940] sm:$0xf]  ;;  %v13950_v20 = vld [vmem:[#allocation5 + $0x94c] sm:$0xf0]  ;;  %v10762_v40 = vor.u32 %v13912_v51, %v13910_v21  ;;  %v10890_v39 = vor.u32 %v13916_v61, %v13914_v38  ;;  %v11018_v43 = vor.u32 %v13920_v1, %v13918_v37  ;;  %v10618_v48 = vor.u32 %v13924_v58, %v13922_v8  ;;  %v14017_v37 = vld [vmem:[#allocation5 + $0xe4] sm:$0xf] }
 0x2d3   : > { %v13952_v16 = vld [vmem:[#allocation5 + $0xa40] sm:$0xf]  ;;  %v13954_v6 = vld [vmem:[#allocation5 + $0xa4c] sm:$0xf0]  ;;  %v1305_v45 = vadd.f32 %v1273_v32, %v1122_v30  ;;  %7135 = vmatpush.bf16.msra.mxu1 %v10778_v26  ;;  %v10746_v21 = vor.u32 %v13930_v50, %v13928_v52  ;;  %v10874_v51 = vor.u32 %v13934_v25, %v13932_v14  ;;  %v11002_v38 = vor.u32 %v13938_v54, %v13936_v36  ;;  %v14019_v1 = vld [vmem:[#allocation5 + $0xf0] sm:$0xf0] }
 0x2d4   : > { %v13956_v11 = vld [vmem:[#allocation5 + $0xb40] sm:$0xf]  ;;  %v13958_v47 = vld [vmem:[#allocation5 + $0xb4c] sm:$0xf0]  ;;  %7148 = vmatpush.bf16.msra.mxu2 %v10906_v22  ;;  %v10602_v8 = vor.u32 %v13946_v60, %v13944_v19  ;;  %v10730_v58 = vor.u32 %v13950_v20, %v13948_v44  ;;  %v14031_v52 = vld [vmem:[#allocation5 + $0x1f0] sm:$0xf0] }
 0x2d5   : > { %v13966_v0 = vld [vmem:[#allocation5 + $0x820] sm:$0xf]  ;;  %v13968_v53 = vld [vmem:[#allocation5 + $0x82c] sm:$0xf0]  ;;  %v14033_v50 = vld [vmem:[#allocation5 + $0x2e4] sm:$0xf]  ;;  %v1488_v14 = vadd.f32 %v1456_v24, %v1305_v45  ;;  %7161 = vmatpush.bf16.msra.mxu3 %v11034_v27  ;;  %7123 = vmatpush.bf16.msra.mxu0 %v10634_v10 }
 0x2d6   : > { %v13970_v55 = vld [vmem:[#allocation5 + $0x920] sm:$0xf]  ;;  %v13972_v46 = vld [vmem:[#allocation5 + $0x92c] sm:$0xf0]  ;;  %v14041_v62 = vld [vmem:[#allocation5 + $0x2f0] sm:$0xf0] }
 0x2d7   : > { %v13974_v34 = vld [vmem:[#allocation5 + $0xa20] sm:$0xf]  ;;  %v13976_v63 = vld [vmem:[#allocation5 + $0xa2c] sm:$0xf0]  ;;  %v14043_v17 = vld [vmem:[#allocation5 + $0x3e4] sm:$0xf]  ;;  %v1671_v12 = vadd.f32 %v1639_v18, %v1488_v14  ;;  %7136 = vmatpush.bf16.msra.mxu1 %v10762_v40 }
 0x2d8   : > { %v13983_v35 = vld [vmem:[#allocation5 + $0xb20] sm:$0xf]  ;;  %v13985_v23 = vld [vmem:[#allocation5 + $0xb2c] sm:$0xf0]  ;;  %v14045_v19 = vld [vmem:[#allocation5 + $0x3f0] sm:$0xf0]  ;;  %7149 = vmatpush.bf16.msra.mxu2 %v10890_v39  ;;  %v14072_v39 = vpop.f32.mrf.mxu1 }
 0x2d9   : > { %v13987_v31 = vld [vmem:[#allocation5 + $0x800] sm:$0xf]  ;;  %v13989_v28 = vld [vmem:[#allocation5 + $0x80c] sm:$0xf0]  ;;  %v373_v45 = vrot.slane %v14820_v13, 2  ;;  %v14067_v14 = vpack.c.bf16 %v1671_v12, %v1671_v12  ;;  %7162 = vmatpush.bf16.msra.mxu3 %v11018_v43  ;;  %v14823_v26 = vld [vmem:[#allocation76_spill] sm:$0xff]  ;;  %7124 = vmatpush.bf16.msra.mxu0 %v10618_v48 }
 0x2da   : > { %v13991_v42 = vld [vmem:[#allocation5 + $0x900] sm:$0xf]  ;;  %v13993_v57 = vld [vmem:[#allocation5 + $0x90c] sm:$0xf0]  ;;  %v727_v20 = vrot.slane %v14823_v26, 2  ;;  %v14825_v60 = vld [vmem:[#allocation78_spill] sm:$0xff] }
 0x2db   : > { %v14003_v33 = vld [vmem:[#allocation5 + $0xa00] sm:$0xf]  ;;  %v14005_v9 = vld [vmem:[#allocation5 + $0xa0c] sm:$0xf0]  ;;  %14822 = vst [vmem:[#allocation124_spill] sm:$0xff] %v14067_v14  ;;  %v1093_v30 = vrot.slane %v14825_v60, 2  ;;  %v374_v27 = vadd.f32 %v373_v45, %v14820_v13  ;;  %7115 = vmatmul.bf16.vlgmr.msrb.gmra.mxu3 %v14067_v14  ;;  %7137 = vmatpush.bf16.msra.mxu1 %v10746_v21 }
 0x2dc   : > { %v14007_v3 = vld [vmem:[#allocation5 + $0xb00] sm:$0xf]  ;;  %v14015_v61 = vld [vmem:[#allocation5 + $0xb0c] sm:$0xf0]  ;;  %v14827_v36 = vld [vmem:[#allocation80_spill] sm:$0xff]  ;;  %v728_v43 = vadd.f32 %v727_v20, %v14823_v26  ;;  %7150 = vmatpush.bf16.msra.mxu2 %v10874_v51 }
 0x2dd   : > { %v14821_v18 = vld [vmem:[#allocation75_spill] sm:$0xff]  ;;  %v14824_v22 = vld [vmem:[#allocation77_spill] sm:$0xff]  ;;  %v1459_v25 = vrot.slane %v14827_v36, 2  ;;  %v1094_v4 = vadd.f32 %v1093_v30, %v14825_v60  ;;  %v375_v48 = vrot.slane %v374_v27, 1  ;;  %7163 = vmatpush.bf16.msra.mxu3 %v11002_v38  ;;  %7125 = vmatpush.bf16.msra.mxu0 %v10602_v8 }
 0x2de   : > { %v544_v40 = vrot.slane %v14821_v18, 2  ;;  %v910_v44 = vrot.slane %v14824_v22, 2  ;;  %v14826_v24 = vld [vmem:[#allocation79_spill] sm:$0xff]  ;;  %v14828_v32 = vld [vmem:[#allocation81_spill] sm:$0xff] }
 0x2df   : > { %v1276_v54 = vrot.slane %v14826_v24, 2  ;;  %v1642_v2 = vrot.slane %v14828_v32, 2  ;;  %v1095_v14 = vrot.slane %v1094_v4, 1  ;;  %v376_v20 = vadd.f32 %v375_v48, %v374_v27  ;;  %7138 = vmatpush.bf16.msra.mxu1 %v10730_v58  ;;  %v14833_v27 = vld [vmem:[#allocation84_spill] sm:$0xff] }
 0x2e0   : > { %v545_v10 = vadd.f32 %v544_v40, %v14821_v18  ;;  %v911_v12 = vadd.f32 %v910_v44, %v14824_v22  ;;  %v1460_v18 = vadd.f32 %v1459_v25, %v14827_v36  ;;  %v729_v40 = vrot.slane %v728_v43, 1 }
 0x2e1   : > { %v1277_v45 = vadd.f32 %v1276_v54, %v14826_v24  ;;  %v1643_v21 = vadd.f32 %v1642_v2, %v14828_v32  ;;  %v1096_v30 = vadd.f32 %v1095_v14, %v1094_v4  ;;  %v14829_v54 = vor.u32 %v13954_v6, %v13952_v16  ;;  %v14830_v24 = vld [vmem:[#allocation82_spill] sm:$0xff]  ;;  %v14832_v32 = vld [vmem:[#allocation83_spill] sm:$0xff]  ;;  %v14834_v4 = vld [vmem:[#allocation85_spill] sm:$0xff]  ;;  %v4964_v14 = vpop.f32.mrf.mxu1 }
 0x2e2   : > { %v546_v13 = vrot.slane %v545_v10, 1  ;;  %v912_v15 = vrot.slane %v911_v12, 1  ;;  %v1461_v60 = vrot.slane %v1460_v18, 1  ;;  %v730_v22 = vadd.f32 %v729_v40, %v728_v43  ;;  %v14839_v40 = vld [vmem:[#allocation88_spill] sm:$0xff] }
 0x2e3   : > { %v1278_v26 = vrot.slane %v1277_v45, 1  ;;  %v1644_v7 = vrot.slane %v1643_v21, 1  ;;  %7151 = vmatpush.bf16.msra.mxu2 %v14829_v54  ;;  %v385_v56 = vrot.slane %v14830_v24, 2  ;;  %v14831_v2 = vor.u32 %v13958_v47, %v13956_v11 }
 0x2e4   : > { %v547_v44 = vadd.f32 %v546_v13, %v545_v10  ;;  %v913_v51 = vadd.f32 %v912_v15, %v911_v12  ;;  %v1462_v36 = vadd.f32 %v1461_v60, %v1460_v18  ;;  %v556_v58 = vrot.slane %v14832_v32, 2  ;;  %v14836_v12 = vld [vmem:[#allocation86_spill] sm:$0xff]  ;;  %v14837_v13 = vld [vmem:[#allocation87_spill] sm:$0xff] }
 0x2e5   : > { %v1279_v25 = vadd.f32 %v1278_v26, %v1277_v45  ;;  %7164 = vmatpush.bf16.msra.mxu3 %v14831_v2  ;;  %v1645_v8 = vadd.f32 %v1644_v7, %v1643_v21  ;;  %v739_v15 = vrot.slane %v14833_v27, 2  ;;  %v922_v10 = vrot.slane %v14834_v4, 2 }
 0x2e6   : > { %v574_v38 = vadd.f32 %v547_v44, %v376_v20  ;;  %v14835_v16 = vor.u32 %v13968_v53, %v13966_v0  ;;  %v386_v43 = vadd.f32 %v385_v56, %v14830_v24  ;;  %v1105_v48 = vrot.slane %v14836_v12, 2 }
 0x2e7   : > { %v1288_v11 = vrot.slane %v14837_v13, 2  ;;  %v14838_v7 = vor.u32 %v13972_v46, %v13970_v55  ;;  %v557_v47 = vadd.f32 %v556_v58, %v14832_v32  ;;  %v740_v45 = vadd.f32 %v739_v15, %v14833_v27 }
 0x2e8   : > { %7126 = vmatpush.bf16.msra.mxu0 %v14835_v16  ;;  %v757_v6 = vadd.f32 %v730_v22, %v574_v38  ;;  %v923_v18 = vadd.f32 %v922_v10, %v14834_v4  ;;  %v1471_v0 = vrot.slane %v14839_v40, 2  ;;  %v14840_v53 = vor.u32 %v13976_v63, %v13974_v34  ;;  %v14853_v16 = vld [vmem:[#allocation93_spill] sm:$0xff] }
 0x2e9   : > { %7139 = vmatpush.bf16.msra.mxu1 %v14838_v7  ;;  %v387_v21 = vrot.slane %v386_v43, 1  ;;  %v1106_v20 = vadd.f32 %v1105_v48, %v14836_v12  ;;  %v1289_v44 = vadd.f32 %v1288_v11, %v14837_v13  ;;  %v14841_v55 = vor.u32 %v13985_v23, %v13983_v35 }
 0x2ea   : > { %7152 = vmatpush.bf16.msra.mxu2 %v14840_v53  ;;  %v940_v56 = vadd.f32 %v913_v51, %v757_v6  ;;  %v558_v46 = vrot.slane %v557_v47, 1  ;;  %v741_v26 = vrot.slane %v740_v45, 1  ;;  %v924_v60 = vrot.slane %v923_v18, 1 }
 0x2eb   : > { %7165 = vmatpush.bf16.msra.mxu3 %v14841_v55  ;;  %v1472_v22 = vadd.f32 %v1471_v0, %v14839_v40  ;;  %v14842_v54 = vor.u32 %v13989_v28, %v13987_v31  ;;  %v388_v63 = vadd.f32 %v387_v21, %v386_v43  ;;  %v1107_v51 = vrot.slane %v1106_v20, 1  ;;  %v14854_v43 = vld [vmem:[#allocation94_spill] sm:$0xff]  ;;  %v14162_v40 = vpop.f32.mrf.mxu0  ;;  %v14164_v0 = vpop.f32.mrf.mxu1 }
 0x2ec   : > { %v1123_v34 = vadd.f32 %v1096_v30, %v940_v56  ;;  %v1290_v38 = vrot.slane %v1289_v44, 1  ;;  %v14843_v24 = vor.u32 %v13993_v57, %v13991_v42  ;;  %v14844_v35 = vor.u32 %v14017_v37, %v14019_v1  ;;  %v14847_v57 = vld [vmem:[#allocation90_spill] sm:$0xff] }
 0x2ed   : > { %7127 = vmatpush.bf16.msra.mxu0 %v14842_v54  ;;  %v559_v23 = vadd.f32 %v558_v46, %v557_v47  ;;  %v742_v2 = vadd.f32 %v741_v26, %v740_v45  ;;  %v925_v32 = vadd.f32 %v924_v60, %v923_v18  ;;  %v1473_v58 = vrot.slane %v1472_v22, 1 }
 0x2ee   : > { %7140 = vmatpush.bf16.msra.mxu1 %v14843_v24  ;;  %v14845_v31 = vor.u32 %v14005_v9, %v14003_v33  ;;  %v14846_v28 = vor.u32 %v14029_v49, %v14031_v52  ;;  %v1306_v30 = vadd.f32 %v1279_v25, %v1123_v34  ;;  %v1108_v27 = vadd.f32 %v1107_v51, %v1106_v20  ;;  %v14850_v49 = vld [vmem:[#allocation91_spill] sm:$0xff]  ;;  %v14857_v34 = vld [vmem:[#allocation98_spill] sm:$0xff] }
 0x2ef   : > { %v1291_v42 = vadd.f32 %v1290_v38, %v1289_v44  ;;  %v1654_v15 = vrot.slane %v14847_v57, 2  ;;  %v14848_v37 = vor.u32 %v14015_v61, %v14007_v3  ;;  %v14849_v1 = vor.u32 %v14033_v50, %v14041_v62  ;;  %v14852_v61 = vld [vmem:[#allocation92_spill] sm:$0xff] }
 0x2f0   : > { %7153 = vmatpush.bf16.msra.mxu2 %v14845_v31  ;;  %v576_v4 = vadd.f32 %v559_v23, %v388_v63  ;;  %v1474_v33 = vadd.f32 %v1473_v58, %v1472_v22  ;;  %v14142_v9 = vadd.f32 %v14072_v39, %v13886_v59  ;;  %v379_v52 = vrot.slane %v14850_v49, 2  ;;  %v14855_v59 = vld [vmem:[#allocation95_spill] sm:$0xff]  ;;  %v14856_v22 = vld [vmem:[#allocation96_spill] sm:$0xff] }
 0x2f1   : > { %7172 = vmatpush.bf16.msrb.mxu0 %v14844_v35  ;;  %7166 = vmatpush.bf16.msra.mxu3 %v14848_v37  ;;  %v14851_v25 = vor.u32 %v14043_v17, %v14045_v19  ;;  %v1489_v10 = vadd.f32 %v1462_v36, %v1306_v30  ;;  %v1655_v3 = vadd.f32 %v1654_v15, %v14847_v57  ;;  %v550_v14 = vrot.slane %v14852_v61, 2  ;;  %v14156_v19 = vpop.f32.mrf.mxu2  ;;  %v14158_v36 = vpop.f32.mrf.mxu3  ;;  %v14858_v35 = vld [vmem:[#allocation99_spill] sm:$0xff]  ;;  %v14859_v31 = vld [vmem:[#allocation100_spill] sm:$0xff]  ;;  %v14860_v57 = vld [vmem:[#allocation101_spill] sm:$0xff] }
 0x2f2   : > { %7185 = vmatpush.bf16.msrb.mxu1 %v14846_v28  ;;  %v733_v50 = vrot.slane %v14853_v16, 2  ;;  %v759_v62 = vadd.f32 %v742_v2, %v576_v4  ;;  %v380_v6 = vadd.f32 %v379_v52, %v14850_v49  ;;  %v916_v12 = vrot.slane %v14854_v43, 2  ;;  %v14861_v37 = vld [vmem:[#allocation102_spill] sm:$0xff] }
 0x2f3   : > { %v1099_v39 = vrot.slane %v14855_v59, 2  ;;  %v1672_v48 = vadd.f32 %v1645_v8, %v1489_v10  ;;  %v1656_v13 = vrot.slane %v1655_v3, 1  ;;  %v551_v11 = vadd.f32 %v550_v14, %v14852_v61 }
 0x2f4   : > { %7198 = vmatpush.bf16.msrb.mxu2 %v14849_v1  ;;  %v734_v17 = vadd.f32 %v733_v50, %v14853_v16  ;;  %v942_v7 = vadd.f32 %v925_v32, %v759_v62  ;;  %v381_v47 = vrot.slane %v380_v6, 1  ;;  %v917_v45 = vadd.f32 %v916_v12, %v14854_v43  ;;  %v5016_v50 = vpop.f32.mrf.mxu1 }
 0x2f5   : > { %7211 = vmatpush.bf16.msrb.mxu3 %v14851_v25  ;;  %v1100_v18 = vadd.f32 %v1099_v39, %v14855_v59  ;;  %v14166_v8 = vpack.c.bf16 %v1672_v48, %v1672_v48  ;;  %v1657_v53 = vadd.f32 %v1656_v13, %v1655_v3  ;;  %v552_v56 = vrot.slane %v551_v11, 1 }
 0x2f6   : > { %v735_v21 = vrot.slane %v734_v17, 1  ;;  %v1125_v20 = vadd.f32 %v1108_v27, %v942_v7  ;;  %v382_v44 = vadd.f32 %v381_v47, %v380_v6  ;;  %v918_v55 = vrot.slane %v917_v45, 1  ;;  %v14862_v7 = vld [vmem:[#allocation103_spill] sm:$0xff] }
 0x2f7   : > { %v1101_v46 = vrot.slane %v1100_v18, 1  ;;  %7128 = vmatmul.bf16.vlgmr.msra.gmra.mxu0 %v14166_v8  ;;  %v553_v26 = vadd.f32 %v552_v56, %v551_v11  ;;  %v1282_v54 = vrot.slane %v14856_v22, 2  ;;  %v1465_v63 = vrot.slane %v14857_v34, 2  ;;  %v9643_v56 = vld [vmem:[#allocation5 + $0xd0] sm:$0xf0] }
 0x2f8   : > { %v736_v60 = vadd.f32 %v735_v21, %v734_v17  ;;  %v1308_v51 = vadd.f32 %v1291_v42, %v1125_v20  ;;  %v919_v38 = vadd.f32 %v918_v55, %v917_v45  ;;  %v1648_v23 = vrot.slane %v14858_v35, 2  ;;  %v14863_v45 = vld [vmem:[#allocation104_spill] sm:$0xff] }
 0x2f9   : > { %v1102_v24 = vadd.f32 %v1101_v46, %v1100_v18  ;;  %v575_v2 = vadd.f32 %v553_v26, %v382_v44  ;;  %v1283_v32 = vadd.f32 %v1282_v54, %v14856_v22  ;;  %v1466_v58 = vadd.f32 %v1465_v63, %v14857_v34  ;;  %v4977_v25 = vpop.f32.mrf.mxu2  ;;  %v4990_v10 = vpop.f32.mrf.mxu3  ;;  %v14864_v44 = vld [vmem:[#allocation105_spill] sm:$0xff]  ;;  %v14865_v46 = vld [vmem:[#allocation107_spill] sm:$0xff]  ;;  %v14866_v63 = vld [vmem:[#allocation108_spill] sm:$0xff] }
 0x2fa   : > { %v391_v28 = vrot.slane %v14859_v31, 2  ;;  %v1491_v30 = vadd.f32 %v1474_v33, %v1308_v51  ;;  %v1649_v27 = vadd.f32 %v1648_v23, %v14858_v35  ;;  %v562_v15 = vrot.slane %v14860_v57, 2  ;;  %v5003_v33 = vpop.f32.mrf.mxu0 }
 0x2fb   : > { %v745_v1 = vrot.slane %v14861_v37, 2  ;;  %v758_v4 = vadd.f32 %v736_v60, %v575_v2  ;;  %v1284_v42 = vrot.slane %v1283_v32, 1  ;;  %v1467_v49 = vrot.slane %v1466_v58, 1  ;;  %v11137_v60 = vld [vmem:[#allocation5 + $0x1c4] sm:$0xf] }
 0x2fc   : > { %v392_v52 = vadd.f32 %v391_v28, %v14859_v31  ;;  %v1674_v3 = vadd.f32 %v1657_v53, %v1491_v30  ;;  %v1650_v61 = vrot.slane %v1649_v27, 1  ;;  %v563_v14 = vadd.f32 %v562_v15, %v14860_v57  ;;  %v11105_v53 = vld [vmem:[#allocation5 + $0xc4] sm:$0xf]  ;;  %v10027_v28 = vld [vmem:[#allocation5 + $0x3d0] sm:$0xf0] }
 0x2fd   : > { %v746_v16 = vadd.f32 %v745_v1, %v14861_v37  ;;  %v941_v62 = vadd.f32 %v919_v38, %v758_v4  ;;  %v1285_v6 = vadd.f32 %v1284_v42, %v1283_v32  ;;  %v1468_v43 = vadd.f32 %v1467_v49, %v1466_v58  ;;  %v9771_v38 = vld [vmem:[#allocation5 + $0x1d0] sm:$0xf0]  ;;  %v11201_v31 = vld [vmem:[#allocation5 + $0x3c4] sm:$0xf] }
 0x2fe   : > { %v393_v12 = vrot.slane %v392_v52, 1  ;;  %v14181_v59 = vpack.c.bf16 %v1674_v3, %v1674_v3  ;;  %v1651_v39 = vadd.f32 %v1650_v61, %v1649_v27  ;;  %v564_v48 = vrot.slane %v563_v14, 1  ;;  %v9899_v58 = vld [vmem:[#allocation5 + $0x2d0] sm:$0xf0]  ;;  %v11101_v37 = vld [vmem:[#allocation5 + $0xa4] sm:$0xf] }
 0x2ff   : > { %v747_v13 = vrot.slane %v746_v16, 1  ;;  %v1124_v11 = vadd.f32 %v1102_v24, %v941_v62  ;;  %v928_v47 = vrot.slane %v14862_v7, 2  ;;  %v1111_v18 = vrot.slane %v14863_v45, 2  ;;  %v11169_v24 = vld [vmem:[#allocation5 + $0x2c4] sm:$0xf] }
 0x300   : > { %v394_v17 = vadd.f32 %v393_v12, %v392_v52  ;;  %7154 = vmatmul.bf16.vlgmr.msra.gmra.mxu2 %v14181_v59  ;;  %v565_v21 = vadd.f32 %v564_v48, %v563_v14  ;;  %v1294_v55 = vrot.slane %v14864_v44, 2  ;;  %v1477_v26 = vrot.slane %v14865_v46, 2  ;;  %v9627_v1 = vld [vmem:[#allocation5 + $0xb0] sm:$0xf0]  ;;  %v11133_v4 = vld [vmem:[#allocation5 + $0x1a4] sm:$0xf] }
 0x301   : > { %v748_v20 = vadd.f32 %v747_v13, %v746_v16  ;;  %v1307_v22 = vadd.f32 %v1285_v6, %v1124_v11  ;;  %v929_v54 = vadd.f32 %v928_v47, %v14862_v7  ;;  %v1112_v34 = vadd.f32 %v1111_v18, %v14863_v45  ;;  %v14194_v42 = vpop.f32.mrf.mxu2  ;;  %v14196_v49 = vpop.f32.mrf.mxu3  ;;  %v9755_v3 = vld [vmem:[#allocation5 + $0x1b0] sm:$0xf0]  ;;  %v11165_v61 = vld [vmem:[#allocation5 + $0x2a4] sm:$0xf] }
 0x302   : > { %v1660_v51 = vrot.slane %v14866_v63, 2  ;;  %v577_v35 = vadd.f32 %v565_v21, %v394_v17  ;;  %v1295_v23 = vadd.f32 %v1294_v55, %v14864_v44  ;;  %v1478_v2 = vadd.f32 %v1477_v26, %v14865_v46  ;;  %v9883_v62 = vld [vmem:[#allocation5 + $0x2b0] sm:$0xf0]  ;;  %v11197_v6 = vld [vmem:[#allocation5 + $0x3a4] sm:$0xf] }
 0x303   : > { %v9646_v32 = vor.u32 %v11105_v53, %v9643_v56  ;;  %v1490_v30 = vadd.f32 %v1468_v43, %v1307_v22  ;;  %v930_v27 = vrot.slane %v929_v54, 1  ;;  %v1113_v57 = vrot.slane %v1112_v34, 1  ;;  %v10011_v13 = vld [vmem:[#allocation5 + $0x3b0] sm:$0xf0]  ;;  %v11097_v11 = vld [vmem:[#allocation5 + $0x84] sm:$0xf] }
 0x304   : > { %v1661_v15 = vadd.f32 %v1660_v51, %v14866_v63  ;;  %v760_v52 = vadd.f32 %v748_v20, %v577_v35  ;;  %v1296_v25 = vrot.slane %v1295_v23, 1  ;;  %v9774_v10 = vor.u32 %v11137_v60, %v9771_v38  ;;  %v9611_v18 = vld [vmem:[#allocation5 + $0x90] sm:$0xf0]  ;;  %v11161_v44 = vld [vmem:[#allocation5 + $0x284] sm:$0xf] }
 0x305   : > { %7173 = vmatpush.bf16.msrb.mxu0 %v9646_v32  ;;  %v1673_v14 = vadd.f32 %v1651_v39, %v1490_v30  ;;  %v931_v16 = vadd.f32 %v930_v27, %v929_v54  ;;  %v1114_v33 = vadd.f32 %v1113_v57, %v1112_v34  ;;  %v1479_v50 = vrot.slane %v1478_v2, 1  ;;  %v11129_v39 = vld [vmem:[#allocation5 + $0x184] sm:$0xf]  ;;  %v9739_v53 = vld [vmem:[#allocation5 + $0x190] sm:$0xf0] }
 0x306   : > { %v1662_v43 = vrot.slane %v1661_v15, 1  ;;  %7186 = vmatpush.bf16.msrb.mxu1 %v9774_v10  ;;  %v9902_v12 = vor.u32 %v11169_v24, %v9899_v58  ;;  %v10030_v48 = vor.u32 %v11201_v31, %v10027_v28  ;;  %v1297_v47 = vadd.f32 %v1296_v25, %v1295_v23  ;;  %v9867_v22 = vld [vmem:[#allocation5 + $0x290] sm:$0xf0]  ;;  %v11193_v54 = vld [vmem:[#allocation5 + $0x384] sm:$0xf] }
 0x307   : > { %v14198_v17 = vpack.c.bf16 %v1673_v14, %v1673_v14  ;;  %v943_v7 = vadd.f32 %v931_v16, %v760_v52  ;;  %v4976_v45 = vadd.f32 %v14156_v19, %v14142_v9  ;;  %v9630_v56 = vor.u32 %v11101_v37, %v9627_v1  ;;  %v9995_v34 = vld [vmem:[#allocation5 + $0x390] sm:$0xf0]  ;;  %v14204_v9 = vpop.f32.mrf.mxu0  ;;  %v11093_v51 = vld [vmem:[#allocation5 + $0x64] sm:$0xf] }
 0x308   : > { %7199 = vmatpush.bf16.msrb.mxu2 %v9902_v12  ;;  %7212 = vmatpush.bf16.msrb.mxu3 %v10030_v48  ;;  %v9758_v21 = vor.u32 %v11133_v4, %v9755_v3  ;;  %v9886_v20 = vor.u32 %v11165_v61, %v9883_v62  ;;  %v1480_v46 = vadd.f32 %v1479_v50, %v1478_v2  ;;  %v9595_v35 = vld [vmem:[#allocation5 + $0x70] sm:$0xf0]  ;;  %v11125_v23 = vld [vmem:[#allocation5 + $0x164] sm:$0xf]  ;;  %v5066_v4 = vpop.f32.mrf.mxu1 }
 0x309   : > { %7141 = vmatmul.bf16.vlgmr.msra.gmra.mxu1 %v14198_v17  ;;  %v1126_v55 = vadd.f32 %v1114_v33, %v943_v7  ;;  %v4989_v26 = vadd.f32 %v14158_v36, %v4976_v45  ;;  %v10014_v60 = vor.u32 %v11197_v6, %v10011_v13  ;;  %7174 = vmatpush.bf16.msrb.mxu0 %v9630_v56  ;;  %v9723_v32 = vld [vmem:[#allocation5 + $0x170] sm:$0xf0]  ;;  %v5029_v58 = vpop.f32.mrf.mxu2  ;;  %v5042_v2 = vpop.f32.mrf.mxu3  ;;  %v11157_v28 = vld [vmem:[#allocation5 + $0x264] sm:$0xf] }
 0x30a   : > { %7187 = vmatpush.bf16.msrb.mxu1 %v9758_v21  ;;  %v9614_v19 = vor.u32 %v11097_v11, %v9611_v18  ;;  %v9742_v63 = vor.u32 %v11129_v39, %v9739_v53  ;;  %v1663_v24 = vadd.f32 %v1662_v43, %v1661_v15  ;;  %v9870_v36 = vor.u32 %v11161_v44, %v9867_v22  ;;  %v9851_v57 = vld [vmem:[#allocation5 + $0x270] sm:$0xf0]  ;;  %v11189_v37 = vld [vmem:[#allocation5 + $0x364] sm:$0xf] }
 0x30b   : > { %v1309_v38 = vadd.f32 %v1297_v47, %v1126_v55  ;;  %v9998_v31 = vor.u32 %v11193_v54, %v9995_v34  ;;  %v5002_v30 = vadd.f32 %v14162_v40, %v4989_v26  ;;  %v9979_v1 = vld [vmem:[#allocation5 + $0x370] sm:$0xf0]  ;;  %v9598_v15 = vor.u32 %v11093_v51, %v9595_v35  ;;  %v11089_v10 = vld [vmem:[#allocation5 + $0x44] sm:$0xf] }
 0x30c   : > { %7200 = vmatpush.bf16.msrb.mxu2 %v9886_v20  ;;  %7213 = vmatpush.bf16.msrb.mxu3 %v10014_v60  ;;  %v9726_v52 = vor.u32 %v11125_v23, %v9723_v32  ;;  %v9579_v61 = vld [vmem:[#allocation5 + $0x50] sm:$0xf0]  ;;  %v11121_v14 = vld [vmem:[#allocation5 + $0x144] sm:$0xf]  ;;  %v9854_v33 = vor.u32 %v11157_v28, %v9851_v57  ;;  %v9982_v40 = vor.u32 %v11189_v37, %v9979_v1 }
 0x30d   : > { %v1492_v27 = vadd.f32 %v1480_v46, %v1309_v38  ;;  %7175 = vmatpush.bf16.msrb.mxu0 %v9614_v19  ;;  %v5015_v25 = vadd.f32 %v14164_v0, %v5002_v30  ;;  %v9707_v16 = vld [vmem:[#allocation5 + $0x150] sm:$0xf0]  ;;  %v11153_v50 = vld [vmem:[#allocation5 + $0x244] sm:$0xf]  ;;  %v9582_v0 = vor.u32 %v11089_v10, %v9579_v61 }
 0x30e   : > { %7188 = vmatpush.bf16.msrb.mxu1 %v9742_v63  ;;  %v9835_v43 = vld [vmem:[#allocation5 + $0x250] sm:$0xf0]  ;;  %v11185_v12 = vld [vmem:[#allocation5 + $0x344] sm:$0xf]  ;;  %v9710_v11 = vor.u32 %v11121_v14, %v9707_v16 }
 0x30f   : > { %v1675_v3 = vadd.f32 %v1663_v24, %v1492_v27  ;;  %v5028_v62 = vadd.f32 %v14194_v42, %v5015_v25  ;;  %v9963_v48 = vld [vmem:[#allocation5 + $0x350] sm:$0xf0]  ;;  %v5055_v13 = vpop.f32.mrf.mxu0  ;;  %v11085_v47 = vld [vmem:[#allocation5 + $0x24] sm:$0xf]  ;;  %v9838_v56 = vor.u32 %v11153_v50, %v9835_v43 }
 0x310   : > { %7201 = vmatpush.bf16.msrb.mxu2 %v9870_v36  ;;  %7214 = vmatpush.bf16.msrb.mxu3 %v9998_v31  ;;  %v9563_v45 = vld [vmem:[#allocation5 + $0x30] sm:$0xf0]  ;;  %v11117_v18 = vld [vmem:[#allocation5 + $0x124] sm:$0xf]  ;;  %v9966_v21 = vor.u32 %v11185_v12, %v9963_v48 }
 0x311   : > { %v14209_v6 = vpack.c.bf16 %v1675_v3, %v1675_v3  ;;  %7176 = vmatpush.bf16.msrb.mxu0 %v9598_v15  ;;  %v5041_v7 = vadd.f32 %v14196_v49, %v5028_v62  ;;  %v9691_v39 = vld [vmem:[#allocation5 + $0x130] sm:$0xf0]  ;;  %v5079_v53 = vpop.f32.mrf.mxu2  ;;  %v5092_v42 = vpop.f32.mrf.mxu3  ;;  %v11149_v20 = vld [vmem:[#allocation5 + $0x224] sm:$0xf]  ;;  %v9566_v22 = vor.u32 %v11085_v47, %v9563_v45 }
 0x312   : > { %7189 = vmatpush.bf16.msrb.mxu1 %v9726_v52  ;;  %v9819_v44 = vld [vmem:[#allocation5 + $0x230] sm:$0xf0]  ;;  %v11181_v55 = vld [vmem:[#allocation5 + $0x324] sm:$0xf]  ;;  %v5068_v49 = vpop.f32.mrf.mxu1  ;;  %v9694_v54 = vor.u32 %v11117_v18, %v9691_v39 }
 0x313   : > { %7167 = vmatmul.bf16.vlgmr.msra.gmra.mxu3 %v14209_v6  ;;  %v9947_v46 = vld [vmem:[#allocation5 + $0x330] sm:$0xf0]  ;;  %v11081_v26 = vld [vmem:[#allocation5 + $0x4] sm:$0xf]  ;;  %v5054_v60 = vadd.f32 %v14204_v9, %v5041_v7  ;;  %v9822_v23 = vor.u32 %v11149_v20, %v9819_v44 }
 0x314   : > { %7202 = vmatpush.bf16.msrb.mxu2 %v9854_v33  ;;  %7215 = vmatpush.bf16.msrb.mxu3 %v9982_v40  ;;  %v9547_v34 = vld [vmem:[#allocation5 + $0x10] sm:$0xf0]  ;;  %v11113_v19 = vld [vmem:[#allocation5 + $0x104] sm:$0xf]  ;;  %v9950_v32 = vor.u32 %v11181_v55, %v9947_v46 }
 0x315   : > { %7177 = vmatpush.bf16.msrb.mxu0 %v9582_v0  ;;  %v9675_v63 = vld [vmem:[#allocation5 + $0x110] sm:$0xf0]  ;;  %v11145_v51 = vld [vmem:[#allocation5 + $0x204] sm:$0xf]  ;;  %v5067_v35 = vadd.f32 %v5066_v4, %v5054_v60  ;;  %v9550_v27 = vor.u32 %v11081_v26, %v9547_v34 }
 0x316   : > { %7190 = vmatpush.bf16.msrb.mxu1 %v9710_v11  ;;  %v9803_v38 = vld [vmem:[#allocation5 + $0x210] sm:$0xf0]  ;;  %v11237_v24 = vld [vmem:[#allocation5 + $0x4e4] sm:$0xf]  ;;  %v9678_v57 = vor.u32 %v11113_v19, %v9675_v63 }
 0x317   : > { %v10171_v58 = vld [vmem:[#allocation5 + $0x4f0] sm:$0xf0]  ;;  %v11269_v2 = vld [vmem:[#allocation5 + $0x5e4] sm:$0xf]  ;;  %v5080_v30 = vadd.f32 %v5079_v53, %v5067_v35  ;;  %v9806_v61 = vor.u32 %v11145_v51, %v9803_v38  ;;  %v14220_v35 = vpop.f32.mrf.mxu0 }
 0x318   : > { %7203 = vmatpush.bf16.msrb.mxu2 %v9838_v56  ;;  %7216 = vmatpush.bf16.msrb.mxu3 %v9966_v21  ;;  %v10299_v36 = vld [vmem:[#allocation5 + $0x5f0] sm:$0xf0]  ;;  %v11177_v9 = vld [vmem:[#allocation5 + $0x304] sm:$0xf]  ;;  %v10174_v52 = vor.u32 %v11237_v24, %v10171_v58 }
 0x319   : > { %v9931_v31 = vld [vmem:[#allocation5 + $0x310] sm:$0xf0]  ;;  %v11301_v28 = vld [vmem:[#allocation5 + $0x6e4] sm:$0xf]  ;;  %7178 = vmatpush.bf16.msrb.mxu0 %v9566_v22  ;;  %v10302_v4 = vor.u32 %v11269_v2, %v10299_v36  ;;  %v14214_v25 = vadd.f32 %v5092_v42, %v5080_v30  ;;  %v5081_v10 = vpop.f32.mrf.mxu2  ;;  %v5094_v3 = vpop.f32.mrf.mxu3 }
 0x31a   : > { %7191 = vmatpush.bf16.msrb.mxu1 %v9694_v54  ;;  %v10427_v37 = vld [vmem:[#allocation5 + $0x6f0] sm:$0xf0]  ;;  %v11333_v1 = vld [vmem:[#allocation5 + $0x7e4] sm:$0xf]  ;;  %v9934_v14 = vor.u32 %v11177_v9, %v9931_v31 }
 0x31b   : > { %v10555_v15 = vld [vmem:[#allocation5 + $0x7f0] sm:$0xf0]  ;;  %v11233_v16 = vld [vmem:[#allocation5 + $0x4c4] sm:$0xf]  ;;  %v10430_v40 = vor.u32 %v11301_v28, %v10427_v37 }
 0x31c   : > { %7204 = vmatpush.bf16.msrb.mxu2 %v9822_v23  ;;  %7217 = vmatpush.bf16.msrb.mxu3 %v9950_v32  ;;  %v10155_v33 = vld [vmem:[#allocation5 + $0x4d0] sm:$0xf0]  ;;  %v10558_v50 = vor.u32 %v11333_v1, %v10555_v15  ;;  %v11265_v62 = vld [vmem:[#allocation5 + $0x5c4] sm:$0xf]  ;;  %v14222_v1 = vpop.f32.mrf.mxu1 }
 0x31d   : > { %v10283_v43 = vld [vmem:[#allocation5 + $0x5d0] sm:$0xf0]  ;;  %v11297_v12 = vld [vmem:[#allocation5 + $0x6c4] sm:$0xf]  ;;  %7179 = vmatpush.bf16.msrb.mxu0 %v9550_v27  ;;  %v10158_v11 = vor.u32 %v11233_v16, %v10155_v33 }
 0x31e   : > { %7192 = vmatpush.bf16.msrb.mxu1 %v9678_v57  ;;  %v10411_v48 = vld [vmem:[#allocation5 + $0x6d0] sm:$0xf0]  ;;  %v11329_v13 = vld [vmem:[#allocation5 + $0x7c4] sm:$0xf]  ;;  %v10286_v7 = vor.u32 %v11265_v62, %v10283_v43 }
 0x31f   : > { %v10539_v0 = vld [vmem:[#allocation5 + $0x7d0] sm:$0xf0]  ;;  %v11229_v47 = vld [vmem:[#allocation5 + $0x4a4] sm:$0xf]  ;;  %v10414_v18 = vor.u32 %v11297_v12, %v10411_v48  ;;  %v7027_v12 = vpop.f32.mrf.mxu0 }
 0x320   : > { %7205 = vmatpush.bf16.msrb.mxu2 %v9806_v61  ;;  %7218 = vmatpush.bf16.msrb.mxu3 %v9934_v14  ;;  %v10139_v45 = vld [vmem:[#allocation5 + $0x4b0] sm:$0xf0]  ;;  %v10542_v39 = vor.u32 %v11329_v13, %v10539_v0  ;;  %v11261_v53 = vld [vmem:[#allocation5 + $0x5a4] sm:$0xf] }
 0x321   : > { %7224 = vmatpush.bf16.msra.mxu0 %v10174_v52  ;;  %v10267_v42 = vld [vmem:[#allocation5 + $0x5b0] sm:$0xf0]  ;;  %v11293_v56 = vld [vmem:[#allocation5 + $0x6a4] sm:$0xf]  ;;  %7193 = vmatmul.bf16.vlgmr.msrb.gmra.mxu1 %v13615_v5  ;;  %v10142_v46 = vor.u32 %v11229_v47, %v10139_v45  ;;  %v14224_v43 = vpop.f32.mrf.mxu2 }
 0x322   : > { %7237 = vmatpush.bf16.msra.mxu1 %v10302_v4  ;;  %7180 = vmatmul.bf16.vlgmr.msrb.gmra.mxu0 %v13454_v41  ;;  %v10395_v21 = vld [vmem:[#allocation5 + $0x6b0] sm:$0xf0]  ;;  %v11325_v20 = vld [vmem:[#allocation5 + $0x7a4] sm:$0xf]  ;;  %v10270_v26 = vor.u32 %v11261_v53, %v10267_v42 }
 0x323   : > { %v10523_v44 = vld [vmem:[#allocation5 + $0x7b0] sm:$0xf0]  ;;  %7206 = vmatmul.bf16.vlgmr.msrb.gmra.mxu2 %v13505_v29  ;;  %v14867_v55 = vld [vmem:[#allocation120_spill] sm:$0xff]  ;;  %v10398_v22 = vor.u32 %v11293_v56, %v10395_v21 }
 0x324   : > { %7250 = vmatpush.bf16.msra.mxu2 %v10430_v40  ;;  %7263 = vmatpush.bf16.msra.mxu3 %v10558_v50  ;;  %v11225_v60 = vld [vmem:[#allocation5 + $0x484] sm:$0xf]  ;;  %v10123_v49 = vld [vmem:[#allocation5 + $0x490] sm:$0xf0]  ;;  %v10526_v54 = vor.u32 %v11325_v20, %v10523_v44  ;;  %v7040_v20 = vpop.f32.mrf.mxu1 }
 0x325   : > { %7219 = vmatmul.bf16.vlgmr.msrb.gmra.mxu3 %v14867_v55  ;;  %7225 = vmatpush.bf16.msra.mxu0 %v10158_v11  ;;  %v11257_v34 = vld [vmem:[#allocation5 + $0x584] sm:$0xf]  ;;  %v10251_v19 = vld [vmem:[#allocation5 + $0x590] sm:$0xf0]  ;;  %v10126_v23 = vor.u32 %v11225_v60, %v10123_v49 }
 0x326   : > { %7238 = vmatpush.bf16.msra.mxu1 %v10286_v7  ;;  %v11289_v63 = vld [vmem:[#allocation5 + $0x684] sm:$0xf]  ;;  %v10379_v51 = vld [vmem:[#allocation5 + $0x690] sm:$0xf0]  ;;  %v10254_v32 = vor.u32 %v11257_v34, %v10251_v19 }
 0x327   : > { %v11321_v38 = vld [vmem:[#allocation5 + $0x784] sm:$0xf]  ;;  %v10507_v24 = vld [vmem:[#allocation5 + $0x790] sm:$0xf0]  ;;  %v10382_v36 = vor.u32 %v11289_v63, %v10379_v51 }
 0x328   : > { %7251 = vmatpush.bf16.msra.mxu2 %v10414_v18  ;;  %7264 = vmatpush.bf16.msra.mxu3 %v10542_v39  ;;  %v11221_v58 = vld [vmem:[#allocation5 + $0x464] sm:$0xf]  ;;  %v10107_v2 = vld [vmem:[#allocation5 + $0x470] sm:$0xf0]  ;;  %v10510_v9 = vor.u32 %v11321_v38, %v10507_v24 }
 0x329   : > { %7226 = vmatpush.bf16.msra.mxu0 %v10142_v46  ;;  %v11253_v31 = vld [vmem:[#allocation5 + $0x564] sm:$0xf]  ;;  %v10235_v28 = vld [vmem:[#allocation5 + $0x570] sm:$0xf0]  ;;  %v10110_v15 = vor.u32 %v11221_v58, %v10107_v2 }
 0x32a   : > { %7239 = vmatpush.bf16.msra.mxu1 %v10270_v26  ;;  %v11285_v30 = vld [vmem:[#allocation5 + $0x664] sm:$0xf]  ;;  %v10363_v27 = vld [vmem:[#allocation5 + $0x670] sm:$0xf0]  ;;  %v10238_v52 = vor.u32 %v11253_v31, %v10235_v28 }
 0x32b   : > { %v11317_v57 = vld [vmem:[#allocation5 + $0x764] sm:$0xf]  ;;  %v10491_v37 = vld [vmem:[#allocation5 + $0x770] sm:$0xf0]  ;;  %v10366_v3 = vor.u32 %v11285_v30, %v10363_v27 }
 0x32c   : > { %7252 = vmatpush.bf16.msra.mxu2 %v10398_v22  ;;  %7265 = vmatpush.bf16.msra.mxu3 %v10526_v54  ;;  %v11217_v4 = vld [vmem:[#allocation5 + $0x444] sm:$0xf]  ;;  %v10091_v10 = vld [vmem:[#allocation5 + $0x450] sm:$0xf0]  ;;  %v10494_v61 = vor.u32 %v11317_v57, %v10491_v37  ;;  %v14226_v22 = vpop.f32.mrf.mxu3 }
 0x32d   : > { %7227 = vmatpush.bf16.msra.mxu0 %v10126_v23  ;;  %v11249_v14 = vld [vmem:[#allocation5 + $0x544] sm:$0xf]  ;;  %v10219_v16 = vld [vmem:[#allocation5 + $0x550] sm:$0xf0]  ;;  %v10094_v48 = vor.u32 %v11217_v4, %v10091_v10 }
 0x32e   : > { %7240 = vmatpush.bf16.msra.mxu1 %v10254_v32  ;;  %v11281_v33 = vld [vmem:[#allocation5 + $0x644] sm:$0xf]  ;;  %v10347_v40 = vld [vmem:[#allocation5 + $0x650] sm:$0xf0]  ;;  %v10222_v13 = vor.u32 %v11249_v14, %v10219_v16 }
 0x32f   : > { %v11313_v50 = vld [vmem:[#allocation5 + $0x744] sm:$0xf]  ;;  %v10475_v62 = vld [vmem:[#allocation5 + $0x750] sm:$0xf0]  ;;  %v10350_v7 = vor.u32 %v11281_v33, %v10347_v40 }
 0x330   : > { %7253 = vmatpush.bf16.msra.mxu2 %v10382_v36  ;;  %7266 = vmatpush.bf16.msra.mxu3 %v10510_v9  ;;  %v11213_v0 = vld [vmem:[#allocation5 + $0x424] sm:$0xf]  ;;  %v10075_v11 = vld [vmem:[#allocation5 + $0x430] sm:$0xf0]  ;;  %v10478_v47 = vor.u32 %v11313_v50, %v10475_v62  ;;  %v7053_v36 = vpop.f32.mrf.mxu2 }
 0x331   : > { %7228 = vmatpush.bf16.msra.mxu0 %v10110_v15  ;;  %v11245_v45 = vld [vmem:[#allocation5 + $0x524] sm:$0xf]  ;;  %v10203_v18 = vld [vmem:[#allocation5 + $0x530] sm:$0xf0]  ;;  %v10078_v44 = vor.u32 %v11213_v0, %v10075_v11 }
 0x332   : > { %7241 = vmatpush.bf16.msra.mxu1 %v10238_v52  ;;  %v11277_v39 = vld [vmem:[#allocation5 + $0x624] sm:$0xf]  ;;  %v10331_v53 = vld [vmem:[#allocation5 + $0x630] sm:$0xf0]  ;;  %v10206_v46 = vor.u32 %v11245_v45, %v10203_v18 }
 0x333   : > { %v11309_v42 = vld [vmem:[#allocation5 + $0x724] sm:$0xf]  ;;  %v10459_v56 = vld [vmem:[#allocation5 + $0x730] sm:$0xf0]  ;;  %v10334_v54 = vor.u32 %v11277_v39, %v10331_v53 }
 0x334   : > { %7254 = vmatpush.bf16.msra.mxu2 %v10366_v3  ;;  %7267 = vmatpush.bf16.msra.mxu3 %v10494_v61  ;;  %v11209_v21 = vld [vmem:[#allocation5 + $0x404] sm:$0xf]  ;;  %v10059_v26 = vld [vmem:[#allocation5 + $0x410] sm:$0xf0]  ;;  %v10462_v34 = vor.u32 %v11309_v42, %v10459_v56 }
 0x335   : > { %7229 = vmatpush.bf16.msra.mxu0 %v10094_v48  ;;  %v11241_v60 = vld [vmem:[#allocation5 + $0x504] sm:$0xf]  ;;  %v10187_v49 = vld [vmem:[#allocation5 + $0x510] sm:$0xf0]  ;;  %v10062_v9 = vor.u32 %v11209_v21, %v10059_v26  ;;  %v14870_v21 = vld [vmem:[#allocation121_spill] sm:$0xff] }
 0x336   : > { %7242 = vmatpush.bf16.msra.mxu1 %v10222_v13  ;;  %v11273_v19 = vld [vmem:[#allocation5 + $0x604] sm:$0xf]  ;;  %v10315_v63 = vld [vmem:[#allocation5 + $0x610] sm:$0xf0]  ;;  %v10190_v31 = vor.u32 %v11241_v60, %v10187_v49  ;;  %v7066_v13 = vpop.f32.mrf.mxu3 }
 0x337   : > { %v11305_v51 = vld [vmem:[#allocation5 + $0x704] sm:$0xf]  ;;  %v10443_v38 = vld [vmem:[#allocation5 + $0x710] sm:$0xf0]  ;;  %v10318_v57 = vor.u32 %v11273_v19, %v10315_v63 }
 0x338   : > { %7255 = vmatpush.bf16.msra.mxu2 %v10350_v7  ;;  %7268 = vmatpush.bf16.msra.mxu3 %v10478_v47  ;;  %v11365_v24 = vld [vmem:[#allocation5 + $0x8e4] sm:$0xf]  ;;  %v10683_v23 = vld [vmem:[#allocation5 + $0x8f0] sm:$0xf0]  ;;  %v10446_v37 = vor.u32 %v11305_v51, %v10443_v38 }
 0x339   : > { %v11397_v32 = vld [vmem:[#allocation5 + $0x9e4] sm:$0xf]  ;;  %v10811_v58 = vld [vmem:[#allocation5 + $0x9f0] sm:$0xf0]  ;;  %7230 = vmatpush.bf16.msra.mxu0 %v10078_v44  ;;  %v10686_v15 = vor.u32 %v11365_v24, %v10683_v23 }
 0x33a   : > { %v11429_v2 = vld [vmem:[#allocation5 + $0xae4] sm:$0xf]  ;;  %7243 = vmatpush.bf16.msra.mxu1 %v10206_v46  ;;  %v10939_v28 = vld [vmem:[#allocation5 + $0xaf0] sm:$0xf0]  ;;  %v10814_v52 = vor.u32 %v11397_v32, %v10811_v58 }
 0x33b   : > { %v11461_v30 = vld [vmem:[#allocation5 + $0xbe4] sm:$0xf]  ;;  %v11067_v27 = vld [vmem:[#allocation5 + $0xbf0] sm:$0xf0]  ;;  %v10942_v14 = vor.u32 %v11429_v2, %v10939_v28 }
 0x33c   : > { %7256 = vmatpush.bf16.msra.mxu2 %v10334_v54  ;;  %7269 = vmatpush.bf16.msra.mxu3 %v10462_v34  ;;  %v11361_v4 = vld [vmem:[#allocation5 + $0x8c4] sm:$0xf]  ;;  %v10667_v10 = vld [vmem:[#allocation5 + $0x8d0] sm:$0xf0]  ;;  %v11070_v16 = vor.u32 %v11461_v30, %v11067_v27 }
 0x33d   : > { %v14868_v3 = vld [vmem:[#allocation110_spill] sm:$0xff]  ;;  %v11393_v33 = vld [vmem:[#allocation5 + $0x9c4] sm:$0xf]  ;;  %7231 = vmatpush.bf16.msra.mxu0 %v10062_v9  ;;  %v10670_v0 = vor.u32 %v11361_v4, %v10667_v10 }
 0x33e   : > { %v7026_v61 = vadd.f32 %v14220_v35, %v14868_v3  ;;  %v10795_v40 = vld [vmem:[#allocation5 + $0x9d0] sm:$0xf0]  ;;  %v11425_v50 = vld [vmem:[#allocation5 + $0xac4] sm:$0xf]  ;;  %7244 = vmatpush.bf16.msra.mxu1 %v10190_v31  ;;  %v7077_v36 = vpop.f32.mrf.mxu0 }
 0x33f   : > { %v10923_v62 = vld [vmem:[#allocation5 + $0xad0] sm:$0xf0]  ;;  %v11457_v12 = vld [vmem:[#allocation5 + $0xbc4] sm:$0xf]  ;;  %v10798_v11 = vor.u32 %v11393_v33, %v10795_v40 }
 0x340   : > { %v11051_v48 = vld [vmem:[#allocation5 + $0xbd0] sm:$0xf0]  ;;  %7257 = vmatpush.bf16.msra.mxu2 %v10318_v57  ;;  %7270 = vmatpush.bf16.msra.mxu3 %v10446_v37  ;;  %v11357_v7 = vld [vmem:[#allocation5 + $0x8a4] sm:$0xf]  ;;  %v7039_v35 = vadd.f32 %v14222_v1, %v7026_v61  ;;  %v10926_v45 = vor.u32 %v11425_v50, %v10923_v62 }
 0x341   : > { %7276 = vmatpush.bf16.msrb.mxu0 %v10686_v15  ;;  %v10651_v47 = vld [vmem:[#allocation5 + $0x8b0] sm:$0xf0]  ;;  %v11054_v18 = vor.u32 %v11457_v12, %v11051_v48  ;;  %v11389_v39 = vld [vmem:[#allocation5 + $0x9a4] sm:$0xf] }
 0x342   : > { %7289 = vmatpush.bf16.msrb.mxu1 %v10814_v52  ;;  %v10779_v53 = vld [vmem:[#allocation5 + $0x9b0] sm:$0xf0]  ;;  %v11421_v42 = vld [vmem:[#allocation5 + $0xaa4] sm:$0xf]  ;;  %v7052_v26 = vadd.f32 %v14224_v43, %v7039_v35  ;;  %v10654_v1 = vor.u32 %v11357_v7, %v10651_v47 }
 0x343   : > { %v14869_v56 = vld [vmem:[#allocation122_spill] sm:$0xff]  ;;  %7258 = vmatmul.bf16.vlgmr.msra.gmra.mxu2 %v14870_v21  ;;  %v11453_v44 = vld [vmem:[#allocation5 + $0xba4] sm:$0xf]  ;;  %v10782_v54 = vor.u32 %v11389_v39, %v10779_v53 }
 0x344   : > { %7302 = vmatpush.bf16.msrb.mxu2 %v10942_v14  ;;  %7315 = vmatpush.bf16.msrb.mxu3 %v11070_v16  ;;  %v10907_v20 = vld [vmem:[#allocation5 + $0xab0] sm:$0xf0]  ;;  %v14871_v60 = vld [vmem:[#allocation24_spill] sm:$0xff]  ;;  %v7065_v2 = vadd.f32 %v14226_v22, %v7052_v26 }
 0x345   : > { %7232 = vmatmul.bf16.vlgmr.msra.gmra.mxu0 %v14869_v56  ;;  %v11035_v46 = vld [vmem:[#allocation5 + $0xbb0] sm:$0xf0]  ;;  %7245 = vmatmul.bf16.vlgmr.msra.gmra.mxu1 %v14871_v60  ;;  %v14872_v49 = vld [vmem:[#allocation124_spill] sm:$0xff]  ;;  %v10910_v63 = vor.u32 %v11421_v42, %v10907_v20 }
 0x346   : > { %7271 = vmatmul.bf16.vlgmr.msra.gmra.mxu3 %v14872_v49  ;;  %7277 = vmatpush.bf16.msrb.mxu0 %v10670_v0  ;;  %v11353_v34 = vld [vmem:[#allocation5 + $0x884] sm:$0xf]  ;;  %v10635_v19 = vld [vmem:[#allocation5 + $0x890] sm:$0xf0]  ;;  %v11038_v51 = vor.u32 %v11453_v44, %v11035_v46  ;;  %v14237_v27 = vadd.f32 %v7077_v36, %v7065_v2  ;;  %v7079_v7 = vpop.f32.mrf.mxu0 }
 0x347   : > { %7290 = vmatpush.bf16.msrb.mxu1 %v10798_v11  ;;  %v11385_v38 = vld [vmem:[#allocation5 + $0x984] sm:$0xf]  ;;  %v10763_v24 = vld [vmem:[#allocation5 + $0x990] sm:$0xf0]  ;;  %v10638_v9 = vor.u32 %v11353_v34, %v10635_v19  ;;  %v11172_v7 = vld [vmem:[#allocation5 + $0x2d4] sm:$0xf0] }
 0x348   : > { %7303 = vmatpush.bf16.msrb.mxu2 %v10926_v45  ;;  %7316 = vmatpush.bf16.msrb.mxu3 %v11054_v18  ;;  %v11417_v23 = vld [vmem:[#allocation5 + $0xa84] sm:$0xf]  ;;  %v10891_v32 = vld [vmem:[#allocation5 + $0xa90] sm:$0xf0]  ;;  %v10766_v31 = vor.u32 %v11385_v38, %v10763_v24 }
 0x349   : > { %v11449_v58 = vld [vmem:[#allocation5 + $0xb84] sm:$0xf]  ;;  %v11019_v43 = vld [vmem:[#allocation5 + $0xb90] sm:$0xf0]  ;;  %v10894_v57 = vor.u32 %v11417_v23, %v10891_v32 }
 0x34a   : > { %7278 = vmatpush.bf16.msrb.mxu0 %v10654_v1  ;;  %v11349_v28 = vld [vmem:[#allocation5 + $0x864] sm:$0xf]  ;;  %v10619_v30 = vld [vmem:[#allocation5 + $0x870] sm:$0xf0]  ;;  %v11022_v37 = vor.u32 %v11449_v58, %v11019_v43 }
 0x34b   : > { %7291 = vmatpush.bf16.msrb.mxu1 %v10782_v54  ;;  %v11381_v15 = vld [vmem:[#allocation5 + $0x964] sm:$0xf]  ;;  %v10747_v52 = vld [vmem:[#allocation5 + $0x970] sm:$0xf0]  ;;  %v10622_v22 = vor.u32 %v11349_v28, %v10619_v30  ;;  %v7103_v2 = vpop.f32.mrf.mxu2  ;;  %v9793_v28 = vld [vmem:[#allocation5 + $0x1e8] sm:$0xf] }
 0x34c   : > { %7304 = vmatpush.bf16.msrb.mxu2 %v10910_v63  ;;  %7317 = vmatpush.bf16.msrb.mxu3 %v11038_v51  ;;  %v11413_v4 = vld [vmem:[#allocation5 + $0xa64] sm:$0xf]  ;;  %v10875_v10 = vld [vmem:[#allocation5 + $0xa70] sm:$0xf0]  ;;  %v10750_v14 = vor.u32 %v11381_v15, %v10747_v52  ;;  %v11144_v30 = vld [vmem:[#allocation5 + $0x1f4] sm:$0xf0] }
 0x34d   : > { %v11445_v3 = vld [vmem:[#allocation5 + $0xb64] sm:$0xf]  ;;  %v11003_v61 = vld [vmem:[#allocation5 + $0xb70] sm:$0xf0]  ;;  %v10878_v40 = vor.u32 %v11413_v4, %v10875_v10  ;;  %v11176_v4 = vld [vmem:[#allocation5 + $0x2f4] sm:$0xf0] }
 0x34e   : > { %7279 = vmatpush.bf16.msrb.mxu0 %v10638_v9  ;;  %v11345_v16 = vld [vmem:[#allocation5 + $0x844] sm:$0xf]  ;;  %v10603_v33 = vld [vmem:[#allocation5 + $0x850] sm:$0xf0]  ;;  %v11006_v50 = vor.u32 %v11445_v3, %v11003_v61  ;;  %v9665_v9 = vld [vmem:[#allocation5 + $0xe8] sm:$0xf] }
 0x34f   : > { %7292 = vmatpush.bf16.msrb.mxu1 %v10766_v31  ;;  %v11377_v62 = vld [vmem:[#allocation5 + $0x944] sm:$0xf]  ;;  %v10731_v12 = vld [vmem:[#allocation5 + $0x950] sm:$0xf0]  ;;  %v10606_v47 = vor.u32 %v11345_v16, %v10603_v33  ;;  %v11112_v31 = vld [vmem:[#allocation5 + $0xf4] sm:$0xf0]  ;;  %v9794_v33 = vor.u32 %v11144_v30, %v9793_v28 }
 0x350   : > { %7305 = vmatpush.bf16.msrb.mxu2 %v10894_v57  ;;  %7318 = vmatpush.bf16.msrb.mxu3 %v11022_v37  ;;  %v11409_v48 = vld [vmem:[#allocation5 + $0xa44] sm:$0xf]  ;;  %v10859_v13 = vld [vmem:[#allocation5 + $0xa50] sm:$0xf0]  ;;  %v10734_v35 = vor.u32 %v11377_v62, %v10731_v12  ;;  %v9921_v57 = vld [vmem:[#allocation5 + $0x2e8] sm:$0xf]  ;;  %v7090_v37 = vpop.f32.mrf.mxu1  ;;  %v9666_v16 = vor.u32 %v11112_v31, %v9665_v9 }
 0x351   : > { %v11441_v0 = vld [vmem:[#allocation5 + $0xb44] sm:$0xf]  ;;  %v10987_v11 = vld [vmem:[#allocation5 + $0xb50] sm:$0xf0]  ;;  %v10862_v39 = vor.u32 %v11409_v48, %v10859_v13  ;;  %v10049_v10 = vld [vmem:[#allocation5 + $0x3e8] sm:$0xf]  ;;  %v7091_v61 = vadd.f32 %v7090_v37, %v14237_v27  ;;  %v9922_v12 = vor.u32 %v11176_v4, %v9921_v57 }
 0x352   : > { %7280 = vmatpush.bf16.msrb.mxu0 %v10622_v22  ;;  %v11341_v45 = vld [vmem:[#allocation5 + $0x824] sm:$0xf]  ;;  %v10587_v18 = vld [vmem:[#allocation5 + $0x830] sm:$0xf0]  ;;  %v10990_v53 = vor.u32 %v11441_v0, %v10987_v11  ;;  %v11208_v3 = vld [vmem:[#allocation5 + $0x3f4] sm:$0xf0] }
 0x353   : > { %7293 = vmatpush.bf16.msrb.mxu1 %v10750_v14  ;;  %v11373_v42 = vld [vmem:[#allocation5 + $0x924] sm:$0xf]  ;;  %v10715_v20 = vld [vmem:[#allocation5 + $0x930] sm:$0xf0]  ;;  %v10590_v34 = vor.u32 %v11341_v45, %v10587_v18  ;;  %v14240_v62 = vadd.f32 %v7103_v2, %v7091_v61  ;;  %v10050_v48 = vor.u32 %v11208_v3, %v10049_v10  ;;  %v9777_v13 = vld [vmem:[#allocation5 + $0x1c8] sm:$0xf] }
 0x354   : > { %7306 = vmatpush.bf16.msrb.mxu2 %v10878_v40  ;;  %7319 = vmatpush.bf16.msrb.mxu3 %v11006_v50  ;;  %v11405_v44 = vld [vmem:[#allocation5 + $0xa24] sm:$0xf]  ;;  %v10843_v46 = vld [vmem:[#allocation5 + $0xa30] sm:$0xf0]  ;;  %v10718_v19 = vor.u32 %v11373_v42, %v10715_v20  ;;  %v9649_v40 = vld [vmem:[#allocation5 + $0xc8] sm:$0xf] }
 0x355   : > { %v11437_v26 = vld [vmem:[#allocation5 + $0xb24] sm:$0xf]  ;;  %v10971_v1 = vld [vmem:[#allocation5 + $0xb30] sm:$0xf0]  ;;  %v10846_v24 = vor.u32 %v11405_v44, %v10843_v46  ;;  %v11108_v50 = vld [vmem:[#allocation5 + $0xd4] sm:$0xf0] }
 0x356   : > { %v11337_v54 = vld [vmem:[#allocation5 + $0x804] sm:$0xf]  ;;  %7281 = vmatpush.bf16.msrb.mxu0 %v10606_v47  ;;  %v10571_v63 = vld [vmem:[#allocation5 + $0x810] sm:$0xf0]  ;;  %v10974_v23 = vor.u32 %v11437_v26, %v10971_v1  ;;  %v11140_v0 = vld [vmem:[#allocation5 + $0x1d4] sm:$0xf0]  ;;  %v9650_v45 = vor.u32 %v11108_v50, %v9649_v40 }
 0x357   : > { %7294 = vmatpush.bf16.msrb.mxu1 %v10734_v35  ;;  %v11369_v51 = vld [vmem:[#allocation5 + $0x904] sm:$0xf]  ;;  %v10699_v38 = vld [vmem:[#allocation5 + $0x910] sm:$0xf0]  ;;  %v10574_v15 = vor.u32 %v11337_v54, %v10571_v63  ;;  %v9905_v11 = vld [vmem:[#allocation5 + $0x2c8] sm:$0xf]  ;;  %v7105_v35 = vpop.f32.mrf.mxu2  ;;  %v9778_v18 = vor.u32 %v11140_v0, %v9777_v13 }
 0x358   : > { %7307 = vmatpush.bf16.msrb.mxu2 %v10862_v39  ;;  %7320 = vmatpush.bf16.msrb.mxu3 %v10990_v53  ;;  %v11401_v32 = vld [vmem:[#allocation5 + $0xa04] sm:$0xf]  ;;  %v10827_v58 = vld [vmem:[#allocation5 + $0xa10] sm:$0xf0]  ;;  %v10702_v52 = vor.u32 %v11369_v51, %v10699_v38  ;;  %v10033_v47 = vld [vmem:[#allocation5 + $0x3c8] sm:$0xf]  ;;  %v9906_v42 = vor.u32 %v11172_v7, %v9905_v11  ;;  %v7092_v1 = vpop.f32.mrf.mxu1 }
 0x359   : > { %v11433_v43 = vld [vmem:[#allocation5 + $0xb04] sm:$0xf]  ;;  %v10955_v36 = vld [vmem:[#allocation5 + $0xb10] sm:$0xf0]  ;;  %v10830_v22 = vor.u32 %v11401_v32, %v10827_v58  ;;  %v11204_v27 = vld [vmem:[#allocation5 + $0x3d4] sm:$0xf0] }
 0x35a   : > { %7282 = vmatpush.bf16.msrb.mxu0 %v10590_v34  ;;  %v10958_v14 = vor.u32 %v11433_v43, %v10955_v36  ;;  %v9633_v39 = vld [vmem:[#allocation5 + $0xa8] sm:$0xf]  ;;  %v11104_v53 = vld [vmem:[#allocation5 + $0xb4] sm:$0xf0]  ;;  %v10034_v20 = vor.u32 %v11204_v27, %v10033_v47 }
 0x35b   : > { %7295 = vmatpush.bf16.msrb.mxu1 %v10718_v19  ;;  %v9761_v44 = vld [vmem:[#allocation5 + $0x1a8] sm:$0xf]  ;;  %v11136_v46 = vld [vmem:[#allocation5 + $0x1b4] sm:$0xf0]  ;;  %v9634_v63 = vor.u32 %v11104_v53, %v9633_v39 }
 0x35c   : > { %7308 = vmatpush.bf16.msrb.mxu2 %v10846_v24  ;;  %7321 = vmatpush.bf16.msrb.mxu3 %v10974_v23  ;;  %v9889_v26 = vld [vmem:[#allocation5 + $0x2a8] sm:$0xf]  ;;  %v11168_v54 = vld [vmem:[#allocation5 + $0x2b4] sm:$0xf0]  ;;  %v9762_v51 = vor.u32 %v11136_v46, %v9761_v44 }
 0x35d   : > { %v10017_v34 = vld [vmem:[#allocation5 + $0x3a8] sm:$0xf]  ;;  %v11200_v19 = vld [vmem:[#allocation5 + $0x3b4] sm:$0xf0]  ;;  %v9890_v23 = vor.u32 %v11168_v54, %v9889_v26 }
 0x35e   : > { %7283 = vmatpush.bf16.msrb.mxu0 %v10574_v15  ;;  %v9617_v38 = vld [vmem:[#allocation5 + $0x88] sm:$0xf]  ;;  %v11100_v24 = vld [vmem:[#allocation5 + $0x94] sm:$0xf0]  ;;  %v10018_v32 = vor.u32 %v11200_v19, %v10017_v34  ;;  %v7116_v61 = vpop.f32.mrf.mxu3 }
 0x35f   : > { %7296 = vmatpush.bf16.msrb.mxu1 %v10702_v52  ;;  %v9745_v58 = vld [vmem:[#allocation5 + $0x188] sm:$0xf]  ;;  %v11132_v43 = vld [vmem:[#allocation5 + $0x194] sm:$0xf0]  ;;  %v9618_v28 = vor.u32 %v11100_v24, %v9617_v38 }
 0x360   : > { %7309 = vmatpush.bf16.msrb.mxu2 %v10830_v22  ;;  %7322 = vmatpush.bf16.msrb.mxu3 %v10958_v14  ;;  %v9873_v2 = vld [vmem:[#allocation5 + $0x288] sm:$0xf]  ;;  %v11164_v36 = vld [vmem:[#allocation5 + $0x294] sm:$0xf0]  ;;  %v9746_v30 = vor.u32 %v11132_v43, %v9745_v58 }
 0x361   : > { %7284 = vmatmul.bf16.vlgmr.msrb.gmra.mxu0 %v14166_v8  ;;  %v10001_v9 = vld [vmem:[#allocation5 + $0x388] sm:$0xf]  ;;  %v11196_v31 = vld [vmem:[#allocation5 + $0x394] sm:$0xf0]  ;;  %v9874_v15 = vor.u32 %v11164_v36, %v9873_v2 }
 0x362   : > { %7328 = vmatpush.bf16.msra.mxu0 %v9666_v16  ;;  %7297 = vmatmul.bf16.vlgmr.msrb.gmra.mxu1 %v14198_v17  ;;  %v9601_v57 = vld [vmem:[#allocation5 + $0x68] sm:$0xf]  ;;  %v11096_v37 = vld [vmem:[#allocation5 + $0x74] sm:$0xf0]  ;;  %v10002_v52 = vor.u32 %v11196_v31, %v10001_v9 }
 0x363   : > { %7341 = vmatpush.bf16.msra.mxu1 %v9794_v33  ;;  %7310 = vmatmul.bf16.vlgmr.msrb.gmra.mxu2 %v14181_v59  ;;  %v9729_v4 = vld [vmem:[#allocation5 + $0x168] sm:$0xf]  ;;  %v11128_v10 = vld [vmem:[#allocation5 + $0x174] sm:$0xf0]  ;;  %v14247_v33 = vadd.f32 %v7116_v61, %v14240_v62  ;;  %v9602_v40 = vor.u32 %v11096_v37, %v9601_v57 }
 0x364   : > { %7354 = vmatpush.bf16.msra.mxu2 %v9922_v12  ;;  %7367 = vmatpush.bf16.msra.mxu3 %v10050_v48  ;;  %v9857_v3 = vld [vmem:[#allocation5 + $0x268] sm:$0xf]  ;;  %v11160_v22 = vld [vmem:[#allocation5 + $0x274] sm:$0xf0]  ;;  %v9730_v50 = vor.u32 %v11128_v10, %v9729_v4 }
 0x365   : > { %7323 = vmatmul.bf16.vlgmr.msrb.gmra.mxu3 %v14209_v6  ;;  %v9985_v14 = vld [vmem:[#allocation5 + $0x368] sm:$0xf]  ;;  %v11192_v16 = vld [vmem:[#allocation5 + $0x374] sm:$0xf0]  ;;  %v9858_v13 = vor.u32 %v11160_v22, %v9857_v3 }
 0x366   : > { %7329 = vmatpush.bf16.msra.mxu0 %v9650_v45  ;;  %v9585_v12 = vld [vmem:[#allocation5 + $0x48] sm:$0xf]  ;;  %v11092_v48 = vld [vmem:[#allocation5 + $0x54] sm:$0xf0]  ;;  %v9986_v0 = vor.u32 %v11192_v16, %v9985_v14  ;;  %v7118_v1 = vpop.f32.mrf.mxu3 }
 0x367   : > { %7342 = vmatpush.bf16.msra.mxu1 %v9778_v18  ;;  %v9713_v11 = vld [vmem:[#allocation5 + $0x148] sm:$0xf]  ;;  %v11124_v7 = vld [vmem:[#allocation5 + $0x154] sm:$0xf0]  ;;  %v9586_v62 = vor.u32 %v11092_v48, %v9585_v12 }
 0x368   : > { %7355 = vmatpush.bf16.msra.mxu2 %v9906_v42  ;;  %7368 = vmatpush.bf16.msra.mxu3 %v10034_v20  ;;  %v9841_v47 = vld [vmem:[#allocation5 + $0x248] sm:$0xf]  ;;  %v11156_v27 = vld [vmem:[#allocation5 + $0x254] sm:$0xf0]  ;;  %v9714_v18 = vor.u32 %v11124_v7, %v9713_v11 }
 0x369   : > { %v9969_v35 = vld [vmem:[#allocation5 + $0x348] sm:$0xf]  ;;  %v11188_v45 = vld [vmem:[#allocation5 + $0x354] sm:$0xf0]  ;;  %v9842_v42 = vor.u32 %v11156_v27, %v9841_v47 }
 0x36a   : > { %7330 = vmatpush.bf16.msra.mxu0 %v9634_v63  ;;  %v9569_v39 = vld [vmem:[#allocation5 + $0x28] sm:$0xf]  ;;  %v11088_v53 = vld [vmem:[#allocation5 + $0x34] sm:$0xf0]  ;;  %v9970_v20 = vor.u32 %v11188_v45, %v9969_v35 }
 0x36b   : > { %7343 = vmatpush.bf16.msra.mxu1 %v9762_v51  ;;  %v9697_v44 = vld [vmem:[#allocation5 + $0x128] sm:$0xf]  ;;  %v11120_v46 = vld [vmem:[#allocation5 + $0x134] sm:$0xf0]  ;;  %v9570_v51 = vor.u32 %v11088_v53, %v9569_v39 }
 0x36c   : > { %7356 = vmatpush.bf16.msra.mxu2 %v9890_v23  ;;  %7369 = vmatpush.bf16.msra.mxu3 %v10018_v32  ;;  %v9825_v26 = vld [vmem:[#allocation5 + $0x228] sm:$0xf]  ;;  %v11152_v54 = vld [vmem:[#allocation5 + $0x234] sm:$0xf0]  ;;  %v9698_v38 = vor.u32 %v11120_v46, %v9697_v44 }
 0x36d   : > { %v9953_v34 = vld [vmem:[#allocation5 + $0x328] sm:$0xf]  ;;  %v11184_v19 = vld [vmem:[#allocation5 + $0x334] sm:$0xf0]  ;;  %v9826_v58 = vor.u32 %v11152_v54, %v9825_v26 }
 0x36e   : > { %7331 = vmatpush.bf16.msra.mxu0 %v9618_v28  ;;  %v9553_v63 = vld [vmem:[#allocation5 + $0x8] sm:$0xf]  ;;  %v11084_v24 = vld [vmem:[#allocation5 + $0x14] sm:$0xf0]  ;;  %v9954_v43 = vor.u32 %v11184_v19, %v9953_v34 }
 0x36f   : > { %7344 = vmatpush.bf16.msra.mxu1 %v9746_v30  ;;  %v9681_v23 = vld [vmem:[#allocation5 + $0x108] sm:$0xf]  ;;  %v11116_v32 = vld [vmem:[#allocation5 + $0x114] sm:$0xf0] }
 0x370   : > { %7357 = vmatpush.bf16.msra.mxu2 %v9874_v15  ;;  %7370 = vmatpush.bf16.msra.mxu3 %v10002_v52  ;;  %v9809_v2 = vld [vmem:[#allocation5 + $0x208] sm:$0xf]  ;;  %v11148_v36 = vld [vmem:[#allocation5 + $0x214] sm:$0xf0]  ;;  %v9554_v52 = vor.u32 %v11084_v24, %v9553_v63  ;;  %v9682_v4 = vor.u32 %v11116_v32, %v9681_v23 }
 0x371   : > { %v9937_v9 = vld [vmem:[#allocation5 + $0x308] sm:$0xf]  ;;  %v11180_v31 = vld [vmem:[#allocation5 + $0x314] sm:$0xf0]  ;;  %v9810_v14 = vor.u32 %v11148_v36, %v9809_v2 }
 0x372   : > { %7332 = vmatpush.bf16.msra.mxu0 %v9602_v40  ;;  %v10177_v28 = vld [vmem:[#allocation5 + $0x4e8] sm:$0xf]  ;;  %v11240_v30 = vld [vmem:[#allocation5 + $0x4f4] sm:$0xf0]  ;;  %v9938_v16 = vor.u32 %v11180_v31, %v9937_v9 }
 0x373   : > { %7345 = vmatpush.bf16.msra.mxu1 %v9730_v50  ;;  %v10305_v57 = vld [vmem:[#allocation5 + $0x5e8] sm:$0xf]  ;;  %v11272_v37 = vld [vmem:[#allocation5 + $0x5f4] sm:$0xf0]  ;;  %v10178_v50 = vor.u32 %v11240_v30, %v10177_v28 }
 0x374   : > { %7358 = vmatpush.bf16.msra.mxu2 %v9858_v13  ;;  %7371 = vmatpush.bf16.msra.mxu3 %v9986_v0  ;;  %v10433_v15 = vld [vmem:[#allocation5 + $0x6e8] sm:$0xf]  ;;  %v11304_v10 = vld [vmem:[#allocation5 + $0x6f4] sm:$0xf0]  ;;  %v7129_v22 = vpop.f32.mrf.mxu0  ;;  %v10306_v12 = vor.u32 %v11272_v37, %v10305_v57 }
 0x375   : > { %v10561_v3 = vld [vmem:[#allocation5 + $0x7e8] sm:$0xf]  ;;  %v11336_v61 = vld [vmem:[#allocation5 + $0x7f4] sm:$0xf0]  ;;  %v14250_v40 = vadd.f32 %v7129_v22, %v14247_v33  ;;  %v10434_v0 = vor.u32 %v11304_v10, %v10433_v15 }
 0x376   : > { %7333 = vmatpush.bf16.msra.mxu0 %v9586_v62  ;;  %v10161_v48 = vld [vmem:[#allocation5 + $0x4c8] sm:$0xf]  ;;  %v11236_v13 = vld [vmem:[#allocation5 + $0x4d4] sm:$0xf0]  ;;  %v10562_v11 = vor.u32 %v11336_v61, %v10561_v3 }
 0x377   : > { %7346 = vmatpush.bf16.msra.mxu1 %v9714_v18  ;;  %v10289_v7 = vld [vmem:[#allocation5 + $0x5c8] sm:$0xf]  ;;  %v11268_v47 = vld [vmem:[#allocation5 + $0x5d4] sm:$0xf0]  ;;  %v10162_v33 = vor.u32 %v11236_v13, %v10161_v48 }
 0x378   : > { %7359 = vmatpush.bf16.msra.mxu2 %v9842_v42  ;;  %7372 = vmatpush.bf16.msra.mxu3 %v9970_v20  ;;  %v10417_v27 = vld [vmem:[#allocation5 + $0x6c8] sm:$0xf]  ;;  %v11300_v35 = vld [vmem:[#allocation5 + $0x6d4] sm:$0xf0]  ;;  %v10290_v18 = vor.u32 %v11268_v47, %v10289_v7 }
 0x379   : > { %v10545_v45 = vld [vmem:[#allocation5 + $0x7c8] sm:$0xf]  ;;  %v11332_v62 = vld [vmem:[#allocation5 + $0x7d4] sm:$0xf0]  ;;  %v10418_v42 = vor.u32 %v11300_v35, %v10417_v27 }
 0x37a   : > { %7334 = vmatpush.bf16.msra.mxu0 %v9570_v51  ;;  %v10145_v39 = vld [vmem:[#allocation5 + $0x4a8] sm:$0xf]  ;;  %v11232_v53 = vld [vmem:[#allocation5 + $0x4b4] sm:$0xf0]  ;;  %v10546_v20 = vor.u32 %v11332_v62, %v10545_v45 }
 0x37b   : > { %7347 = vmatpush.bf16.msra.mxu1 %v9698_v38  ;;  %v10273_v44 = vld [vmem:[#allocation5 + $0x5a8] sm:$0xf]  ;;  %v11264_v46 = vld [vmem:[#allocation5 + $0x5b4] sm:$0xf0]  ;;  %v10146_v63 = vor.u32 %v11232_v53, %v10145_v39 }
 0x37c   : > { %7360 = vmatpush.bf16.msra.mxu2 %v9826_v58  ;;  %7373 = vmatpush.bf16.msra.mxu3 %v9954_v43  ;;  %v10401_v26 = vld [vmem:[#allocation5 + $0x6a8] sm:$0xf]  ;;  %v11296_v1 = vld [vmem:[#allocation5 + $0x6b4] sm:$0xf0]  ;;  %v7131_v19 = vpop.f32.mrf.mxu0  ;;  %v10274_v51 = vor.u32 %v11264_v46, %v10273_v44 }
 0x37d   : > { %v10529_v54 = vld [vmem:[#allocation5 + $0x7a8] sm:$0xf]  ;;  %v11328_v34 = vld [vmem:[#allocation5 + $0x7b4] sm:$0xf0]  ;;  %v10402_v23 = vor.u32 %v11296_v1, %v10401_v26 }
 0x37e   : > { %7335 = vmatpush.bf16.msra.mxu0 %v9554_v52  ;;  %v10129_v38 = vld [vmem:[#allocation5 + $0x488] sm:$0xf]  ;;  %v11228_v24 = vld [vmem:[#allocation5 + $0x494] sm:$0xf0]  ;;  %v10530_v32 = vor.u32 %v11328_v34, %v10529_v54 }
 0x37f   : > { %7348 = vmatpush.bf16.msra.mxu1 %v9682_v4  ;;  %v10257_v58 = vld [vmem:[#allocation5 + $0x588] sm:$0xf]  ;;  %v11260_v43 = vld [vmem:[#allocation5 + $0x594] sm:$0xf0]  ;;  %v10130_v28 = vor.u32 %v11228_v24, %v10129_v38 }
 0x380   : > { %7361 = vmatpush.bf16.msra.mxu2 %v9810_v14  ;;  %7374 = vmatpush.bf16.msra.mxu3 %v9938_v16  ;;  %v10385_v2 = vld [vmem:[#allocation5 + $0x688] sm:$0xf]  ;;  %v11292_v36 = vld [vmem:[#allocation5 + $0x694] sm:$0xf0]  ;;  %v10258_v30 = vor.u32 %v11260_v43, %v10257_v58 }
 0x381   : > { %7336 = vmatmul.bf16.vlgmr.msra.gmra.mxu0 %v13454_v41  ;;  %v10513_v9 = vld [vmem:[#allocation5 + $0x788] sm:$0xf]  ;;  %v11324_v31 = vld [vmem:[#allocation5 + $0x794] sm:$0xf0]  ;;  %v10386_v15 = vor.u32 %v11292_v36, %v10385_v2 }
 0x382   : > { %7380 = vmatpush.bf16.msrb.mxu0 %v10178_v50  ;;  %7349 = vmatmul.bf16.vlgmr.msra.gmra.mxu1 %v13615_v5  ;;  %v10113_v57 = vld [vmem:[#allocation5 + $0x468] sm:$0xf]  ;;  %v11224_v37 = vld [vmem:[#allocation5 + $0x474] sm:$0xf0]  ;;  %v10514_v52 = vor.u32 %v11324_v31, %v10513_v9 }
 0x383   : > { %7393 = vmatpush.bf16.msrb.mxu1 %v10306_v12  ;;  %7362 = vmatmul.bf16.vlgmr.msra.gmra.mxu2 %v13505_v29  ;;  %v10241_v4 = vld [vmem:[#allocation5 + $0x568] sm:$0xf]  ;;  %v11256_v10 = vld [vmem:[#allocation5 + $0x574] sm:$0xf0]  ;;  %v7155_v61 = vpop.f32.mrf.mxu2  ;;  %v10114_v12 = vor.u32 %v11224_v37, %v10113_v57 }
 0x384   : > { %7406 = vmatpush.bf16.msrb.mxu2 %v10434_v0  ;;  %7419 = vmatpush.bf16.msrb.mxu3 %v10562_v11  ;;  %v10369_v3 = vld [vmem:[#allocation5 + $0x668] sm:$0xf]  ;;  %v11288_v22 = vld [vmem:[#allocation5 + $0x674] sm:$0xf0]  ;;  %v10242_v48 = vor.u32 %v11256_v10, %v10241_v4 }
 0x385   : > { %7375 = vmatmul.bf16.vlgmr.msra.gmra.mxu3 %v14867_v55  ;;  %v10497_v14 = vld [vmem:[#allocation5 + $0x768] sm:$0xf]  ;;  %v11320_v16 = vld [vmem:[#allocation5 + $0x774] sm:$0xf0]  ;;  %v10370_v7 = vor.u32 %v11288_v22, %v10369_v3 }
 0x386   : > { %7381 = vmatpush.bf16.msrb.mxu0 %v10162_v33  ;;  %v7142_v50 = vpop.f32.mrf.mxu1  ;;  %v10097_v13 = vld [vmem:[#allocation5 + $0x448] sm:$0xf]  ;;  %v11220_v0 = vld [vmem:[#allocation5 + $0x454] sm:$0xf0]  ;;  %v10498_v47 = vor.u32 %v11320_v16, %v10497_v14 }
 0x387   : > { %7394 = vmatpush.bf16.msrb.mxu1 %v10290_v18  ;;  %v7143_v11 = vadd.f32 %v7142_v50, %v14250_v40  ;;  %v10225_v27 = vld [vmem:[#allocation5 + $0x548] sm:$0xf]  ;;  %v11252_v35 = vld [vmem:[#allocation5 + $0x554] sm:$0xf0]  ;;  %v10098_v53 = vor.u32 %v11220_v0, %v10097_v13 }
 0x388   : > { %7407 = vmatpush.bf16.msrb.mxu2 %v10418_v42  ;;  %7420 = vmatpush.bf16.msrb.mxu3 %v10546_v20  ;;  %v10353_v45 = vld [vmem:[#allocation5 + $0x648] sm:$0xf]  ;;  %v11284_v62 = vld [vmem:[#allocation5 + $0x654] sm:$0xf0]  ;;  %v10226_v42 = vor.u32 %v11252_v35, %v10225_v27 }
 0x389   : > { %v10481_v33 = vld [vmem:[#allocation5 + $0x748] sm:$0xf]  ;;  %v11316_v18 = vld [vmem:[#allocation5 + $0x754] sm:$0xf0]  ;;  %v14257_v39 = vadd.f32 %v7155_v61, %v7143_v11  ;;  %v10354_v46 = vor.u32 %v11284_v62, %v10353_v45 }
 0x38a   : > { %7382 = vmatpush.bf16.msrb.mxu0 %v10146_v63  ;;  %v10081_v20 = vld [vmem:[#allocation5 + $0x428] sm:$0xf]  ;;  %v11216_v44 = vld [vmem:[#allocation5 + $0x434] sm:$0xf0]  ;;  %v10482_v40 = vor.u32 %v11316_v18, %v10481_v33 }
 0x38b   : > { %7395 = vmatpush.bf16.msrb.mxu1 %v10274_v51  ;;  %v10209_v26 = vld [vmem:[#allocation5 + $0x528] sm:$0xf]  ;;  %v11248_v1 = vld [vmem:[#allocation5 + $0x534] sm:$0xf0]  ;;  %v7157_v34 = vpop.f32.mrf.mxu2  ;;  %v10082_v24 = vor.u32 %v11216_v44, %v10081_v20 }
 0x38c   : > { %7408 = vmatpush.bf16.msrb.mxu2 %v10402_v23  ;;  %7421 = vmatpush.bf16.msrb.mxu3 %v10530_v32  ;;  %v10337_v54 = vld [vmem:[#allocation5 + $0x628] sm:$0xf]  ;;  %v11280_v19 = vld [vmem:[#allocation5 + $0x634] sm:$0xf0]  ;;  %v10210_v23 = vor.u32 %v11248_v1, %v10209_v26 }
 0x38d   : > { %v10465_v63 = vld [vmem:[#allocation5 + $0x728] sm:$0xf]  ;;  %v11312_v51 = vld [vmem:[#allocation5 + $0x734] sm:$0xf0]  ;;  %v10338_v36 = vor.u32 %v11280_v19, %v10337_v54 }
 0x38e   : > { %7383 = vmatpush.bf16.msrb.mxu0 %v10130_v28  ;;  %v10065_v38 = vld [vmem:[#allocation5 + $0x408] sm:$0xf]  ;;  %v11212_v32 = vld [vmem:[#allocation5 + $0x414] sm:$0xf0]  ;;  %v7144_v2 = vpop.f32.mrf.mxu1  ;;  %v10466_v9 = vor.u32 %v11312_v51, %v10465_v63 }
 0x38f   : > { %7396 = vmatpush.bf16.msrb.mxu1 %v10258_v30  ;;  %v10193_v58 = vld [vmem:[#allocation5 + $0x508] sm:$0xf]  ;;  %v11244_v43 = vld [vmem:[#allocation5 + $0x514] sm:$0xf0]  ;;  %v10066_v3 = vor.u32 %v11212_v32, %v10065_v38 }
 0x390   : > { %7409 = vmatpush.bf16.msrb.mxu2 %v10386_v15  ;;  %7422 = vmatpush.bf16.msrb.mxu3 %v10514_v52  ;;  %v10321_v31 = vld [vmem:[#allocation5 + $0x608] sm:$0xf]  ;;  %v11276_v28 = vld [vmem:[#allocation5 + $0x614] sm:$0xf0]  ;;  %v10194_v61 = vor.u32 %v11244_v43, %v10193_v58 }
 0x391   : > { %v10449_v30 = vld [vmem:[#allocation5 + $0x708] sm:$0xf]  ;;  %v11308_v57 = vld [vmem:[#allocation5 + $0x714] sm:$0xf0]  ;;  %v10322_v50 = vor.u32 %v11276_v28, %v10321_v31 }
 0x392   : > { %7384 = vmatpush.bf16.msrb.mxu0 %v10114_v12  ;;  %v10689_v37 = vld [vmem:[#allocation5 + $0x8e8] sm:$0xf]  ;;  %v11368_v15 = vld [vmem:[#allocation5 + $0x8f4] sm:$0xf0]  ;;  %v10450_v12 = vor.u32 %v11308_v57, %v10449_v30 }
 0x393   : > { %7397 = vmatpush.bf16.msrb.mxu1 %v10242_v48  ;;  %v10817_v52 = vld [vmem:[#allocation5 + $0x9e8] sm:$0xf]  ;;  %v11400_v4 = vld [vmem:[#allocation5 + $0x9f4] sm:$0xf0]  ;;  %v10690_v48 = vor.u32 %v11368_v15, %v10689_v37 }
 0x394   : > { %7410 = vmatpush.bf16.msrb.mxu2 %v10370_v7  ;;  %7423 = vmatpush.bf16.msrb.mxu3 %v10498_v47  ;;  %v10945_v10 = vld [vmem:[#allocation5 + $0xae8] sm:$0xf]  ;;  %v11432_v22 = vld [vmem:[#allocation5 + $0xaf4] sm:$0xf0]  ;;  %v10818_v13 = vor.u32 %v11400_v4, %v10817_v52  ;;  %v14873_v52 = vld [vmem:[#allocation111_spill] sm:$0xff] }
 0x395   : > { %v11073_v14 = vld [vmem:[#allocation5 + $0xbe8] sm:$0xf]  ;;  %v11464_v16 = vld [vmem:[#allocation5 + $0xbf4] sm:$0xf0]  ;;  %v10946_v7 = vor.u32 %v11432_v22, %v10945_v10 }
 0x396   : > { %7385 = vmatpush.bf16.msrb.mxu0 %v10098_v53  ;;  %v10673_v0 = vld [vmem:[#allocation5 + $0x8c8] sm:$0xf]  ;;  %v11364_v11 = vld [vmem:[#allocation5 + $0x8d4] sm:$0xf0]  ;;  %v11074_v47 = vor.u32 %v11464_v16, %v11073_v14  ;;  %v7168_v62 = vpop.f32.mrf.mxu3 }
 0x397   : > { %7398 = vmatpush.bf16.msrb.mxu1 %v10226_v42  ;;  %v10801_v27 = vld [vmem:[#allocation5 + $0x9c8] sm:$0xf]  ;;  %v11396_v35 = vld [vmem:[#allocation5 + $0x9d4] sm:$0xf0]  ;;  %v14260_v42 = vadd.f32 %v7168_v62, %v14257_v39  ;;  %v10674_v20 = vor.u32 %v11364_v11, %v10673_v0 }
 0x398   : > { %7411 = vmatpush.bf16.msrb.mxu2 %v10354_v46  ;;  %7424 = vmatpush.bf16.msrb.mxu3 %v10482_v40  ;;  %v10929_v45 = vld [vmem:[#allocation5 + $0xac8] sm:$0xf]  ;;  %v11428_v33 = vld [vmem:[#allocation5 + $0xad4] sm:$0xf0]  ;;  %v10802_v44 = vor.u32 %v11396_v35, %v10801_v27 }
 0x399   : > { %v11057_v18 = vld [vmem:[#allocation5 + $0xbc8] sm:$0xf]  ;;  %v11460_v53 = vld [vmem:[#allocation5 + $0xbd4] sm:$0xf0]  ;;  %v10930_v26 = vor.u32 %v11428_v33, %v10929_v45 }
 0x39a   : > { %7386 = vmatpush.bf16.msrb.mxu0 %v10082_v24  ;;  %v10657_v46 = vld [vmem:[#allocation5 + $0x8a8] sm:$0xf]  ;;  %v11360_v40 = vld [vmem:[#allocation5 + $0x8b4] sm:$0xf0]  ;;  %v11058_v1 = vor.u32 %v11460_v53, %v11057_v18 }
 0x39b   : > { %7399 = vmatpush.bf16.msrb.mxu1 %v10210_v23  ;;  %v10785_v54 = vld [vmem:[#allocation5 + $0x9a8] sm:$0xf]  ;;  %v11392_v34 = vld [vmem:[#allocation5 + $0x9b4] sm:$0xf0]  ;;  %v10658_v38 = vor.u32 %v11360_v40, %v10657_v46 }
 0x39c   : > { %7412 = vmatpush.bf16.msrb.mxu2 %v10338_v36  ;;  %7425 = vmatpush.bf16.msrb.mxu3 %v10466_v9  ;;  %v10913_v19 = vld [vmem:[#allocation5 + $0xaa8] sm:$0xf]  ;;  %v11424_v39 = vld [vmem:[#allocation5 + $0xab4] sm:$0xf0]  ;;  %v10786_v24 = vor.u32 %v11392_v34, %v10785_v54 }
 0x39d   : > { %v11041_v63 = vld [vmem:[#allocation5 + $0xba8] sm:$0xf]  ;;  %v11456_v51 = vld [vmem:[#allocation5 + $0xbb4] sm:$0xf0]  ;;  %v10914_v58 = vor.u32 %v11424_v39, %v10913_v19 }
 0x39e   : > { %7387 = vmatpush.bf16.msrb.mxu0 %v10066_v3  ;;  %v10641_v23 = vld [vmem:[#allocation5 + $0x888] sm:$0xf]  ;;  %v11356_v32 = vld [vmem:[#allocation5 + $0x894] sm:$0xf0]  ;;  %v11042_v43 = vor.u32 %v11456_v51, %v11041_v63  ;;  %v7170_v31 = vpop.f32.mrf.mxu3  ;;  %v7194_v15 = vpop.f32.mrf.mxu1 }
 0x39f   : > { %7400 = vmatpush.bf16.msrb.mxu1 %v10194_v61  ;;  %v10769_v2 = vld [vmem:[#allocation5 + $0x988] sm:$0xf]  ;;  %v11388_v36 = vld [vmem:[#allocation5 + $0x994] sm:$0xf0]  ;;  %v7181_v37 = vpop.f32.mrf.mxu0  ;;  %v10642_v10 = vor.u32 %v11356_v32, %v10641_v23 }
 0x3a0   : > { %7413 = vmatpush.bf16.msrb.mxu2 %v10322_v50  ;;  %7426 = vmatpush.bf16.msrb.mxu3 %v10450_v12  ;;  %v10897_v9 = vld [vmem:[#allocation5 + $0xa88] sm:$0xf]  ;;  %v11420_v28 = vld [vmem:[#allocation5 + $0xa94] sm:$0xf0]  ;;  %v7182_v4 = vadd.f32 %v7181_v37, %v14873_v52  ;;  %v10770_v3 = vor.u32 %v11388_v36, %v10769_v2 }
 0x3a1   : > { %7388 = vmatmul.bf16.vlgmr.msrb.gmra.mxu0 %v14869_v56  ;;  %v11025_v30 = vld [vmem:[#allocation5 + $0xb88] sm:$0xf]  ;;  %v11452_v57 = vld [vmem:[#allocation5 + $0xb94] sm:$0xf0]  ;;  %v10898_v14 = vor.u32 %v11420_v28, %v10897_v9 }
 0x3a2   : > { %7432 = vmatpush.bf16.msra.mxu0 %v10690_v48  ;;  %7401 = vmatmul.bf16.vlgmr.msrb.gmra.mxu1 %v14871_v60  ;;  %v10625_v61 = vld [vmem:[#allocation5 + $0x868] sm:$0xf]  ;;  %v11352_v22 = vld [vmem:[#allocation5 + $0x874] sm:$0xf0]  ;;  %v11026_v16 = vor.u32 %v11452_v57, %v11025_v30 }
 0x3a3   : > { %7445 = vmatpush.bf16.msra.mxu1 %v10818_v13  ;;  %7414 = vmatmul.bf16.vlgmr.msrb.gmra.mxu2 %v14870_v21  ;;  %v10753_v50 = vld [vmem:[#allocation5 + $0x968] sm:$0xf]  ;;  %v11384_v12 = vld [vmem:[#allocation5 + $0x974] sm:$0xf0]  ;;  %v7195_v13 = vadd.f32 %v7194_v15, %v7182_v4 }
 0x3a4   : > { %7458 = vmatpush.bf16.msra.mxu2 %v10946_v7  ;;  %7471 = vmatpush.bf16.msra.mxu3 %v11074_v47  ;;  %v10881_v48 = vld [vmem:[#allocation5 + $0xa68] sm:$0xf]  ;;  %v11416_v0 = vld [vmem:[#allocation5 + $0xa74] sm:$0xf0]  ;;  %v10626_v47 = vor.u32 %v11352_v22, %v10625_v61  ;;  %v10754_v27 = vor.u32 %v11384_v12, %v10753_v50  ;;  %v9667_v50 = vld [vmem:[#allocation5 + $0xf8] sm:$0xf0] }
 0x3a5   : > { %7427 = vmatmul.bf16.vlgmr.msrb.gmra.mxu3 %v14872_v49  ;;  %v11009_v11 = vld [vmem:[#allocation5 + $0xb68] sm:$0xf]  ;;  %v11448_v7 = vld [vmem:[#allocation5 + $0xb74] sm:$0xf0]  ;;  %v10882_v62 = vor.u32 %v11416_v0, %v10881_v48  ;;  %v9795_v0 = vld [vmem:[#allocation5 + $0x1f8] sm:$0xf0] }
 0x3a6   : > { %7433 = vmatpush.bf16.msra.mxu0 %v10674_v20  ;;  %v10609_v35 = vld [vmem:[#allocation5 + $0x848] sm:$0xf]  ;;  %v11348_v45 = vld [vmem:[#allocation5 + $0x854] sm:$0xf0]  ;;  %v11010_v33 = vor.u32 %v11448_v7, %v11009_v11  ;;  %v7196_v19 = vpop.f32.mrf.mxu1  ;;  %v11174_v11 = vld [vmem:[#allocation5 + $0x2ec] sm:$0xf] }
 0x3a7   : > { %7446 = vmatpush.bf16.msra.mxu1 %v10802_v44  ;;  %v10737_v18 = vld [vmem:[#allocation5 + $0x948] sm:$0xf]  ;;  %v11380_v53 = vld [vmem:[#allocation5 + $0x954] sm:$0xf0]  ;;  %v7207_v44 = vpop.f32.mrf.mxu2  ;;  %v7183_v34 = vpop.f32.mrf.mxu0  ;;  %v10610_v39 = vor.u32 %v11348_v45, %v10609_v35  ;;  %v11206_v35 = vld [vmem:[#allocation5 + $0x3ec] sm:$0xf] }
 0x3a8   : > { %7459 = vmatpush.bf16.msra.mxu2 %v10930_v26  ;;  %7472 = vmatpush.bf16.msra.mxu3 %v11058_v1  ;;  %v10865_v20 = vld [vmem:[#allocation5 + $0xa48] sm:$0xf]  ;;  %v7220_v46 = vpop.f32.mrf.mxu3  ;;  %v11412_v40 = vld [vmem:[#allocation5 + $0xa54] sm:$0xf0]  ;;  %v7208_v54 = vadd.f32 %v7207_v44, %v7195_v13  ;;  %v10738_v63 = vor.u32 %v11380_v53, %v10737_v18  ;;  %v11142_v13 = vld [vmem:[#allocation5 + $0x1ec] sm:$0xf] }
 0x3a9   : > { %v10993_v26 = vld [vmem:[#allocation5 + $0xb48] sm:$0xf]  ;;  %v11444_v1 = vld [vmem:[#allocation5 + $0xb54] sm:$0xf0]  ;;  %v10866_v23 = vor.u32 %v11412_v40, %v10865_v20  ;;  %v10051_v45 = vld [vmem:[#allocation5 + $0x3f8] sm:$0xf0]  ;;  %v9798_v53 = vor.u32 %v11142_v13, %v9795_v0 }
 0x3aa   : > { %7434 = vmatpush.bf16.msra.mxu0 %v10658_v38  ;;  %v10593_v51 = vld [vmem:[#allocation5 + $0x828] sm:$0xf]  ;;  %v11344_v38 = vld [vmem:[#allocation5 + $0x834] sm:$0xf0]  ;;  %v10994_v32 = vor.u32 %v11444_v1, %v10993_v26  ;;  %v11106_v20 = vld [vmem:[#allocation5 + $0xcc] sm:$0xf]  ;;  %v10054_v40 = vor.u32 %v11206_v35, %v10051_v45 }
 0x3ab   : > { %7447 = vmatpush.bf16.msra.mxu1 %v10786_v24  ;;  %v14267_v24 = vadd.f32 %v7220_v46, %v7208_v54  ;;  %v10849_v2 = vld [vmem:[#allocation5 + $0xa28] sm:$0xf]  ;;  %v11408_v36 = vld [vmem:[#allocation5 + $0xa34] sm:$0xf0]  ;;  %v10594_v30 = vor.u32 %v11344_v38, %v10593_v51  ;;  %v9651_v44 = vld [vmem:[#allocation5 + $0xd8] sm:$0xf0] }
 0x3ac   : > { %7460 = vmatpush.bf16.msra.mxu2 %v10914_v58  ;;  %7473 = vmatpush.bf16.msra.mxu3 %v11042_v43  ;;  %v10721_v58 = vld [vmem:[#allocation5 + $0x928] sm:$0xf]  ;;  %v11376_v43 = vld [vmem:[#allocation5 + $0x934] sm:$0xf0]  ;;  %v10850_v4 = vor.u32 %v11408_v36, %v10849_v2  ;;  %v11138_v26 = vld [vmem:[#allocation5 + $0x1cc] sm:$0xf] }
 0x3ad   : > { %v10977_v9 = vld [vmem:[#allocation5 + $0xb28] sm:$0xf]  ;;  %v11440_v31 = vld [vmem:[#allocation5 + $0xb34] sm:$0xf0]  ;;  %v10722_v57 = vor.u32 %v11376_v43, %v10721_v58  ;;  %v9779_v1 = vld [vmem:[#allocation5 + $0x1d8] sm:$0xf0] }
 0x3ae   : > { %7435 = vmatpush.bf16.msra.mxu0 %v10642_v10  ;;  %v10577_v28 = vld [vmem:[#allocation5 + $0x808] sm:$0xf]  ;;  %v11340_v37 = vld [vmem:[#allocation5 + $0x814] sm:$0xf0]  ;;  %v10978_v10 = vor.u32 %v11440_v31, %v10977_v9  ;;  %v11170_v54 = vld [vmem:[#allocation5 + $0x2cc] sm:$0xf]  ;;  %v9782_v51 = vor.u32 %v11138_v26, %v9779_v1 }
 0x3af   : > { %7448 = vmatpush.bf16.msra.mxu1 %v10770_v3  ;;  %v10705_v15 = vld [vmem:[#allocation5 + $0x908] sm:$0xf]  ;;  %v11372_v52 = vld [vmem:[#allocation5 + $0x914] sm:$0xf0]  ;;  %v7209_v12 = vpop.f32.mrf.mxu2  ;;  %v10578_v7 = vor.u32 %v11340_v37, %v10577_v28  ;;  %v9907_v34 = vld [vmem:[#allocation5 + $0x2d8] sm:$0xf0] }
 0x3b0   : > { %7461 = vmatpush.bf16.msra.mxu2 %v10898_v14  ;;  %7474 = vmatpush.bf16.msra.mxu3 %v11026_v16  ;;  %v10833_v3 = vld [vmem:[#allocation5 + $0xa08] sm:$0xf]  ;;  %v11404_v61 = vld [vmem:[#allocation5 + $0xa14] sm:$0xf0]  ;;  %v11110_v16 = vld [vmem:[#allocation5 + $0xec] sm:$0xf]  ;;  %v7222_v48 = vpop.f32.mrf.mxu3 }
 0x3b1   : > { %v10961_v22 = vld [vmem:[#allocation5 + $0xb08] sm:$0xf]  ;;  %v11436_v14 = vld [vmem:[#allocation5 + $0xb14] sm:$0xf0]  ;;  %v9670_v18 = vor.u32 %v11110_v16, %v9667_v50  ;;  %v11202_v19 = vld [vmem:[#allocation5 + $0x3cc] sm:$0xf] }
 0x3b2   : > { %7436 = vmatpush.bf16.msra.mxu0 %v10626_v47  ;;  %v10706_v47 = vor.u32 %v11372_v52, %v10705_v15  ;;  %v11102_v38 = vld [vmem:[#allocation5 + $0xac] sm:$0xf]  ;;  %v9763_v2 = vld [vmem:[#allocation5 + $0x1b8] sm:$0xf0] }
 0x3b3   : > { %7449 = vmatpush.bf16.msra.mxu1 %v10754_v27  ;;  %v9923_v27 = vld [vmem:[#allocation5 + $0x2f8] sm:$0xf0]  ;;  %v11134_v43 = vld [vmem:[#allocation5 + $0x1ac] sm:$0xf] }
 0x3b4   : > { %7462 = vmatpush.bf16.msra.mxu2 %v10882_v62  ;;  %7475 = vmatpush.bf16.msra.mxu3 %v11010_v33  ;;  %v10834_v62 = vor.u32 %v11404_v61, %v10833_v3  ;;  %v10962_v33 = vor.u32 %v11436_v14, %v10961_v22  ;;  %v9926_v46 = vor.u32 %v11174_v11, %v9923_v27  ;;  %v11166_v36 = vld [vmem:[#allocation5 + $0x2ac] sm:$0xf]  ;;  %v9891_v9 = vld [vmem:[#allocation5 + $0x2b8] sm:$0xf0] }
 0x3b5   : > { %v11198_v31 = vld [vmem:[#allocation5 + $0x3ac] sm:$0xf]  ;;  %v10019_v28 = vld [vmem:[#allocation5 + $0x3b8] sm:$0xf0]  ;;  %v9894_v52 = vor.u32 %v11166_v36, %v9891_v9 }
 0x3b6   : > { %7437 = vmatpush.bf16.msra.mxu0 %v10610_v39  ;;  %v10035_v39 = vld [vmem:[#allocation5 + $0x3d8] sm:$0xf0]  ;;  %v11098_v37 = vld [vmem:[#allocation5 + $0x8c] sm:$0xf] }
 0x3b7   : > { %7450 = vmatpush.bf16.msra.mxu1 %v10738_v63  ;;  %v9654_v63 = vor.u32 %v11106_v20, %v9651_v44  ;;  %v10038_v58 = vor.u32 %v11202_v19, %v10035_v39  ;;  %v9619_v15 = vld [vmem:[#allocation5 + $0x98] sm:$0xf0]  ;;  %v11162_v61 = vld [vmem:[#allocation5 + $0x28c] sm:$0xf] }
 0x3b8   : > { %7463 = vmatpush.bf16.msra.mxu2 %v10866_v23  ;;  %7476 = vmatpush.bf16.msra.mxu3 %v10994_v32  ;;  %v9635_v23 = vld [vmem:[#allocation5 + $0xb8] sm:$0xf0]  ;;  %v9910_v32 = vor.u32 %v11170_v54, %v9907_v34  ;;  %v11194_v14 = vld [vmem:[#allocation5 + $0x38c] sm:$0xf]  ;;  %v9622_v48 = vor.u32 %v11098_v37, %v9619_v15 }
 0x3b9   : > { %v9747_v3 = vld [vmem:[#allocation5 + $0x198] sm:$0xf0]  ;;  %v11094_v11 = vld [vmem:[#allocation5 + $0x6c] sm:$0xf] }
 0x3ba   : > { %7438 = vmatpush.bf16.msra.mxu0 %v10594_v30  ;;  %v9638_v30 = vor.u32 %v11102_v38, %v9635_v23  ;;  %v9875_v22 = vld [vmem:[#allocation5 + $0x298] sm:$0xf0]  ;;  %v11126_v35 = vld [vmem:[#allocation5 + $0x16c] sm:$0xf] }
 0x3bb   : > { %7451 = vmatpush.bf16.msra.mxu1 %v10722_v57  ;;  %v9766_v57 = vor.u32 %v11134_v43, %v9763_v2  ;;  %v10003_v16 = vld [vmem:[#allocation5 + $0x398] sm:$0xf0]  ;;  %v11122_v34 = vld [vmem:[#allocation5 + $0x14c] sm:$0xf] }
 0x3bc   : > { %7464 = vmatpush.bf16.msra.mxu2 %v10850_v4  ;;  %7477 = vmatpush.bf16.msra.mxu3 %v10978_v10  ;;  %v10022_v4 = vor.u32 %v11198_v31, %v10019_v28  ;;  %v11130_v10 = vld [vmem:[#allocation5 + $0x18c] sm:$0xf]  ;;  %v10006_v27 = vor.u32 %v11194_v14, %v10003_v16  ;;  %v9731_v45 = vld [vmem:[#allocation5 + $0x178] sm:$0xf0] }
 0x3bd   : > { %v9750_v13 = vor.u32 %v11130_v10, %v9747_v3  ;;  %v9987_v20 = vld [vmem:[#allocation5 + $0x378] sm:$0xf0]  ;;  %v11154_v39 = vld [vmem:[#allocation5 + $0x24c] sm:$0xf] }
 0x3be   : > { %7439 = vmatpush.bf16.msra.mxu0 %v10578_v7  ;;  %v9603_v7 = vld [vmem:[#allocation5 + $0x78] sm:$0xf0]  ;;  %v11186_v23 = vld [vmem:[#allocation5 + $0x34c] sm:$0xf] }
 0x3bf   : > { %7452 = vmatpush.bf16.msra.mxu1 %v10706_v47  ;;  %v9878_v47 = vor.u32 %v11162_v61, %v9875_v22  ;;  %v9606_v44 = vor.u32 %v11094_v11, %v9603_v7  ;;  %v9715_v19 = vld [vmem:[#allocation5 + $0x158] sm:$0xf0]  ;;  %v11086_v9 = vld [vmem:[#allocation5 + $0x2c] sm:$0xf] }
 0x3c0   : > { %7465 = vmatpush.bf16.msra.mxu2 %v10834_v62  ;;  %7478 = vmatpush.bf16.msra.mxu3 %v10962_v33  ;;  %v11158_v62 = vld [vmem:[#allocation5 + $0x26c] sm:$0xf]  ;;  %v9843_v38 = vld [vmem:[#allocation5 + $0x258] sm:$0xf0]  ;;  %v9718_v36 = vor.u32 %v11122_v34, %v9715_v19 }
 0x3c1   : > { %7440 = vmatmul.bf16.vlgmr.msra.gmra.mxu0 %v14166_v8  ;;  %v9571_v31 = vld [vmem:[#allocation5 + $0x38] sm:$0xf0]  ;;  %v11118_v37 = vld [vmem:[#allocation5 + $0x12c] sm:$0xf] }
 0x3c2   : > { %7484 = vmatpush.bf16.msrb.mxu0 %v9670_v18  ;;  %7453 = vmatmul.bf16.vlgmr.msra.gmra.mxu1 %v14198_v17  ;;  %v7233_v50 = vpop.f32.mrf.mxu0  ;;  %v7246_v0 = vpop.f32.mrf.mxu1  ;;  %v9859_v18 = vld [vmem:[#allocation5 + $0x278] sm:$0xf0]  ;;  %v11182_v10 = vld [vmem:[#allocation5 + $0x32c] sm:$0xf]  ;;  %v9574_v22 = vor.u32 %v11086_v9, %v9571_v31 }
 0x3c3   : > { %7497 = vmatpush.bf16.msrb.mxu1 %v9798_v53  ;;  %7466 = vmatmul.bf16.vlgmr.msra.gmra.mxu2 %v14181_v59  ;;  %v7234_v12 = vadd.f32 %v7233_v50, %v14267_v24  ;;  %v11190_v53 = vld [vmem:[#allocation5 + $0x36c] sm:$0xf]  ;;  %v9734_v24 = vor.u32 %v11126_v35, %v9731_v45  ;;  %v9862_v26 = vor.u32 %v11158_v62, %v9859_v18  ;;  %v9699_v15 = vld [vmem:[#allocation5 + $0x138] sm:$0xf0] }
 0x3c4   : > { %7510 = vmatpush.bf16.msrb.mxu2 %v9926_v46  ;;  %7523 = vmatpush.bf16.msrb.mxu3 %v10054_v40  ;;  %v11090_v46 = vld [vmem:[#allocation5 + $0x4c] sm:$0xf]  ;;  %v9587_v40 = vld [vmem:[#allocation5 + $0x58] sm:$0xf0]  ;;  %v9990_v1 = vor.u32 %v11190_v53, %v9987_v20  ;;  %v9702_v14 = vor.u32 %v11118_v37, %v9699_v15 }
 0x3c5   : > { %7479 = vmatmul.bf16.vlgmr.msra.gmra.mxu3 %v14209_v6  ;;  %v7247_v33 = vadd.f32 %v7246_v0, %v7234_v12  ;;  %v9590_v2 = vor.u32 %v11090_v46, %v9587_v40  ;;  %v9955_v3 = vld [vmem:[#allocation5 + $0x338] sm:$0xf0]  ;;  %v11082_v61 = vld [vmem:[#allocation5 + $0xc] sm:$0xf] }
 0x3c6   : > { %7485 = vmatpush.bf16.msrb.mxu0 %v9654_v63  ;;  %v7259_v54 = vpop.f32.mrf.mxu2  ;;  %v9555_v16 = vld [vmem:[#allocation5 + $0x18] sm:$0xf0]  ;;  %v11114_v50 = vld [vmem:[#allocation5 + $0x10c] sm:$0xf] }
 0x3c7   : > { %7498 = vmatpush.bf16.msrb.mxu1 %v9782_v51  ;;  %v7260_v63 = vadd.f32 %v7259_v54, %v7247_v33  ;;  %v9683_v12 = vld [vmem:[#allocation5 + $0x118] sm:$0xf0]  ;;  %v11146_v0 = vld [vmem:[#allocation5 + $0x20c] sm:$0xf]  ;;  %v9558_v20 = vor.u32 %v11082_v61, %v9555_v16 }
 0x3c8   : > { %7511 = vmatpush.bf16.msrb.mxu2 %v9910_v32  ;;  %7524 = vmatpush.bf16.msrb.mxu3 %v10038_v58  ;;  %v9971_v32 = vld [vmem:[#allocation5 + $0x358] sm:$0xf0]  ;;  %v11178_v7 = vld [vmem:[#allocation5 + $0x30c] sm:$0xf] }
 0x3c9   : > { %v7272_v51 = vpop.f32.mrf.mxu3  ;;  %v9811_v11 = vld [vmem:[#allocation5 + $0x218] sm:$0xf0]  ;;  %v11238_v35 = vld [vmem:[#allocation5 + $0x4ec] sm:$0xf] }
 0x3ca   : > { %7486 = vmatpush.bf16.msrb.mxu0 %v9638_v30  ;;  %v7235_v58 = vpop.f32.mrf.mxu0  ;;  %v14274_v43 = vadd.f32 %v7272_v51, %v7260_v63  ;;  %v7248_v28 = vpop.f32.mrf.mxu1  ;;  %v9846_v30 = vor.u32 %v11154_v39, %v9843_v38  ;;  %v10179_v45 = vld [vmem:[#allocation5 + $0x4f8] sm:$0xf0]  ;;  %v11270_v33 = vld [vmem:[#allocation5 + $0x5ec] sm:$0xf] }
 0x3cb   : > { %7499 = vmatpush.bf16.msrb.mxu1 %v9766_v57  ;;  %v9974_v57 = vor.u32 %v11186_v23, %v9971_v32  ;;  %v10307_v18 = vld [vmem:[#allocation5 + $0x5f8] sm:$0xf0]  ;;  %v11302_v53 = vld [vmem:[#allocation5 + $0x6ec] sm:$0xf]  ;;  %v10182_v54 = vor.u32 %v11238_v35, %v10179_v45 }
 0x3cc   : > { %7512 = vmatpush.bf16.msrb.mxu2 %v9894_v52  ;;  %7525 = vmatpush.bf16.msrb.mxu3 %v10022_v4  ;;  %v11150_v52 = vld [vmem:[#allocation5 + $0x22c] sm:$0xf]  ;;  %v9827_v4 = vld [vmem:[#allocation5 + $0x238] sm:$0xf0]  ;;  %v10310_v34 = vor.u32 %v11270_v33, %v10307_v18 }
 0x3cd   : > { %v11334_v46 = vld [vmem:[#allocation5 + $0x7ec] sm:$0xf]  ;;  %v10563_v40 = vld [vmem:[#allocation5 + $0x7f8] sm:$0xf0] }
 0x3ce   : > { %7487 = vmatpush.bf16.msrb.mxu0 %v9622_v48  ;;  %v9830_v48 = vor.u32 %v11150_v52, %v9827_v4  ;;  %v11234_v19 = vld [vmem:[#allocation5 + $0x4cc] sm:$0xf]  ;;  %v10163_v39 = vld [vmem:[#allocation5 + $0x4d8] sm:$0xf0]  ;;  %v10566_v51 = vor.u32 %v11334_v46, %v10563_v40 }
 0x3cf   : > { %7500 = vmatpush.bf16.msrb.mxu1 %v9750_v13  ;;  %v9958_v13 = vor.u32 %v11182_v10, %v9955_v3  ;;  %v11266_v38 = vld [vmem:[#allocation5 + $0x5cc] sm:$0xf]  ;;  %v10291_v23 = vld [vmem:[#allocation5 + $0x5d8] sm:$0xf0]  ;;  %v10166_v9 = vor.u32 %v11234_v19, %v10163_v39 }
 0x3d0   : > { %7513 = vmatpush.bf16.msrb.mxu2 %v9878_v47  ;;  %7526 = vmatpush.bf16.msrb.mxu3 %v10006_v27  ;;  %v7261_v47 = vpop.f32.mrf.mxu2  ;;  %v9939_v27 = vld [vmem:[#allocation5 + $0x318] sm:$0xf0]  ;;  %v11298_v32 = vld [vmem:[#allocation5 + $0x6cc] sm:$0xf]  ;;  %v10294_v31 = vor.u32 %v11266_v38, %v10291_v23 }
 0x3d1   : > { %v7274_v62 = vpop.f32.mrf.mxu3  ;;  %v10419_v58 = vld [vmem:[#allocation5 + $0x6d8] sm:$0xf0]  ;;  %v11230_v28 = vld [vmem:[#allocation5 + $0x4ac] sm:$0xf] }
 0x3d2   : > { %7488 = vmatpush.bf16.msrb.mxu0 %v9606_v44  ;;  %v9686_v44 = vor.u32 %v11114_v50, %v9683_v12  ;;  %v11262_v15 = vld [vmem:[#allocation5 + $0x5ac] sm:$0xf]  ;;  %v10275_v52 = vld [vmem:[#allocation5 + $0x5b8] sm:$0xf0] }
 0x3d3   : > { %7501 = vmatpush.bf16.msrb.mxu1 %v9734_v24  ;;  %v10435_v24 = vld [vmem:[#allocation5 + $0x6f8] sm:$0xf0]  ;;  %v11294_v4 = vld [vmem:[#allocation5 + $0x6ac] sm:$0xf] }
 0x3d4   : > { %7514 = vmatpush.bf16.msrb.mxu2 %v9862_v26  ;;  %7527 = vmatpush.bf16.msrb.mxu3 %v9990_v1  ;;  %v9814_v26 = vor.u32 %v11146_v0, %v9811_v11  ;;  %v9942_v1 = vor.u32 %v11178_v7, %v9939_v27  ;;  %v10438_v63 = vor.u32 %v11302_v53, %v10435_v24  ;;  %v10403_v10 = vld [vmem:[#allocation5 + $0x6b8] sm:$0xf0]  ;;  %v11326_v3 = vld [vmem:[#allocation5 + $0x7ac] sm:$0xf] }
 0x3d5   : > { %v10531_v61 = vld [vmem:[#allocation5 + $0x7b8] sm:$0xf0]  ;;  %v11226_v16 = vld [vmem:[#allocation5 + $0x48c] sm:$0xf]  ;;  %v10406_v12 = vor.u32 %v11294_v4, %v10403_v10 }
 0x3d6   : > { %7489 = vmatpush.bf16.msrb.mxu0 %v9590_v2  ;;  %v11330_v2 = vld [vmem:[#allocation5 + $0x7cc] sm:$0xf]  ;;  %v10131_v50 = vld [vmem:[#allocation5 + $0x498] sm:$0xf0] }
 0x3d7   : > { %7502 = vmatpush.bf16.msrb.mxu1 %v9718_v36  ;;  %v10547_v36 = vld [vmem:[#allocation5 + $0x7d8] sm:$0xf0]  ;;  %v11322_v11 = vld [vmem:[#allocation5 + $0x78c] sm:$0xf] }
 0x3d8   : > { %7515 = vmatpush.bf16.msrb.mxu2 %v9846_v30  ;;  %7528 = vmatpush.bf16.msrb.mxu3 %v9974_v57  ;;  %v10147_v30 = vld [vmem:[#allocation5 + $0x4b8] sm:$0xf0]  ;;  %v10422_v57 = vor.u32 %v11298_v32, %v10419_v58  ;;  %v10550_v37 = vor.u32 %v11330_v2, %v10547_v36  ;;  %v11222_v45 = vld [vmem:[#allocation5 + $0x46c] sm:$0xf] }
 0x3d9   : > { %v10387_v0 = vld [vmem:[#allocation5 + $0x698] sm:$0xf0]  ;;  %v11254_v53 = vld [vmem:[#allocation5 + $0x56c] sm:$0xf] }
 0x3da   : > { %7490 = vmatpush.bf16.msrb.mxu0 %v9574_v22  ;;  %v10150_v22 = vor.u32 %v11230_v28, %v10147_v30  ;;  %v10515_v7 = vld [vmem:[#allocation5 + $0x798] sm:$0xf0]  ;;  %v11318_v40 = vld [vmem:[#allocation5 + $0x76c] sm:$0xf] }
 0x3db   : > { %7503 = vmatpush.bf16.msrb.mxu1 %v9702_v14  ;;  %v10278_v14 = vor.u32 %v11262_v15, %v10275_v52  ;;  %v10115_v62 = vld [vmem:[#allocation5 + $0x478] sm:$0xf0]  ;;  %v10518_v18 = vor.u32 %v11322_v11, %v10515_v7  ;;  %v11282_v23 = vld [vmem:[#allocation5 + $0x64c] sm:$0xf] }
 0x3dc   : > { %7516 = vmatpush.bf16.msrb.mxu2 %v9830_v48  ;;  %7529 = vmatpush.bf16.msrb.mxu3 %v9958_v13  ;;  %v10534_v48 = vor.u32 %v11326_v3, %v10531_v61  ;;  %v10259_v13 = vld [vmem:[#allocation5 + $0x598] sm:$0xf0]  ;;  %v11314_v36 = vld [vmem:[#allocation5 + $0x74c] sm:$0xf] }
 0x3dd   : > { %v10371_v46 = vld [vmem:[#allocation5 + $0x678] sm:$0xf0]  ;;  %v11246_v3 = vld [vmem:[#allocation5 + $0x52c] sm:$0xf] }
 0x3de   : > { %7491 = vmatpush.bf16.msrb.mxu0 %v9558_v20  ;;  %v7285_v47 = vpop.f32.mrf.mxu0  ;;  %v10243_v20 = vld [vmem:[#allocation5 + $0x578] sm:$0xf0] }
 0x3df   : > { %7504 = vmatpush.bf16.msrb.mxu1 %v9686_v44  ;;  %v7298_v35 = vpop.f32.mrf.mxu1  ;;  %v11286_v44 = vld [vmem:[#allocation5 + $0x66c] sm:$0xf]  ;;  %v10227_v38 = vld [vmem:[#allocation5 + $0x558] sm:$0xf0] }
 0x3e0   : > { %7517 = vmatpush.bf16.msrb.mxu2 %v9814_v26  ;;  %7530 = vmatpush.bf16.msrb.mxu3 %v9942_v1  ;;  %v10499_v26 = vld [vmem:[#allocation5 + $0x778] sm:$0xf0]  ;;  %v10118_v1 = vor.u32 %v11222_v45, %v10115_v62  ;;  %v10374_v19 = vor.u32 %v11286_v44, %v10371_v46  ;;  %v11366_v45 = vld [vmem:[#allocation5 + $0x8ec] sm:$0xf] }
 0x3e1   : > { %7492 = vmatmul.bf16.vlgmr.msrb.gmra.mxu0 %v13454_v41  ;;  %v11258_v41 = vld [vmem:[#allocation5 + $0x58c] sm:$0xf]  ;;  %v10502_v39 = vor.u32 %v11318_v40, %v10499_v26  ;;  %v10355_v2 = vld [vmem:[#allocation5 + $0x658] sm:$0xf0] }
 0x3e2   : > { %7536 = vmatpush.bf16.msra.mxu0 %v10182_v54  ;;  %7505 = vmatmul.bf16.vlgmr.msrb.gmra.mxu1 %v13615_v5  ;;  %v7286_v5 = vadd.f32 %v7285_v47, %v14274_v43  ;;  %v10262_v27 = vor.u32 %v11258_v41, %v10259_v13  ;;  %v10246_v43 = vor.u32 %v11254_v53, %v10243_v20  ;;  %v11218_v54 = vld [vmem:[#allocation5 + $0x44c] sm:$0xf]  ;;  %v10083_v15 = vld [vmem:[#allocation5 + $0x438] sm:$0xf0] }
 0x3e3   : > { %7549 = vmatpush.bf16.msra.mxu1 %v10310_v34  ;;  %7518 = vmatmul.bf16.vlgmr.msrb.gmra.mxu2 %v13505_v29  ;;  %v11290_v29 = vld [vmem:[#allocation5 + $0x68c] sm:$0xf]  ;;  %v10099_v34 = vld [vmem:[#allocation5 + $0x458] sm:$0xf0]  ;;  %v10358_v4 = vor.u32 %v11282_v23, %v10355_v2 }
 0x3e4   : > { %7562 = vmatpush.bf16.msra.mxu2 %v10438_v63  ;;  %7575 = vmatpush.bf16.msra.mxu3 %v10566_v51  ;;  %v10390_v33 = vor.u32 %v11290_v29, %v10387_v0  ;;  %v7299_v24 = vadd.f32 %v7298_v35, %v7286_v5  ;;  %v11250_v51 = vld [vmem:[#allocation5 + $0x54c] sm:$0xf]  ;;  %v10102_v30 = vor.u32 %v11218_v54, %v10099_v34  ;;  %v10211_v61 = vld [vmem:[#allocation5 + $0x538] sm:$0xf0] }
 0x3e5   : > { %7531 = vmatmul.bf16.vlgmr.msrb.gmra.mxu3 %v14867_v55  ;;  %v10134_v55 = vor.u32 %v11226_v16, %v10131_v50  ;;  %v11310_v16 = vld [vmem:[#allocation5 + $0x72c] sm:$0xf]  ;;  %v10467_v50 = vld [vmem:[#allocation5 + $0x738] sm:$0xf0]  ;;  %v10214_v41 = vor.u32 %v11246_v3, %v10211_v61 }
 0x3e6   : > { %7537 = vmatpush.bf16.msra.mxu0 %v10166_v9  ;;  %v7311_v63 = vpop.f32.mrf.mxu2  ;;  %v10483_v9 = vld [vmem:[#allocation5 + $0x758] sm:$0xf0]  ;;  %v11242_v29 = vld [vmem:[#allocation5 + $0x50c] sm:$0xf]  ;;  %v10470_v7 = vor.u32 %v11310_v16, %v10467_v50 }
 0x3e7   : > { %7550 = vmatpush.bf16.msra.mxu1 %v10294_v31  ;;  %v7312_v32 = vadd.f32 %v7311_v63, %v7299_v24  ;;  %v7287_v31 = vpop.f32.mrf.mxu0  ;;  %v7300_v52 = vpop.f32.mrf.mxu1  ;;  %v10486_v10 = vor.u32 %v11314_v36, %v10483_v9  ;;  %v10067_v13 = vld [vmem:[#allocation5 + $0x418] sm:$0xf0]  ;;  %v11274_v47 = vld [vmem:[#allocation5 + $0x60c] sm:$0xf] }
 0x3e8   : > { %7563 = vmatpush.bf16.msra.mxu2 %v10422_v57  ;;  %7576 = vmatpush.bf16.msra.mxu3 %v10550_v37  ;;  %v7324_v58 = vpop.f32.mrf.mxu3  ;;  %v10230_v57 = vor.u32 %v11250_v51, %v10227_v38  ;;  %v11214_v37 = vld [vmem:[#allocation5 + $0x42c] sm:$0xf]  ;;  %v10195_v0 = vld [vmem:[#allocation5 + $0x518] sm:$0xf0] }
 0x3e9   : > { %v14281_v28 = vadd.f32 %v7324_v58, %v7312_v32  ;;  %v10323_v5 = vld [vmem:[#allocation5 + $0x618] sm:$0xf0]  ;;  %v11430_v20 = vld [vmem:[#allocation5 + $0xaec] sm:$0xf]  ;;  %v10198_v24 = vor.u32 %v11242_v29, %v10195_v0 }
 0x3ea   : > { %7538 = vmatpush.bf16.msra.mxu0 %v10150_v22  ;;  %v11278_v22 = vld [vmem:[#allocation5 + $0x62c] sm:$0xf]  ;;  %v10451_v35 = vld [vmem:[#allocation5 + $0x718] sm:$0xf0] }
 0x3eb   : > { %7551 = vmatpush.bf16.msra.mxu1 %v10278_v14  ;;  %v10339_v14 = vld [vmem:[#allocation5 + $0x638] sm:$0xf0]  ;;  %v11462_v40 = vld [vmem:[#allocation5 + $0xbec] sm:$0xf] }
 0x3ec   : > { %7564 = vmatpush.bf16.msra.mxu2 %v10406_v12  ;;  %7577 = vmatpush.bf16.msra.mxu3 %v10534_v48  ;;  %v11210_v12 = vld [vmem:[#allocation5 + $0x40c] sm:$0xf]  ;;  %v10086_v48 = vor.u32 %v11214_v37, %v10083_v15  ;;  %v10342_v11 = vor.u32 %v11278_v22, %v10339_v14  ;;  %v10691_v62 = vld [vmem:[#allocation5 + $0x8f8] sm:$0xf0] }
 0x3ed   : > { %v10819_v53 = vld [vmem:[#allocation5 + $0x9f8] sm:$0xf0]  ;;  %v10070_v44 = vor.u32 %v11210_v12, %v10067_v13  ;;  %v10694_v54 = vor.u32 %v11366_v45, %v10691_v62  ;;  %v11394_v38 = vld [vmem:[#allocation5 + $0x9cc] sm:$0xf] }
 0x3ee   : > { %7539 = vmatpush.bf16.msra.mxu0 %v10134_v55  ;;  %v11306_v55 = vld [vmem:[#allocation5 + $0x70c] sm:$0xf]  ;;  %v10947_v46 = vld [vmem:[#allocation5 + $0xaf8] sm:$0xf0] }
 0x3ef   : > { %7552 = vmatpush.bf16.msra.mxu1 %v10262_v27  ;;  %v7313_v27 = vpop.f32.mrf.mxu2  ;;  %v11075_v26 = vld [vmem:[#allocation5 + $0xbf8] sm:$0xf0]  ;;  %v10950_v63 = vor.u32 %v11430_v20, %v10947_v46  ;;  %v11426_v32 = vld [vmem:[#allocation5 + $0xacc] sm:$0xf] }
 0x3f0   : > { %7565 = vmatpush.bf16.msra.mxu2 %v10390_v33  ;;  %7578 = vmatpush.bf16.msra.mxu3 %v10518_v18  ;;  %v7326_v33 = vpop.f32.mrf.mxu3  ;;  %v11398_v18 = vld [vmem:[#allocation5 + $0x9ec] sm:$0xf]  ;;  %v11078_v51 = vor.u32 %v11462_v40, %v11075_v26  ;;  %v10803_v23 = vld [vmem:[#allocation5 + $0x9d8] sm:$0xf0] }
 0x3f1   : > { %v10822_v34 = vor.u32 %v11398_v18, %v10819_v53  ;;  %v10931_v58 = vld [vmem:[#allocation5 + $0xad8] sm:$0xf0]  ;;  %v11458_v2 = vld [vmem:[#allocation5 + $0xbcc] sm:$0xf]  ;;  %v10806_v31 = vor.u32 %v11394_v38, %v10803_v23 }
 0x3f2   : > { %7540 = vmatpush.bf16.msra.mxu0 %v10118_v1  ;;  %v10326_v1 = vor.u32 %v11274_v47, %v10323_v5  ;;  %v11059_v36 = vld [vmem:[#allocation5 + $0xbd8] sm:$0xf0]  ;;  %v10934_v37 = vor.u32 %v11426_v32, %v10931_v58  ;;  %v11390_v52 = vld [vmem:[#allocation5 + $0x9ac] sm:$0xf] }
 0x3f3   : > { %7553 = vmatpush.bf16.msra.mxu1 %v10246_v43  ;;  %v10454_v43 = vor.u32 %v11306_v55, %v10451_v35  ;;  %v11062_v15 = vor.u32 %v11458_v2, %v11059_v36  ;;  %v10915_v3 = vld [vmem:[#allocation5 + $0xab8] sm:$0xf0]  ;;  %v11454_v61 = vld [vmem:[#allocation5 + $0xbac] sm:$0xf] }
 0x3f4   : > { %7566 = vmatpush.bf16.msra.mxu2 %v10374_v19  ;;  %7579 = vmatpush.bf16.msra.mxu3 %v10502_v39  ;;  %v11362_v19 = vld [vmem:[#allocation5 + $0x8cc] sm:$0xf]  ;;  %v10675_v39 = vld [vmem:[#allocation5 + $0x8d8] sm:$0xf0] }
 0x3f5   : > { %v10678_v9 = vor.u32 %v11362_v19, %v10675_v39  ;;  %v11043_v22 = vld [vmem:[#allocation5 + $0xbb8] sm:$0xf0]  ;;  %v11354_v50 = vld [vmem:[#allocation5 + $0x88c] sm:$0xf] }
 0x3f6   : > { %7541 = vmatpush.bf16.msra.mxu0 %v10102_v30  ;;  %v11358_v30 = vld [vmem:[#allocation5 + $0x8ac] sm:$0xf]  ;;  %v10643_v12 = vld [vmem:[#allocation5 + $0x898] sm:$0xf0] }
 0x3f7   : > { %7554 = vmatpush.bf16.msra.mxu1 %v10230_v57  ;;  %v10659_v57 = vld [vmem:[#allocation5 + $0x8b8] sm:$0xf0]  ;;  %v11450_v0 = vld [vmem:[#allocation5 + $0xb8c] sm:$0xf] }
 0x3f8   : > { %7567 = vmatpush.bf16.msra.mxu2 %v10358_v4  ;;  %7580 = vmatpush.bf16.msra.mxu3 %v10486_v10  ;;  %v10787_v4 = vld [vmem:[#allocation5 + $0x9b8] sm:$0xf0]  ;;  %v11422_v10 = vld [vmem:[#allocation5 + $0xaac] sm:$0xf]  ;;  %v10662_v14 = vor.u32 %v11358_v30, %v10659_v57 }
 0x3f9   : > { %v10790_v16 = vor.u32 %v11390_v52, %v10787_v4  ;;  %v10771_v13 = vld [vmem:[#allocation5 + $0x998] sm:$0xf0]  ;;  %v11350_v5 = vld [vmem:[#allocation5 + $0x86c] sm:$0xf] }
 0x3fa   : > { %7542 = vmatpush.bf16.msra.mxu0 %v10086_v48  ;;  %v10918_v48 = vor.u32 %v11422_v10, %v10915_v3  ;;  %v10899_v29 = vld [vmem:[#allocation5 + $0xa98] sm:$0xf0]  ;;  %v11382_v45 = vld [vmem:[#allocation5 + $0x96c] sm:$0xf] }
 0x3fb   : > { %7555 = vmatpush.bf16.msra.mxu1 %v10214_v41  ;;  %v11046_v41 = vor.u32 %v11454_v61, %v11043_v22  ;;  %v10627_v55 = vld [vmem:[#allocation5 + $0x878] sm:$0xf0]  ;;  %v11414_v33 = vld [vmem:[#allocation5 + $0xa6c] sm:$0xf] }
 0x3fc   : > { %7568 = vmatpush.bf16.msra.mxu2 %v10342_v11  ;;  %7581 = vmatpush.bf16.msra.mxu3 %v10470_v7  ;;  %v11027_v11 = vld [vmem:[#allocation5 + $0xb98] sm:$0xf0]  ;;  %v11446_v53 = vld [vmem:[#allocation5 + $0xb6c] sm:$0xf] }
 0x3fd   : > { %v11030_v35 = vor.u32 %v11450_v0, %v11027_v11  ;;  %v10755_v62 = vld [vmem:[#allocation5 + $0x978] sm:$0xf0]  ;;  %v11346_v46 = vld [vmem:[#allocation5 + $0x84c] sm:$0xf] }
 0x3fe   : > { %7543 = vmatpush.bf16.msra.mxu0 %v10070_v44  ;;  %v14287_v7 = vpop.f32.mrf.mxu0  ;;  %v10883_v18 = vld [vmem:[#allocation5 + $0xa78] sm:$0xf0]  ;;  %v10630_v44 = vor.u32 %v11350_v5, %v10627_v55  ;;  %v11410_v19 = vld [vmem:[#allocation5 + $0xa4c] sm:$0xf] }
 0x3ff   : > { %7556 = vmatpush.bf16.msra.mxu1 %v10198_v24  ;;  %v14289_v47 = vpop.f32.mrf.mxu1  ;;  %v11011_v20 = vld [vmem:[#allocation5 + $0xb78] sm:$0xf0]  ;;  %v10758_v24 = vor.u32 %v11382_v45, %v10755_v62  ;;  %v10886_v26 = vor.u32 %v11414_v33, %v10883_v18  ;;  %v11342_v2 = vld [vmem:[#allocation5 + $0x82c] sm:$0xf]  ;;  %v7670_v45 = vld [vmem:[#allocation8 + $0xf0] sm:$0xff] }
 0x400   : > { %7569 = vmatpush.bf16.msra.mxu2 %v10326_v1  ;;  %7582 = vmatpush.bf16.msra.mxu3 %v10454_v43  ;;  %v10611_v40 = vld [vmem:[#allocation5 + $0x858] sm:$0xf0]  ;;  %v11014_v1 = vor.u32 %v11446_v53, %v11011_v20  ;;  %v11374_v57 = vld [vmem:[#allocation5 + $0x92c] sm:$0xf]  ;;  %v7686_v53 = vld [vmem:[#allocation8 + $0x170] sm:$0xff] }
 0x401   : > { %7544 = vmatmul.bf16.vlgmr.msra.gmra.mxu0 %v14869_v56  ;;  %v11386_v56 = vld [vmem:[#allocation5 + $0x98c] sm:$0xf]  ;;  %v10995_v38 = vld [vmem:[#allocation5 + $0xb58] sm:$0xf0]  ;;  %v10614_v32 = vor.u32 %v11346_v46, %v10611_v40  ;;  %v7652_v20 = vld [vmem:[#allocation8 + $0x60] sm:$0xff] }
 0x402   : > { %7588 = vmatpush.bf16.msrb.mxu0 %v10694_v54  ;;  %7557 = vmatmul.bf16.vlgmr.msra.gmra.mxu1 %v14871_v60  ;;  %v10646_v60 = vor.u32 %v11354_v50, %v10643_v12  ;;  %v11378_v54 = vld [vmem:[#allocation5 + $0x94c] sm:$0xf]  ;;  %v10595_v36 = vld [vmem:[#allocation5 + $0x838] sm:$0xf0]  ;;  %v7666_v40 = vld [vmem:[#allocation8 + $0xd0] sm:$0xff] }
 0x403   : > { %7601 = vmatpush.bf16.msrb.mxu1 %v10822_v34  ;;  %7570 = vmatmul.bf16.vlgmr.msra.gmra.mxu2 %v14870_v21  ;;  %v11418_v21 = vld [vmem:[#allocation5 + $0xa8c] sm:$0xf]  ;;  %v10739_v34 = vld [vmem:[#allocation5 + $0x958] sm:$0xf0]  ;;  %v10598_v3 = vor.u32 %v11342_v2, %v10595_v36 }
 0x404   : > { %7614 = vmatpush.bf16.msrb.mxu2 %v10950_v63  ;;  %7627 = vmatpush.bf16.msrb.mxu3 %v11078_v51  ;;  %v10902_v27 = vor.u32 %v11418_v21, %v10899_v29  ;;  %v10867_v63 = vld [vmem:[#allocation5 + $0xa58] sm:$0xf0]  ;;  %v11442_v51 = vld [vmem:[#allocation5 + $0xb4c] sm:$0xf]  ;;  %v10742_v58 = vor.u32 %v11378_v54, %v10739_v34 }
 0x405   : > { %7583 = vmatmul.bf16.vlgmr.msra.gmra.mxu3 %v14872_v49  ;;  %v10774_v49 = vor.u32 %v11386_v56, %v10771_v13  ;;  %v10998_v30 = vor.u32 %v11442_v51, %v10995_v38  ;;  %v10851_v52 = vld [vmem:[#allocation5 + $0xa38] sm:$0xf0]  ;;  %v11438_v4 = vld [vmem:[#allocation5 + $0xb2c] sm:$0xf]  ;;  %v7664_v51 = vld [vmem:[#allocation8 + $0xc0] sm:$0xff] }
 0x406   : > { %7589 = vmatpush.bf16.msrb.mxu0 %v10678_v9  ;;  %v14291_v43 = vpop.f32.mrf.mxu2  ;;  %v7339_v23 = vpop.f32.mrf.mxu0  ;;  %v10979_v10 = vld [vmem:[#allocation5 + $0xb38] sm:$0xf0]  ;;  %v11338_v22 = vld [vmem:[#allocation5 + $0x80c] sm:$0xf] }
 0x407   : > { %7602 = vmatpush.bf16.msrb.mxu1 %v10806_v31  ;;  %v7352_v9 = vpop.f32.mrf.mxu1  ;;  %v10870_v31 = vor.u32 %v11410_v19, %v10867_v63  ;;  %v10982_v50 = vor.u32 %v11438_v4, %v10979_v10  ;;  %v11370_v12 = vld [vmem:[#allocation5 + $0x90c] sm:$0xf]  ;;  %v10835_v13 = vld [vmem:[#allocation5 + $0xa18] sm:$0xf0]  ;;  %v7682_v19 = vld [vmem:[#allocation8 + $0x150] sm:$0xff] }
 0x408   : > { %7615 = vmatpush.bf16.msrb.mxu2 %v10934_v37  ;;  %7628 = vmatpush.bf16.msrb.mxu3 %v11062_v15  ;;  %v14293_v39 = vpop.f32.mrf.mxu3  ;;  %v10723_v37 = vld [vmem:[#allocation5 + $0x938] sm:$0xf0]  ;;  %v11406_v15 = vld [vmem:[#allocation5 + $0xa2c] sm:$0xf]  ;;  %v7648_v63 = vld [vmem:[#allocation8 + $0x40] sm:$0xff] }
 0x409   : > { %v10726_v61 = vor.u32 %v11374_v57, %v10723_v37  ;;  %v11434_v21 = vld [vmem:[#allocation5 + $0xb0c] sm:$0xf]  ;;  %v10963_v29 = vld [vmem:[#allocation5 + $0xb18] sm:$0xf0]  ;;  %v7646_v57 = vld [vmem:[#allocation8 + $0x30] sm:$0xff] }
 0x40a   : > { %7590 = vmatpush.bf16.msrb.mxu0 %v10662_v14  ;;  %v10579_v14 = vld [vmem:[#allocation5 + $0x818] sm:$0xf0]  ;;  %v10966_v5 = vor.u32 %v11434_v21, %v10963_v29  ;;  %v7653_v33 = vld [vmem:[#allocation8 + $0x68] sm:$0xff]  ;;  %v7662_v37 = vld [vmem:[#allocation8 + $0xb0] sm:$0xff] }
 0x40b   : > { %7603 = vmatpush.bf16.msrb.mxu1 %v10790_v16  ;;  %v10854_v16 = vor.u32 %v11406_v15, %v10851_v52  ;;  %v10582_v11 = vor.u32 %v11338_v22, %v10579_v14  ;;  %v7655_v55 = vld [vmem:[#allocation8 + $0x78] sm:$0xff]  ;;  %v7669_v18 = vld [vmem:[#allocation8 + $0xe8] sm:$0xff]  ;;  %v7644_v22 = vld [vmem:[#allocation8 + $0x20] sm:$0xff] }
 0x40c   : > { %7616 = vmatpush.bf16.msrb.mxu2 %v10918_v48  ;;  %7629 = vmatpush.bf16.msrb.mxu3 %v11046_v41  ;;  %v10707_v48 = vld [vmem:[#allocation5 + $0x918] sm:$0xf0]  ;;  %v11402_v41 = vld [vmem:[#allocation5 + $0xa0c] sm:$0xf]  ;;  %v7660_v14 = vld [vmem:[#allocation8 + $0xa0] sm:$0xff] }
 0x40d   : > { %v7687_v62 = vld [vmem:[#allocation8 + $0x178] sm:$0xff]  ;;  %v7649_v54 = vld [vmem:[#allocation8 + $0x48] sm:$0xff]  ;;  %v7658_v21 = vld [vmem:[#allocation8 + $0x90] sm:$0xff] }
 0x40e   : > { %7591 = vmatpush.bf16.msrb.mxu0 %v10646_v60  ;;  %v7365_v56 = vpop.f32.mrf.mxu2  ;;  %v10710_v60 = vor.u32 %v11370_v12, %v10707_v48  ;;  %v7651_v46 = vld [vmem:[#allocation8 + $0x58] sm:$0xff]  ;;  %v7665_v34 = vld [vmem:[#allocation8 + $0xc8] sm:$0xff] }
 0x40f   : > { %7604 = vmatpush.bf16.msrb.mxu1 %v10774_v49  ;;  %v10838_v49 = vor.u32 %v11402_v41, %v10835_v13  ;;  %v7681_v23 = vld [vmem:[#allocation8 + $0x148] sm:$0xff]  ;;  %v7647_v2 = vld [vmem:[#allocation8 + $0x38] sm:$0xff]  ;;  %v7642_v13 = vld [vmem:[#allocation8 + $0x10] sm:$0xff] }
 0x410   : > { %7617 = vmatpush.bf16.msrb.mxu2 %v10902_v27  ;;  %7630 = vmatpush.bf16.msrb.mxu3 %v11030_v35  ;;  %v7378_v0 = vpop.f32.mrf.mxu3  ;;  %v7671_v27 = vld [vmem:[#allocation8 + $0xf8] sm:$0xff]  ;;  %v7654_v35 = vld [vmem:[#allocation8 + $0x70] sm:$0xff]  ;;  %v7645_v10 = vld [vmem:[#allocation8 + $0x28] sm:$0xff] }
 0x411   : > { %v7663_v36 = vld [vmem:[#allocation8 + $0xb8] sm:$0xff]  ;;  %v7641_v0 = vld [vmem:[#allocation8 + $0x8] sm:$0xff] }
 0x412   : > { %7592 = vmatpush.bf16.msrb.mxu0 %v10630_v44  ;;  %v7668_v44 = vld [vmem:[#allocation8 + $0xe0] sm:$0xff]  ;;  %v7679_v52 = vld [vmem:[#allocation8 + $0x138] sm:$0xff] }
 0x413   : > { %7605 = vmatpush.bf16.msrb.mxu1 %v10758_v24  ;;  %v7685_v24 = vld [vmem:[#allocation8 + $0x168] sm:$0xff]  ;;  %v7643_v12 = vld [vmem:[#allocation8 + $0x18] sm:$0xff] }
 0x414   : > { %7618 = vmatpush.bf16.msrb.mxu2 %v10886_v26  ;;  %7631 = vmatpush.bf16.msrb.mxu3 %v11014_v1  ;;  %v7683_v1 = vld [vmem:[#allocation8 + $0x158] sm:$0xff] }
 0x415   : > { %v7659_v48 = vld [vmem:[#allocation8 + $0x98] sm:$0xff] }
 0x416   : > { %7593 = vmatpush.bf16.msrb.mxu0 %v10614_v32  ;;  %v14874_v32 = vld [vmem:[#allocation119_spill] sm:$0xff] }
 0x417   : > { %7606 = vmatpush.bf16.msrb.mxu1 %v10742_v58  ;;  %v7338_v58 = vadd.f32 %v14287_v7, %v14874_v32  ;;  %v7661_v7 = vld [vmem:[#allocation8 + $0xa8] sm:$0xff] }
 0x418   : > { %7619 = vmatpush.bf16.msrb.mxu2 %v10870_v31  ;;  %7632 = vmatpush.bf16.msrb.mxu3 %v10998_v30  ;;  %v7680_v30 = vld [vmem:[#allocation8 + $0x140] sm:$0xff] }
 0x419   : > { %v7351_v4 = vadd.f32 %v14289_v47, %v7338_v58  ;;  %v7676_v47 = vld [vmem:[#allocation8 + $0x120] sm:$0xff]  ;;  %v7698_v58 = vld [vmem:[#allocation8 + $0x1d0] sm:$0xff] }
 0x41a   : > { %7594 = vmatpush.bf16.msrb.mxu0 %v10598_v3  ;;  %v7678_v3 = vld [vmem:[#allocation8 + $0x130] sm:$0xff] }
 0x41b   : > { %7607 = vmatpush.bf16.msrb.mxu1 %v10726_v61  ;;  %v7364_v61 = vadd.f32 %v14291_v43, %v7351_v4  ;;  %v7675_v43 = vld [vmem:[#allocation8 + $0x118] sm:$0xff] }
 0x41c   : > { %7620 = vmatpush.bf16.msrb.mxu2 %v10854_v16  ;;  %7633 = vmatpush.bf16.msrb.mxu3 %v10982_v50  ;;  %v7677_v50 = vld [vmem:[#allocation8 + $0x128] sm:$0xff] }
 0x41d   : > { %v7377_v56 = vadd.f32 %v14293_v39, %v7364_v61  ;;  %v7689_v61 = vld [vmem:[#allocation8 + $0x188] sm:$0xff] }
 0x41e   : > { %7595 = vmatpush.bf16.msrb.mxu0 %v10582_v11  ;;  %v7657_v11 = vld [vmem:[#allocation8 + $0x88] sm:$0xff] }
 0x41f   : > { %7608 = vmatpush.bf16.msrb.mxu1 %v10710_v60  ;;  %v14301_v26 = vpop.f32.mrf.mxu1  ;;  %v7674_v60 = vld [vmem:[#allocation8 + $0x110] sm:$0xff] }
 0x420   : > { %7621 = vmatpush.bf16.msrb.mxu2 %v10838_v49  ;;  %7634 = vmatpush.bf16.msrb.mxu3 %v10966_v5  ;;  %v7640_v49 = vld [vmem:[#allocation8] sm:$0xff] }
 0x421   : > { %7596 = vmatmul.bf16.vlgmr.msrb.gmra.mxu0 %v14166_v8  ;;  %v7667_v8 = vld [vmem:[#allocation8 + $0xd8] sm:$0xff]  ;;  %v7656_v5 = vld [vmem:[#allocation8 + $0x80] sm:$0xff] }
 0x422   : > { %7705 = vmatpush.msra.mxu0 %v7655_v55  ;;  %7609 = vmatmul.bf16.vlgmr.msrb.gmra.mxu1 %v14198_v17  ;;  %v14299_v17 = vpop.f32.mrf.mxu0  ;;  %v7673_v55 = vld [vmem:[#allocation8 + $0x108] sm:$0xff] }
 0x423   : > { %7725 = vmatpush.msra.mxu1 %v7671_v27  ;;  %7622 = vmatmul.bf16.vlgmr.msrb.gmra.mxu2 %v14181_v59  ;;  %v7684_v59 = vld [vmem:[#allocation8 + $0x160] sm:$0xff]  ;;  %v7390_v29 = vadd.f32 %v14299_v17, %v7377_v56 }
 0x424   : > { %7635 = vmatmul.bf16.vlgmr.msrb.gmra.mxu3 %v14209_v6  ;;  %7706 = vmatpush.msra.mxu0 %v7654_v35  ;;  %v7650_v6 = vld [vmem:[#allocation8 + $0x50] sm:$0xff]  ;;  %v7672_v35 = vld [vmem:[#allocation8 + $0x100] sm:$0xff] }
 0x425   : > { %7726 = vmatpush.msra.mxu1 %v7670_v45  ;;  %7745 = vmatpush.msra.mxu2 %v7687_v62  ;;  %v7403_v39 = vadd.f32 %v14301_v26, %v7390_v29 }
 0x426   : > { %7707 = vmatpush.msra.mxu0 %v7653_v33  ;;  %v14303_v38 = vpop.f32.mrf.mxu2 }
 0x427   : > { %7727 = vmatpush.msra.mxu1 %v7669_v18  ;;  %7746 = vmatpush.msra.mxu2 %v7686_v53  ;;  %v7404_v15 = vpop.f32.mrf.mxu1  ;;  %v7416_v27 = vadd.f32 %v14303_v38, %v7403_v39  ;;  %v7699_v38 = vld [vmem:[#allocation8 + $0x1d8] sm:$0xff] }
 0x428   : > { %7708 = vmatpush.msra.mxu0 %v7652_v20  ;;  %v14307_v9 = vpop.f32.mrf.mxu3 }
 0x429   : > { %7728 = vmatpush.msra.mxu1 %v7668_v44  ;;  %7747 = vmatpush.msra.mxu2 %v7685_v24  ;;  %v7429_v45 = vadd.f32 %v14307_v9, %v7416_v27  ;;  %v7695_v9 = vld [vmem:[#allocation8 + $0x1b8] sm:$0xff] }
 0x42a   : > { %7709 = vmatpush.msra.mxu0 %v7651_v46  ;;  %v7391_v31 = vpop.f32.mrf.mxu0 }
 0x42b   : > { %7729 = vmatpush.msra.mxu1 %v7667_v8  ;;  %7748 = vmatpush.msra.mxu2 %v7684_v59  ;;  %v7694_v31 = vld [vmem:[#allocation8 + $0x1b0] sm:$0xff] }
 0x42c   : > { %7710 = vmatpush.msra.mxu0 %v7650_v6 }
 0x42d   : > { %7730 = vmatpush.msra.mxu1 %v7666_v40  ;;  %7749 = vmatpush.msra.mxu2 %v7683_v1  ;;  %v7703_v1 = vld [vmem:[#allocation8 + $0x1f8] sm:$0xff] }
 0x42e   : > { %7711 = vmatpush.msra.mxu0 %v7649_v54  ;;  %v7417_v16 = vpop.f32.mrf.mxu2  ;;  %v7702_v54 = vld [vmem:[#allocation8 + $0x1f0] sm:$0xff]  ;;  %7765 = vmatpush.msra.mxu3 %v7703_v1 }
 0x42f   : > { %7731 = vmatpush.msra.mxu1 %v7665_v34  ;;  %7750 = vmatpush.msra.mxu2 %v7682_v19  ;;  %v7688_v16 = vld [vmem:[#allocation8 + $0x180] sm:$0xff] }
 0x430   : > { %7712 = vmatpush.msra.mxu0 %v7648_v63  ;;  %v7430_v41 = vpop.f32.mrf.mxu3  ;;  %v7701_v63 = vld [vmem:[#allocation8 + $0x1e8] sm:$0xff]  ;;  %7766 = vmatpush.msra.mxu3 %v7702_v54 }
 0x431   : > { %7732 = vmatpush.msra.mxu1 %v7664_v51  ;;  %7751 = vmatpush.msra.mxu2 %v7681_v23  ;;  %v7700_v51 = vld [vmem:[#allocation8 + $0x1e0] sm:$0xff] }
 0x432   : > { %7713 = vmatpush.msra.mxu0 %v7647_v2  ;;  %7767 = vmatpush.msra.mxu3 %v7701_v63  ;;  %v7697_v2 = vld [vmem:[#allocation8 + $0x1c8] sm:$0xff] }
 0x433   : > { %7733 = vmatpush.msra.mxu1 %v7663_v36  ;;  %7752 = vmatpush.msra.mxu2 %v7680_v30  ;;  %v7696_v36 = vld [vmem:[#allocation8 + $0x1c0] sm:$0xff] }
 0x434   : > { %7714 = vmatpush.msra.mxu0 %v7646_v57  ;;  %7768 = vmatpush.msra.mxu3 %v7700_v51  ;;  %v7693_v57 = vld [vmem:[#allocation8 + $0x1a8] sm:$0xff] }
 0x435   : > { %7734 = vmatpush.msra.mxu1 %v7662_v37  ;;  %7753 = vmatpush.msra.mxu2 %v7679_v52  ;;  %v7692_v37 = vld [vmem:[#allocation8 + $0x1a0] sm:$0xff]  ;;  %v7691_v52 = vld [vmem:[#allocation8 + $0x198] sm:$0xff] }
 0x436   : > { %7715 = vmatpush.msra.mxu0 %v7645_v10  ;;  %7769 = vmatpush.msra.mxu3 %v7699_v38 }
 0x437   : > { %7735 = vmatpush.msra.mxu1 %v7661_v7  ;;  %7754 = vmatpush.msra.mxu2 %v7678_v3  ;;  %v7690_v3 = vld [vmem:[#allocation8 + $0x190] sm:$0xff] }
 0x438   : > { %7716 = vmatpush.msra.mxu0 %v7644_v22  ;;  %7770 = vmatpush.msra.mxu3 %v7698_v58 }
 0x439   : > { %7736 = vmatpush.msra.mxu1 %v7660_v14  ;;  %7755 = vmatpush.msra.mxu2 %v7677_v50 }
 0x43a   : > { %7717 = vmatpush.msra.mxu0 %v7643_v12  ;;  %7771 = vmatpush.msra.mxu3 %v7697_v2 }
 0x43b   : > { %7737 = vmatpush.msra.mxu1 %v7659_v48  ;;  %7756 = vmatpush.msra.mxu2 %v7676_v47 }
 0x43c   : > { %7718 = vmatpush.msra.mxu0 %v7642_v13  ;;  %7772 = vmatpush.msra.mxu3 %v7696_v36 }
 0x43d   : > { %7738 = vmatpush.msra.mxu1 %v7658_v21  ;;  %7757 = vmatpush.msra.mxu2 %v7675_v43 }
 0x43e   : > { %7719 = vmatpush.msra.mxu0 %v7641_v0  ;;  %v7441_v62 = vpop.f32.mrf.mxu0  ;;  %7773 = vmatpush.msra.mxu3 %v7695_v9 }
 0x43f   : > { %7739 = vmatpush.msra.mxu1 %v7657_v11  ;;  %7758 = vmatpush.msra.mxu2 %v7674_v60  ;;  %v7442_v33 = vadd.f32 %v7441_v62, %v7429_v45  ;;  %v7454_v18 = vpop.f32.mrf.mxu1  ;;  %v7704_v62 = vld [vmem:[#allocation10] sm:$0x1] }
 0x440   : > { %7720 = vmatpush.msra.mxu0 %v7640_v49  ;;  %7774 = vmatpush.msra.mxu3 %v7694_v31 }
 0x441   : > { %7740 = vmatpush.msra.mxu1 %v7656_v5  ;;  %7721 = vmatmul.f32.vlgmr.msra.gmra.mxu0 %v14260_v42  ;;  %v7455_v53 = vadd.f32 %v7454_v18, %v7442_v33 }
 0x442   : > { %7741 = vmatmul.f32.vlgmr.msra.gmra.mxu1 %v14281_v28  ;;  %7759 = vmatpush.msra.mxu2 %v7673_v55 }
 0x443   : > { %7775 = vmatpush.msra.mxu3 %v7693_v57 }
 0x444   : > { %7760 = vmatpush.msra.mxu2 %v7672_v35 }
 0x445   : > { %7776 = vmatpush.msra.mxu3 %v7692_v37 }
 0x446   : > { %v7467_v20 = vpop.f32.mrf.mxu2  ;;  %v7443_v46 = vpop.f32.mrf.mxu0 }
 0x447   : > { %v7468_v44 = vadd.f32 %v7467_v20, %v7455_v53  ;;  %v7456_v17 = vpop.f32.mrf.mxu1  ;;  %7777 = vmatpush.msra.mxu3 %v7691_v52 }
 0x448   : > { %v7480_v24 = vpop.f32.mrf.mxu3 }
 0x449   : > { %v7481_v8 = vadd.f32 %v7480_v24, %v7468_v44  ;;  %7778 = vmatpush.msra.mxu3 %v7690_v3 }
 0x44b   : > { %7761 = vmatmul.f32.vlgmr.msra.gmra.mxu2 %v7481_v8  ;;  %7779 = vmatpush.msra.mxu3 %v7689_v61 }
 0x44d   : > { %7780 = vmatpush.msra.mxu3 %v7688_v16 }
 0x44e   : > { %v7469_v59 = vpop.f32.mrf.mxu2 }
 0x450   : > { %v7482_v42 = vpop.f32.mrf.mxu3 }
 0x45e   : > { %v7493_v6 = vpop.f32.mrf.mxu0 }
 0x45f   : > { %v7506_v28 = vpop.f32.mrf.mxu1  ;;  %v7494_v10 = vadd.f32 %v7493_v6, %v14214_v25 }
 0x461   : > { %v7507_v50 = vadd.f32 %v7506_v28, %v7494_v10 }
 0x466   : > { %v7519_v40 = vpop.f32.mrf.mxu2  ;;  %v7495_v34 = vpop.f32.mrf.mxu0 }
 0x467   : > { %v7508_v19 = vpop.f32.mrf.mxu1  ;;  %v7520_v12 = vadd.f32 %v7519_v40, %v7507_v50 }
 0x468   : > { %v7532_v26 = vpop.f32.mrf.mxu3 }
 0x469   : > { %v7533_v47 = vadd.f32 %v7532_v26, %v7520_v12 }
 0x46e   : > { %v7521_v23 = vpop.f32.mrf.mxu2 }
 0x470   : > { %v7534_v32 = vpop.f32.mrf.mxu3 }
 0x47e   : > { %v7545_v30 = vpop.f32.mrf.mxu0 }
 0x47f   : > { %v7558_v15 = vpop.f32.mrf.mxu1  ;;  %v7546_v56 = vadd.f32 %v7545_v30, %v7533_v47 }
 0x481   : > { %v7559_v13 = vadd.f32 %v7558_v15, %v7546_v56 }
 0x486   : > { %v7571_v4 = vpop.f32.mrf.mxu2  ;;  %v7547_v22 = vpop.f32.mrf.mxu0 }
 0x487   : > { %v7560_v14 = vpop.f32.mrf.mxu1  ;;  %v7572_v21 = vadd.f32 %v7571_v4, %v7559_v13 }
 0x488   : > { %v7584_v7 = vpop.f32.mrf.mxu3 }
 0x489   : > { %v7585_v43 = vadd.f32 %v7584_v7, %v7572_v21 }
 0x48e   : > { %v7573_v48 = vpop.f32.mrf.mxu2 }
 0x490   : > { %v7586_v41 = vpop.f32.mrf.mxu3 }
 0x49e   : > { %v7597_v29 = vpop.f32.mrf.mxu0 }
 0x49f   : > { %v7610_v25 = vpop.f32.mrf.mxu1  ;;  %v7598_v0 = vadd.f32 %v7597_v29, %v7585_v43 }
 0x4a1   : > { %v7611_v11 = vadd.f32 %v7610_v25, %v7598_v0 }
 0x4a6   : > { %v7623_v60 = vpop.f32.mrf.mxu2  ;;  %v7599_v39 = vpop.f32.mrf.mxu0 }
 0x4a7   : > { %v7636_v49 = vpop.f32.mrf.mxu3  ;;  %v7624_v5 = vadd.f32 %v7623_v60, %v7611_v11  ;;  %v7612_v55 = vpop.f32.mrf.mxu1 }
 0x4a9   : > { %v7637_v27 = vadd.f32 %v7636_v49, %v7624_v5 }
 0x4ab   : > { %7781 = vmatmul.f32.vlgmr.msra.gmra.mxu3 %v7637_v27 }
 0x4ae   : > { %v7625_v35 = vpop.f32.mrf.mxu2 }
 0x4af   : > { %v7638_v45 = vpop.f32.mrf.mxu3 }
 0x4be   : > { %v7722_v33 = vpop.f32.mrf.mxu0 }
 0x4bf   : > { %v7723_v18 = vadd.f32 %v7722_v33, %v7704_v62  ;;  %v7742_v53 = vpop.f32.mrf.mxu1 }
 0x4c1   : > { %v7743_v44 = vadd.f32 %v7742_v53, %v7723_v18 }
 0x4ce   : > { %v7762_v20 = vpop.f32.mrf.mxu2 }
 0x4cf   : > { %v7763_v24 = vadd.f32 %v7762_v20, %v7743_v44 }
 0x52e   : > { %v7782_v46 = vpop.f32.mrf.mxu3 }
 0x52f   : > { %v7783_v8 = vadd.f32 %v7782_v46, %v7763_v24 }
 0x531   : > { %7785 = vst [vmem:[%s307_s6] sm:$0x1] %v7783_v8 }
 0x532   : > { %12122 = shalt.err (!%p12119_p10)
}
 0x533   : > { %11870 = dma.vmem_to_hbm [thread:$0]  (%p12295_p3), %s7798_s8, 16, %s7800_s9, %s7787_s14  }
 0x534 PF: > { %s7811_s1 = sand.u32 1, %s12157_s18   ;;  %p14875_p12 = scmp.ge.s32.totalorder %s12169_s21, 2 }
 0x535   : > { %s7812_s28 = scalar_lea.sflag [#allocation4], %s7811_s1 }
 0x536   : > { %p11890_p13 = pnand %p14875_p12, %p12246_p6 }
 0x538   : > { %p11891_p0 = pneg %p11890_p13 }
 0x53a   : > { %12152 = dma.done.wait (%p11891_p0), %s7812_s28, 16  }
 0x53b   : > { %12154 = vsyncadd (%p11891_p0), %s7812_s28, 4294967280  ;;  %p20_p5 = scmp.ge.s32.totalorder %s12285_s13, 4   ;;  %s14876_s18 = smov %s12161_s19 }
 0x53c   : > { %s14877_s19 = smov %s12165_s20  ;;  %s14878_s20 = smov %s12301_s11 }
 0x53d   : > { %s14879_s21 = smov %s12285_s13  ;;  %22 = sbr.rel (!%p20_p5) target bundleno = 9 (0x9), region = 109 }
 0x542   :  { %7817 = vsyncpa [#allocation3], 1 }
 0x543   :  { %7819 = vsyncpa [#allocation3 + $0x1], 1 }
 0x544   :  { %7820 = vsyncpa [#allocation6], 1 }
 0x545   :  { %7821 = vsyncpa [#allocation9], 1 }
 0x546   :  { %7822 = vsyncpa [#allocation4], 1 }
 0x547   :  { %7824 = vsyncpa [#allocation4 + $0x1], 1 }

</bundles_post_ra>
